<compile_context>
chip_gen: v7x
topology: tpu7x:2x2x1
jax: 0.10.0
libtpu: 0.0.40
codegen_flags: <defaults>
</compile_context>

<pallas_src>
import functools

import jax
import jax.numpy as jnp
from jax.experimental import pallas as pl
from jax.experimental.pallas import tpu as pltpu


# -----------------------------------------------------------------------------
# Fused whole-network kernel (one invocation per batch element)
# -----------------------------------------------------------------------------
def _lrelu(v):
    return jnp.where(v >= 0.0, v, 0.2 * v)


def _disc_kernel(p1_ref, w1_ref, w2_ref, w3_ref, w4_ref, w5_ref,
                 out_ref, c1_ref, c2_ref, c3_ref, c4_ref, c5_ref,
                 pad2_ref, pad3_ref, pad4_ref, pad5_ref, *, dims, cin):
    h1, h2, h3, h4, h5 = dims
    f32 = jnp.float32
    bf16 = jnp.bfloat16

    # Zero the padded activation buffers (only the 1-px borders actually need it;
    # the interiors are fully overwritten below).
    for ref in (pad2_ref, pad3_ref, pad4_ref, pad5_ref):
        ref[...] = jnp.zeros(ref.shape, ref.dtype)

    # ---- conv1: stride 2 absorbed into im2col patches -> one GEMM with K = 16*cin ----
    lhs1 = p1_ref[...].reshape(h1 * h1, 16 * cin)                       # bf16
    a1 = _lrelu(jnp.dot(lhs1, w1_ref[...], preferred_element_type=f32))  # (h1*h1, 64) f32
    c1_ref[...] = a1.reshape(1, h1, h1, 64)
    pad2_ref[1:1 + h1, 1:1 + h1, :] = a1.reshape(h1, h1, 64)

    # ---- conv2: k=4 s=2 p=1, 16 taps, K=64, SSA accumulation ----
    acc = None
    for kh in range(4):
        for kw in range(4):
            win = pad2_ref[pl.ds(kh, h2, 2), pl.ds(kw, h2, 2), :]        # (h2, h2, 64) f32
            lhs = win.reshape(h2 * h2, 64).astype(bf16)
            t = jnp.dot(lhs, w2_ref[kh * 4 + kw], preferred_element_type=f32)
            acc = t if acc is None else acc + t
    a2 = _lrelu(acc)                                                     # (h2*h2, 128)
    c2_ref[...] = a2.reshape(1, h2, h2, 128)
    pad3_ref[1:1 + h2, 1:1 + h2, :] = a2.reshape(h2, h2, 128)

    # ---- conv3: k=4 s=2 p=1, 16 taps, K=128 ----
    acc = None
    for kh in range(4):
        for kw in range(4):
            win = pad3_ref[pl.ds(kh, h3, 2), pl.ds(kw, h3, 2), :]        # (h3, h3, 128) f32
            lhs = win.reshape(h3 * h3, 128).astype(bf16)
            t = jnp.dot(lhs, w3_ref[kh * 4 + kw], preferred_element_type=f32)
            acc = t if acc is None else acc + t
    a3 = _lrelu(acc)                                                     # (h3*h3, 256)
    c3_ref[...] = a3.reshape(1, h3, h3, 256)
    pad4_ref[1:1 + h3, 1:1 + h3, :] = a3.reshape(h3, h3, 256).astype(bf16)

    # ---- conv4: k=4 s=1 p=1, 16 taps, K=256, bf16 activations ----
    acc = None
    for kh in range(4):
        for kw in range(4):
            win = pad4_ref[kh:kh + h4, kw:kw + h4, :]                    # (h4, h4, 256) bf16
            lhs = win.reshape(h4 * h4, 256)
            t = jnp.dot(lhs, w4_ref[kh * 4 + kw], preferred_element_type=f32)
            acc = t if acc is None else acc + t
    a4 = _lrelu(acc)                                                     # (h4*h4, 512)
    c4_ref[...] = a4.reshape(1, h4, h4, 512)
    pad5_ref[1:1 + h4, 1:1 + h4, :] = a4.reshape(h4, h4, 512).astype(bf16)

    # ---- conv5: k=4 s=1 p=1, OC=1 -> VPU multiply + lane reduction + sigmoid ----
    acc = jnp.zeros((h5 * h5, 512), f32)
    for kh in range(4):
        for kw in range(4):
            t = kh * 4 + kw
            win = pad5_ref[kh:kh + h5, kw:kw + h5, :].reshape(h5 * h5, 512).astype(f32)
            acc = acc + win * w5_ref[t:t + 1, :]
    s = jnp.sum(acc, axis=-1, keepdims=True)                             # (h5*h5, 1)
    c5_ref[...] = s.reshape(1, h5, h5, 1)
    out_ref[...] = (1.0 / (1.0 + jnp.exp(-s))).reshape(1, h5, h5, 1)


# -----------------------------------------------------------------------------
# Forward wrapper: one transpose in, one tiny im2col, ONE pallas_call, small
# transposes out.
# -----------------------------------------------------------------------------
def discriminator_forward(x_nchw, params, use_sigmoid=True):
    w1, w2, w3, w4, w5 = params
    cin = x_nchw.shape[1]
    x = jnp.transpose(x_nchw, (0, 2, 3, 1)).astype(jnp.float32)          # NCHW -> NHWC
    N, H, W, _ = x.shape
    assert H == W and H % 8 == 0 and H >= 32, "fused kernel expects square inputs, mult of 8, >= 32"
    h1, h2, h3 = H // 2, H // 4, H // 8
    h4, h5 = h3 - 1, h3 - 2
    dims = (h1, h2, h3, h4, h5)

    # conv1 im2col patches, tap-major channel order (kh, kw, c); built once on the tiny input.
    xp = jnp.pad(x, ((0, 0), (1, 1), (1, 1), (0, 0)))
    cols = [xp[:, kh:kh + 2 * h1 - 1:2, kw:kw + 2 * h1 - 1:2, :]
            for kh in range(4) for kw in range(4)]
    patches = jnp.concatenate(cols, axis=-1).astype(jnp.bfloat16)        # (N, h1, h1, 16*cin)

    kernel = functools.partial(_disc_kernel, dims=dims, cin=cin)

    def act_spec(hh, cc):
        return pl.BlockSpec((1, hh, hh, cc), lambda n: (n, 0, 0, 0))

    out_shapes = (
        jax.ShapeDtypeStruct((N, h5, h5, 1), jnp.float32),      # sigmoid(conv5)
        jax.ShapeDtypeStruct((N, h1, h1, 64), jnp.float32),     # conv1
        jax.ShapeDtypeStruct((N, h2, h2, 128), jnp.float32),    # conv2
        jax.ShapeDtypeStruct((N, h3, h3, 256), jnp.float32),    # conv3
        jax.ShapeDtypeStruct((N, h4, h4, 512), jnp.float32),    # conv4
        jax.ShapeDtypeStruct((N, h5, h5, 1), jnp.float32),      # conv5 (raw)
    )
    grid_spec = pltpu.PrefetchScalarGridSpec(
        num_scalar_prefetch=0,
        grid=(N,),
        in_specs=[
            act_spec(h1, 16 * cin),                                     # conv1 patches
            pl.BlockSpec((16 * cin, 64), lambda n: (0, 0)),             # w1 (im2col packed)
            pl.BlockSpec((16, 64, 128), lambda n: (0, 0, 0)),           # w2
            pl.BlockSpec((16, 128, 256), lambda n: (0, 0, 0)),          # w3
            pl.BlockSpec((16, 256, 512), lambda n: (0, 0, 0)),          # w4
            pl.BlockSpec((16, 512), lambda n: (0, 0)),                  # w5
        ],
        out_specs=[
            act_spec(h5, 1), act_spec(h1, 64), act_spec(h2, 128),
            act_spec(h3, 256), act_spec(h4, 512), act_spec(h5, 1),
        ],
        scratch_shapes=[
            pltpu.VMEM((h1 + 2, h1 + 2, 64), jnp.float32),    # conv2 padded input (strided reads)
            pltpu.VMEM((h2 + 2, h2 + 2, 128), jnp.float32),   # conv3 padded input (strided reads)
            pltpu.VMEM((h3 + 2, h3 + 2, 256), jnp.bfloat16),  # conv4 padded input
            pltpu.VMEM((h4 + 2, h4 + 2, 512), jnp.bfloat16),  # conv5 padded input
        ],
    )
    sig, c1, c2, c3, c4, c5 = pl.pallas_call(
        kernel,
        out_shape=out_shapes,
        grid_spec=grid_spec,
        compiler_params=pltpu.CompilerParams(
            dimension_semantics=("parallel",),
            vmem_limit_bytes=32 * 1024 * 1024),
    )(patches, w1, w2, w3, w4, w5)

    outputs = sig if use_sigmoid else c5
    to_nchw = lambda t: jnp.transpose(t, (0, 3, 1, 2))
    return to_nchw(outputs), [to_nchw(c1), to_nchw(c2), to_nchw(c3), to_nchw(c4), to_nchw(c5)]


# -----------------------------------------------------------------------------
# Parameters: normal(0, 0.02) + spectral-norm reparam, pre-packed tap-major once.
# -----------------------------------------------------------------------------
def spectral_normalize(w, key, n_iter=10):
    oc = w.shape[0]
    wm = w.reshape(oc, -1).astype(jnp.float32)
    u = jax.random.normal(key, (oc,), jnp.float32)
    u = u / (jnp.linalg.norm(u) + 1e-12)
    v = None
    for _ in range(n_iter):
        v = wm.T @ u
        v = v / (jnp.linalg.norm(v) + 1e-12)
        u = wm @ v
        u = u / (jnp.linalg.norm(u) + 1e-12)
    sigma = u @ (wm @ v)
    return w / sigma


def init_discriminator_params(in_channels, key, gain=0.02):
    specs = [(64, in_channels), (128, 64), (256, 128), (512, 256), (1, 512)]
    keys = jax.random.split(key, 2 * len(specs))
    packed, hwio = [], []
    for i, (oc, ic) in enumerate(specs):
        w = gain * jax.random.normal(keys[2 * i], (oc, ic, 4, 4), dtype=jnp.float32)
        w = spectral_normalize(w, keys[2 * i + 1])
        w_hwio = jnp.transpose(w, (2, 3, 1, 0))               # (kh, kw, ic, oc)
        hwio.append(w_hwio)
        taps = w_hwio.reshape(16, ic, oc)                     # tap index = kh*4 + kw
        if i == 0:
            packed.append(taps.reshape(16 * ic, oc).astype(jnp.bfloat16))   # conv1 im2col weight
        elif oc == 1:
            packed.append(taps.reshape(16, ic))                             # conv5: f32 VPU path
        else:
            packed.append(taps.astype(jnp.bfloat16))                        # conv2-4: bf16 MXU
    return packed, hwio


# -----------------------------------------------------------------------------
# Self-test
# -----------------------------------------------------------------------------
if __name__ == "__main__":
    key = jax.random.PRNGKey(0)
    k_param, k_x = jax.random.split(key)

    in_channels = 4
    # spatial=32 so conv5 (k=4, s=1, p=1) still has a valid 2x2 output.
    x = jax.random.normal(k_x, (2, in_channels, 32, 32), dtype=jnp.float32)

    params, w_hwio = init_discriminator_params(in_channels, k_param)

    fwd = jax.jit(functools.partial(discriminator_forward, use_sigmoid=True))
    outputs, feats = fwd(x, params)
    jax.block_until_ready((outputs, feats))

    # ---- shape checks (NCHW, matching the PyTorch module) ----
    assert outputs.shape == (2, 1, 2, 2)
    assert feats[0].shape == (2, 64, 16, 16)
    assert feats[1].shape == (2, 128, 8, 8)
    assert feats[2].shape == (2, 256, 4, 4)
    assert feats[3].shape == (2, 512, 3, 3)
    assert feats[4].shape == (2, 1, 2, 2)

    # ---- layer-by-layer numerical check against XLA convs with matching bf16 quantization ----
    def lrelu(v):
        return jnp.where(v >= 0.0, v, 0.2 * v)

    def ref_conv(x_nhwc, w_hwio_l, stride, bf16_w=True):
        xin = x_nhwc.astype(jnp.bfloat16).astype(jnp.float32)
        wl = w_hwio_l.astype(jnp.bfloat16).astype(jnp.float32) if bf16_w else w_hwio_l
        return jax.lax.conv_general_dilated(
            xin, wl, window_strides=(stride, stride), padding=((1, 1), (1, 1)),
            dimension_numbers=("NHWC", "HWIO", "NHWC"),
            precision=jax.lax.Precision.HIGHEST)

    def check(name, got_nchw, want_nhwc):
        got = jnp.transpose(got_nchw, (0, 2, 3, 1))
        diff = float(jnp.max(jnp.abs(got - want_nhwc)))
        ref = float(jnp.max(jnp.abs(want_nhwc)))
        assert diff <= 2e-3 * (1.0 + ref), f"{name}: max|diff|={diff:.3e}, max|ref|={ref:.3e}"

    x_nhwc = jnp.transpose(x, (0, 2, 3, 1))
    f_nhwc = [jnp.transpose(f, (0, 2, 3, 1)) for f in feats]
    check("conv1", feats[0], lrelu(ref_conv(x_nhwc, w_hwio[0], 2)))
    check("conv2", feats[1], lrelu(ref_conv(f_nhwc[0], w_hwio[1], 2)))
    check("conv3", feats[2], lrelu(ref_conv(f_nhwc[1], w_hwio[2], 2)))
    check("conv4", feats[3], lrelu(ref_conv(f_nhwc[2], w_hwio[3], 1)))
    check("conv5", feats[4], ref_conv(f_nhwc[3], w_hwio[4], 1, bf16_w=False))
    check("sigmoid", outputs, jax.nn.sigmoid(f_nhwc[4]))

    print("KERNEL_OK")
</pallas_src>

<mosaic_0001>
module attributes {stable_mosaic.version = 11 : i64} {
  func.func @_disc_kernel(%arg0: i32, %arg1: memref<1x16x16x64xbf16, #tpu.memory_space<vmem>>, %arg2: memref<64x64xbf16, #tpu.memory_space<vmem>>, %arg3: memref<16x64x128xbf16, #tpu.memory_space<vmem>>, %arg4: memref<16x128x256xbf16, #tpu.memory_space<vmem>>, %arg5: memref<16x256x512xbf16, #tpu.memory_space<vmem>>, %arg6: memref<16x512xf32, #tpu.memory_space<vmem>>, %arg7: memref<1x2x2x1xf32, #tpu.memory_space<vmem>>, %arg8: memref<1x16x16x64xf32, #tpu.memory_space<vmem>>, %arg9: memref<1x8x8x128xf32, #tpu.memory_space<vmem>>, %arg10: memref<1x4x4x256xf32, #tpu.memory_space<vmem>>, %arg11: memref<1x3x3x512xf32, #tpu.memory_space<vmem>>, %arg12: memref<1x2x2x1xf32, #tpu.memory_space<vmem>>, %arg13: memref<18x18x64xf32, #tpu.memory_space<vmem>>, %arg14: memref<10x10x128xf32, #tpu.memory_space<vmem>>, %arg15: memref<6x6x256xbf16, #tpu.memory_space<vmem>>, %arg16: memref<5x5x512xbf16, #tpu.memory_space<vmem>>) attributes {dimension_semantics = [#tpu.dimension_semantics<parallel>], iteration_bounds = array<i64: 2>, scalar_prefetch = 0 : i64, scratch_operands = 4 : i64, tpu.core_type = #tpu.core_type<tc>, window_params = [{transform_indices = @transform_0, window_bounds = array<i64: 1, 16, 16, 64>}, {pipeline_mode = #tpu.pipeline_mode<synchronous>, transform_indices = @transform_1, window_bounds = array<i64: 64, 64>}, {pipeline_mode = #tpu.pipeline_mode<synchronous>, transform_indices = @transform_2, window_bounds = array<i64: 16, 64, 128>}, {pipeline_mode = #tpu.pipeline_mode<synchronous>, transform_indices = @transform_3, window_bounds = array<i64: 16, 128, 256>}, {pipeline_mode = #tpu.pipeline_mode<synchronous>, transform_indices = @transform_4, window_bounds = array<i64: 16, 256, 512>}, {pipeline_mode = #tpu.pipeline_mode<synchronous>, transform_indices = @transform_5, window_bounds = array<i64: 16, 512>}, {transform_indices = @transform_6, window_bounds = array<i64: 1, 2, 2, 1>}, {transform_indices = @transform_7, window_bounds = array<i64: 1, 16, 16, 64>}, {transform_indices = @transform_8, window_bounds = array<i64: 1, 8, 8, 128>}, {transform_indices = @transform_9, window_bounds = array<i64: 1, 4, 4, 256>}, {transform_indices = @transform_10, window_bounds = array<i64: 1, 3, 3, 512>}, {transform_indices = @transform_11, window_bounds = array<i64: 1, 2, 2, 1>}]} {
    %cst = arith.constant 0.000000e+00 : f32
    %0 = vector.broadcast %cst : f32 to vector<18x18x64xf32>
    %c0 = arith.constant 0 : index
    %c0_0 = arith.constant 0 : index
    %c0_1 = arith.constant 0 : index
    %1 = vector.load %arg13[%c0, %c0_0, %c0_1] : memref<18x18x64xf32, #tpu.memory_space<vmem>>, vector<18x18x64xf32>
    tpu.vector_store %arg13[%c0, %c0_0, %c0_1], %0 {strides = array<i32>} : memref<18x18x64xf32, #tpu.memory_space<vmem>>, vector<18x18x64xf32>,
    %cst_2 = arith.constant 0.000000e+00 : f32
    %2 = vector.broadcast %cst_2 : f32 to vector<10x10x128xf32>
    %c0_3 = arith.constant 0 : index
    %c0_4 = arith.constant 0 : index
    %c0_5 = arith.constant 0 : index
    %3 = vector.load %arg14[%c0_3, %c0_4, %c0_5] : memref<10x10x128xf32, #tpu.memory_space<vmem>>, vector<10x10x128xf32>
    tpu.vector_store %arg14[%c0_3, %c0_4, %c0_5], %2 {strides = array<i32>} : memref<10x10x128xf32, #tpu.memory_space<vmem>>, vector<10x10x128xf32>,
    %cst_6 = arith.constant 0.000000e+00 : bf16
    %4 = vector.broadcast %cst_6 : bf16 to vector<6x6x256xbf16>
    %c0_7 = arith.constant 0 : index
    %c0_8 = arith.constant 0 : index
    %c0_9 = arith.constant 0 : index
    %5 = vector.load %arg15[%c0_7, %c0_8, %c0_9] : memref<6x6x256xbf16, #tpu.memory_space<vmem>>, vector<6x6x256xbf16>
    tpu.vector_store %arg15[%c0_7, %c0_8, %c0_9], %4 {strides = array<i32>} : memref<6x6x256xbf16, #tpu.memory_space<vmem>>, vector<6x6x256xbf16>,
    %cst_10 = arith.constant 0.000000e+00 : bf16
    %6 = vector.broadcast %cst_10 : bf16 to vector<5x5x512xbf16>
    %c0_11 = arith.constant 0 : index
    %c0_12 = arith.constant 0 : index
    %c0_13 = arith.constant 0 : index
    %7 = vector.load %arg16[%c0_11, %c0_12, %c0_13] : memref<5x5x512xbf16, #tpu.memory_space<vmem>>, vector<5x5x512xbf16>
    tpu.vector_store %arg16[%c0_11, %c0_12, %c0_13], %6 {strides = array<i32>} : memref<5x5x512xbf16, #tpu.memory_space<vmem>>, vector<5x5x512xbf16>,
    %c0_14 = arith.constant 0 : index
    %c0_15 = arith.constant 0 : index
    %c0_16 = arith.constant 0 : index
    %c0_17 = arith.constant 0 : index
    %8 = vector.load %arg1[%c0_14, %c0_15, %c0_16, %c0_17] : memref<1x16x16x64xbf16, #tpu.memory_space<vmem>>, vector<1x16x16x64xbf16>
    %9 = vector.shape_cast %8 : vector<1x16x16x64xbf16> to vector<256x64xbf16>
    %c0_18 = arith.constant 0 : index
    %c0_19 = arith.constant 0 : index
    %10 = vector.load %arg2[%c0_18, %c0_19] : memref<64x64xbf16, #tpu.memory_space<vmem>>, vector<64x64xbf16>
    %cst_20 = arith.constant dense<0.000000e+00> : vector<256x64xf32>
    %11 = tpu.matmul %9, %10, %cst_20 {dimension_numbers = #tpu.dot_dimension_numbers<[1], [0], [0], [1], [0, 0, 1, 1], [], []>} : vector<256x64xbf16>, vector<64x64xbf16>, vector<256x64xf32> -> vector<256x64xf32>
    %cst_21 = arith.constant 0.000000e+00 : f32
    %12 = vector.broadcast %cst_21 : f32 to vector<256x64xf32>
    %13 = arith.cmpf oge, %11, %12 : vector<256x64xf32>
    %cst_22 = arith.constant 2.000000e-01 : f32
    %14 = vector.broadcast %cst_22 : f32 to vector<256x64xf32>
    %15 = arith.mulf %14, %11 : vector<256x64xf32>
    %16 = arith.select %13, %11, %15 : vector<256x64xi1>, vector<256x64xf32>
    %17 = vector.shape_cast %16 : vector<256x64xf32> to vector<1x16x16x64xf32>
    %c0_23 = arith.constant 0 : index
    %c0_24 = arith.constant 0 : index
    %c0_25 = arith.constant 0 : index
    %c0_26 = arith.constant 0 : index
    %18 = vector.load %arg8[%c0_23, %c0_24, %c0_25, %c0_26] : memref<1x16x16x64xf32, #tpu.memory_space<vmem>>, vector<1x16x16x64xf32>
    tpu.vector_store %arg8[%c0_23, %c0_24, %c0_25, %c0_26], %17 {strides = array<i32>} : memref<1x16x16x64xf32, #tpu.memory_space<vmem>>, vector<1x16x16x64xf32>,
    %19 = vector.shape_cast %16 : vector<256x64xf32> to vector<16x16x64xf32>
    %c1 = arith.constant 1 : index
    %c1_27 = arith.constant 1 : index
    %c0_28 = arith.constant 0 : index
    %20 = vector.load %arg13[%c1, %c1_27, %c0_28] : memref<18x18x64xf32, #tpu.memory_space<vmem>>, vector<16x16x64xf32>
    tpu.vector_store %arg13[%c1, %c1_27, %c0_28], %19 {strides = array<i32>} : memref<18x18x64xf32, #tpu.memory_space<vmem>>, vector<16x16x64xf32>,
    %c0_29 = arith.constant 0 : index
    %c0_30 = arith.constant 0 : index
    %c0_31 = arith.constant 0 : index
    %21 = tpu.strided_load %arg13[%c0_29, %c0_30, %c0_31] {strides = array<i32: 2, 2, 1>} : memref<18x18x64xf32, #tpu.memory_space<vmem>>, vector<8x8x64xf32>
    %22 = vector.shape_cast %21 : vector<8x8x64xf32> to vector<64x64xf32>
    %23 = arith.truncf %22 : vector<64x64xf32> to vector<64x64xbf16>
    %c0_32 = arith.constant 0 : index
    %c0_33 = arith.constant 0 : index
    %c0_34 = arith.constant 0 : index
    %24 = vector.load %arg3[%c0_32, %c0_33, %c0_34] : memref<16x64x128xbf16, #tpu.memory_space<vmem>>, vector<1x64x128xbf16>
    %25 = vector.shape_cast %24 : vector<1x64x128xbf16> to vector<64x128xbf16>
    %cst_35 = arith.constant dense<0.000000e+00> : vector<64x128xf32>
    %26 = tpu.matmul %23, %25, %cst_35 {dimension_numbers = #tpu.dot_dimension_numbers<[1], [0], [0], [1], [0, 0, 1, 1], [], []>} : vector<64x64xbf16>, vector<64x128xbf16>, vector<64x128xf32> -> vector<64x128xf32>
    %c0_36 = arith.constant 0 : index
    %c1_37 = arith.constant 1 : index
    %c0_38 = arith.constant 0 : index
    %27 = tpu.strided_load %arg13[%c0_36, %c1_37, %c0_38] {strides = array<i32: 2, 2, 1>} : memref<18x18x64xf32, #tpu.memory_space<vmem>>, vector<8x8x64xf32>
    %28 = vector.shape_cast %27 : vector<8x8x64xf32> to vector<64x64xf32>
    %29 = arith.truncf %28 : vector<64x64xf32> to vector<64x64xbf16>
    %c1_39 = arith.constant 1 : index
    %c0_40 = arith.constant 0 : index
    %c0_41 = arith.constant 0 : index
    %30 = vector.load %arg3[%c1_39, %c0_40, %c0_41] : memref<16x64x128xbf16, #tpu.memory_space<vmem>>, vector<1x64x128xbf16>
    %31 = vector.shape_cast %30 : vector<1x64x128xbf16> to vector<64x128xbf16>
    %cst_42 = arith.constant dense<0.000000e+00> : vector<64x128xf32>
    %32 = tpu.matmul %29, %31, %cst_42 {dimension_numbers = #tpu.dot_dimension_numbers<[1], [0], [0], [1], [0, 0, 1, 1], [], []>} : vector<64x64xbf16>, vector<64x128xbf16>, vector<64x128xf32> -> vector<64x128xf32>
    %33 = arith.addf %26, %32 : vector<64x128xf32>
    %c0_43 = arith.constant 0 : index
    %c2 = arith.constant 2 : index
    %c0_44 = arith.constant 0 : index
    %34 = tpu.strided_load %arg13[%c0_43, %c2, %c0_44] {strides = array<i32: 2, 2, 1>} : memref<18x18x64xf32, #tpu.memory_space<vmem>>, vector<8x8x64xf32>
    %35 = vector.shape_cast %34 : vector<8x8x64xf32> to vector<64x64xf32>
    %36 = arith.truncf %35 : vector<64x64xf32> to vector<64x64xbf16>
    %c2_45 = arith.constant 2 : index
    %c0_46 = arith.constant 0 : index
    %c0_47 = arith.constant 0 : index
    %37 = vector.load %arg3[%c2_45, %c0_46, %c0_47] : memref<16x64x128xbf16, #tpu.memory_space<vmem>>, vector<1x64x128xbf16>
    %38 = vector.shape_cast %37 : vector<1x64x128xbf16> to vector<64x128xbf16>
    %cst_48 = arith.constant dense<0.000000e+00> : vector<64x128xf32>
    %39 = tpu.matmul %36, %38, %cst_48 {dimension_numbers = #tpu.dot_dimension_numbers<[1], [0], [0], [1], [0, 0, 1, 1], [], []>} : vector<64x64xbf16>, vector<64x128xbf16>, vector<64x128xf32> -> vector<64x128xf32>
    %40 = arith.addf %33, %39 : vector<64x128xf32>
    %c0_49 = arith.constant 0 : index
    %c3 = arith.constant 3 : index
    %c0_50 = arith.constant 0 : index
    %41 = tpu.strided_load %arg13[%c0_49, %c3, %c0_50] {strides = array<i32: 2, 2, 1>} : memref<18x18x64xf32, #tpu.memory_space<vmem>>, vector<8x8x64xf32>
    %42 = vector.shape_cast %41 : vector<8x8x64xf32> to vector<64x64xf32>
    %43 = arith.truncf %42 : vector<64x64xf32> to vector<64x64xbf16>
    %c3_51 = arith.constant 3 : index
    %c0_52 = arith.constant 0 : index
    %c0_53 = arith.constant 0 : index
    %44 = vector.load %arg3[%c3_51, %c0_52, %c0_53] : memref<16x64x128xbf16, #tpu.memory_space<vmem>>, vector<1x64x128xbf16>
    %45 = vector.shape_cast %44 : vector<1x64x128xbf16> to vector<64x128xbf16>
    %cst_54 = arith.constant dense<0.000000e+00> : vector<64x128xf32>
    %46 = tpu.matmul %43, %45, %cst_54 {dimension_numbers = #tpu.dot_dimension_numbers<[1], [0], [0], [1], [0, 0, 1, 1], [], []>} : vector<64x64xbf16>, vector<64x128xbf16>, vector<64x128xf32> -> vector<64x128xf32>
    %47 = arith.addf %40, %46 : vector<64x128xf32>
    %c1_55 = arith.constant 1 : index
    %c0_56 = arith.constant 0 : index
    %c0_57 = arith.constant 0 : index
    %48 = tpu.strided_load %arg13[%c1_55, %c0_56, %c0_57] {strides = array<i32: 2, 2, 1>} : memref<18x18x64xf32, #tpu.memory_space<vmem>>, vector<8x8x64xf32>
    %49 = vector.shape_cast %48 : vector<8x8x64xf32> to vector<64x64xf32>
    %50 = arith.truncf %49 : vector<64x64xf32> to vector<64x64xbf16>
    %c4 = arith.constant 4 : index
    %c0_58 = arith.constant 0 : index
    %c0_59 = arith.constant 0 : index
    %51 = vector.load %arg3[%c4, %c0_58, %c0_59] : memref<16x64x128xbf16, #tpu.memory_space<vmem>>, vector<1x64x128xbf16>
    %52 = vector.shape_cast %51 : vector<1x64x128xbf16> to vector<64x128xbf16>
    %cst_60 = arith.constant dense<0.000000e+00> : vector<64x128xf32>
    %53 = tpu.matmul %50, %52, %cst_60 {dimension_numbers = #tpu.dot_dimension_numbers<[1], [0], [0], [1], [0, 0, 1, 1], [], []>} : vector<64x64xbf16>, vector<64x128xbf16>, vector<64x128xf32> -> vector<64x128xf32>
    %54 = arith.addf %47, %53 : vector<64x128xf32>
    %c1_61 = arith.constant 1 : index
    %c1_62 = arith.constant 1 : index
    %c0_63 = arith.constant 0 : index
    %55 = tpu.strided_load %arg13[%c1_61, %c1_62, %c0_63] {strides = array<i32: 2, 2, 1>} : memref<18x18x64xf32, #tpu.memory_space<vmem>>, vector<8x8x64xf32>
    %56 = vector.shape_cast %55 : vector<8x8x64xf32> to vector<64x64xf32>
    %57 = arith.truncf %56 : vector<64x64xf32> to vector<64x64xbf16>
    %c5 = arith.constant 5 : index
    %c0_64 = arith.constant 0 : index
    %c0_65 = arith.constant 0 : index
    %58 = vector.load %arg3[%c5, %c0_64, %c0_65] : memref<16x64x128xbf16, #tpu.memory_space<vmem>>, vector<1x64x128xbf16>
    %59 = vector.shape_cast %58 : vector<1x64x128xbf16> to vector<64x128xbf16>
    %cst_66 = arith.constant dense<0.000000e+00> : vector<64x128xf32>
    %60 = tpu.matmul %57, %59, %cst_66 {dimension_numbers = #tpu.dot_dimension_numbers<[1], [0], [0], [1], [0, 0, 1, 1], [], []>} : vector<64x64xbf16>, vector<64x128xbf16>, vector<64x128xf32> -> vector<64x128xf32>
    %61 = arith.addf %54, %60 : vector<64x128xf32>
    %c1_67 = arith.constant 1 : index
    %c2_68 = arith.constant 2 : index
    %c0_69 = arith.constant 0 : index
    %62 = tpu.strided_load %arg13[%c1_67, %c2_68, %c0_69] {strides = array<i32: 2, 2, 1>} : memref<18x18x64xf32, #tpu.memory_space<vmem>>, vector<8x8x64xf32>
    %63 = vector.shape_cast %62 : vector<8x8x64xf32> to vector<64x64xf32>
    %64 = arith.truncf %63 : vector<64x64xf32> to vector<64x64xbf16>
    %c6 = arith.constant 6 : index
    %c0_70 = arith.constant 0 : index
    %c0_71 = arith.constant 0 : index
    %65 = vector.load %arg3[%c6, %c0_70, %c0_71] : memref<16x64x128xbf16, #tpu.memory_space<vmem>>, vector<1x64x128xbf16>
    %66 = vector.shape_cast %65 : vector<1x64x128xbf16> to vector<64x128xbf16>
    %cst_72 = arith.constant dense<0.000000e+00> : vector<64x128xf32>
    %67 = tpu.matmul %64, %66, %cst_72 {dimension_numbers = #tpu.dot_dimension_numbers<[1], [0], [0], [1], [0, 0, 1, 1], [], []>} : vector<64x64xbf16>, vector<64x128xbf16>, vector<64x128xf32> -> vector<64x128xf32>
    %68 = arith.addf %61, %67 : vector<64x128xf32>
    %c1_73 = arith.constant 1 : index
    %c3_74 = arith.constant 3 : index
    %c0_75 = arith.constant 0 : index
    %69 = tpu.strided_load %arg13[%c1_73, %c3_74, %c0_75] {strides = array<i32: 2, 2, 1>} : memref<18x18x64xf32, #tpu.memory_space<vmem>>, vector<8x8x64xf32>
    %70 = vector.shape_cast %69 : vector<8x8x64xf32> to vector<64x64xf32>
    %71 = arith.truncf %70 : vector<64x64xf32> to vector<64x64xbf16>
    %c7 = arith.constant 7 : index
    %c0_76 = arith.constant 0 : index
    %c0_77 = arith.constant 0 : index
    %72 = vector.load %arg3[%c7, %c0_76, %c0_77] : memref<16x64x128xbf16, #tpu.memory_space<vmem>>, vector<1x64x128xbf16>
    %73 = vector.shape_cast %72 : vector<1x64x128xbf16> to vector<64x128xbf16>
    %cst_78 = arith.constant dense<0.000000e+00> : vector<64x128xf32>
    %74 = tpu.matmul %71, %73, %cst_78 {dimension_numbers = #tpu.dot_dimension_numbers<[1], [0], [0], [1], [0, 0, 1, 1], [], []>} : vector<64x64xbf16>, vector<64x128xbf16>, vector<64x128xf32> -> vector<64x128xf32>
    %75 = arith.addf %68, %74 : vector<64x128xf32>
    %c2_79 = arith.constant 2 : index
    %c0_80 = arith.constant 0 : index
    %c0_81 = arith.constant 0 : index
    %76 = tpu.strided_load %arg13[%c2_79, %c0_80, %c0_81] {strides = array<i32: 2, 2, 1>} : memref<18x18x64xf32, #tpu.memory_space<vmem>>, vector<8x8x64xf32>
    %77 = vector.shape_cast %76 : vector<8x8x64xf32> to vector<64x64xf32>
    %78 = arith.truncf %77 : vector<64x64xf32> to vector<64x64xbf16>
    %c8 = arith.constant 8 : index
    %c0_82 = arith.constant 0 : index
    %c0_83 = arith.constant 0 : index
    %79 = vector.load %arg3[%c8, %c0_82, %c0_83] : memref<16x64x128xbf16, #tpu.memory_space<vmem>>, vector<1x64x128xbf16>
    %80 = vector.shape_cast %79 : vector<1x64x128xbf16> to vector<64x128xbf16>
    %cst_84 = arith.constant dense<0.000000e+00> : vector<64x128xf32>
    %81 = tpu.matmul %78, %80, %cst_84 {dimension_numbers = #tpu.dot_dimension_numbers<[1], [0], [0], [1], [0, 0, 1, 1], [], []>} : vector<64x64xbf16>, vector<64x128xbf16>, vector<64x128xf32> -> vector<64x128xf32>
    %82 = arith.addf %75, %81 : vector<64x128xf32>
    %c2_85 = arith.constant 2 : index
    %c1_86 = arith.constant 1 : index
    %c0_87 = arith.constant 0 : index
    %83 = tpu.strided_load %arg13[%c2_85, %c1_86, %c0_87] {strides = array<i32: 2, 2, 1>} : memref<18x18x64xf32, #tpu.memory_space<vmem>>, vector<8x8x64xf32>
    %84 = vector.shape_cast %83 : vector<8x8x64xf32> to vector<64x64xf32>
    %85 = arith.truncf %84 : vector<64x64xf32> to vector<64x64xbf16>
    %c9 = arith.constant 9 : index
    %c0_88 = arith.constant 0 : index
    %c0_89 = arith.constant 0 : index
    %86 = vector.load %arg3[%c9, %c0_88, %c0_89] : memref<16x64x128xbf16, #tpu.memory_space<vmem>>, vector<1x64x128xbf16>
    %87 = vector.shape_cast %86 : vector<1x64x128xbf16> to vector<64x128xbf16>
    %cst_90 = arith.constant dense<0.000000e+00> : vector<64x128xf32>
    %88 = tpu.matmul %85, %87, %cst_90 {dimension_numbers = #tpu.dot_dimension_numbers<[1], [0], [0], [1], [0, 0, 1, 1], [], []>} : vector<64x64xbf16>, vector<64x128xbf16>, vector<64x128xf32> -> vector<64x128xf32>
    %89 = arith.addf %82, %88 : vector<64x128xf32>
    %c2_91 = arith.constant 2 : index
    %c2_92 = arith.constant 2 : index
    %c0_93 = arith.constant 0 : index
    %90 = tpu.strided_load %arg13[%c2_91, %c2_92, %c0_93] {strides = array<i32: 2, 2, 1>} : memref<18x18x64xf32, #tpu.memory_space<vmem>>, vector<8x8x64xf32>
    %91 = vector.shape_cast %90 : vector<8x8x64xf32> to vector<64x64xf32>
    %92 = arith.truncf %91 : vector<64x64xf32> to vector<64x64xbf16>
    %c10 = arith.constant 10 : index
    %c0_94 = arith.constant 0 : index
    %c0_95 = arith.constant 0 : index
    %93 = vector.load %arg3[%c10, %c0_94, %c0_95] : memref<16x64x128xbf16, #tpu.memory_space<vmem>>, vector<1x64x128xbf16>
    %94 = vector.shape_cast %93 : vector<1x64x128xbf16> to vector<64x128xbf16>
    %cst_96 = arith.constant dense<0.000000e+00> : vector<64x128xf32>
    %95 = tpu.matmul %92, %94, %cst_96 {dimension_numbers = #tpu.dot_dimension_numbers<[1], [0], [0], [1], [0, 0, 1, 1], [], []>} : vector<64x64xbf16>, vector<64x128xbf16>, vector<64x128xf32> -> vector<64x128xf32>
    %96 = arith.addf %89, %95 : vector<64x128xf32>
    %c2_97 = arith.constant 2 : index
    %c3_98 = arith.constant 3 : index
    %c0_99 = arith.constant 0 : index
    %97 = tpu.strided_load %arg13[%c2_97, %c3_98, %c0_99] {strides = array<i32: 2, 2, 1>} : memref<18x18x64xf32, #tpu.memory_space<vmem>>, vector<8x8x64xf32>
    %98 = vector.shape_cast %97 : vector<8x8x64xf32> to vector<64x64xf32>
    %99 = arith.truncf %98 : vector<64x64xf32> to vector<64x64xbf16>
    %c11 = arith.constant 11 : index
    %c0_100 = arith.constant 0 : index
    %c0_101 = arith.constant 0 : index
    %100 = vector.load %arg3[%c11, %c0_100, %c0_101] : memref<16x64x128xbf16, #tpu.memory_space<vmem>>, vector<1x64x128xbf16>
    %101 = vector.shape_cast %100 : vector<1x64x128xbf16> to vector<64x128xbf16>
    %cst_102 = arith.constant dense<0.000000e+00> : vector<64x128xf32>
    %102 = tpu.matmul %99, %101, %cst_102 {dimension_numbers = #tpu.dot_dimension_numbers<[1], [0], [0], [1], [0, 0, 1, 1], [], []>} : vector<64x64xbf16>, vector<64x128xbf16>, vector<64x128xf32> -> vector<64x128xf32>
    %103 = arith.addf %96, %102 : vector<64x128xf32>
    %c3_103 = arith.constant 3 : index
    %c0_104 = arith.constant 0 : index
    %c0_105 = arith.constant 0 : index
    %104 = tpu.strided_load %arg13[%c3_103, %c0_104, %c0_105] {strides = array<i32: 2, 2, 1>} : memref<18x18x64xf32, #tpu.memory_space<vmem>>, vector<8x8x64xf32>
    %105 = vector.shape_cast %104 : vector<8x8x64xf32> to vector<64x64xf32>
    %106 = arith.truncf %105 : vector<64x64xf32> to vector<64x64xbf16>
    %c12 = arith.constant 12 : index
    %c0_106 = arith.constant 0 : index
    %c0_107 = arith.constant 0 : index
    %107 = vector.load %arg3[%c12, %c0_106, %c0_107] : memref<16x64x128xbf16, #tpu.memory_space<vmem>>, vector<1x64x128xbf16>
    %108 = vector.shape_cast %107 : vector<1x64x128xbf16> to vector<64x128xbf16>
    %cst_108 = arith.constant dense<0.000000e+00> : vector<64x128xf32>
    %109 = tpu.matmul %106, %108, %cst_108 {dimension_numbers = #tpu.dot_dimension_numbers<[1], [0], [0], [1], [0, 0, 1, 1], [], []>} : vector<64x64xbf16>, vector<64x128xbf16>, vector<64x128xf32> -> vector<64x128xf32>
    %110 = arith.addf %103, %109 : vector<64x128xf32>
    %c3_109 = arith.constant 3 : index
    %c1_110 = arith.constant 1 : index
    %c0_111 = arith.constant 0 : index
    %111 = tpu.strided_load %arg13[%c3_109, %c1_110, %c0_111] {strides = array<i32: 2, 2, 1>} : memref<18x18x64xf32, #tpu.memory_space<vmem>>, vector<8x8x64xf32>
    %112 = vector.shape_cast %111 : vector<8x8x64xf32> to vector<64x64xf32>
    %113 = arith.truncf %112 : vector<64x64xf32> to vector<64x64xbf16>
    %c13 = arith.constant 13 : index
    %c0_112 = arith.constant 0 : index
    %c0_113 = arith.constant 0 : index
    %114 = vector.load %arg3[%c13, %c0_112, %c0_113] : memref<16x64x128xbf16, #tpu.memory_space<vmem>>, vector<1x64x128xbf16>
    %115 = vector.shape_cast %114 : vector<1x64x128xbf16> to vector<64x128xbf16>
    %cst_114 = arith.constant dense<0.000000e+00> : vector<64x128xf32>
    %116 = tpu.matmul %113, %115, %cst_114 {dimension_numbers = #tpu.dot_dimension_numbers<[1], [0], [0], [1], [0, 0, 1, 1], [], []>} : vector<64x64xbf16>, vector<64x128xbf16>, vector<64x128xf32> -> vector<64x128xf32>
    %117 = arith.addf %110, %116 : vector<64x128xf32>
    %c3_115 = arith.constant 3 : index
    %c2_116 = arith.constant 2 : index
    %c0_117 = arith.constant 0 : index
    %118 = tpu.strided_load %arg13[%c3_115, %c2_116, %c0_117] {strides = array<i32: 2, 2, 1>} : memref<18x18x64xf32, #tpu.memory_space<vmem>>, vector<8x8x64xf32>
    %119 = vector.shape_cast %118 : vector<8x8x64xf32> to vector<64x64xf32>
    %120 = arith.truncf %119 : vector<64x64xf32> to vector<64x64xbf16>
    %c14 = arith.constant 14 : index
    %c0_118 = arith.constant 0 : index
    %c0_119 = arith.constant 0 : index
    %121 = vector.load %arg3[%c14, %c0_118, %c0_119] : memref<16x64x128xbf16, #tpu.memory_space<vmem>>, vector<1x64x128xbf16>
    %122 = vector.shape_cast %121 : vector<1x64x128xbf16> to vector<64x128xbf16>
    %cst_120 = arith.constant dense<0.000000e+00> : vector<64x128xf32>
    %123 = tpu.matmul %120, %122, %cst_120 {dimension_numbers = #tpu.dot_dimension_numbers<[1], [0], [0], [1], [0, 0, 1, 1], [], []>} : vector<64x64xbf16>, vector<64x128xbf16>, vector<64x128xf32> -> vector<64x128xf32>
    %124 = arith.addf %117, %123 : vector<64x128xf32>
    %c3_121 = arith.constant 3 : index
    %c3_122 = arith.constant 3 : index
    %c0_123 = arith.constant 0 : index
    %125 = tpu.strided_load %arg13[%c3_121, %c3_122, %c0_123] {strides = array<i32: 2, 2, 1>} : memref<18x18x64xf32, #tpu.memory_space<vmem>>, vector<8x8x64xf32>
    %126 = vector.shape_cast %125 : vector<8x8x64xf32> to vector<64x64xf32>
    %127 = arith.truncf %126 : vector<64x64xf32> to vector<64x64xbf16>
    %c15 = arith.constant 15 : index
    %c0_124 = arith.constant 0 : index
    %c0_125 = arith.constant 0 : index
    %128 = vector.load %arg3[%c15, %c0_124, %c0_125] : memref<16x64x128xbf16, #tpu.memory_space<vmem>>, vector<1x64x128xbf16>
    %129 = vector.shape_cast %128 : vector<1x64x128xbf16> to vector<64x128xbf16>
    %cst_126 = arith.constant dense<0.000000e+00> : vector<64x128xf32>
    %130 = tpu.matmul %127, %129, %cst_126 {dimension_numbers = #tpu.dot_dimension_numbers<[1], [0], [0], [1], [0, 0, 1, 1], [], []>} : vector<64x64xbf16>, vector<64x128xbf16>, vector<64x128xf32> -> vector<64x128xf32>
    %131 = arith.addf %124, %130 : vector<64x128xf32>
    %cst_127 = arith.constant 0.000000e+00 : f32
    %132 = vector.broadcast %cst_127 : f32 to vector<64x128xf32>
    %133 = arith.cmpf oge, %131, %132 : vector<64x128xf32>
    %cst_128 = arith.constant 2.000000e-01 : f32
    %134 = vector.broadcast %cst_128 : f32 to vector<64x128xf32>
    %135 = arith.mulf %134, %131 : vector<64x128xf32>
    %136 = arith.select %133, %131, %135 : vector<64x128xi1>, vector<64x128xf32>
    %137 = vector.shape_cast %136 : vector<64x128xf32> to vector<1x8x8x128xf32>
    %c0_129 = arith.constant 0 : index
    %c0_130 = arith.constant 0 : index
    %c0_131 = arith.constant 0 : index
    %c0_132 = arith.constant 0 : index
    %138 = vector.load %arg9[%c0_129, %c0_130, %c0_131, %c0_132] : memref<1x8x8x128xf32, #tpu.memory_space<vmem>>, vector<1x8x8x128xf32>
    tpu.vector_store %arg9[%c0_129, %c0_130, %c0_131, %c0_132], %137 {strides = array<i32>} : memref<1x8x8x128xf32, #tpu.memory_space<vmem>>, vector<1x8x8x128xf32>,
    %139 = vector.shape_cast %136 : vector<64x128xf32> to vector<8x8x128xf32>
    %c1_133 = arith.constant 1 : index
    %c1_134 = arith.constant 1 : index
    %c0_135 = arith.constant 0 : index
    %140 = vector.load %arg14[%c1_133, %c1_134, %c0_135] : memref<10x10x128xf32, #tpu.memory_space<vmem>>, vector<8x8x128xf32>
    tpu.vector_store %arg14[%c1_133, %c1_134, %c0_135], %139 {strides = array<i32>} : memref<10x10x128xf32, #tpu.memory_space<vmem>>, vector<8x8x128xf32>,
    %c0_136 = arith.constant 0 : index
    %c0_137 = arith.constant 0 : index
    %c0_138 = arith.constant 0 : index
    %141 = tpu.strided_load %arg14[%c0_136, %c0_137, %c0_138] {strides = array<i32: 2, 2, 1>} : memref<10x10x128xf32, #tpu.memory_space<vmem>>, vector<4x4x128xf32>
    %142 = vector.shape_cast %141 : vector<4x4x128xf32> to vector<16x128xf32>
    %143 = arith.truncf %142 : vector<16x128xf32> to vector<16x128xbf16>
    %c0_139 = arith.constant 0 : index
    %c0_140 = arith.constant 0 : index
    %c0_141 = arith.constant 0 : index
    %144 = vector.load %arg4[%c0_139, %c0_140, %c0_141] : memref<16x128x256xbf16, #tpu.memory_space<vmem>>, vector<1x128x256xbf16>
    %145 = vector.shape_cast %144 : vector<1x128x256xbf16> to vector<128x256xbf16>
    %cst_142 = arith.constant dense<0.000000e+00> : vector<16x256xf32>
    %146 = tpu.matmul %143, %145, %cst_142 {dimension_numbers = #tpu.dot_dimension_numbers<[1], [0], [0], [1], [0, 0, 1, 1], [], []>} : vector<16x128xbf16>, vector<128x256xbf16>, vector<16x256xf32> -> vector<16x256xf32>
    %c0_143 = arith.constant 0 : index
    %c1_144 = arith.constant 1 : index
    %c0_145 = arith.constant 0 : index
    %147 = tpu.strided_load %arg14[%c0_143, %c1_144, %c0_145] {strides = array<i32: 2, 2, 1>} : memref<10x10x128xf32, #tpu.memory_space<vmem>>, vector<4x4x128xf32>
    %148 = vector.shape_cast %147 : vector<4x4x128xf32> to vector<16x128xf32>
    %149 = arith.truncf %148 : vector<16x128xf32> to vector<16x128xbf16>
    %c1_146 = arith.constant 1 : index
    %c0_147 = arith.constant 0 : index
    %c0_148 = arith.constant 0 : index
    %150 = vector.load %arg4[%c1_146, %c0_147, %c0_148] : memref<16x128x256xbf16, #tpu.memory_space<vmem>>, vector<1x128x256xbf16>
    %151 = vector.shape_cast %150 : vector<1x128x256xbf16> to vector<128x256xbf16>
    %cst_149 = arith.constant dense<0.000000e+00> : vector<16x256xf32>
    %152 = tpu.matmul %149, %151, %cst_149 {dimension_numbers = #tpu.dot_dimension_numbers<[1], [0], [0], [1], [0, 0, 1, 1], [], []>} : vector<16x128xbf16>, vector<128x256xbf16>, vector<16x256xf32> -> vector<16x256xf32>
    %153 = arith.addf %146, %152 : vector<16x256xf32>
    %c0_150 = arith.constant 0 : index
    %c2_151 = arith.constant 2 : index
    %c0_152 = arith.constant 0 : index
    %154 = tpu.strided_load %arg14[%c0_150, %c2_151, %c0_152] {strides = array<i32: 2, 2, 1>} : memref<10x10x128xf32, #tpu.memory_space<vmem>>, vector<4x4x128xf32>
    %155 = vector.shape_cast %154 : vector<4x4x128xf32> to vector<16x128xf32>
    %156 = arith.truncf %155 : vector<16x128xf32> to vector<16x128xbf16>
    %c2_153 = arith.constant 2 : index
    %c0_154 = arith.constant 0 : index
    %c0_155 = arith.constant 0 : index
    %157 = vector.load %arg4[%c2_153, %c0_154, %c0_155] : memref<16x128x256xbf16, #tpu.memory_space<vmem>>, vector<1x128x256xbf16>
    %158 = vector.shape_cast %157 : vector<1x128x256xbf16> to vector<128x256xbf16>
    %cst_156 = arith.constant dense<0.000000e+00> : vector<16x256xf32>
    %159 = tpu.matmul %156, %158, %cst_156 {dimension_numbers = #tpu.dot_dimension_numbers<[1], [0], [0], [1], [0, 0, 1, 1], [], []>} : vector<16x128xbf16>, vector<128x256xbf16>, vector<16x256xf32> -> vector<16x256xf32>
    %160 = arith.addf %153, %159 : vector<16x256xf32>
    %c0_157 = arith.constant 0 : index
    %c3_158 = arith.constant 3 : index
    %c0_159 = arith.constant 0 : index
    %161 = tpu.strided_load %arg14[%c0_157, %c3_158, %c0_159] {strides = array<i32: 2, 2, 1>} : memref<10x10x128xf32, #tpu.memory_space<vmem>>, vector<4x4x128xf32>
    %162 = vector.shape_cast %161 : vector<4x4x128xf32> to vector<16x128xf32>
    %163 = arith.truncf %162 : vector<16x128xf32> to vector<16x128xbf16>
    %c3_160 = arith.constant 3 : index
    %c0_161 = arith.constant 0 : index
    %c0_162 = arith.constant 0 : index
    %164 = vector.load %arg4[%c3_160, %c0_161, %c0_162] : memref<16x128x256xbf16, #tpu.memory_space<vmem>>, vector<1x128x256xbf16>
    %165 = vector.shape_cast %164 : vector<1x128x256xbf16> to vector<128x256xbf16>
    %cst_163 = arith.constant dense<0.000000e+00> : vector<16x256xf32>
    %166 = tpu.matmul %163, %165, %cst_163 {dimension_numbers = #tpu.dot_dimension_numbers<[1], [0], [0], [1], [0, 0, 1, 1], [], []>} : vector<16x128xbf16>, vector<128x256xbf16>, vector<16x256xf32> -> vector<16x256xf32>
    %167 = arith.addf %160, %166 : vector<16x256xf32>
    %c1_164 = arith.constant 1 : index
    %c0_165 = arith.constant 0 : index
    %c0_166 = arith.constant 0 : index
    %168 = tpu.strided_load %arg14[%c1_164, %c0_165, %c0_166] {strides = array<i32: 2, 2, 1>} : memref<10x10x128xf32, #tpu.memory_space<vmem>>, vector<4x4x128xf32>
    %169 = vector.shape_cast %168 : vector<4x4x128xf32> to vector<16x128xf32>
    %170 = arith.truncf %169 : vector<16x128xf32> to vector<16x128xbf16>
    %c4_167 = arith.constant 4 : index
    %c0_168 = arith.constant 0 : index
    %c0_169 = arith.constant 0 : index
    %171 = vector.load %arg4[%c4_167, %c0_168, %c0_169] : memref<16x128x256xbf16, #tpu.memory_space<vmem>>, vector<1x128x256xbf16>
    %172 = vector.shape_cast %171 : vector<1x128x256xbf16> to vector<128x256xbf16>
    %cst_170 = arith.constant dense<0.000000e+00> : vector<16x256xf32>
    %173 = tpu.matmul %170, %172, %cst_170 {dimension_numbers = #tpu.dot_dimension_numbers<[1], [0], [0], [1], [0, 0, 1, 1], [], []>} : vector<16x128xbf16>, vector<128x256xbf16>, vector<16x256xf32> -> vector<16x256xf32>
    %174 = arith.addf %167, %173 : vector<16x256xf32>
    %c1_171 = arith.constant 1 : index
    %c1_172 = arith.constant 1 : index
    %c0_173 = arith.constant 0 : index
    %175 = tpu.strided_load %arg14[%c1_171, %c1_172, %c0_173] {strides = array<i32: 2, 2, 1>} : memref<10x10x128xf32, #tpu.memory_space<vmem>>, vector<4x4x128xf32>
    %176 = vector.shape_cast %175 : vector<4x4x128xf32> to vector<16x128xf32>
    %177 = arith.truncf %176 : vector<16x128xf32> to vector<16x128xbf16>
    %c5_174 = arith.constant 5 : index
    %c0_175 = arith.constant 0 : index
    %c0_176 = arith.constant 0 : index
    %178 = vector.load %arg4[%c5_174, %c0_175, %c0_176] : memref<16x128x256xbf16, #tpu.memory_space<vmem>>, vector<1x128x256xbf16>
    %179 = vector.shape_cast %178 : vector<1x128x256xbf16> to vector<128x256xbf16>
    %cst_177 = arith.constant dense<0.000000e+00> : vector<16x256xf32>
    %180 = tpu.matmul %177, %179, %cst_177 {dimension_numbers = #tpu.dot_dimension_numbers<[1], [0], [0], [1], [0, 0, 1, 1], [], []>} : vector<16x128xbf16>, vector<128x256xbf16>, vector<16x256xf32> -> vector<16x256xf32>
    %181 = arith.addf %174, %180 : vector<16x256xf32>
    %c1_178 = arith.constant 1 : index
    %c2_179 = arith.constant 2 : index
    %c0_180 = arith.constant 0 : index
    %182 = tpu.strided_load %arg14[%c1_178, %c2_179, %c0_180] {strides = array<i32: 2, 2, 1>} : memref<10x10x128xf32, #tpu.memory_space<vmem>>, vector<4x4x128xf32>
    %183 = vector.shape_cast %182 : vector<4x4x128xf32> to vector<16x128xf32>
    %184 = arith.truncf %183 : vector<16x128xf32> to vector<16x128xbf16>
    %c6_181 = arith.constant 6 : index
    %c0_182 = arith.constant 0 : index
    %c0_183 = arith.constant 0 : index
    %185 = vector.load %arg4[%c6_181, %c0_182, %c0_183] : memref<16x128x256xbf16, #tpu.memory_space<vmem>>, vector<1x128x256xbf16>
    %186 = vector.shape_cast %185 : vector<1x128x256xbf16> to vector<128x256xbf16>
    %cst_184 = arith.constant dense<0.000000e+00> : vector<16x256xf32>
    %187 = tpu.matmul %184, %186, %cst_184 {dimension_numbers = #tpu.dot_dimension_numbers<[1], [0], [0], [1], [0, 0, 1, 1], [], []>} : vector<16x128xbf16>, vector<128x256xbf16>, vector<16x256xf32> -> vector<16x256xf32>
    %188 = arith.addf %181, %187 : vector<16x256xf32>
    %c1_185 = arith.constant 1 : index
    %c3_186 = arith.constant 3 : index
    %c0_187 = arith.constant 0 : index
    %189 = tpu.strided_load %arg14[%c1_185, %c3_186, %c0_187] {strides = array<i32: 2, 2, 1>} : memref<10x10x128xf32, #tpu.memory_space<vmem>>, vector<4x4x128xf32>
    %190 = vector.shape_cast %189 : vector<4x4x128xf32> to vector<16x128xf32>
    %191 = arith.truncf %190 : vector<16x128xf32> to vector<16x128xbf16>
    %c7_188 = arith.constant 7 : index
    %c0_189 = arith.constant 0 : index
    %c0_190 = arith.constant 0 : index
    %192 = vector.load %arg4[%c7_188, %c0_189, %c0_190] : memref<16x128x256xbf16, #tpu.memory_space<vmem>>, vector<1x128x256xbf16>
    %193 = vector.shape_cast %192 : vector<1x128x256xbf16> to vector<128x256xbf16>
    %cst_191 = arith.constant dense<0.000000e+00> : vector<16x256xf32>
    %194 = tpu.matmul %191, %193, %cst_191 {dimension_numbers = #tpu.dot_dimension_numbers<[1], [0], [0], [1], [0, 0, 1, 1], [], []>} : vector<16x128xbf16>, vector<128x256xbf16>, vector<16x256xf32> -> vector<16x256xf32>
    %195 = arith.addf %188, %194 : vector<16x256xf32>
    %c2_192 = arith.constant 2 : index
    %c0_193 = arith.constant 0 : index
    %c0_194 = arith.constant 0 : index
    %196 = tpu.strided_load %arg14[%c2_192, %c0_193, %c0_194] {strides = array<i32: 2, 2, 1>} : memref<10x10x128xf32, #tpu.memory_space<vmem>>, vector<4x4x128xf32>
    %197 = vector.shape_cast %196 : vector<4x4x128xf32> to vector<16x128xf32>
    %198 = arith.truncf %197 : vector<16x128xf32> to vector<16x128xbf16>
    %c8_195 = arith.constant 8 : index
    %c0_196 = arith.constant 0 : index
    %c0_197 = arith.constant 0 : index
    %199 = vector.load %arg4[%c8_195, %c0_196, %c0_197] : memref<16x128x256xbf16, #tpu.memory_space<vmem>>, vector<1x128x256xbf16>
    %200 = vector.shape_cast %199 : vector<1x128x256xbf16> to vector<128x256xbf16>
    %cst_198 = arith.constant dense<0.000000e+00> : vector<16x256xf32>
    %201 = tpu.matmul %198, %200, %cst_198 {dimension_numbers = #tpu.dot_dimension_numbers<[1], [0], [0], [1], [0, 0, 1, 1], [], []>} : vector<16x128xbf16>, vector<128x256xbf16>, vector<16x256xf32> -> vector<16x256xf32>
    %202 = arith.addf %195, %201 : vector<16x256xf32>
    %c2_199 = arith.constant 2 : index
    %c1_200 = arith.constant 1 : index
    %c0_201 = arith.constant 0 : index
    %203 = tpu.strided_load %arg14[%c2_199, %c1_200, %c0_201] {strides = array<i32: 2, 2, 1>} : memref<10x10x128xf32, #tpu.memory_space<vmem>>, vector<4x4x128xf32>
    %204 = vector.shape_cast %203 : vector<4x4x128xf32> to vector<16x128xf32>
    %205 = arith.truncf %204 : vector<16x128xf32> to vector<16x128xbf16>
    %c9_202 = arith.constant 9 : index
    %c0_203 = arith.constant 0 : index
    %c0_204 = arith.constant 0 : index
    %206 = vector.load %arg4[%c9_202, %c0_203, %c0_204] : memref<16x128x256xbf16, #tpu.memory_space<vmem>>, vector<1x128x256xbf16>
    %207 = vector.shape_cast %206 : vector<1x128x256xbf16> to vector<128x256xbf16>
    %cst_205 = arith.constant dense<0.000000e+00> : vector<16x256xf32>
    %208 = tpu.matmul %205, %207, %cst_205 {dimension_numbers = #tpu.dot_dimension_numbers<[1], [0], [0], [1], [0, 0, 1, 1], [], []>} : vector<16x128xbf16>, vector<128x256xbf16>, vector<16x256xf32> -> vector<16x256xf32>
    %209 = arith.addf %202, %208 : vector<16x256xf32>
    %c2_206 = arith.constant 2 : index
    %c2_207 = arith.constant 2 : index
    %c0_208 = arith.constant 0 : index
    %210 = tpu.strided_load %arg14[%c2_206, %c2_207, %c0_208] {strides = array<i32: 2, 2, 1>} : memref<10x10x128xf32, #tpu.memory_space<vmem>>, vector<4x4x128xf32>
    %211 = vector.shape_cast %210 : vector<4x4x128xf32> to vector<16x128xf32>
    %212 = arith.truncf %211 : vector<16x128xf32> to vector<16x128xbf16>
    %c10_209 = arith.constant 10 : index
    %c0_210 = arith.constant 0 : index
    %c0_211 = arith.constant 0 : index
    %213 = vector.load %arg4[%c10_209, %c0_210, %c0_211] : memref<16x128x256xbf16, #tpu.memory_space<vmem>>, vector<1x128x256xbf16>
    %214 = vector.shape_cast %213 : vector<1x128x256xbf16> to vector<128x256xbf16>
    %cst_212 = arith.constant dense<0.000000e+00> : vector<16x256xf32>
    %215 = tpu.matmul %212, %214, %cst_212 {dimension_numbers = #tpu.dot_dimension_numbers<[1], [0], [0], [1], [0, 0, 1, 1], [], []>} : vector<16x128xbf16>, vector<128x256xbf16>, vector<16x256xf32> -> vector<16x256xf32>
    %216 = arith.addf %209, %215 : vector<16x256xf32>
    %c2_213 = arith.constant 2 : index
    %c3_214 = arith.constant 3 : index
    %c0_215 = arith.constant 0 : index
    %217 = tpu.strided_load %arg14[%c2_213, %c3_214, %c0_215] {strides = array<i32: 2, 2, 1>} : memref<10x10x128xf32, #tpu.memory_space<vmem>>, vector<4x4x128xf32>
    %218 = vector.shape_cast %217 : vector<4x4x128xf32> to vector<16x128xf32>
    %219 = arith.truncf %218 : vector<16x128xf32> to vector<16x128xbf16>
    %c11_216 = arith.constant 11 : index
    %c0_217 = arith.constant 0 : index
    %c0_218 = arith.constant 0 : index
    %220 = vector.load %arg4[%c11_216, %c0_217, %c0_218] : memref<16x128x256xbf16, #tpu.memory_space<vmem>>, vector<1x128x256xbf16>
    %221 = vector.shape_cast %220 : vector<1x128x256xbf16> to vector<128x256xbf16>
    %cst_219 = arith.constant dense<0.000000e+00> : vector<16x256xf32>
    %222 = tpu.matmul %219, %221, %cst_219 {dimension_numbers = #tpu.dot_dimension_numbers<[1], [0], [0], [1], [0, 0, 1, 1], [], []>} : vector<16x128xbf16>, vector<128x256xbf16>, vector<16x256xf32> -> vector<16x256xf32>
    %223 = arith.addf %216, %222 : vector<16x256xf32>
    %c3_220 = arith.constant 3 : index
    %c0_221 = arith.constant 0 : index
    %c0_222 = arith.constant 0 : index
    %224 = tpu.strided_load %arg14[%c3_220, %c0_221, %c0_222] {strides = array<i32: 2, 2, 1>} : memref<10x10x128xf32, #tpu.memory_space<vmem>>, vector<4x4x128xf32>
    %225 = vector.shape_cast %224 : vector<4x4x128xf32> to vector<16x128xf32>
    %226 = arith.truncf %225 : vector<16x128xf32> to vector<16x128xbf16>
    %c12_223 = arith.constant 12 : index
    %c0_224 = arith.constant 0 : index
    %c0_225 = arith.constant 0 : index
    %227 = vector.load %arg4[%c12_223, %c0_224, %c0_225] : memref<16x128x256xbf16, #tpu.memory_space<vmem>>, vector<1x128x256xbf16>
    %228 = vector.shape_cast %227 : vector<1x128x256xbf16> to vector<128x256xbf16>
    %cst_226 = arith.constant dense<0.000000e+00> : vector<16x256xf32>
    %229 = tpu.matmul %226, %228, %cst_226 {dimension_numbers = #tpu.dot_dimension_numbers<[1], [0], [0], [1], [0, 0, 1, 1], [], []>} : vector<16x128xbf16>, vector<128x256xbf16>, vector<16x256xf32> -> vector<16x256xf32>
    %230 = arith.addf %223, %229 : vector<16x256xf32>
    %c3_227 = arith.constant 3 : index
    %c1_228 = arith.constant 1 : index
    %c0_229 = arith.constant 0 : index
    %231 = tpu.strided_load %arg14[%c3_227, %c1_228, %c0_229] {strides = array<i32: 2, 2, 1>} : memref<10x10x128xf32, #tpu.memory_space<vmem>>, vector<4x4x128xf32>
    %232 = vector.shape_cast %231 : vector<4x4x128xf32> to vector<16x128xf32>
    %233 = arith.truncf %232 : vector<16x128xf32> to vector<16x128xbf16>
    %c13_230 = arith.constant 13 : index
    %c0_231 = arith.constant 0 : index
    %c0_232 = arith.constant 0 : index
    %234 = vector.load %arg4[%c13_230, %c0_231, %c0_232] : memref<16x128x256xbf16, #tpu.memory_space<vmem>>, vector<1x128x256xbf16>
    %235 = vector.shape_cast %234 : vector<1x128x256xbf16> to vector<128x256xbf16>
    %cst_233 = arith.constant dense<0.000000e+00> : vector<16x256xf32>
    %236 = tpu.matmul %233, %235, %cst_233 {dimension_numbers = #tpu.dot_dimension_numbers<[1], [0], [0], [1], [0, 0, 1, 1], [], []>} : vector<16x128xbf16>, vector<128x256xbf16>, vector<16x256xf32> -> vector<16x256xf32>
    %237 = arith.addf %230, %236 : vector<16x256xf32>
    %c3_234 = arith.constant 3 : index
    %c2_235 = arith.constant 2 : index
    %c0_236 = arith.constant 0 : index
    %238 = tpu.strided_load %arg14[%c3_234, %c2_235, %c0_236] {strides = array<i32: 2, 2, 1>} : memref<10x10x128xf32, #tpu.memory_space<vmem>>, vector<4x4x128xf32>
    %239 = vector.shape_cast %238 : vector<4x4x128xf32> to vector<16x128xf32>
    %240 = arith.truncf %239 : vector<16x128xf32> to vector<16x128xbf16>
    %c14_237 = arith.constant 14 : index
    %c0_238 = arith.constant 0 : index
    %c0_239 = arith.constant 0 : index
    %241 = vector.load %arg4[%c14_237, %c0_238, %c0_239] : memref<16x128x256xbf16, #tpu.memory_space<vmem>>, vector<1x128x256xbf16>
    %242 = vector.shape_cast %241 : vector<1x128x256xbf16> to vector<128x256xbf16>
    %cst_240 = arith.constant dense<0.000000e+00> : vector<16x256xf32>
    %243 = tpu.matmul %240, %242, %cst_240 {dimension_numbers = #tpu.dot_dimension_numbers<[1], [0], [0], [1], [0, 0, 1, 1], [], []>} : vector<16x128xbf16>, vector<128x256xbf16>, vector<16x256xf32> -> vector<16x256xf32>
    %244 = arith.addf %237, %243 : vector<16x256xf32>
    %c3_241 = arith.constant 3 : index
    %c3_242 = arith.constant 3 : index
    %c0_243 = arith.constant 0 : index
    %245 = tpu.strided_load %arg14[%c3_241, %c3_242, %c0_243] {strides = array<i32: 2, 2, 1>} : memref<10x10x128xf32, #tpu.memory_space<vmem>>, vector<4x4x128xf32>
    %246 = vector.shape_cast %245 : vector<4x4x128xf32> to vector<16x128xf32>
    %247 = arith.truncf %246 : vector<16x128xf32> to vector<16x128xbf16>
    %c15_244 = arith.constant 15 : index
    %c0_245 = arith.constant 0 : index
    %c0_246 = arith.constant 0 : index
    %248 = vector.load %arg4[%c15_244, %c0_245, %c0_246] : memref<16x128x256xbf16, #tpu.memory_space<vmem>>, vector<1x128x256xbf16>
    %249 = vector.shape_cast %248 : vector<1x128x256xbf16> to vector<128x256xbf16>
    %cst_247 = arith.constant dense<0.000000e+00> : vector<16x256xf32>
    %250 = tpu.matmul %247, %249, %cst_247 {dimension_numbers = #tpu.dot_dimension_numbers<[1], [0], [0], [1], [0, 0, 1, 1], [], []>} : vector<16x128xbf16>, vector<128x256xbf16>, vector<16x256xf32> -> vector<16x256xf32>
    %251 = arith.addf %244, %250 : vector<16x256xf32>
    %cst_248 = arith.constant 0.000000e+00 : f32
    %252 = vector.broadcast %cst_248 : f32 to vector<16x256xf32>
    %253 = arith.cmpf oge, %251, %252 : vector<16x256xf32>
    %cst_249 = arith.constant 2.000000e-01 : f32
    %254 = vector.broadcast %cst_249 : f32 to vector<16x256xf32>
    %255 = arith.mulf %254, %251 : vector<16x256xf32>
    %256 = arith.select %253, %251, %255 : vector<16x256xi1>, vector<16x256xf32>
    %257 = vector.shape_cast %256 : vector<16x256xf32> to vector<1x4x4x256xf32>
    %c0_250 = arith.constant 0 : index
    %c0_251 = arith.constant 0 : index
    %c0_252 = arith.constant 0 : index
    %c0_253 = arith.constant 0 : index
    %258 = vector.load %arg10[%c0_250, %c0_251, %c0_252, %c0_253] : memref<1x4x4x256xf32, #tpu.memory_space<vmem>>, vector<1x4x4x256xf32>
    tpu.vector_store %arg10[%c0_250, %c0_251, %c0_252, %c0_253], %257 {strides = array<i32>} : memref<1x4x4x256xf32, #tpu.memory_space<vmem>>, vector<1x4x4x256xf32>,
    %259 = vector.shape_cast %256 : vector<16x256xf32> to vector<4x4x256xf32>
    %260 = arith.truncf %259 : vector<4x4x256xf32> to vector<4x4x256xbf16>
    %c1_254 = arith.constant 1 : index
    %c1_255 = arith.constant 1 : index
    %c0_256 = arith.constant 0 : index
    %261 = vector.load %arg15[%c1_254, %c1_255, %c0_256] : memref<6x6x256xbf16, #tpu.memory_space<vmem>>, vector<4x4x256xbf16>
    tpu.vector_store %arg15[%c1_254, %c1_255, %c0_256], %260 {strides = array<i32>} : memref<6x6x256xbf16, #tpu.memory_space<vmem>>, vector<4x4x256xbf16>,
    %c0_257 = arith.constant 0 : index
    %c0_258 = arith.constant 0 : index
    %c0_259 = arith.constant 0 : index
    %262 = vector.load %arg15[%c0_257, %c0_258, %c0_259] : memref<6x6x256xbf16, #tpu.memory_space<vmem>>, vector<3x3x256xbf16>
    %263 = vector.shape_cast %262 : vector<3x3x256xbf16> to vector<9x256xbf16>
    %c0_260 = arith.constant 0 : index
    %c0_261 = arith.constant 0 : index
    %c0_262 = arith.constant 0 : index
    %264 = vector.load %arg5[%c0_260, %c0_261, %c0_262] : memref<16x256x512xbf16, #tpu.memory_space<vmem>>, vector<1x256x512xbf16>
    %265 = vector.shape_cast %264 : vector<1x256x512xbf16> to vector<256x512xbf16>
    %cst_263 = arith.constant dense<0.000000e+00> : vector<9x512xf32>
    %266 = tpu.matmul %263, %265, %cst_263 {dimension_numbers = #tpu.dot_dimension_numbers<[1], [0], [0], [1], [0, 0, 1, 1], [], []>} : vector<9x256xbf16>, vector<256x512xbf16>, vector<9x512xf32> -> vector<9x512xf32>
    %c0_264 = arith.constant 0 : index
    %c1_265 = arith.constant 1 : index
    %c0_266 = arith.constant 0 : index
    %267 = vector.load %arg15[%c0_264, %c1_265, %c0_266] : memref<6x6x256xbf16, #tpu.memory_space<vmem>>, vector<3x3x256xbf16>
    %268 = vector.shape_cast %267 : vector<3x3x256xbf16> to vector<9x256xbf16>
    %c1_267 = arith.constant 1 : index
    %c0_268 = arith.constant 0 : index
    %c0_269 = arith.constant 0 : index
    %269 = vector.load %arg5[%c1_267, %c0_268, %c0_269] : memref<16x256x512xbf16, #tpu.memory_space<vmem>>, vector<1x256x512xbf16>
    %270 = vector.shape_cast %269 : vector<1x256x512xbf16> to vector<256x512xbf16>
    %cst_270 = arith.constant dense<0.000000e+00> : vector<9x512xf32>
    %271 = tpu.matmul %268, %270, %cst_270 {dimension_numbers = #tpu.dot_dimension_numbers<[1], [0], [0], [1], [0, 0, 1, 1], [], []>} : vector<9x256xbf16>, vector<256x512xbf16>, vector<9x512xf32> -> vector<9x512xf32>
    %272 = arith.addf %266, %271 : vector<9x512xf32>
    %c0_271 = arith.constant 0 : index
    %c2_272 = arith.constant 2 : index
    %c0_273 = arith.constant 0 : index
    %273 = vector.load %arg15[%c0_271, %c2_272, %c0_273] : memref<6x6x256xbf16, #tpu.memory_space<vmem>>, vector<3x3x256xbf16>
    %274 = vector.shape_cast %273 : vector<3x3x256xbf16> to vector<9x256xbf16>
    %c2_274 = arith.constant 2 : index
    %c0_275 = arith.constant 0 : index
    %c0_276 = arith.constant 0 : index
    %275 = vector.load %arg5[%c2_274, %c0_275, %c0_276] : memref<16x256x512xbf16, #tpu.memory_space<vmem>>, vector<1x256x512xbf16>
    %276 = vector.shape_cast %275 : vector<1x256x512xbf16> to vector<256x512xbf16>
    %cst_277 = arith.constant dense<0.000000e+00> : vector<9x512xf32>
    %277 = tpu.matmul %274, %276, %cst_277 {dimension_numbers = #tpu.dot_dimension_numbers<[1], [0], [0], [1], [0, 0, 1, 1], [], []>} : vector<9x256xbf16>, vector<256x512xbf16>, vector<9x512xf32> -> vector<9x512xf32>
    %278 = arith.addf %272, %277 : vector<9x512xf32>
    %c0_278 = arith.constant 0 : index
    %c3_279 = arith.constant 3 : index
    %c0_280 = arith.constant 0 : index
    %279 = vector.load %arg15[%c0_278, %c3_279, %c0_280] : memref<6x6x256xbf16, #tpu.memory_space<vmem>>, vector<3x3x256xbf16>
    %280 = vector.shape_cast %279 : vector<3x3x256xbf16> to vector<9x256xbf16>
    %c3_281 = arith.constant 3 : index
    %c0_282 = arith.constant 0 : index
    %c0_283 = arith.constant 0 : index
    %281 = vector.load %arg5[%c3_281, %c0_282, %c0_283] : memref<16x256x512xbf16, #tpu.memory_space<vmem>>, vector<1x256x512xbf16>
    %282 = vector.shape_cast %281 : vector<1x256x512xbf16> to vector<256x512xbf16>
    %cst_284 = arith.constant dense<0.000000e+00> : vector<9x512xf32>
    %283 = tpu.matmul %280, %282, %cst_284 {dimension_numbers = #tpu.dot_dimension_numbers<[1], [0], [0], [1], [0, 0, 1, 1], [], []>} : vector<9x256xbf16>, vector<256x512xbf16>, vector<9x512xf32> -> vector<9x512xf32>
    %284 = arith.addf %278, %283 : vector<9x512xf32>
    %c1_285 = arith.constant 1 : index
    %c0_286 = arith.constant 0 : index
    %c0_287 = arith.constant 0 : index
    %285 = vector.load %arg15[%c1_285, %c0_286, %c0_287] : memref<6x6x256xbf16, #tpu.memory_space<vmem>>, vector<3x3x256xbf16>
    %286 = vector.shape_cast %285 : vector<3x3x256xbf16> to vector<9x256xbf16>
    %c4_288 = arith.constant 4 : index
    %c0_289 = arith.constant 0 : index
    %c0_290 = arith.constant 0 : index
    %287 = vector.load %arg5[%c4_288, %c0_289, %c0_290] : memref<16x256x512xbf16, #tpu.memory_space<vmem>>, vector<1x256x512xbf16>
    %288 = vector.shape_cast %287 : vector<1x256x512xbf16> to vector<256x512xbf16>
    %cst_291 = arith.constant dense<0.000000e+00> : vector<9x512xf32>
    %289 = tpu.matmul %286, %288, %cst_291 {dimension_numbers = #tpu.dot_dimension_numbers<[1], [0], [0], [1], [0, 0, 1, 1], [], []>} : vector<9x256xbf16>, vector<256x512xbf16>, vector<9x512xf32> -> vector<9x512xf32>
    %290 = arith.addf %284, %289 : vector<9x512xf32>
    %c1_292 = arith.constant 1 : index
    %c1_293 = arith.constant 1 : index
    %c0_294 = arith.constant 0 : index
    %291 = vector.load %arg15[%c1_292, %c1_293, %c0_294] : memref<6x6x256xbf16, #tpu.memory_space<vmem>>, vector<3x3x256xbf16>
    %292 = vector.shape_cast %291 : vector<3x3x256xbf16> to vector<9x256xbf16>
    %c5_295 = arith.constant 5 : index
    %c0_296 = arith.constant 0 : index
    %c0_297 = arith.constant 0 : index
    %293 = vector.load %arg5[%c5_295, %c0_296, %c0_297] : memref<16x256x512xbf16, #tpu.memory_space<vmem>>, vector<1x256x512xbf16>
    %294 = vector.shape_cast %293 : vector<1x256x512xbf16> to vector<256x512xbf16>
    %cst_298 = arith.constant dense<0.000000e+00> : vector<9x512xf32>
    %295 = tpu.matmul %292, %294, %cst_298 {dimension_numbers = #tpu.dot_dimension_numbers<[1], [0], [0], [1], [0, 0, 1, 1], [], []>} : vector<9x256xbf16>, vector<256x512xbf16>, vector<9x512xf32> -> vector<9x512xf32>
    %296 = arith.addf %290, %295 : vector<9x512xf32>
    %c1_299 = arith.constant 1 : index
    %c2_300 = arith.constant 2 : index
    %c0_301 = arith.constant 0 : index
    %297 = vector.load %arg15[%c1_299, %c2_300, %c0_301] : memref<6x6x256xbf16, #tpu.memory_space<vmem>>, vector<3x3x256xbf16>
    %298 = vector.shape_cast %297 : vector<3x3x256xbf16> to vector<9x256xbf16>
    %c6_302 = arith.constant 6 : index
    %c0_303 = arith.constant 0 : index
    %c0_304 = arith.constant 0 : index
    %299 = vector.load %arg5[%c6_302, %c0_303, %c0_304] : memref<16x256x512xbf16, #tpu.memory_space<vmem>>, vector<1x256x512xbf16>
    %300 = vector.shape_cast %299 : vector<1x256x512xbf16> to vector<256x512xbf16>
    %cst_305 = arith.constant dense<0.000000e+00> : vector<9x512xf32>
    %301 = tpu.matmul %298, %300, %cst_305 {dimension_numbers = #tpu.dot_dimension_numbers<[1], [0], [0], [1], [0, 0, 1, 1], [], []>} : vector<9x256xbf16>, vector<256x512xbf16>, vector<9x512xf32> -> vector<9x512xf32>
    %302 = arith.addf %296, %301 : vector<9x512xf32>
    %c1_306 = arith.constant 1 : index
    %c3_307 = arith.constant 3 : index
    %c0_308 = arith.constant 0 : index
    %303 = vector.load %arg15[%c1_306, %c3_307, %c0_308] : memref<6x6x256xbf16, #tpu.memory_space<vmem>>, vector<3x3x256xbf16>
    %304 = vector.shape_cast %303 : vector<3x3x256xbf16> to vector<9x256xbf16>
    %c7_309 = arith.constant 7 : index
    %c0_310 = arith.constant 0 : index
    %c0_311 = arith.constant 0 : index
    %305 = vector.load %arg5[%c7_309, %c0_310, %c0_311] : memref<16x256x512xbf16, #tpu.memory_space<vmem>>, vector<1x256x512xbf16>
    %306 = vector.shape_cast %305 : vector<1x256x512xbf16> to vector<256x512xbf16>
    %cst_312 = arith.constant dense<0.000000e+00> : vector<9x512xf32>
    %307 = tpu.matmul %304, %306, %cst_312 {dimension_numbers = #tpu.dot_dimension_numbers<[1], [0], [0], [1], [0, 0, 1, 1], [], []>} : vector<9x256xbf16>, vector<256x512xbf16>, vector<9x512xf32> -> vector<9x512xf32>
    %308 = arith.addf %302, %307 : vector<9x512xf32>
    %c2_313 = arith.constant 2 : index
    %c0_314 = arith.constant 0 : index
    %c0_315 = arith.constant 0 : index
    %309 = vector.load %arg15[%c2_313, %c0_314, %c0_315] : memref<6x6x256xbf16, #tpu.memory_space<vmem>>, vector<3x3x256xbf16>
    %310 = vector.shape_cast %309 : vector<3x3x256xbf16> to vector<9x256xbf16>
    %c8_316 = arith.constant 8 : index
    %c0_317 = arith.constant 0 : index
    %c0_318 = arith.constant 0 : index
    %311 = vector.load %arg5[%c8_316, %c0_317, %c0_318] : memref<16x256x512xbf16, #tpu.memory_space<vmem>>, vector<1x256x512xbf16>
    %312 = vector.shape_cast %311 : vector<1x256x512xbf16> to vector<256x512xbf16>
    %cst_319 = arith.constant dense<0.000000e+00> : vector<9x512xf32>
    %313 = tpu.matmul %310, %312, %cst_319 {dimension_numbers = #tpu.dot_dimension_numbers<[1], [0], [0], [1], [0, 0, 1, 1], [], []>} : vector<9x256xbf16>, vector<256x512xbf16>, vector<9x512xf32> -> vector<9x512xf32>
    %314 = arith.addf %308, %313 : vector<9x512xf32>
    %c2_320 = arith.constant 2 : index
    %c1_321 = arith.constant 1 : index
    %c0_322 = arith.constant 0 : index
    %315 = vector.load %arg15[%c2_320, %c1_321, %c0_322] : memref<6x6x256xbf16, #tpu.memory_space<vmem>>, vector<3x3x256xbf16>
    %316 = vector.shape_cast %315 : vector<3x3x256xbf16> to vector<9x256xbf16>
    %c9_323 = arith.constant 9 : index
    %c0_324 = arith.constant 0 : index
    %c0_325 = arith.constant 0 : index
    %317 = vector.load %arg5[%c9_323, %c0_324, %c0_325] : memref<16x256x512xbf16, #tpu.memory_space<vmem>>, vector<1x256x512xbf16>
    %318 = vector.shape_cast %317 : vector<1x256x512xbf16> to vector<256x512xbf16>
    %cst_326 = arith.constant dense<0.000000e+00> : vector<9x512xf32>
    %319 = tpu.matmul %316, %318, %cst_326 {dimension_numbers = #tpu.dot_dimension_numbers<[1], [0], [0], [1], [0, 0, 1, 1], [], []>} : vector<9x256xbf16>, vector<256x512xbf16>, vector<9x512xf32> -> vector<9x512xf32>
    %320 = arith.addf %314, %319 : vector<9x512xf32>
    %c2_327 = arith.constant 2 : index
    %c2_328 = arith.constant 2 : index
    %c0_329 = arith.constant 0 : index
    %321 = vector.load %arg15[%c2_327, %c2_328, %c0_329] : memref<6x6x256xbf16, #tpu.memory_space<vmem>>, vector<3x3x256xbf16>
    %322 = vector.shape_cast %321 : vector<3x3x256xbf16> to vector<9x256xbf16>
    %c10_330 = arith.constant 10 : index
    %c0_331 = arith.constant 0 : index
    %c0_332 = arith.constant 0 : index
    %323 = vector.load %arg5[%c10_330, %c0_331, %c0_332] : memref<16x256x512xbf16, #tpu.memory_space<vmem>>, vector<1x256x512xbf16>
    %324 = vector.shape_cast %323 : vector<1x256x512xbf16> to vector<256x512xbf16>
    %cst_333 = arith.constant dense<0.000000e+00> : vector<9x512xf32>
    %325 = tpu.matmul %322, %324, %cst_333 {dimension_numbers = #tpu.dot_dimension_numbers<[1], [0], [0], [1], [0, 0, 1, 1], [], []>} : vector<9x256xbf16>, vector<256x512xbf16>, vector<9x512xf32> -> vector<9x512xf32>
    %326 = arith.addf %320, %325 : vector<9x512xf32>
    %c2_334 = arith.constant 2 : index
    %c3_335 = arith.constant 3 : index
    %c0_336 = arith.constant 0 : index
    %327 = vector.load %arg15[%c2_334, %c3_335, %c0_336] : memref<6x6x256xbf16, #tpu.memory_space<vmem>>, vector<3x3x256xbf16>
    %328 = vector.shape_cast %327 : vector<3x3x256xbf16> to vector<9x256xbf16>
    %c11_337 = arith.constant 11 : index
    %c0_338 = arith.constant 0 : index
    %c0_339 = arith.constant 0 : index
    %329 = vector.load %arg5[%c11_337, %c0_338, %c0_339] : memref<16x256x512xbf16, #tpu.memory_space<vmem>>, vector<1x256x512xbf16>
    %330 = vector.shape_cast %329 : vector<1x256x512xbf16> to vector<256x512xbf16>
    %cst_340 = arith.constant dense<0.000000e+00> : vector<9x512xf32>
    %331 = tpu.matmul %328, %330, %cst_340 {dimension_numbers = #tpu.dot_dimension_numbers<[1], [0], [0], [1], [0, 0, 1, 1], [], []>} : vector<9x256xbf16>, vector<256x512xbf16>, vector<9x512xf32> -> vector<9x512xf32>
    %332 = arith.addf %326, %331 : vector<9x512xf32>
    %c3_341 = arith.constant 3 : index
    %c0_342 = arith.constant 0 : index
    %c0_343 = arith.constant 0 : index
    %333 = vector.load %arg15[%c3_341, %c0_342, %c0_343] : memref<6x6x256xbf16, #tpu.memory_space<vmem>>, vector<3x3x256xbf16>
    %334 = vector.shape_cast %333 : vector<3x3x256xbf16> to vector<9x256xbf16>
    %c12_344 = arith.constant 12 : index
    %c0_345 = arith.constant 0 : index
    %c0_346 = arith.constant 0 : index
    %335 = vector.load %arg5[%c12_344, %c0_345, %c0_346] : memref<16x256x512xbf16, #tpu.memory_space<vmem>>, vector<1x256x512xbf16>
    %336 = vector.shape_cast %335 : vector<1x256x512xbf16> to vector<256x512xbf16>
    %cst_347 = arith.constant dense<0.000000e+00> : vector<9x512xf32>
    %337 = tpu.matmul %334, %336, %cst_347 {dimension_numbers = #tpu.dot_dimension_numbers<[1], [0], [0], [1], [0, 0, 1, 1], [], []>} : vector<9x256xbf16>, vector<256x512xbf16>, vector<9x512xf32> -> vector<9x512xf32>
    %338 = arith.addf %332, %337 : vector<9x512xf32>
    %c3_348 = arith.constant 3 : index
    %c1_349 = arith.constant 1 : index
    %c0_350 = arith.constant 0 : index
    %339 = vector.load %arg15[%c3_348, %c1_349, %c0_350] : memref<6x6x256xbf16, #tpu.memory_space<vmem>>, vector<3x3x256xbf16>
    %340 = vector.shape_cast %339 : vector<3x3x256xbf16> to vector<9x256xbf16>
    %c13_351 = arith.constant 13 : index
    %c0_352 = arith.constant 0 : index
    %c0_353 = arith.constant 0 : index
    %341 = vector.load %arg5[%c13_351, %c0_352, %c0_353] : memref<16x256x512xbf16, #tpu.memory_space<vmem>>, vector<1x256x512xbf16>
    %342 = vector.shape_cast %341 : vector<1x256x512xbf16> to vector<256x512xbf16>
    %cst_354 = arith.constant dense<0.000000e+00> : vector<9x512xf32>
    %343 = tpu.matmul %340, %342, %cst_354 {dimension_numbers = #tpu.dot_dimension_numbers<[1], [0], [0], [1], [0, 0, 1, 1], [], []>} : vector<9x256xbf16>, vector<256x512xbf16>, vector<9x512xf32> -> vector<9x512xf32>
    %344 = arith.addf %338, %343 : vector<9x512xf32>
    %c3_355 = arith.constant 3 : index
    %c2_356 = arith.constant 2 : index
    %c0_357 = arith.constant 0 : index
    %345 = vector.load %arg15[%c3_355, %c2_356, %c0_357] : memref<6x6x256xbf16, #tpu.memory_space<vmem>>, vector<3x3x256xbf16>
    %346 = vector.shape_cast %345 : vector<3x3x256xbf16> to vector<9x256xbf16>
    %c14_358 = arith.constant 14 : index
    %c0_359 = arith.constant 0 : index
    %c0_360 = arith.constant 0 : index
    %347 = vector.load %arg5[%c14_358, %c0_359, %c0_360] : memref<16x256x512xbf16, #tpu.memory_space<vmem>>, vector<1x256x512xbf16>
    %348 = vector.shape_cast %347 : vector<1x256x512xbf16> to vector<256x512xbf16>
    %cst_361 = arith.constant dense<0.000000e+00> : vector<9x512xf32>
    %349 = tpu.matmul %346, %348, %cst_361 {dimension_numbers = #tpu.dot_dimension_numbers<[1], [0], [0], [1], [0, 0, 1, 1], [], []>} : vector<9x256xbf16>, vector<256x512xbf16>, vector<9x512xf32> -> vector<9x512xf32>
    %350 = arith.addf %344, %349 : vector<9x512xf32>
    %c3_362 = arith.constant 3 : index
    %c3_363 = arith.constant 3 : index
    %c0_364 = arith.constant 0 : index
    %351 = vector.load %arg15[%c3_362, %c3_363, %c0_364] : memref<6x6x256xbf16, #tpu.memory_space<vmem>>, vector<3x3x256xbf16>
    %352 = vector.shape_cast %351 : vector<3x3x256xbf16> to vector<9x256xbf16>
    %c15_365 = arith.constant 15 : index
    %c0_366 = arith.constant 0 : index
    %c0_367 = arith.constant 0 : index
    %353 = vector.load %arg5[%c15_365, %c0_366, %c0_367] : memref<16x256x512xbf16, #tpu.memory_space<vmem>>, vector<1x256x512xbf16>
    %354 = vector.shape_cast %353 : vector<1x256x512xbf16> to vector<256x512xbf16>
    %cst_368 = arith.constant dense<0.000000e+00> : vector<9x512xf32>
    %355 = tpu.matmul %352, %354, %cst_368 {dimension_numbers = #tpu.dot_dimension_numbers<[1], [0], [0], [1], [0, 0, 1, 1], [], []>} : vector<9x256xbf16>, vector<256x512xbf16>, vector<9x512xf32> -> vector<9x512xf32>
    %356 = arith.addf %350, %355 : vector<9x512xf32>
    %cst_369 = arith.constant 0.000000e+00 : f32
    %357 = vector.broadcast %cst_369 : f32 to vector<9x512xf32>
    %358 = arith.cmpf oge, %356, %357 : vector<9x512xf32>
    %cst_370 = arith.constant 2.000000e-01 : f32
    %359 = vector.broadcast %cst_370 : f32 to vector<9x512xf32>
    %360 = arith.mulf %359, %356 : vector<9x512xf32>
    %361 = arith.select %358, %356, %360 : vector<9x512xi1>, vector<9x512xf32>
    %362 = vector.shape_cast %361 : vector<9x512xf32> to vector<1x3x3x512xf32>
    %c0_371 = arith.constant 0 : index
    %c0_372 = arith.constant 0 : index
    %c0_373 = arith.constant 0 : index
    %c0_374 = arith.constant 0 : index
    %363 = vector.load %arg11[%c0_371, %c0_372, %c0_373, %c0_374] : memref<1x3x3x512xf32, #tpu.memory_space<vmem>>, vector<1x3x3x512xf32>
    tpu.vector_store %arg11[%c0_371, %c0_372, %c0_373, %c0_374], %362 {strides = array<i32>} : memref<1x3x3x512xf32, #tpu.memory_space<vmem>>, vector<1x3x3x512xf32>,
    %364 = vector.shape_cast %361 : vector<9x512xf32> to vector<3x3x512xf32>
    %365 = arith.truncf %364 : vector<3x3x512xf32> to vector<3x3x512xbf16>
    %c1_375 = arith.constant 1 : index
    %c1_376 = arith.constant 1 : index
    %c0_377 = arith.constant 0 : index
    %366 = vector.load %arg16[%c1_375, %c1_376, %c0_377] : memref<5x5x512xbf16, #tpu.memory_space<vmem>>, vector<3x3x512xbf16>
    tpu.vector_store %arg16[%c1_375, %c1_376, %c0_377], %365 {strides = array<i32>} : memref<5x5x512xbf16, #tpu.memory_space<vmem>>, vector<3x3x512xbf16>,
    %cst_378 = arith.constant 0.000000e+00 : f32
    %367 = vector.broadcast %cst_378 : f32 to vector<4x512xf32>
    %c0_379 = arith.constant 0 : index
    %c0_380 = arith.constant 0 : index
    %c0_381 = arith.constant 0 : index
    %368 = vector.load %arg16[%c0_379, %c0_380, %c0_381] : memref<5x5x512xbf16, #tpu.memory_space<vmem>>, vector<2x2x512xbf16>
    %369 = vector.shape_cast %368 : vector<2x2x512xbf16> to vector<4x512xbf16>
    %370 = arith.extf %369 : vector<4x512xbf16> to vector<4x512xf32>
    %c0_382 = arith.constant 0 : index
    %c0_383 = arith.constant 0 : index
    %371 = vector.load %arg6[%c0_382, %c0_383] : memref<16x512xf32, #tpu.memory_space<vmem>>, vector<1x512xf32>
    %372 = vector.broadcast %371 : vector<1x512xf32> to vector<4x512xf32>
    %373 = arith.mulf %370, %372 : vector<4x512xf32>
    %374 = arith.addf %367, %373 : vector<4x512xf32>
    %c0_384 = arith.constant 0 : index
    %c1_385 = arith.constant 1 : index
    %c0_386 = arith.constant 0 : index
    %375 = vector.load %arg16[%c0_384, %c1_385, %c0_386] : memref<5x5x512xbf16, #tpu.memory_space<vmem>>, vector<2x2x512xbf16>
    %376 = vector.shape_cast %375 : vector<2x2x512xbf16> to vector<4x512xbf16>
    %377 = arith.extf %376 : vector<4x512xbf16> to vector<4x512xf32>
    %c1_387 = arith.constant 1 : index
    %c0_388 = arith.constant 0 : index
    %378 = vector.load %arg6[%c1_387, %c0_388] : memref<16x512xf32, #tpu.memory_space<vmem>>, vector<1x512xf32>
    %379 = vector.broadcast %378 : vector<1x512xf32> to vector<4x512xf32>
    %380 = arith.mulf %377, %379 : vector<4x512xf32>
    %381 = arith.addf %374, %380 : vector<4x512xf32>
    %c0_389 = arith.constant 0 : index
    %c2_390 = arith.constant 2 : index
    %c0_391 = arith.constant 0 : index
    %382 = vector.load %arg16[%c0_389, %c2_390, %c0_391] : memref<5x5x512xbf16, #tpu.memory_space<vmem>>, vector<2x2x512xbf16>
    %383 = vector.shape_cast %382 : vector<2x2x512xbf16> to vector<4x512xbf16>
    %384 = arith.extf %383 : vector<4x512xbf16> to vector<4x512xf32>
    %c2_392 = arith.constant 2 : index
    %c0_393 = arith.constant 0 : index
    %385 = vector.load %arg6[%c2_392, %c0_393] : memref<16x512xf32, #tpu.memory_space<vmem>>, vector<1x512xf32>
    %386 = vector.broadcast %385 : vector<1x512xf32> to vector<4x512xf32>
    %387 = arith.mulf %384, %386 : vector<4x512xf32>
    %388 = arith.addf %381, %387 : vector<4x512xf32>
    %c0_394 = arith.constant 0 : index
    %c3_395 = arith.constant 3 : index
    %c0_396 = arith.constant 0 : index
    %389 = vector.load %arg16[%c0_394, %c3_395, %c0_396] : memref<5x5x512xbf16, #tpu.memory_space<vmem>>, vector<2x2x512xbf16>
    %390 = vector.shape_cast %389 : vector<2x2x512xbf16> to vector<4x512xbf16>
    %391 = arith.extf %390 : vector<4x512xbf16> to vector<4x512xf32>
    %c3_397 = arith.constant 3 : index
    %c0_398 = arith.constant 0 : index
    %392 = vector.load %arg6[%c3_397, %c0_398] : memref<16x512xf32, #tpu.memory_space<vmem>>, vector<1x512xf32>
    %393 = vector.broadcast %392 : vector<1x512xf32> to vector<4x512xf32>
    %394 = arith.mulf %391, %393 : vector<4x512xf32>
    %395 = arith.addf %388, %394 : vector<4x512xf32>
    %c1_399 = arith.constant 1 : index
    %c0_400 = arith.constant 0 : index
    %c0_401 = arith.constant 0 : index
    %396 = vector.load %arg16[%c1_399, %c0_400, %c0_401] : memref<5x5x512xbf16, #tpu.memory_space<vmem>>, vector<2x2x512xbf16>
    %397 = vector.shape_cast %396 : vector<2x2x512xbf16> to vector<4x512xbf16>
    %398 = arith.extf %397 : vector<4x512xbf16> to vector<4x512xf32>
    %c4_402 = arith.constant 4 : index
    %c0_403 = arith.constant 0 : index
    %399 = vector.load %arg6[%c4_402, %c0_403] : memref<16x512xf32, #tpu.memory_space<vmem>>, vector<1x512xf32>
    %400 = vector.broadcast %399 : vector<1x512xf32> to vector<4x512xf32>
    %401 = arith.mulf %398, %400 : vector<4x512xf32>
    %402 = arith.addf %395, %401 : vector<4x512xf32>
    %c1_404 = arith.constant 1 : index
    %c1_405 = arith.constant 1 : index
    %c0_406 = arith.constant 0 : index
    %403 = vector.load %arg16[%c1_404, %c1_405, %c0_406] : memref<5x5x512xbf16, #tpu.memory_space<vmem>>, vector<2x2x512xbf16>
    %404 = vector.shape_cast %403 : vector<2x2x512xbf16> to vector<4x512xbf16>
    %405 = arith.extf %404 : vector<4x512xbf16> to vector<4x512xf32>
    %c5_407 = arith.constant 5 : index
    %c0_408 = arith.constant 0 : index
    %406 = vector.load %arg6[%c5_407, %c0_408] : memref<16x512xf32, #tpu.memory_space<vmem>>, vector<1x512xf32>
    %407 = vector.broadcast %406 : vector<1x512xf32> to vector<4x512xf32>
    %408 = arith.mulf %405, %407 : vector<4x512xf32>
    %409 = arith.addf %402, %408 : vector<4x512xf32>
    %c1_409 = arith.constant 1 : index
    %c2_410 = arith.constant 2 : index
    %c0_411 = arith.constant 0 : index
    %410 = vector.load %arg16[%c1_409, %c2_410, %c0_411] : memref<5x5x512xbf16, #tpu.memory_space<vmem>>, vector<2x2x512xbf16>
    %411 = vector.shape_cast %410 : vector<2x2x512xbf16> to vector<4x512xbf16>
    %412 = arith.extf %411 : vector<4x512xbf16> to vector<4x512xf32>
    %c6_412 = arith.constant 6 : index
    %c0_413 = arith.constant 0 : index
    %413 = vector.load %arg6[%c6_412, %c0_413] : memref<16x512xf32, #tpu.memory_space<vmem>>, vector<1x512xf32>
    %414 = vector.broadcast %413 : vector<1x512xf32> to vector<4x512xf32>
    %415 = arith.mulf %412, %414 : vector<4x512xf32>
    %416 = arith.addf %409, %415 : vector<4x512xf32>
    %c1_414 = arith.constant 1 : index
    %c3_415 = arith.constant 3 : index
    %c0_416 = arith.constant 0 : index
    %417 = vector.load %arg16[%c1_414, %c3_415, %c0_416] : memref<5x5x512xbf16, #tpu.memory_space<vmem>>, vector<2x2x512xbf16>
    %418 = vector.shape_cast %417 : vector<2x2x512xbf16> to vector<4x512xbf16>
    %419 = arith.extf %418 : vector<4x512xbf16> to vector<4x512xf32>
    %c7_417 = arith.constant 7 : index
    %c0_418 = arith.constant 0 : index
    %420 = vector.load %arg6[%c7_417, %c0_418] : memref<16x512xf32, #tpu.memory_space<vmem>>, vector<1x512xf32>
    %421 = vector.broadcast %420 : vector<1x512xf32> to vector<4x512xf32>
    %422 = arith.mulf %419, %421 : vector<4x512xf32>
    %423 = arith.addf %416, %422 : vector<4x512xf32>
    %c2_419 = arith.constant 2 : index
    %c0_420 = arith.constant 0 : index
    %c0_421 = arith.constant 0 : index
    %424 = vector.load %arg16[%c2_419, %c0_420, %c0_421] : memref<5x5x512xbf16, #tpu.memory_space<vmem>>, vector<2x2x512xbf16>
    %425 = vector.shape_cast %424 : vector<2x2x512xbf16> to vector<4x512xbf16>
    %426 = arith.extf %425 : vector<4x512xbf16> to vector<4x512xf32>
    %c8_422 = arith.constant 8 : index
    %c0_423 = arith.constant 0 : index
    %427 = vector.load %arg6[%c8_422, %c0_423] : memref<16x512xf32, #tpu.memory_space<vmem>>, vector<1x512xf32>
    %428 = vector.broadcast %427 : vector<1x512xf32> to vector<4x512xf32>
    %429 = arith.mulf %426, %428 : vector<4x512xf32>
    %430 = arith.addf %423, %429 : vector<4x512xf32>
    %c2_424 = arith.constant 2 : index
    %c1_425 = arith.constant 1 : index
    %c0_426 = arith.constant 0 : index
    %431 = vector.load %arg16[%c2_424, %c1_425, %c0_426] : memref<5x5x512xbf16, #tpu.memory_space<vmem>>, vector<2x2x512xbf16>
    %432 = vector.shape_cast %431 : vector<2x2x512xbf16> to vector<4x512xbf16>
    %433 = arith.extf %432 : vector<4x512xbf16> to vector<4x512xf32>
    %c9_427 = arith.constant 9 : index
    %c0_428 = arith.constant 0 : index
    %434 = vector.load %arg6[%c9_427, %c0_428] : memref<16x512xf32, #tpu.memory_space<vmem>>, vector<1x512xf32>
    %435 = vector.broadcast %434 : vector<1x512xf32> to vector<4x512xf32>
    %436 = arith.mulf %433, %435 : vector<4x512xf32>
    %437 = arith.addf %430, %436 : vector<4x512xf32>
    %c2_429 = arith.constant 2 : index
    %c2_430 = arith.constant 2 : index
    %c0_431 = arith.constant 0 : index
    %438 = vector.load %arg16[%c2_429, %c2_430, %c0_431] : memref<5x5x512xbf16, #tpu.memory_space<vmem>>, vector<2x2x512xbf16>
    %439 = vector.shape_cast %438 : vector<2x2x512xbf16> to vector<4x512xbf16>
    %440 = arith.extf %439 : vector<4x512xbf16> to vector<4x512xf32>
    %c10_432 = arith.constant 10 : index
    %c0_433 = arith.constant 0 : index
    %441 = vector.load %arg6[%c10_432, %c0_433] : memref<16x512xf32, #tpu.memory_space<vmem>>, vector<1x512xf32>
    %442 = vector.broadcast %441 : vector<1x512xf32> to vector<4x512xf32>
    %443 = arith.mulf %440, %442 : vector<4x512xf32>
    %444 = arith.addf %437, %443 : vector<4x512xf32>
    %c2_434 = arith.constant 2 : index
    %c3_435 = arith.constant 3 : index
    %c0_436 = arith.constant 0 : index
    %445 = vector.load %arg16[%c2_434, %c3_435, %c0_436] : memref<5x5x512xbf16, #tpu.memory_space<vmem>>, vector<2x2x512xbf16>
    %446 = vector.shape_cast %445 : vector<2x2x512xbf16> to vector<4x512xbf16>
    %447 = arith.extf %446 : vector<4x512xbf16> to vector<4x512xf32>
    %c11_437 = arith.constant 11 : index
    %c0_438 = arith.constant 0 : index
    %448 = vector.load %arg6[%c11_437, %c0_438] : memref<16x512xf32, #tpu.memory_space<vmem>>, vector<1x512xf32>
    %449 = vector.broadcast %448 : vector<1x512xf32> to vector<4x512xf32>
    %450 = arith.mulf %447, %449 : vector<4x512xf32>
    %451 = arith.addf %444, %450 : vector<4x512xf32>
    %c3_439 = arith.constant 3 : index
    %c0_440 = arith.constant 0 : index
    %c0_441 = arith.constant 0 : index
    %452 = vector.load %arg16[%c3_439, %c0_440, %c0_441] : memref<5x5x512xbf16, #tpu.memory_space<vmem>>, vector<2x2x512xbf16>
    %453 = vector.shape_cast %452 : vector<2x2x512xbf16> to vector<4x512xbf16>
    %454 = arith.extf %453 : vector<4x512xbf16> to vector<4x512xf32>
    %c12_442 = arith.constant 12 : index
    %c0_443 = arith.constant 0 : index
    %455 = vector.load %arg6[%c12_442, %c0_443] : memref<16x512xf32, #tpu.memory_space<vmem>>, vector<1x512xf32>
    %456 = vector.broadcast %455 : vector<1x512xf32> to vector<4x512xf32>
    %457 = arith.mulf %454, %456 : vector<4x512xf32>
    %458 = arith.addf %451, %457 : vector<4x512xf32>
    %c3_444 = arith.constant 3 : index
    %c1_445 = arith.constant 1 : index
    %c0_446 = arith.constant 0 : index
    %459 = vector.load %arg16[%c3_444, %c1_445, %c0_446] : memref<5x5x512xbf16, #tpu.memory_space<vmem>>, vector<2x2x512xbf16>
    %460 = vector.shape_cast %459 : vector<2x2x512xbf16> to vector<4x512xbf16>
    %461 = arith.extf %460 : vector<4x512xbf16> to vector<4x512xf32>
    %c13_447 = arith.constant 13 : index
    %c0_448 = arith.constant 0 : index
    %462 = vector.load %arg6[%c13_447, %c0_448] : memref<16x512xf32, #tpu.memory_space<vmem>>, vector<1x512xf32>
    %463 = vector.broadcast %462 : vector<1x512xf32> to vector<4x512xf32>
    %464 = arith.mulf %461, %463 : vector<4x512xf32>
    %465 = arith.addf %458, %464 : vector<4x512xf32>
    %c3_449 = arith.constant 3 : index
    %c2_450 = arith.constant 2 : index
    %c0_451 = arith.constant 0 : index
    %466 = vector.load %arg16[%c3_449, %c2_450, %c0_451] : memref<5x5x512xbf16, #tpu.memory_space<vmem>>, vector<2x2x512xbf16>
    %467 = vector.shape_cast %466 : vector<2x2x512xbf16> to vector<4x512xbf16>
    %468 = arith.extf %467 : vector<4x512xbf16> to vector<4x512xf32>
    %c14_452 = arith.constant 14 : index
    %c0_453 = arith.constant 0 : index
    %469 = vector.load %arg6[%c14_452, %c0_453] : memref<16x512xf32, #tpu.memory_space<vmem>>, vector<1x512xf32>
    %470 = vector.broadcast %469 : vector<1x512xf32> to vector<4x512xf32>
    %471 = arith.mulf %468, %470 : vector<4x512xf32>
    %472 = arith.addf %465, %471 : vector<4x512xf32>
    %c3_454 = arith.constant 3 : index
    %c3_455 = arith.constant 3 : index
    %c0_456 = arith.constant 0 : index
    %473 = vector.load %arg16[%c3_454, %c3_455, %c0_456] : memref<5x5x512xbf16, #tpu.memory_space<vmem>>, vector<2x2x512xbf16>
    %474 = vector.shape_cast %473 : vector<2x2x512xbf16> to vector<4x512xbf16>
    %475 = arith.extf %474 : vector<4x512xbf16> to vector<4x512xf32>
    %c15_457 = arith.constant 15 : index
    %c0_458 = arith.constant 0 : index
    %476 = vector.load %arg6[%c15_457, %c0_458] : memref<16x512xf32, #tpu.memory_space<vmem>>, vector<1x512xf32>
    %477 = vector.broadcast %476 : vector<1x512xf32> to vector<4x512xf32>
    %478 = arith.mulf %475, %477 : vector<4x512xf32>
    %479 = arith.addf %472, %478 : vector<4x512xf32>
    %cst_459 = arith.constant dense<0.000000e+00> : vector<4xf32>
    %480 = vector.multi_reduction <add>, %479, %cst_459 [1] : vector<4x512xf32> to vector<4xf32>
    %481 = vector.shape_cast %480 : vector<4xf32> to vector<4x1xf32>
    %482 = vector.shape_cast %481 : vector<4x1xf32> to vector<1x2x2x1xf32>
    %c0_460 = arith.constant 0 : index
    %c0_461 = arith.constant 0 : index
    %c0_462 = arith.constant 0 : index
    %c0_463 = arith.constant 0 : index
    %483 = vector.load %arg12[%c0_460, %c0_461, %c0_462, %c0_463] : memref<1x2x2x1xf32, #tpu.memory_space<vmem>>, vector<1x2x2x1xf32>
    tpu.vector_store %arg12[%c0_460, %c0_461, %c0_462, %c0_463], %482 {strides = array<i32>} : memref<1x2x2x1xf32, #tpu.memory_space<vmem>>, vector<1x2x2x1xf32>,
    %cst_464 = arith.constant 0.000000e+00 : f32
    %484 = vector.broadcast %cst_464 : f32 to vector<4x1xf32>
    %485 = arith.subf %484, %481 : vector<4x1xf32>
    %486 = math.exp %485 : vector<4x1xf32>
    %cst_465 = arith.constant 1.000000e+00 : f32
    %487 = vector.broadcast %cst_465 : f32 to vector<4x1xf32>
    %488 = arith.addf %487, %486 : vector<4x1xf32>
    %cst_466 = arith.constant 1.000000e+00 : f32
    %489 = vector.broadcast %cst_466 : f32 to vector<4x1xf32>
    %490 = arith.divf %489, %488 : vector<4x1xf32>
    %491 = vector.shape_cast %490 : vector<4x1xf32> to vector<1x2x2x1xf32>
    %c0_467 = arith.constant 0 : index
    %c0_468 = arith.constant 0 : index
    %c0_469 = arith.constant 0 : index
    %c0_470 = arith.constant 0 : index
    %492 = vector.load %arg7[%c0_467, %c0_468, %c0_469, %c0_470] : memref<1x2x2x1xf32, #tpu.memory_space<vmem>>, vector<1x2x2x1xf32>
    tpu.vector_store %arg7[%c0_467, %c0_468, %c0_469, %c0_470], %491 {strides = array<i32>} : memref<1x2x2x1xf32, #tpu.memory_space<vmem>>, vector<1x2x2x1xf32>,
    return
  }
  func.func @transform_0(%arg0: i32) -> (i32, i32, i32, i32) {
    %c0_i32 = arith.constant 0 : i32
    %c0_i32_0 = arith.constant 0 : i32
    %c0_i32_1 = arith.constant 0 : i32
    %c0_i32_2 = arith.constant 0 : i32
    return %arg0, %c0_i32, %c0_i32_0, %c0_i32_1 : i32, i32, i32, i32
  }
  func.func @transform_1(%arg0: i32) -> (i32, i32) {
    %c0_i32 = arith.constant 0 : i32
    %c0_i32_0 = arith.constant 0 : i32
    %c0_i32_1 = arith.constant 0 : i32
    return %c0_i32, %c0_i32_0 : i32, i32
  }
  func.func @transform_2(%arg0: i32) -> (i32, i32, i32) {
    %c0_i32 = arith.constant 0 : i32
    %c0_i32_0 = arith.constant 0 : i32
    %c0_i32_1 = arith.constant 0 : i32
    %c0_i32_2 = arith.constant 0 : i32
    return %c0_i32, %c0_i32_0, %c0_i32_1 : i32, i32, i32
  }
  func.func @transform_3(%arg0: i32) -> (i32, i32, i32) {
    %c0_i32 = arith.constant 0 : i32
    %c0_i32_0 = arith.constant 0 : i32
    %c0_i32_1 = arith.constant 0 : i32
    %c0_i32_2 = arith.constant 0 : i32
    return %c0_i32, %c0_i32_0, %c0_i32_1 : i32, i32, i32
  }
  func.func @transform_4(%arg0: i32) -> (i32, i32, i32) {
    %c0_i32 = arith.constant 0 : i32
    %c0_i32_0 = arith.constant 0 : i32
    %c0_i32_1 = arith.constant 0 : i32
    %c0_i32_2 = arith.constant 0 : i32
    return %c0_i32, %c0_i32_0, %c0_i32_1 : i32, i32, i32
  }
  func.func @transform_5(%arg0: i32) -> (i32, i32) {
    %c0_i32 = arith.constant 0 : i32
    %c0_i32_0 = arith.constant 0 : i32
    %c0_i32_1 = arith.constant 0 : i32
    return %c0_i32, %c0_i32_0 : i32, i32
  }
  func.func @transform_6(%arg0: i32) -> (i32, i32, i32, i32) {
    %c0_i32 = arith.constant 0 : i32
    %c0_i32_0 = arith.constant 0 : i32
    %c0_i32_1 = arith.constant 0 : i32
    %c0_i32_2 = arith.constant 0 : i32
    return %arg0, %c0_i32, %c0_i32_0, %c0_i32_1 : i32, i32, i32, i32
  }
  func.func @transform_7(%arg0: i32) -> (i32, i32, i32, i32) {
    %c0_i32 = arith.constant 0 : i32
    %c0_i32_0 = arith.constant 0 : i32
    %c0_i32_1 = arith.constant 0 : i32
    %c0_i32_2 = arith.constant 0 : i32
    return %arg0, %c0_i32, %c0_i32_0, %c0_i32_1 : i32, i32, i32, i32
  }
  func.func @transform_8(%arg0: i32) -> (i32, i32, i32, i32) {
    %c0_i32 = arith.constant 0 : i32
    %c0_i32_0 = arith.constant 0 : i32
    %c0_i32_1 = arith.constant 0 : i32
    %c0_i32_2 = arith.constant 0 : i32
    return %arg0, %c0_i32, %c0_i32_0, %c0_i32_1 : i32, i32, i32, i32
  }
  func.func @transform_9(%arg0: i32) -> (i32, i32, i32, i32) {
    %c0_i32 = arith.constant 0 : i32
    %c0_i32_0 = arith.constant 0 : i32
    %c0_i32_1 = arith.constant 0 : i32
    %c0_i32_2 = arith.constant 0 : i32
    return %arg0, %c0_i32, %c0_i32_0, %c0_i32_1 : i32, i32, i32, i32
  }
  func.func @transform_10(%arg0: i32) -> (i32, i32, i32, i32) {
    %c0_i32 = arith.constant 0 : i32
    %c0_i32_0 = arith.constant 0 : i32
    %c0_i32_1 = arith.constant 0 : i32
    %c0_i32_2 = arith.constant 0 : i32
    return %arg0, %c0_i32, %c0_i32_0, %c0_i32_1 : i32, i32, i32, i32
  }
  func.func @transform_11(%arg0: i32) -> (i32, i32, i32, i32) {
    %c0_i32 = arith.constant 0 : i32
    %c0_i32_0 = arith.constant 0 : i32
    %c0_i32_1 = arith.constant 0 : i32
    %c0_i32_2 = arith.constant 0 : i32
    return %arg0, %c0_i32, %c0_i32_0, %c0_i32_1 : i32, i32, i32, i32
  }
}

</mosaic_0001>

<bundles_post_ra>
// kernel: discriminator_forward.1
= control target key start
LH: loop header
LB: loop body
LE: loop exit
PB: predicated region body
PF: predicated region fallthrough
CT: control target
= control target key end

     0   :  { %s30583_s0 = inlined_call_operand.vmem [shape: bf16[2,16,16,64], index: 0, kind: input, shape index: {}]   ;;  %s30584_s1 = inlined_call_operand.vmem [shape: bf16[64,64], index: 1, kind: input, shape index: {}]   ;;  %s30585_s2 = inlined_call_operand.vmem [shape: bf16[16,64,128], index: 2, kind: input, shape index: {}]   ;;  %s30586_s3 = inlined_call_operand.vmem [shape: bf16[16,128,256], index: 3, kind: input, shape index: {}]   ;;  %s30587_s4 = inlined_call_operand.vmem [shape: bf16[16,256,512], index: 4, kind: input, shape index: {}]   ;;  %s30588_s5 = inlined_call_operand.vmem [shape: f32[16,512], index: 5, kind: input, shape index: {}]   ;;  %s30589_s6 = inlined_call_operand.vmem [shape: f32[2,2,2,1], index: 6, kind: output, shape index: {0}]   ;;  %s30590_s7 = inlined_call_operand.hbm [shape: f32[2,16,16,64], index: 7, kind: output, shape index: {1}]   ;;  %s30591_s8 = inlined_call_operand.hbm [shape: f32[2,8,8,128], index: 8, kind: output, shape index: {2}]   ;;  %s30592_s9 = inlined_call_operand.hbm [shape: f32[2,4,4,256], index: 9, kind: output, shape index: {3}]   ;;  %s30593_s10 = inlined_call_operand.vmem [shape: f32[2,3,3,512], index: 10, kind: output, shape index: {4}]   ;;  %s30594_s11 = inlined_call_operand.vmem [shape: f32[2,2,2,1], index: 11, kind: output, shape index: {5}]  }
   0x1   :  { %30611 = sst [smem:[#allocation21_spill]] %s30583_s0 }
   0x2   :  { %30612 = sst [smem:[#allocation22_spill]] %s30584_s1 }
   0x3   :  { %30613 = sst [smem:[#allocation23_spill]] %s30585_s2 }
   0x4   :  { %30614 = sst [smem:[#allocation24_spill]] %s30586_s3 }
   0x5   :  { %30615 = sst [smem:[#allocation25_spill]] %s30587_s4 }
   0x6   :  { %30616 = sst [smem:[#allocation26_spill]] %s30588_s5 }
   0x7   :  { %17 = vsyncpa [#allocation7], 0 }
   0x8   :  { %19 = vsyncpa [#allocation7 + $0x1], 0 }
   0x9   :  { %20 = vsyncpa [#allocation9], 0 }
   0xa   :  { %22 = vsyncpa [#allocation9 + $0x1], 0  ;;  %s24717_s17 = smov 0   ;;  %s24719_s18 = smov 0  }
   0xb   :  { %s24721_s19 = smov 0   ;;  %s24723_s20 = smov 0  }
   0xc LB: > { %s24738_s21 = sadd.s32 4294967295, %s24643_s20   ;;  %s30595_s22 = sadd.s32 4294967294, %s24643_s20   ;;  %s24643_s20 = sphi %s24723_s20, %s30694_s20   ;;  %s24639_s19 = sphi %s24721_s19, %s30693_s19   ;;  %s24635_s18 = sphi %s24719_s18, %s30692_s18   ;;  %s24631_s17 = sphi %s24717_s17, %s30691_s17  }
   0xd   : > { %s24742_s23 = sadd.s32 1, %s24643_s20   ;;  %s192_s24 = sadd.s32 1, %s24639_s19 }
   0xe   : > { %s189_s25 = ssub.s32 %s24643_s20, %s24742_s23  ;;  %p202_p0 = scmp.ne.s32.totalorder %s24639_s19, %s24635_s18 }
   0xf   : > { %p190_p1 = scmp.eq.s32.totalorder %s189_s25, 0  ;;  %p203_p2 = scmp.eq.s32.totalorder %s24738_s21, 1 }
  0x10   : > { %p208_p3 = scmp.ne.s32.totalorder %s24635_s18, %s24631_s17  ;;  %p209_p4 = scmp.eq.s32.totalorder %s30595_s22, 1 }
  0x11   : > { %s24755_s26 = scalar_select %p190_p1, %s24639_s19, %s192_s24  }
  0x12   : > { %p24757_p5 = por %p203_p2, %p202_p0  ;;  %p24761_p6 = por %p209_p4, %p208_p3 }
  0x13   : > { %30617 = sst [smem:[#allocation13_spill]] %s24755_s26  ;;  %p18715_p7 = scmp.ge.s32.totalorder %s24643_s20, 1 }
  0x14   : > { %p354_p8 = scmp.lt.s32.totalorder %s24643_s20, 3 }
  0x16   : > { %p355_p9 = pnand %p18715_p7, %p354_p8 }
  0x18   : > { %358 = sbr.rel (%p355_p9) target bundleno = 3153 (0xc51), region = 44 }
  0x1f   : > { %s30620_s1 = sld [smem:[#allocation22_spill]]  ;;  %p419_p10 = scmp.lt.s32.totalorder %s24738_s21, 1  ;;  %vm440_vm0 = vcmask 523264   ;;  %v24645_v3 = vmov 0.0   ;;  %vm443_vm1 = vcmask 517120  }
  0x20   : > { %s30621_s0 = sld [smem:[#allocation21_spill]]  ;;  %448 = vst.msk [vmem:[#allocation2 + $0x30] sm:$0xff] %vm440_vm0, %v24645_v3  ;;  %449 = vst.msk [vmem:[#allocation2 + $0x38] sm:$0xff] %vm440_vm0, %v24645_v3  ;;  %s30622_s2 = sld [smem:[#allocation23_spill]] }
  0x21   : > { %s24777_s14 = scalar_select %p419_p10, %s24738_s21, 1  ;;  %441 = vst.msk [vmem:[#allocation2] sm:$0xff] %vm440_vm0, %v24645_v3  ;;  %442 = vst.msk [vmem:[#allocation2 + $0x8] sm:$0xff] %vm440_vm0, %v24645_v3 }
  0x22   : > { %445 = vst.msk [vmem:[#allocation2 + $0x18] sm:$0xff] %vm440_vm0, %v24645_v3  ;;  %446 = vst.msk [vmem:[#allocation2 + $0x20] sm:$0xff] %vm440_vm0, %v24645_v3  ;;  %s24994_s29 = sand.u32 1, %s24635_s18   ;;  %s30623_s3 = sld [smem:[#allocation24_spill]] }
  0x23   : > { %s21694_s24 = sshll.u32 %s24777_s14, 7  ;;  %451 = vst.msk [vmem:[#allocation2 + $0x48] sm:$0xff] %vm440_vm0, %v24645_v3  ;;  %452 = vst.msk [vmem:[#allocation2 + $0x50] sm:$0xff] %vm440_vm0, %v24645_v3  ;;  %s30624_s4 = sld [smem:[#allocation25_spill]] }
  0x24   : > { %454 = vst.msk [vmem:[#allocation2 + $0x60] sm:$0xff] %vm440_vm0, %v24645_v3  ;;  %455 = vst.msk [vmem:[#allocation2 + $0x68] sm:$0xff] %vm440_vm0, %v24645_v3  ;;  %s30645_s5 = sld [smem:[#allocation26_spill]]  ;;  %s18306_s16 = sand.u32 1, %s24738_s21  }
  0x25   : > { %v22513_v0 = vld [vmem:[%s30620_s1] sm:$0xff]   ;;  %v24774_v1 = vld [vmem:[%s30620_s1 + $0x8] sm:$0xff]   ;;  %v24783_v2 = vld [vmem:[%s30620_s1 + $0x10] sm:$0xff]   ;;  %457 = vst.msk [vmem:[#allocation2 + $0x78] sm:$0xff] %vm440_vm0, %v24645_v3  ;;  %s21708_s26 = sshll.u32 %s24738_s21, 10  ;;  %s30457_s25 = scalar_lea.sflag [#allocation9], %s18306_s16 }
  0x26   : > { %21858 = vmatprep.subr.bf16.mxu0 %v22513_v0  ;;  %s24789_s30 = scalar_lea.vmem %s30621_s0, %s21694_s24  ;;  %458 = vst.msk [vmem:[#allocation2 + $0x80] sm:$0xff] %vm440_vm0, %v24645_v3  ;;  %460 = vst.msk [vmem:[#allocation2 + $0x90] sm:$0xff] %vm440_vm0, %v24645_v3  ;;  %v22516_v5 = vld [vmem:[%s30620_s1 + $0x18] sm:$0xff]   ;;  %v22533_v21 = vld [vmem:[%s30622_s2 + $0x20] sm:$0xff]   ;;  %s18717_s0 = sshll.u32 %s24994_s29, 6 }
  0x27   : > { %21859 = vmatpush3.bf16.msra.mxu0 %v22513_v0  ;;  %461 = vst.msk [vmem:[#allocation2 + $0x98] sm:$0xff] %vm440_vm0, %v24645_v3  ;;  %463 = vst.msk [vmem:[#allocation2 + $0xa8] sm:$0xff] %vm440_vm0, %v24645_v3  ;;  %v22517_v4 = vld [vmem:[%s24789_s30] sm:$0xff]   ;;  %v22518_v6 = vld [vmem:[%s24789_s30 + $0x8] sm:$0xff]   ;;  %s25394_s22 = scalar_lea.vmem [#allocation8], %s18717_s0  ;;  %s30453_s0 = scalar_lea.hbm %s30591_s8, %s21708_s26 }
  0x28   : > { %21860 = vmatprep.subr.bf16.mxu0 %v24774_v1  ;;  %464 = vst.msk [vmem:[#allocation2 + $0xb0] sm:$0xff] %vm440_vm0, %v24645_v3  ;;  %466 = vst.msk [vmem:[#allocation2 + $0xc0] sm:$0xff] %vm440_vm0, %v24645_v3  ;;  %21866 = vmatprep.mubr.msk.bf16.mxu0 %vm440_vm0, %v22517_v4  ;;  %v22519_v7 = vld [vmem:[%s24789_s30 + $0x10] sm:$0xff]   ;;  %v22520_v8 = vld [vmem:[%s24789_s30 + $0x18] sm:$0xff]  }
  0x29   : > { %467 = vst.msk [vmem:[#allocation2 + $0xc8] sm:$0xff] %vm440_vm0, %v24645_v3  ;;  %469 = vst.msk [vmem:[#allocation2 + $0xd8] sm:$0xff] %vm440_vm0, %v24645_v3  ;;  %v22521_v9 = vld [vmem:[%s24789_s30 + $0x20] sm:$0xff]   ;;  %v22522_v10 = vld [vmem:[%s24789_s30 + $0x28] sm:$0xff]  }
  0x2a   : > { %470 = vst.msk [vmem:[#allocation2 + $0xe0] sm:$0xff] %vm440_vm0, %v24645_v3  ;;  %472 = vst.msk [vmem:[#allocation2 + $0xf0] sm:$0xff] %vm440_vm0, %v24645_v3  ;;  %v22523_v11 = vld [vmem:[%s24789_s30 + $0x30] sm:$0xff]   ;;  %v22524_v12 = vld [vmem:[%s24789_s30 + $0x38] sm:$0xff]  }
  0x2b   : > { %473 = vst.msk [vmem:[#allocation2 + $0xf8] sm:$0xff] %vm440_vm0, %v24645_v3  ;;  %475 = vst.msk [vmem:[#allocation2 + $0x108] sm:$0xff] %vm440_vm0, %v24645_v3  ;;  %21861 = vmatpush3.bf16.msra.mxu0 %v24774_v1  ;;  %v22525_v13 = vld [vmem:[%s24789_s30 + $0x40] sm:$0xff]   ;;  %v22526_v14 = vld [vmem:[%s24789_s30 + $0x48] sm:$0xff]  }
  0x2c   : > { %476 = vst.msk [vmem:[#allocation2 + $0x110] sm:$0xff] %vm440_vm0, %v24645_v3  ;;  %478 = vst.msk [vmem:[#allocation2 + $0x120] sm:$0xff] %vm440_vm0, %v24645_v3  ;;  %21862 = vmatprep.subr.bf16.mxu0 %v24783_v2  ;;  %v22527_v15 = vld [vmem:[%s24789_s30 + $0x50] sm:$0xff]   ;;  %v22528_v16 = vld [vmem:[%s24789_s30 + $0x58] sm:$0xff]  }
  0x2d   : > { %479 = vst.msk [vmem:[#allocation2 + $0x128] sm:$0xff] %vm440_vm0, %v24645_v3  ;;  %481 = vst.msk [vmem:[#allocation2 + $0x138] sm:$0xff] %vm440_vm0, %v24645_v3  ;;  %v22529_v17 = vld [vmem:[%s24789_s30 + $0x60] sm:$0xff]   ;;  %v22530_v18 = vld [vmem:[%s24789_s30 + $0x68] sm:$0xff]  }
  0x2e   : > { %482 = vst.msk [vmem:[#allocation2 + $0x140] sm:$0xff] %vm440_vm0, %v24645_v3  ;;  %484 = vst.msk [vmem:[#allocation2 + $0x150] sm:$0xff] %vm440_vm0, %v24645_v3  ;;  %v22531_v19 = vld [vmem:[%s24789_s30 + $0x70] sm:$0xff]   ;;  %v22532_v20 = vld [vmem:[%s24789_s30 + $0x78] sm:$0xff]   ;;  %s18716_s30 = sshll.u32 %s24994_s29, 8 }
  0x2f   : > { %485 = vst.msk [vmem:[#allocation2 + $0x158] sm:$0xff] %vm440_vm0, %v24645_v3  ;;  %487 = vst.msk [vmem:[#allocation2 + $0x168] sm:$0xff] %vm440_vm0, %v24645_v3  ;;  %21863 = vmatpush3.bf16.msra.mxu0 %v24783_v2  ;;  %v22534_v22 = vld [vmem:[%s30622_s2 + $0x40] sm:$0xff]   ;;  %v22535_v23 = vld [vmem:[%s30622_s2 + $0x28] sm:$0xff]   ;;  %s24997_s12 = scalar_lea.vmem [#allocation6], %s18716_s30  ;;  %s18718_s30 = sshll.u32 %s24994_s29, 5 }
  0x30   : > { %488 = vst.msk [vmem:[#allocation2 + $0x170] sm:$0xff] %vm440_vm0, %v24645_v3  ;;  %490 = vst.msk [vmem:[#allocation2 + $0x180] sm:$0xff] %vm440_vm0, %v24645_v3  ;;  %21864 = vmatprep.subr.bf16.mxu0 %v22516_v5  ;;  %21930 = vmatprep.subr.bf16.mxu1 %v22534_v22  ;;  %v22536_v24 = vld [vmem:[%s30622_s2 + $0x48] sm:$0xff]   ;;  %v22537_v25 = vld [vmem:[%s30622_s2 + $0x30] sm:$0xff]   ;;  %s26361_s13 = scalar_lea.vmem [#allocation10], %s18718_s30 }
  0x31   : > { %491 = vst.msk [vmem:[#allocation2 + $0x188] sm:$0xff] %vm440_vm0, %v24645_v3  ;;  %493 = vst.msk [vmem:[#allocation2 + $0x198] sm:$0xff] %vm440_vm0, %v24645_v3  ;;  %21931 = vmatpush3.bf16.msra.mxu1 %v22534_v22  ;;  %v22538_v26 = vld [vmem:[%s30622_s2 + $0x50] sm:$0xff]   ;;  %v22539_v27 = vld [vmem:[%s30622_s2 + $0x38] sm:$0xff]  }
  0x32   : > { %494 = vst.msk [vmem:[#allocation2 + $0x1a0] sm:$0xff] %vm440_vm0, %v24645_v3  ;;  %496 = vst [vmem:[#allocation3] sm:$0xff] %v24645_v3  ;;  %21932 = vmatprep.subr.bf16.mxu1 %v22536_v24  ;;  %v22540_v28 = vld [vmem:[%s30622_s2 + $0x58] sm:$0xff]   ;;  %v24984_v29 = vld [vmem:[%s30622_s2 + $0x60] sm:$0xff]  }
  0x33   : > { %497 = vst [vmem:[#allocation3 + $0x8] sm:$0x3] %v24645_v3  ;;  %498 = vst [vmem:[#allocation3 + $0x10] sm:$0xff] %v24645_v3  ;;  %21865 = vmatpush3.bf16.msra.mxu0 %v22516_v5  ;;  %v24989_v30 = vld [vmem:[%s30622_s2] sm:$0xff]  }
  0x34   : > { %499 = vst [vmem:[#allocation3 + $0x18] sm:$0x3] %v24645_v3  ;;  %500 = vst [vmem:[#allocation3 + $0x20] sm:$0xff] %v24645_v3  ;;  %21898 = vmatprep.subr.bf16.mxu0 %v22533_v21  ;;  %v1101_v46 = vld [vmem:[#allocation2 + $0x1] ss:$2 sm:$0xff] }
  0x35   : > { %501 = vst [vmem:[#allocation3 + $0x28] sm:$0x3] %v24645_v3  ;;  %502 = vst [vmem:[#allocation3 + $0x30] sm:$0xff] %v24645_v3  ;;  %21933 = vmatpush3.bf16.msra.mxu1 %v22536_v24 }
  0x36   : > { %503 = vst [vmem:[#allocation3 + $0x38] sm:$0x3] %v24645_v3  ;;  %504 = vst [vmem:[#allocation3 + $0x40] sm:$0xff] %v24645_v3  ;;  %21867 = vmatmul.mubr.msk.bf16.vlgmr.msra.gmra.mrb[0].mxu0 %vm440_vm0, %v22518_v6  ;;  %21934 = vmatprep.subr.bf16.mxu1 %v22538_v26 }
  0x37   : > { %505 = vst [vmem:[#allocation3 + $0x48] sm:$0x3] %v24645_v3  ;;  %506 = vst [vmem:[#allocation3 + $0x50] sm:$0xff] %v24645_v3  ;;  %21870 = vmatprep.mubr.msk.bf16.mxu0 %vm440_vm0, %v22519_v7  ;;  %21899 = vmatpush3.bf16.msra.mxu0 %v22533_v21 }
  0x38   : > { %507 = vst [vmem:[#allocation3 + $0x58] sm:$0x3] %v24645_v3  ;;  %508 = vst [vmem:[#allocation3 + $0x60] sm:$0xff] %v24645_v3  ;;  %21900 = vmatprep.subr.bf16.mxu0 %v22535_v23 }
  0x39   : > { %509 = vst [vmem:[#allocation3 + $0x68] sm:$0x3] %v24645_v3  ;;  %510 = vst [vmem:[#allocation3 + $0x70] sm:$0xff] %v24645_v3  ;;  %21935 = vmatpush3.bf16.msra.mxu1 %v22538_v26 }
  0x3a   : > { %511 = vst [vmem:[#allocation3 + $0x78] sm:$0x3] %v24645_v3  ;;  %512 = vst [vmem:[#allocation3 + $0x80] sm:$0xff] %v24645_v3  ;;  %21936 = vmatprep.subr.bf16.mxu1 %v22540_v28 }
  0x3b   : > { %513 = vst [vmem:[#allocation3 + $0x88] sm:$0x3] %v24645_v3  ;;  %514 = vst [vmem:[#allocation3 + $0x90] sm:$0xff] %v24645_v3  ;;  %21901 = vmatpush3.bf16.msra.mxu0 %v22535_v23 }
  0x3c   : > { %515 = vst [vmem:[#allocation3 + $0x98] sm:$0x3] %v24645_v3  ;;  %450 = vst.msk [vmem:[#allocation2 + $0x40] sm:$0x3] %vm443_vm1, %v24645_v3  ;;  %21902 = vmatprep.subr.bf16.mxu0 %v22537_v25 }
  0x3d   : > { %444 = vst.msk [vmem:[#allocation2 + $0x10] sm:$0x3] %vm443_vm1, %v24645_v3  ;;  %447 = vst.msk [vmem:[#allocation2 + $0x28] sm:$0x3] %vm443_vm1, %v24645_v3  ;;  %21937 = vmatpush3.bf16.msra.mxu1 %v22540_v28  ;;  %v22544_v28 = vld [vmem:[%s30622_s2 + $0x8] sm:$0xff]  }
  0x3e   : > { %21871 = vmatmul.mubr.msk.bf16.gmra.mrb[4].mxu0 %vm440_vm0, %v22520_v8  ;;  %453 = vst.msk [vmem:[#allocation2 + $0x58] sm:$0x3] %vm443_vm1, %v24645_v3  ;;  %456 = vst.msk [vmem:[#allocation2 + $0x70] sm:$0x3] %vm443_vm1, %v24645_v3  ;;  %21946 = vmatprep.subr.bf16.mxu1 %v24984_v29 }
  0x3f   : > { %21874 = vmatprep.mubr.msk.bf16.mxu0 %vm440_vm0, %v22521_v9  ;;  %459 = vst.msk [vmem:[#allocation2 + $0x88] sm:$0x3] %vm443_vm1, %v24645_v3  ;;  %462 = vst.msk [vmem:[#allocation2 + $0xa0] sm:$0x3] %vm443_vm1, %v24645_v3  ;;  %21903 = vmatpush3.bf16.msra.mxu0 %v22537_v25 }
  0x40   : > { %465 = vst.msk [vmem:[#allocation2 + $0xb8] sm:$0x3] %vm443_vm1, %v24645_v3  ;;  %468 = vst.msk [vmem:[#allocation2 + $0xd0] sm:$0x3] %vm443_vm1, %v24645_v3  ;;  %21904 = vmatprep.subr.bf16.mxu0 %v22539_v27 }
  0x41   : > { %471 = vst.msk [vmem:[#allocation2 + $0xe8] sm:$0x3] %vm443_vm1, %v24645_v3  ;;  %474 = vst.msk [vmem:[#allocation2 + $0x100] sm:$0x3] %vm443_vm1, %v24645_v3 }
  0x42   : > { %477 = vst.msk [vmem:[#allocation2 + $0x118] sm:$0x3] %vm443_vm1, %v24645_v3  ;;  %480 = vst.msk [vmem:[#allocation2 + $0x130] sm:$0x3] %vm443_vm1, %v24645_v3 }
  0x43   : > { %483 = vst.msk [vmem:[#allocation2 + $0x148] sm:$0x3] %vm443_vm1, %v24645_v3  ;;  %486 = vst.msk [vmem:[#allocation2 + $0x160] sm:$0x3] %vm443_vm1, %v24645_v3  ;;  %21905 = vmatpush3.bf16.msra.mxu0 %v22539_v27  ;;  %v22543_v27 = vld [vmem:[%s30622_s2 + $0x68] sm:$0xff]  }
  0x44   : > { %489 = vst.msk [vmem:[#allocation2 + $0x178] sm:$0x3] %vm443_vm1, %v24645_v3  ;;  %492 = vst.msk [vmem:[#allocation2 + $0x190] sm:$0x3] %vm443_vm1, %v24645_v3  ;;  %21914 = vmatprep.subr.bf16.mxu0 %v24989_v30  ;;  %v1332_v47 = vld [vmem:[#allocation2 + $0x2] ss:$2 sm:$0xff] }
  0x45   : > { %495 = vst.msk [vmem:[#allocation2 + $0x1a8] sm:$0x3] %vm443_vm1, %v24645_v3 }
  0x46   : > { %21875 = vmatmul.mubr.msk.bf16.gmra.mrb[8].mxu0 %vm440_vm0, %v22522_v10 }
  0x47   : > { %21878 = vmatprep.mubr.msk.bf16.mxu0 %vm440_vm0, %v22523_v11 }
  0x4e   : > { %21879 = vmatmul.mubr.msk.bf16.gmra.mrb[12].mxu0 %vm440_vm0, %v22524_v12 }
  0x4f   : > { %21882 = vmatprep.mubr.msk.bf16.mxu0 %vm440_vm0, %v22525_v13 }
  0x56   : > { %21883 = vmatmul.mubr.msk.bf16.gmra.mrb[16].mxu0 %vm440_vm0, %v22526_v14 }
  0x57   : > { %21886 = vmatprep.mubr.msk.bf16.mxu0 %vm440_vm0, %v22527_v15 }
  0x5e   : > { %21887 = vmatmul.mubr.msk.bf16.gmra.mrb[20].mxu0 %vm440_vm0, %v22528_v16 }
  0x5f   : > { %21890 = vmatprep.mubr.msk.bf16.mxu0 %vm440_vm0, %v22529_v17 }
  0x66   : > { %21891 = vmatmul.mubr.msk.bf16.gmra.mrb[24].mxu0 %vm440_vm0, %v22530_v18 }
  0x67   : > { %21894 = vmatprep.mubr.msk.bf16.mxu0 %vm440_vm0, %v22531_v19 }
  0x6e   : > { %21895 = vmatmul.mubr.msk.bf16.gmra.mrb[28].mxu0 %vm440_vm0, %v22532_v20 }
 0x109   : > { %v21868_v31 = vpop.f32.mrb[0].mxu0 }
 0x10a   : > { %vm914_vm2 = vcmp.ge.f32.partialorder %v21868_v31, 0.0  ;;  %v946_v32 = vmul.f32 0.2, %v21868_v31  ;;  %v785_v33 = vpop.f32.mrb[1].mxu0 }
 0x10b   : > { %vm912_vm3 = vcmp.ge.f32.partialorder %v785_v33, 0.0  ;;  %v944_v34 = vmul.f32 0.2, %v785_v33  ;;  %v21869_v35 = vpop.f32.mrb[2].mxu0 }
 0x10c   : > { %v978_v36 = vsel %vm914_vm2, %v21868_v31, %v946_v32  ;;  %vm915_vm4 = vcmp.ge.f32.partialorder %v21869_v35, 0.0  ;;  %v947_v37 = vmul.f32 0.2, %v21869_v35  ;;  %v788_v38 = vpop.f32.mrb[3].mxu0 }
 0x10d   : > { %1010 = vst.msk [vmem:[%s24997_s12 + $0x10] sm:$0xff] %vm440_vm0, %v978_v36  ;;  %1043 = vst.msk [vmem:[#allocation2 + $0x31] sm:$0xff] %vm440_vm0, %v978_v36  ;;  %v976_v39 = vsel %vm912_vm3, %v785_v33, %v944_v34  ;;  %vm913_vm5 = vcmp.ge.f32.partialorder %v788_v38, 0.0  ;;  %v945_v40 = vmul.f32 0.2, %v788_v38  ;;  %v22545_v36 = vld [vmem:[%s30622_s2 + $0x70] sm:$0xff]  }
 0x10e   : > { %1008 = vst.msk [vmem:[%s24997_s12] sm:$0xff] %vm440_vm0, %v976_v39  ;;  %1041 = vst.msk [vmem:[#allocation2 + $0x19] sm:$0xff] %vm440_vm0, %v976_v39  ;;  %v979_v41 = vsel %vm915_vm4, %v21869_v35, %v947_v37  ;;  %v22546_v37 = vld [vmem:[%s30622_s2 + $0x10] sm:$0xff]  }
 0x10f   : > { %1011 = vst.msk [vmem:[%s24997_s12 + $0x18] sm:$0xff] %vm440_vm0, %v979_v41  ;;  %1044 = vst.msk [vmem:[#allocation2 + $0x39] sm:$0xff] %vm440_vm0, %v979_v41  ;;  %v977_v42 = vsel %vm913_vm5, %v788_v38, %v945_v40 }
 0x110   : > { %1009 = vst.msk [vmem:[%s24997_s12 + $0x8] sm:$0xff] %vm440_vm0, %v977_v42  ;;  %1042 = vst.msk [vmem:[#allocation2 + $0x21] sm:$0xff] %vm440_vm0, %v977_v42 }
 0x111   : > { %v21872_v43 = vpop.f32.mrb[4].mxu0 }
 0x112   : > { %vm918_vm6 = vcmp.ge.f32.partialorder %v21872_v43, 0.0  ;;  %v950_v44 = vmul.f32 0.2, %v21872_v43  ;;  %v801_v45 = vpop.f32.mrb[5].mxu0 }
 0x113   : > { %vm916_vm7 = vcmp.ge.f32.partialorder %v801_v45, 0.0  ;;  %v948_v48 = vmul.f32 0.2, %v801_v45  ;;  %v21873_v49 = vpop.f32.mrb[6].mxu0 }
 0x114   : > { %v982_v50 = vsel %vm918_vm6, %v21872_v43, %v950_v44  ;;  %vm919_vm8 = vcmp.ge.f32.partialorder %v21873_v49, 0.0  ;;  %v951_v51 = vmul.f32 0.2, %v21873_v49  ;;  %v804_v52 = vpop.f32.mrb[7].mxu0  ;;  %v22547_v43 = vld [vmem:[%s30622_s2 + $0x78] sm:$0xff]  }
 0x115   : > { %1014 = vst.msk [vmem:[%s24997_s12 + $0x30] sm:$0xff] %vm440_vm0, %v982_v50  ;;  %1047 = vst.msk [vmem:[#allocation2 + $0x61] sm:$0xff] %vm440_vm0, %v982_v50  ;;  %v980_v53 = vsel %vm916_vm7, %v801_v45, %v948_v48  ;;  %vm917_vm9 = vcmp.ge.f32.partialorder %v804_v52, 0.0  ;;  %v949_v54 = vmul.f32 0.2, %v804_v52  ;;  %v22548_v44 = vld [vmem:[%s30622_s2 + $0x18] sm:$0xff]  }
 0x116   : > { %1012 = vst.msk [vmem:[%s24997_s12 + $0x20] sm:$0xff] %vm440_vm0, %v980_v53  ;;  %1045 = vst.msk [vmem:[#allocation2 + $0x49] sm:$0xff] %vm440_vm0, %v980_v53  ;;  %v983_v55 = vsel %vm919_vm8, %v21873_v49, %v951_v51  ;;  %v1103_v56 = vld [vmem:[#allocation2 + $0x31] ss:$2 sm:$0xff]  ;;  %v1334_v57 = vld [vmem:[#allocation2 + $0x32] ss:$2 sm:$0xff] }
 0x117   : > { %1015 = vst.msk [vmem:[%s24997_s12 + $0x38] sm:$0xff] %vm440_vm0, %v983_v55  ;;  %1048 = vst.msk [vmem:[#allocation2 + $0x69] sm:$0xff] %vm440_vm0, %v983_v55  ;;  %v981_v58 = vsel %vm917_vm9, %v804_v52, %v949_v54  ;;  %v1116_v59 = vpack.c.bf16 %v1103_v56, %v1101_v46  ;;  %v1347_v60 = vpack.c.bf16 %v1334_v57, %v1332_v47  ;;  %v25086_v50 = vld [vmem:[%s30622_s2 + $0x80] sm:$0xff]  }
 0x118   : > { %1013 = vst.msk [vmem:[%s24997_s12 + $0x28] sm:$0xff] %vm440_vm0, %v981_v58  ;;  %1046 = vst.msk [vmem:[#allocation2 + $0x51] sm:$0xff] %vm440_vm0, %v981_v58 }
 0x119   : > { %v21876_v61 = vpop.f32.mrb[8].mxu0  ;;  %21906 = vmatprep.mubr.msk.bf16.mxu0 %vm440_vm0, %v1116_v59  ;;  %21938 = vmatprep.mubr.msk.bf16.mxu1 %vm440_vm0, %v1347_v60 }
 0x11a   : > { %vm922_vm10 = vcmp.ge.f32.partialorder %v21876_v61, 0.0  ;;  %v954_v62 = vmul.f32 0.2, %v21876_v61  ;;  %v817_v63 = vpop.f32.mrb[9].mxu0 }
 0x11b   : > { %vm920_vm11 = vcmp.ge.f32.partialorder %v817_v63, 0.0  ;;  %v952_v0 = vmul.f32 0.2, %v817_v63  ;;  %v21877_v1 = vpop.f32.mrb[10].mxu0 }
 0x11c   : > { %v986_v2 = vsel %vm922_vm10, %v21876_v61, %v954_v62  ;;  %vm923_vm12 = vcmp.ge.f32.partialorder %v21877_v1, 0.0  ;;  %v955_v3 = vmul.f32 0.2, %v21877_v1  ;;  %v820_v4 = vpop.f32.mrb[11].mxu0 }
 0x11d   : > { %1018 = vst.msk [vmem:[%s24997_s12 + $0x50] sm:$0xff] %vm440_vm0, %v986_v2  ;;  %1051 = vst.msk [vmem:[#allocation2 + $0x91] sm:$0xff] %vm440_vm0, %v986_v2  ;;  %v984_v5 = vsel %vm920_vm11, %v817_v63, %v952_v0  ;;  %vm921_vm13 = vcmp.ge.f32.partialorder %v820_v4, 0.0  ;;  %v953_v6 = vmul.f32 0.2, %v820_v4 }
 0x11e   : > { %1016 = vst.msk [vmem:[%s24997_s12 + $0x40] sm:$0xff] %vm440_vm0, %v984_v5  ;;  %1049 = vst.msk [vmem:[#allocation2 + $0x79] sm:$0xff] %vm440_vm0, %v984_v5  ;;  %v987_v7 = vsel %vm923_vm12, %v21877_v1, %v955_v3  ;;  %v1105_v19 = vld [vmem:[#allocation2 + $0x61] ss:$2 sm:$0xff]  ;;  %v1336_v22 = vld [vmem:[#allocation2 + $0x62] ss:$2 sm:$0xff] }
 0x11f   : > { %1019 = vst.msk [vmem:[%s24997_s12 + $0x58] sm:$0xff] %vm440_vm0, %v987_v7  ;;  %1052 = vst.msk [vmem:[#allocation2 + $0x99] sm:$0xff] %vm440_vm0, %v987_v7  ;;  %v985_v8 = vsel %vm921_vm13, %v820_v4, %v953_v6 }
 0x120   : > { %1017 = vst.msk [vmem:[%s24997_s12 + $0x48] sm:$0xff] %vm440_vm0, %v985_v8  ;;  %1050 = vst.msk [vmem:[#allocation2 + $0x81] sm:$0xff] %vm440_vm0, %v985_v8 }
 0x121   : > { %v21880_v9 = vpop.f32.mrb[12].mxu0 }
 0x122   : > { %vm926_vm14 = vcmp.ge.f32.partialorder %v21880_v9, 0.0  ;;  %v958_v10 = vmul.f32 0.2, %v21880_v9  ;;  %v833_v11 = vpop.f32.mrb[13].mxu0 }
 0x123   : > { %vm924_vm15 = vcmp.ge.f32.partialorder %v833_v11, 0.0  ;;  %v956_v12 = vmul.f32 0.2, %v833_v11  ;;  %v21881_v13 = vpop.f32.mrb[14].mxu0 }
 0x124   : > { %v990_v14 = vsel %vm926_vm14, %v21880_v9, %v958_v10  ;;  %vm927_vm1 = vcmp.ge.f32.partialorder %v21881_v13, 0.0  ;;  %v959_v15 = vmul.f32 0.2, %v21881_v13  ;;  %v836_v16 = vpop.f32.mrb[15].mxu0 }
 0x125   : > { %1022 = vst.msk [vmem:[%s24997_s12 + $0x70] sm:$0xff] %vm440_vm0, %v990_v14  ;;  %1055 = vst.msk [vmem:[#allocation2 + $0xc1] sm:$0xff] %vm440_vm0, %v990_v14  ;;  %v988_v17 = vsel %vm924_vm15, %v833_v11, %v956_v12  ;;  %vm925_vm2 = vcmp.ge.f32.partialorder %v836_v16, 0.0  ;;  %v957_v18 = vmul.f32 0.2, %v836_v16 }
 0x126   : > { %1020 = vst.msk [vmem:[%s24997_s12 + $0x60] sm:$0xff] %vm440_vm0, %v988_v17  ;;  %1053 = vst.msk [vmem:[#allocation2 + $0xa9] sm:$0xff] %vm440_vm0, %v988_v17  ;;  %v991_v20 = vsel %vm927_vm1, %v21881_v13, %v959_v15  ;;  %v1107_v21 = vld [vmem:[#allocation2 + $0x91] ss:$2 sm:$0xff]  ;;  %v1338_v23 = vld [vmem:[#allocation2 + $0x92] ss:$2 sm:$0xff] }
 0x127   : > { %1023 = vst.msk [vmem:[%s24997_s12 + $0x78] sm:$0xff] %vm440_vm0, %v991_v20  ;;  %1056 = vst.msk [vmem:[#allocation2 + $0xc9] sm:$0xff] %vm440_vm0, %v991_v20  ;;  %v989_v24 = vsel %vm925_vm2, %v836_v16, %v957_v18  ;;  %v1117_v25 = vpack.c.bf16 %v1107_v21, %v1105_v19  ;;  %v1348_v26 = vpack.c.bf16 %v1338_v23, %v1336_v22  ;;  %v1073_v17 = vld [vmem:[#allocation2] ss:$2 sm:$0xff]  ;;  %v1075_v18 = vld [vmem:[#allocation2 + $0x30] ss:$2 sm:$0xff] }
 0x128   : > { %1021 = vst.msk [vmem:[%s24997_s12 + $0x68] sm:$0xff] %vm440_vm0, %v989_v24  ;;  %1054 = vst.msk [vmem:[#allocation2 + $0xb1] sm:$0xff] %vm440_vm0, %v989_v24  ;;  %v1470_v19 = vld [vmem:[#allocation2 + $0x3] ss:$2 sm:$0xff]  ;;  %v1472_v23 = vld [vmem:[#allocation2 + $0x33] ss:$2 sm:$0xff] }
 0x129   : > { %v21884_v31 = vpop.f32.mrb[16].mxu0  ;;  %21907 = vmatmul.mubr.msk.bf16.vlgmr.msra.gmra.mrb[32].mxu0 %vm440_vm0, %v1117_v25  ;;  %21939 = vmatmul.mubr.msk.bf16.vlgmr.msra.gmra.mrb[0].mxu1 %vm440_vm0, %v1348_v26 }
 0x12a   : > { %vm930_vm3 = vcmp.ge.f32.partialorder %v21884_v31, 0.0  ;;  %v962_v32 = vmul.f32 0.2, %v21884_v31  ;;  %v849_v33 = vpop.f32.mrb[17].mxu0  ;;  %21947 = vmatpush3.bf16.msra.mxu1 %v24984_v29  ;;  %21915 = vmatpush3.bf16.msra.mxu0 %v24989_v30 }
 0x12b   : > { %vm928_vm4 = vcmp.ge.f32.partialorder %v849_v33, 0.0  ;;  %v960_v34 = vmul.f32 0.2, %v849_v33  ;;  %v21885_v35 = vpop.f32.mrb[18].mxu0  ;;  %21948 = vmatprep.subr.bf16.mxu1 %v22543_v27  ;;  %21916 = vmatprep.subr.bf16.mxu0 %v22544_v28 }
 0x12c   : > { %v994_v38 = vsel %vm930_vm3, %v21884_v31, %v962_v32  ;;  %vm931_vm5 = vcmp.ge.f32.partialorder %v21885_v35, 0.0  ;;  %v963_v29 = vmul.f32 0.2, %v21885_v35  ;;  %v852_v39 = vpop.f32.mrb[19].mxu0 }
 0x12d   : > { %1026 = vst.msk [vmem:[%s24997_s12 + $0x90] sm:$0xff] %vm440_vm0, %v994_v38  ;;  %1059 = vst.msk [vmem:[#allocation2 + $0xf1] sm:$0xff] %vm440_vm0, %v994_v38  ;;  %v992_v30 = vsel %vm928_vm4, %v849_v33, %v960_v34  ;;  %vm929_vm6 = vcmp.ge.f32.partialorder %v852_v39, 0.0  ;;  %v961_v40 = vmul.f32 0.2, %v852_v39 }
 0x12e   : > { %1024 = vst.msk [vmem:[%s24997_s12 + $0x80] sm:$0xff] %vm440_vm0, %v992_v30  ;;  %1057 = vst.msk [vmem:[#allocation2 + $0xd9] sm:$0xff] %vm440_vm0, %v992_v30  ;;  %v995_v41 = vsel %vm931_vm5, %v21885_v35, %v963_v29  ;;  %21949 = vmatpush3.bf16.msra.mxu1 %v22543_v27  ;;  %21917 = vmatpush3.bf16.msra.mxu0 %v22544_v28  ;;  %v1109_v56 = vld [vmem:[#allocation2 + $0xc1] ss:$2 sm:$0xff]  ;;  %v1340_v59 = vld [vmem:[#allocation2 + $0xc2] ss:$2 sm:$0xff] }
 0x12f   : > { %1027 = vst.msk [vmem:[%s24997_s12 + $0x98] sm:$0xff] %vm440_vm0, %v995_v41  ;;  %1060 = vst.msk [vmem:[#allocation2 + $0xf9] sm:$0xff] %vm440_vm0, %v995_v41  ;;  %v993_v42 = vsel %vm929_vm6, %v852_v39, %v961_v40  ;;  %21950 = vmatprep.subr.bf16.mxu1 %v22545_v36  ;;  %21918 = vmatprep.subr.bf16.mxu0 %v22546_v37  ;;  %v1079_v38 = vld [vmem:[#allocation2 + $0x90] ss:$2 sm:$0xff]  ;;  %v1476_v29 = vld [vmem:[#allocation2 + $0x93] ss:$2 sm:$0xff] }
 0x130   : > { %1025 = vst.msk [vmem:[%s24997_s12 + $0x88] sm:$0xff] %vm440_vm0, %v993_v42  ;;  %1058 = vst.msk [vmem:[#allocation2 + $0xe1] sm:$0xff] %vm440_vm0, %v993_v42  ;;  %v1077_v30 = vld [vmem:[#allocation2 + $0x60] ss:$2 sm:$0xff]  ;;  %v1474_v40 = vld [vmem:[#allocation2 + $0x63] ss:$2 sm:$0xff] }
 0x131   : > { %v21888_v45 = vpop.f32.mrb[20].mxu0  ;;  %v1089_v42 = vpack.c.bf16 %v1079_v38, %v1077_v30  ;;  %v22563_v38 = vld [vmem:[%s30622_s2 + $0xf0] sm:$0xff]   ;;  %v2021_v30 = vld [vmem:[#allocation2 + $0x1b] ss:$2 sm:$0xff] }
 0x132   : > { %vm934_vm7 = vcmp.ge.f32.partialorder %v21888_v45, 0.0  ;;  %v966_v46 = vmul.f32 0.2, %v21888_v45  ;;  %v865_v47 = vpop.f32.mrb[21].mxu0  ;;  %21951 = vmatpush3.bf16.msra.mxu1 %v22545_v36  ;;  %21919 = vmatpush3.bf16.msra.mxu0 %v22546_v37  ;;  %v1088_v36 = vpack.c.bf16 %v1075_v18, %v1073_v17  ;;  %v1485_v37 = vpack.c.bf16 %v1472_v23, %v1470_v19  ;;  %v1883_v23 = vld [vmem:[#allocation2 + $0x1a] ss:$2 sm:$0xff] }
 0x133   : > { %vm932_vm8 = vcmp.ge.f32.partialorder %v865_v47, 0.0  ;;  %v964_v48 = vmul.f32 0.2, %v865_v47  ;;  %v21889_v49 = vpop.f32.mrb[22].mxu0  ;;  %21952 = vmatprep.subr.bf16.mxu1 %v22547_v43  ;;  %21920 = vmatprep.subr.bf16.mxu0 %v22548_v44 }
 0x134   : > { %v998_v51 = vsel %vm934_vm7, %v21888_v45, %v966_v46  ;;  %vm935_vm9 = vcmp.ge.f32.partialorder %v21889_v49, 0.0  ;;  %v967_v52 = vmul.f32 0.2, %v21889_v49  ;;  %v868_v53 = vpop.f32.mrb[23].mxu0  ;;  %v22550_v45 = vld [vmem:[%s30622_s2 + $0x88] sm:$0xff]  }
 0x135   : > { %1030 = vst.msk [vmem:[%s24997_s12 + $0xb0] sm:$0xff] %vm440_vm0, %v998_v51  ;;  %1063 = vst.msk [vmem:[#allocation2 + $0x121] sm:$0xff] %vm440_vm0, %v998_v51  ;;  %v996_v54 = vsel %vm932_vm8, %v865_v47, %v964_v48  ;;  %vm933_vm10 = vcmp.ge.f32.partialorder %v868_v53, 0.0  ;;  %v965_v55 = vmul.f32 0.2, %v868_v53 }
 0x136   : > { %1028 = vst.msk [vmem:[%s24997_s12 + $0xa0] sm:$0xff] %vm440_vm0, %v996_v54  ;;  %1061 = vst.msk [vmem:[#allocation2 + $0x109] sm:$0xff] %vm440_vm0, %v996_v54  ;;  %v999_v57 = vsel %vm935_vm9, %v21889_v49, %v967_v52  ;;  %v1111_v58 = vld [vmem:[#allocation2 + $0xf1] ss:$2 sm:$0xff]  ;;  %v1342_v60 = vld [vmem:[#allocation2 + $0xf2] ss:$2 sm:$0xff]  ;;  %21953 = vmatpush3.bf16.msra.mxu1 %v22547_v43  ;;  %21921 = vmatpush3.bf16.msra.mxu0 %v22548_v44  ;;  %v1486_v43 = vpack.c.bf16 %v1476_v29, %v1474_v40 }
 0x137   : > { %1031 = vst.msk [vmem:[%s24997_s12 + $0xb8] sm:$0xff] %vm440_vm0, %v999_v57  ;;  %1064 = vst.msk [vmem:[#allocation2 + $0x129] sm:$0xff] %vm440_vm0, %v999_v57  ;;  %v997_v61 = vsel %vm933_vm10, %v868_v53, %v965_v55  ;;  %v1118_v62 = vpack.c.bf16 %v1111_v58, %v1109_v56  ;;  %v1349_v63 = vpack.c.bf16 %v1342_v60, %v1340_v59  ;;  %21962 = vmatprep.subr.bf16.mxu1 %v25086_v50  ;;  %v1083_v39 = vld [vmem:[#allocation2 + $0xf0] ss:$2 sm:$0xff]  ;;  %v1480_v41 = vld [vmem:[#allocation2 + $0xf3] ss:$2 sm:$0xff] }
 0x138   : > { %1029 = vst.msk [vmem:[%s24997_s12 + $0xa8] sm:$0xff] %vm440_vm0, %v997_v61  ;;  %1062 = vst.msk [vmem:[#allocation2 + $0x111] sm:$0xff] %vm440_vm0, %v997_v61  ;;  %v1081_v44 = vld [vmem:[#allocation2 + $0xc0] ss:$2 sm:$0xff]  ;;  %v1478_v47 = vld [vmem:[#allocation2 + $0xc3] ss:$2 sm:$0xff] }
 0x139   : > { %v21892_v0 = vpop.f32.mrb[24].mxu0  ;;  %21910 = vmatprep.mubr.msk.bf16.mxu0 %vm440_vm0, %v1118_v62  ;;  %21942 = vmatprep.mubr.msk.bf16.mxu1 %vm440_vm0, %v1349_v63  ;;  %v1090_v46 = vpack.c.bf16 %v1083_v39, %v1081_v44  ;;  %v1487_v48 = vpack.c.bf16 %v1480_v41, %v1478_v47  ;;  %v22551_v49 = vld [vmem:[%s30622_s2 + $0x90] sm:$0xff]   ;;  %v1607_v55 = vld [vmem:[#allocation2 + $0x18] ss:$2 sm:$0xff]  ;;  %v1753_v17 = vld [vmem:[#allocation2 + $0xd9] ss:$2 sm:$0xff] }
 0x13a   : > { %vm938_vm11 = vcmp.ge.f32.partialorder %v21892_v0, 0.0  ;;  %v970_v1 = vmul.f32 0.2, %v21892_v0  ;;  %v881_v2 = vpop.f32.mrb[25].mxu0  ;;  %v1609_v53 = vld [vmem:[#allocation2 + $0x48] ss:$2 sm:$0xff] }
 0x13b   : > { %vm936_vm12 = vcmp.ge.f32.partialorder %v881_v2, 0.0  ;;  %v968_v3 = vmul.f32 0.2, %v881_v2  ;;  %v21893_v4 = vpop.f32.mrb[26].mxu0  ;;  %v22552_v56 = vld [vmem:[%s30622_s2 + $0x98] sm:$0xff]   ;;  %v1622_v59 = vpack.c.bf16 %v1609_v53, %v1607_v55  ;;  %v22553_v60 = vld [vmem:[%s30622_s2 + $0xa0] sm:$0xff]  }
 0x13c   : > { %v1002_v5 = vsel %vm938_vm11, %v21892_v0, %v970_v1  ;;  %vm939_vm13 = vcmp.ge.f32.partialorder %v21893_v4, 0.0  ;;  %v971_v6 = vmul.f32 0.2, %v21893_v4  ;;  %v884_v7 = vpop.f32.mrb[27].mxu0  ;;  %v1613_v61 = vld [vmem:[#allocation2 + $0xa8] ss:$2 sm:$0xff] }
 0x13d   : > { %1034 = vst.msk [vmem:[%s24997_s12 + $0xd0] sm:$0xff] %vm440_vm0, %v1002_v5  ;;  %1067 = vst.msk [vmem:[#allocation2 + $0x151] sm:$0xff] %vm440_vm0, %v1002_v5  ;;  %v1000_v8 = vsel %vm936_vm12, %v881_v2, %v968_v3  ;;  %vm937_vm14 = vcmp.ge.f32.partialorder %v884_v7, 0.0  ;;  %v969_v9 = vmul.f32 0.2, %v884_v7  ;;  %v22554_v0 = vld [vmem:[%s30622_s2 + $0xa8] sm:$0xff]  }
 0x13e   : > { %1032 = vst.msk [vmem:[%s24997_s12 + $0xc0] sm:$0xff] %vm440_vm0, %v1000_v8  ;;  %1065 = vst.msk [vmem:[#allocation2 + $0x139] sm:$0xff] %vm440_vm0, %v1000_v8  ;;  %v1003_v10 = vsel %vm939_vm13, %v21893_v4, %v971_v6  ;;  %v1113_v26 = vld [vmem:[#allocation2 + $0x121] ss:$2 sm:$0xff]  ;;  %v1344_v31 = vld [vmem:[#allocation2 + $0x122] ss:$2 sm:$0xff] }
 0x13f   : > { %1035 = vst.msk [vmem:[%s24997_s12 + $0xd8] sm:$0xff] %vm440_vm0, %v1003_v10  ;;  %1068 = vst.msk [vmem:[#allocation2 + $0x159] sm:$0xff] %vm440_vm0, %v1003_v10  ;;  %v1001_v11 = vsel %vm937_vm14, %v884_v7, %v969_v9  ;;  %v1085_v54 = vld [vmem:[#allocation2 + $0x120] ss:$2 sm:$0xff]  ;;  %v22555_v4 = vld [vmem:[%s30622_s2 + $0xb0] sm:$0xff]   ;;  %vm522_vm11 = vcmask 1042432  }
 0x140   : > { %1033 = vst.msk [vmem:[%s24997_s12 + $0xc8] sm:$0xff] %vm440_vm0, %v1001_v11  ;;  %1066 = vst.msk [vmem:[#allocation2 + $0x141] sm:$0xff] %vm440_vm0, %v1001_v11  ;;  %v1617_v62 = vld [vmem:[#allocation2 + $0x108] ss:$2 sm:$0xff]  ;;  %v1611_v63 = vld [vmem:[#allocation2 + $0x78] ss:$2 sm:$0xff] }
 0x141   : > { %v21896_v12 = vpop.f32.mrb[28].mxu0  ;;  %v1615_v1 = vld [vmem:[#allocation2 + $0xd8] ss:$2 sm:$0xff]  ;;  %v1623_v2 = vpack.c.bf16 %v1613_v61, %v1611_v63  ;;  %v1747_v6 = vld [vmem:[#allocation2 + $0x49] ss:$2 sm:$0xff] }
 0x142   : > { %vm942_vm15 = vcmp.ge.f32.partialorder %v21896_v12, 0.0  ;;  %v974_v13 = vmul.f32 0.2, %v21896_v12  ;;  %v897_v14 = vpop.f32.mrb[29].mxu0  ;;  %v1624_v3 = vpack.c.bf16 %v1617_v62, %v1615_v1  ;;  %v1745_v7 = vld [vmem:[#allocation2 + $0x19] ss:$2 sm:$0xff] }
 0x143   : > { %vm940_vm1 = vcmp.ge.f32.partialorder %v897_v14, 0.0  ;;  %v972_v15 = vmul.f32 0.2, %v897_v14  ;;  %v21897_v16 = vpop.f32.mrb[30].mxu0  ;;  %v22556_v8 = vld [vmem:[%s30622_s2 + $0xb8] sm:$0xff]   ;;  %v1760_v11 = vpack.c.bf16 %v1747_v6, %v1745_v7  ;;  %v22565_v44 = vld [vmem:[%s30622_s2 + $0x100] sm:$0xff]  }
 0x144   : > { %v1006_v20 = vsel %vm942_vm15, %v21896_v12, %v974_v13  ;;  %vm943_vm2 = vcmp.ge.f32.partialorder %v21897_v16, 0.0  ;;  %v975_v21 = vmul.f32 0.2, %v21897_v16  ;;  %v900_v22 = vpop.f32.mrb[31].mxu0  ;;  %v22557_v12 = vld [vmem:[%s30622_s2 + $0xc0] sm:$0xff]   ;;  %v22564_v40 = vld [vmem:[%s30622_s2 + $0xf8] sm:$0xff]  }
 0x145   : > { %1038 = vst.msk [vmem:[%s24997_s12 + $0xf0] sm:$0xff] %vm440_vm0, %v1006_v20  ;;  %1071 = vst.msk [vmem:[#allocation2 + $0x181] sm:$0xff] %vm440_vm0, %v1006_v20  ;;  %v1004_v24 = vsel %vm940_vm1, %v897_v14, %v972_v15  ;;  %vm941_vm3 = vcmp.ge.f32.partialorder %v900_v22, 0.0  ;;  %v973_v25 = vmul.f32 0.2, %v900_v22  ;;  %v22559_v20 = vld [vmem:[%s30622_s2 + $0xd0] sm:$0xff]  }
 0x146   : > { %1036 = vst.msk [vmem:[%s24997_s12 + $0xe0] sm:$0xff] %vm440_vm0, %v1004_v24  ;;  %1069 = vst.msk [vmem:[#allocation2 + $0x169] sm:$0xff] %vm440_vm0, %v1004_v24  ;;  %v1007_v27 = vsel %vm943_vm2, %v21897_v16, %v975_v21  ;;  %v1115_v28 = vld [vmem:[#allocation2 + $0x151] ss:$2 sm:$0xff]  ;;  %v1346_v32 = vld [vmem:[#allocation2 + $0x152] ss:$2 sm:$0xff] }
 0x147   : > { %1039 = vst.msk [vmem:[%s24997_s12 + $0xf8] sm:$0xff] %vm440_vm0, %v1007_v27  ;;  %1072 = vst.msk [vmem:[#allocation2 + $0x189] sm:$0xff] %vm440_vm0, %v1007_v27  ;;  %v1005_v33 = vsel %vm941_vm3, %v900_v22, %v973_v25  ;;  %v1119_v34 = vpack.c.bf16 %v1115_v28, %v1113_v26  ;;  %v1350_v35 = vpack.c.bf16 %v1346_v32, %v1344_v31  ;;  %v1087_v51 = vld [vmem:[#allocation2 + $0x150] ss:$2 sm:$0xff]  ;;  %v1484_v52 = vld [vmem:[#allocation2 + $0x153] ss:$2 sm:$0xff] }
 0x148   : > { %1037 = vst.msk [vmem:[%s24997_s12 + $0xe8] sm:$0xff] %vm440_vm0, %v1005_v33  ;;  %1070 = vst.msk [vmem:[#allocation2 + $0x171] sm:$0xff] %vm440_vm0, %v1005_v33  ;;  %v1091_v57 = vpack.c.bf16 %v1087_v51, %v1085_v54  ;;  %v1619_v9 = vld [vmem:[#allocation2 + $0x138] ss:$2 sm:$0xff]  ;;  %v1751_v13 = vld [vmem:[#allocation2 + $0xa9] ss:$2 sm:$0xff] }
 0x149   : > { %21911 = vmatmul.mubr.msk.bf16.gmra.mrb[36].mxu0 %vm440_vm0, %v1119_v34  ;;  %21943 = vmatmul.mubr.msk.bf16.gmra.mrb[4].mxu1 %vm440_vm0, %v1350_v35  ;;  %v1755_v14 = vld [vmem:[#allocation2 + $0x109] ss:$2 sm:$0xff]  ;;  %v1749_v15 = vld [vmem:[#allocation2 + $0x79] ss:$2 sm:$0xff]  ;;  %v1885_v22 = vld [vmem:[#allocation2 + $0x4a] ss:$2 sm:$0xff] }
 0x14a   : > { %21922 = vmatprep.mubr.msk.bf16.mxu0 %vm440_vm0, %v1088_v36  ;;  %21954 = vmatprep.mubr.msk.bf16.mxu1 %vm440_vm0, %v1485_v37  ;;  %v22558_v16 = vld [vmem:[%s30622_s2 + $0xc8] sm:$0xff]   ;;  %v1761_v18 = vpack.c.bf16 %v1751_v13, %v1749_v15  ;;  %v1762_v19 = vpack.c.bf16 %v1755_v14, %v1753_v17  ;;  %v22560_v24 = vld [vmem:[%s30622_s2 + $0xd8] sm:$0xff]   ;;  %v1898_v27 = vpack.c.bf16 %v1885_v22, %v1883_v23  ;;  %v22561_v28 = vld [vmem:[%s30622_s2 + $0xe0] sm:$0xff]   ;;  %vm523_vm12 = vsmask.f32 2304 }
 0x14b   : > { %v1757_v25 = vld [vmem:[#allocation2 + $0x139] ss:$2 sm:$0xff]  ;;  %v1889_v31 = vld [vmem:[#allocation2 + $0xaa] ss:$2 sm:$0xff]  ;;  %v1887_v33 = vld [vmem:[#allocation2 + $0x7a] ss:$2 sm:$0xff] }
 0x14c   : > { %v1893_v32 = vld [vmem:[#allocation2 + $0x10a] ss:$2 sm:$0xff]  ;;  %v1891_v35 = vld [vmem:[#allocation2 + $0xda] ss:$2 sm:$0xff]  ;;  %v1899_v36 = vpack.c.bf16 %v1889_v31, %v1887_v33  ;;  %v2023_v39 = vld [vmem:[#allocation2 + $0x4b] ss:$2 sm:$0xff] }
 0x14d   : > { %v22562_v34 = vld [vmem:[%s30622_s2 + $0xe8] sm:$0xff]   ;;  %v1900_v37 = vpack.c.bf16 %v1893_v32, %v1891_v35  ;;  %v22567_v53 = vld [vmem:[%s30622_s2 + $0x110] sm:$0xff]   ;;  %v22577_v32 = vld [vmem:[%s30622_s2 + $0x160] sm:$0xff]   ;;  %vm526_vm13 = vsmask.f32 6400  ;;  %vm525_vm15 = vcmask 1046532  }
 0x14e   : > { %v1895_v41 = vld [vmem:[#allocation2 + $0x13a] ss:$2 sm:$0xff]  ;;  %v2025_v47 = vld [vmem:[#allocation2 + $0x7b] ss:$2 sm:$0xff]  ;;  %v22575_v22 = vld [vmem:[%s30622_s2 + $0x150] sm:$0xff]  }
 0x14f   : > { %v1621_v5 = vld [vmem:[#allocation2 + $0x168] ss:$2 sm:$0xff]  ;;  %v1759_v21 = vld [vmem:[#allocation2 + $0x169] ss:$2 sm:$0xff]  ;;  %vm524_vm14 = vmand %vm522_vm11, %vm523_vm12  ;;  %vm5965_vm3 = vsmask.f32 2306 }
 0x150   : > { %v1625_v10 = vpack.c.bf16 %v1621_v5, %v1619_v9  ;;  %v1763_v26 = vpack.c.bf16 %v1759_v21, %v1757_v25  ;;  %v1897_v29 = vld [vmem:[#allocation2 + $0x16a] ss:$2 sm:$0xff]  ;;  %v2035_v54 = vld [vmem:[#allocation2 + $0x16b] ss:$2 sm:$0xff]  ;;  %vm527_vm1 = vmand %vm525_vm15, %vm526_vm13 }
 0x151   : > { %21923 = vmatmul.mubr.msk.bf16.vlgmr.msra.gmra.mrb[32].mxu0 %vm440_vm0, %v1089_v42  ;;  %21955 = vmatmul.mubr.msk.bf16.vlgmr.msra.gmra.mrb[0].mxu1 %vm440_vm0, %v1486_v43  ;;  %v1901_v42 = vpack.c.bf16 %v1897_v29, %v1895_v41  ;;  %v2036_v43 = vpack.c.bf16 %v2023_v39, %v2021_v30  ;;  %v2161_v55 = vld [vmem:[#allocation2 + $0x60] ss:$2 sm:$0xff]  ;;  %v2163_v63 = vld [vmem:[#allocation2 + $0x90] ss:$2 sm:$0xff]  ;;  %v2299_v6 = vld [vmem:[#allocation2 + $0x61] ss:$2 sm:$0xff] }
 0x152   : > { %21963 = vmatpush3.bf16.msra.mxu1 %v25086_v50  ;;  %21926 = vmatprep.mubr.msk.bf16.mxu0 %vm440_vm0, %v1090_v46  ;;  %v1482_v50 = vld [vmem:[#allocation2 + $0x123] ss:$2 sm:$0xff]  ;;  %v2165_v61 = vld [vmem:[#allocation2 + $0xc0] ss:$2 sm:$0xff]  ;;  %v2171_v7 = vld [vmem:[#allocation2 + $0x150] ss:$2 sm:$0xff] }
 0x153   : > { %21958 = vmatprep.mubr.msk.bf16.mxu1 %vm440_vm0, %v1487_v48  ;;  %21964 = vmatprep.subr.bf16.mxu1 %v22550_v45  ;;  %v1488_v58 = vpack.c.bf16 %v1484_v52, %v1482_v50  ;;  %v2031_v46 = vld [vmem:[#allocation2 + $0x10b] ss:$2 sm:$0xff]  ;;  %v2029_v48 = vld [vmem:[#allocation2 + $0xdb] ss:$2 sm:$0xff]  ;;  %v2159_v50 = vld [vmem:[#allocation2 + $0x30] ss:$2 sm:$0xff] }
 0x154   : > { %v2038_v52 = vpack.c.bf16 %v2031_v46, %v2029_v48  ;;  %v2169_v62 = vld [vmem:[#allocation2 + $0x120] ss:$2 sm:$0xff]  ;;  %v22572_v9 = vld [vmem:[%s30622_s2 + $0x138] sm:$0xff]   ;;  %v2303_v13 = vld [vmem:[#allocation2 + $0xc1] ss:$2 sm:$0xff] }
 0x155   : > { %v22570_v1 = vld [vmem:[%s30622_s2 + $0x128] sm:$0xff]   ;;  %v2301_v15 = vld [vmem:[#allocation2 + $0x91] ss:$2 sm:$0xff]  ;;  %v2439_v35 = vld [vmem:[#allocation2 + $0x92] ss:$2 sm:$0xff] }
 0x156   : > { %21965 = vmatpush3.bf16.msra.mxu1 %v22550_v45  ;;  %v2027_v45 = vld [vmem:[#allocation2 + $0xab] ss:$2 sm:$0xff]  ;;  %v2173_v5 = vld [vmem:[#allocation2 + $0x180] ss:$2 sm:$0xff]  ;;  %vm26220_vm2 = vmor %vm527_vm1, %vm524_vm14  ;;  %vm16504_vm1 = vsmask.f32 1284 }
 0x157   : > { %21966 = vmatprep.subr.bf16.mxu1 %v22551_v49  ;;  %v2037_v51 = vpack.c.bf16 %v2027_v45, %v2025_v47  ;;  %v2307_v14 = vld [vmem:[#allocation2 + $0x121] ss:$2 sm:$0xff]  ;;  %v2309_v25 = vld [vmem:[#allocation2 + $0x151] ss:$2 sm:$0xff]  ;;  %v2441_v33 = vld [vmem:[#allocation2 + $0xc2] ss:$2 sm:$0xff] }
 0x158   : > { %v22574_v17 = vld [vmem:[%s30622_s2 + $0x148] sm:$0xff]   ;;  %v22579_v39 = vld [vmem:[%s30622_s2 + $0x170] sm:$0xff]   ;;  %v22581_v46 = vld [vmem:[%s30622_s2 + $0x180] sm:$0xff]  }
 0x159   : > { %21927 = vmatmul.mubr.msk.bf16.gmra.mrb[36].mxu0 %vm440_vm0, %v1091_v57  ;;  %21959 = vmatmul.mubr.msk.bf16.gmra.mrb[4].mxu1 %vm440_vm0, %v1488_v58  ;;  %v22568_v57 = vld [vmem:[%s30622_s2 + $0x118] sm:$0xff]   ;;  %v2311_v23 = vld [vmem:[#allocation2 + $0x181] ss:$2 sm:$0xff]  ;;  %v2449_v30 = vld [vmem:[#allocation2 + $0x182] ss:$2 sm:$0xff] }
 0x15a   : > { %21967 = vmatpush3.bf16.msra.mxu1 %v22551_v49  ;;  %21970 = vmatprep.mubr.msk.bf16.mxu1 %vm440_vm0, %v1622_v59  ;;  %v22566_v49 = vld [vmem:[%s30622_s2 + $0x108] sm:$0xff]   ;;  %v2174_v59 = vpack.c.bf16 %v2161_v55, %v2159_v50  ;;  %v2447_v41 = vld [vmem:[#allocation2 + $0x152] ss:$2 sm:$0xff] }
 0x15b   : > { %21968 = vmatprep.subr.bf16.mxu1 %v22552_v56  ;;  %v2579_v47 = vld [vmem:[#allocation2 + $0xc3] ss:$2 sm:$0xff]  ;;  %v2713_v50 = vld [vmem:[#allocation2 + $0x78] ss:$2 sm:$0xff] }
 0x15c   : > { %v2583_v48 = vld [vmem:[#allocation2 + $0x123] ss:$2 sm:$0xff] }
 0x15d   : > { %v22583_v55 = vld [vmem:[%s30622_s2 + $0x190] sm:$0xff]  }
 0x15e   : > { %21969 = vmatpush3.bf16.msra.mxu1 %v22552_v56  ;;  %v2033_v56 = vld [vmem:[#allocation2 + $0x13b] ss:$2 sm:$0xff] }
 0x15f   : > { %21978 = vmatprep.subr.bf16.mxu1 %v22553_v60  ;;  %v2039_v58 = vpack.c.bf16 %v2035_v54, %v2033_v56  ;;  %v2587_v56 = vld [vmem:[#allocation2 + $0x183] ss:$2 sm:$0xff] }
 0x161   : > { %21971 = vmatmul.mubr.msk.bf16.vlgmr.msra.gmra.mrb[0].mxu1 %vm440_vm0, %v1623_v2  ;;  %v2175_v2 = vpack.c.bf16 %v2165_v61, %v2163_v63  ;;  %v2717_v63 = vld [vmem:[#allocation2 + $0xd8] ss:$2 sm:$0xff] }
 0x162   : > { %21979 = vmatpush3.bf16.msra.mxu1 %v22553_v60  ;;  %21974 = vmatprep.mubr.msk.bf16.mxu1 %vm440_vm0, %v1624_v3  ;;  %v22569_v60 = vld [vmem:[%s30622_s2 + $0x120] sm:$0xff]  }
 0x163   : > { %21980 = vmatprep.subr.bf16.mxu1 %v22554_v0 }
 0x166   : > { %21981 = vmatpush3.bf16.msra.mxu1 %v22554_v0  ;;  %v2167_v0 = vld [vmem:[#allocation2 + $0xf0] ss:$2 sm:$0xff] }
 0x167   : > { %21982 = vmatprep.subr.bf16.mxu1 %v22555_v4  ;;  %v2176_v3 = vpack.c.bf16 %v2169_v62, %v2167_v0  ;;  %v22585_v62 = vld [vmem:[%s30622_s2 + $0x1a0] sm:$0xff]  }
 0x168   : > { %v2721_v0 = vld [vmem:[#allocation2 + $0x138] ss:$2 sm:$0xff] }
 0x169   : > { %21975 = vmatmul.mubr.msk.bf16.gmra.mrb[4].mxu1 %vm440_vm0, %v1625_v10  ;;  %v2177_v10 = vpack.c.bf16 %v2173_v5, %v2171_v7  ;;  %v2723_v7 = vld [vmem:[#allocation2 + $0x168] ss:$2 sm:$0xff] }
 0x16a   : > { %21983 = vmatpush3.bf16.msra.mxu1 %v22555_v4  ;;  %21986 = vmatprep.mubr.msk.bf16.mxu1 %vm440_vm0, %v1760_v11  ;;  %v22571_v4 = vld [vmem:[%s30622_s2 + $0x130] sm:$0xff]  }
 0x16b   : > { %21984 = vmatprep.subr.bf16.mxu1 %v22556_v8 }
 0x16e   : > { %21985 = vmatpush3.bf16.msra.mxu1 %v22556_v8  ;;  %v2297_v8 = vld [vmem:[#allocation2 + $0x31] ss:$2 sm:$0xff] }
 0x16f   : > { %21994 = vmatprep.subr.bf16.mxu1 %v22557_v12  ;;  %v2312_v11 = vpack.c.bf16 %v2299_v6, %v2297_v8  ;;  %v22587_v6 = vld [vmem:[%s30622_s2 + $0x1b0] sm:$0xff]   ;;  %v2725_v8 = vld [vmem:[#allocation2 + $0x198] ss:$2 sm:$0xff] }
 0x171   : > { %21987 = vmatmul.mubr.msk.bf16.vlgmr.msra.gmra.mrb[0].mxu1 %vm440_vm0, %v1761_v18  ;;  %v2313_v18 = vpack.c.bf16 %v2303_v13, %v2301_v15  ;;  %v2855_v15 = vld [vmem:[#allocation2 + $0xd9] ss:$2 sm:$0xff] }
 0x172   : > { %21995 = vmatpush3.bf16.msra.mxu1 %v22557_v12  ;;  %21990 = vmatprep.mubr.msk.bf16.mxu1 %vm440_vm0, %v1762_v19  ;;  %v22573_v12 = vld [vmem:[%s30622_s2 + $0x140] sm:$0xff]  }
 0x173   : > { %21996 = vmatprep.subr.bf16.mxu1 %v22558_v16  ;;  %v22597_v19 = vld [vmem:[%s30623_s3 + $0x80] ss:$8 sps:$4 sm:$0xff]  }
 0x176   : > { %21997 = vmatpush3.bf16.msra.mxu1 %v22558_v16  ;;  %v2305_v16 = vld [vmem:[#allocation2 + $0xf1] ss:$2 sm:$0xff] }
 0x177   : > { %21998 = vmatprep.subr.bf16.mxu1 %v22559_v20  ;;  %v2314_v21 = vpack.c.bf16 %v2307_v14, %v2305_v16  ;;  %v22589_v14 = vld [vmem:[%s30622_s2 + $0x1c0] sm:$0xff]  }
 0x178   : > { %v2859_v16 = vld [vmem:[#allocation2 + $0x139] ss:$2 sm:$0xff] }
 0x179   : > { %21991 = vmatmul.mubr.msk.bf16.gmra.mrb[4].mxu1 %vm440_vm0, %v1763_v26  ;;  %v2435_v26 = vld [vmem:[#allocation2 + $0x32] ss:$2 sm:$0xff] }
 0x17a   : > { %21999 = vmatpush3.bf16.msra.mxu1 %v22559_v20  ;;  %22002 = vmatprep.mubr.msk.bf16.mxu1 %vm440_vm0, %v1898_v27  ;;  %v22599_v20 = vld [vmem:[%s30623_s3 + $0x84] ss:$8 sps:$4 sm:$0xff]   ;;  %v22576_v27 = vld [vmem:[%s30622_s2 + $0x158] sm:$0xff]  }
 0x17b   : > { %22000 = vmatprep.subr.bf16.mxu1 %v22560_v24  ;;  %3449 = vmatprep.subr.bf16.mxu0 %v22599_v20 }
 0x17c   : > { %3450 = vmatpush1.bf16.msra.mxu0 %v22597_v19  ;;  %v22590_v19 = vld [vmem:[%s30622_s2 + $0x1c8] sm:$0xff]  }
 0x17e   : > { %22001 = vmatpush3.bf16.msra.mxu1 %v22560_v24  ;;  %v2437_v24 = vld [vmem:[#allocation2 + $0x62] ss:$2 sm:$0xff] }
 0x17f   : > { %22010 = vmatprep.subr.bf16.mxu1 %v22561_v28  ;;  %v2450_v31 = vpack.c.bf16 %v2437_v24, %v2435_v26  ;;  %v2863_v24 = vld [vmem:[#allocation2 + $0x199] ss:$2 sm:$0xff]  ;;  %v2987_v26 = vld [vmem:[#allocation2 + $0x4a] ss:$2 sm:$0xff] }
 0x181   : > { %22003 = vmatmul.mubr.msk.bf16.vlgmr.msra.gmra.mrb[0].mxu1 %vm440_vm0, %v1899_v36  ;;  %v2443_v36 = vld [vmem:[#allocation2 + $0xf2] ss:$2 sm:$0xff] }
 0x182   : > { %22011 = vmatpush3.bf16.msra.mxu1 %v22561_v28  ;;  %22006 = vmatprep.mubr.msk.bf16.mxu1 %vm440_vm0, %v1900_v37  ;;  %v2315_v28 = vpack.c.bf16 %v2311_v23, %v2309_v25  ;;  %v22578_v37 = vld [vmem:[%s30622_s2 + $0x168] sm:$0xff]  }
 0x183   : > { %22012 = vmatprep.subr.bf16.mxu1 %v22562_v34  ;;  %v2861_v23 = vld [vmem:[#allocation2 + $0x169] ss:$2 sm:$0xff]  ;;  %v2989_v25 = vld [vmem:[#allocation2 + $0x7a] ss:$2 sm:$0xff] }
 0x186   : > { %22013 = vmatpush3.bf16.msra.mxu1 %v22562_v34  ;;  %v2445_v34 = vld [vmem:[#allocation2 + $0x122] ss:$2 sm:$0xff] }
 0x187   : > { %22014 = vmatprep.subr.bf16.mxu1 %v22563_v38  ;;  %v2452_v29 = vpack.c.bf16 %v2445_v34, %v2443_v36  ;;  %v2997_v34 = vld [vmem:[#allocation2 + $0x13a] ss:$2 sm:$0xff]  ;;  %v2995_v36 = vld [vmem:[#allocation2 + $0x10a] ss:$2 sm:$0xff] }
 0x189   : > { %22007 = vmatmul.mubr.msk.bf16.gmra.mrb[4].mxu1 %vm440_vm0, %v1901_v42  ;;  %v2573_v42 = vld [vmem:[#allocation2 + $0x33] ss:$2 sm:$0xff] }
 0x18a   : > { %22015 = vmatpush3.bf16.msra.mxu1 %v22563_v38  ;;  %22018 = vmatprep.mubr.msk.bf16.mxu1 %vm440_vm0, %v2036_v43  ;;  %v2451_v38 = vpack.c.bf16 %v2441_v33, %v2439_v35  ;;  %v22580_v43 = vld [vmem:[%s30622_s2 + $0x178] sm:$0xff]  }
 0x18b   : > { %22016 = vmatprep.subr.bf16.mxu1 %v22564_v40  ;;  %v2993_v33 = vld [vmem:[#allocation2 + $0xda] ss:$2 sm:$0xff]  ;;  %v2991_v35 = vld [vmem:[#allocation2 + $0xaa] ss:$2 sm:$0xff] }
 0x18e   : > { %22017 = vmatpush3.bf16.msra.mxu1 %v22564_v40  ;;  %v2575_v40 = vld [vmem:[#allocation2 + $0x63] ss:$2 sm:$0xff] }
 0x18f   : > { %22026 = vmatprep.subr.bf16.mxu1 %v22565_v44  ;;  %v2588_v45 = vpack.c.bf16 %v2575_v40, %v2573_v42  ;;  %v3001_v40 = vld [vmem:[#allocation2 + $0x19a] ss:$2 sm:$0xff]  ;;  %v3125_v42 = vld [vmem:[#allocation2 + $0x4b] ss:$2 sm:$0xff] }
 0x191   : > { %22019 = vmatmul.mubr.msk.bf16.vlgmr.msra.gmra.mrb[0].mxu1 %vm440_vm0, %v2037_v51  ;;  %v2581_v51 = vld [vmem:[#allocation2 + $0xf3] ss:$2 sm:$0xff] }
 0x192   : > { %22027 = vmatpush3.bf16.msra.mxu1 %v22565_v44  ;;  %22022 = vmatprep.mubr.msk.bf16.mxu1 %vm440_vm0, %v2038_v52  ;;  %v2453_v44 = vpack.c.bf16 %v2449_v30, %v2447_v41  ;;  %v22582_v52 = vld [vmem:[%s30622_s2 + $0x188] sm:$0xff]   ;;  %v2590_v54 = vpack.c.bf16 %v2583_v48, %v2581_v51 }
 0x193   : > { %22028 = vmatprep.subr.bf16.mxu1 %v22566_v49  ;;  %v2999_v30 = vld [vmem:[#allocation2 + $0x16a] ss:$2 sm:$0xff]  ;;  %v3127_v41 = vld [vmem:[#allocation2 + $0x7b] ss:$2 sm:$0xff]  ;;  %v3129_v48 = vld [vmem:[#allocation2 + $0xab] ss:$2 sm:$0xff] }
 0x196   : > { %22029 = vmatpush3.bf16.msra.mxu1 %v22566_v49  ;;  %v2577_v49 = vld [vmem:[#allocation2 + $0x93] ss:$2 sm:$0xff] }
 0x197   : > { %22030 = vmatprep.subr.bf16.mxu1 %v22567_v53 }
 0x199   : > { %22023 = vmatmul.mubr.msk.bf16.gmra.mrb[4].mxu1 %vm440_vm0, %v2039_v58  ;;  %v2711_v58 = vld [vmem:[#allocation2 + $0x48] ss:$2 sm:$0xff] }
 0x19a   : > { %22031 = vmatpush3.bf16.msra.mxu1 %v22567_v53  ;;  %22034 = vmatprep.mubr.msk.bf16.mxu1 %vm440_vm0, %v2174_v59  ;;  %v2589_v53 = vpack.c.bf16 %v2579_v47, %v2577_v49  ;;  %v22584_v59 = vld [vmem:[%s30622_s2 + $0x198] sm:$0xff]   ;;  %v2726_v61 = vpack.c.bf16 %v2713_v50, %v2711_v58 }
 0x19b   : > { %22032 = vmatprep.subr.bf16.mxu1 %v22568_v57  ;;  %v3135_v47 = vld [vmem:[#allocation2 + $0x13b] ss:$2 sm:$0xff]  ;;  %v3133_v49 = vld [vmem:[#allocation2 + $0x10b] ss:$2 sm:$0xff] }
 0x19e   : > { %22033 = vmatpush3.bf16.msra.mxu1 %v22568_v57  ;;  %v2585_v57 = vld [vmem:[#allocation2 + $0x153] ss:$2 sm:$0xff] }
 0x19f   : > { %22042 = vmatprep.subr.bf16.mxu1 %v22569_v60 }
 0x1a1   : > { %22035 = vmatmul.mubr.msk.bf16.vlgmr.msra.gmra.mrb[0].mxu1 %vm440_vm0, %v2175_v2  ;;  %v2719_v2 = vld [vmem:[#allocation2 + $0x108] ss:$2 sm:$0xff] }
 0x1a2   : > { %22043 = vmatpush3.bf16.msra.mxu1 %v22569_v60  ;;  %22038 = vmatprep.mubr.msk.bf16.mxu1 %vm440_vm0, %v2176_v3  ;;  %v2591_v60 = vpack.c.bf16 %v2587_v56, %v2585_v57  ;;  %v22586_v3 = vld [vmem:[%s30622_s2 + $0x1a8] sm:$0xff]   ;;  %v2728_v5 = vpack.c.bf16 %v2721_v0, %v2719_v2  ;;  %v22602_v0 = vld [vmem:[%s30623_s3 + $0x94] ss:$8 sps:$4 sm:$0xff]  }
 0x1a3   : > { %22044 = vmatprep.subr.bf16.mxu1 %v22570_v1  ;;  %3451 = vmatprep.subr.bf16.mxu0 %v22602_v0  ;;  %v22605_v2 = vld [vmem:[%s30623_s3 + $0xa4] ss:$8 sps:$4 sm:$0xff]   ;;  %v22636_v0 = vld [vmem:[%s30623_s3 + $0x50] ss:$8 sps:$4 sm:$0xff]  }
 0x1a6   : > { %22045 = vmatpush3.bf16.msra.mxu1 %v22570_v1  ;;  %v2715_v1 = vld [vmem:[#allocation2 + $0xa8] ss:$2 sm:$0xff] }
 0x1a7   : > { %22046 = vmatprep.subr.bf16.mxu1 %v22571_v4 }
 0x1a9   : > { %22039 = vmatmul.mubr.msk.bf16.gmra.mrb[4].mxu1 %vm440_vm0, %v2177_v10  ;;  %v2849_v10 = vld [vmem:[#allocation2 + $0x49] ss:$2 sm:$0xff] }
 0x1aa   : > { %22047 = vmatpush3.bf16.msra.mxu1 %v22571_v4  ;;  %22050 = vmatprep.mubr.msk.bf16.mxu1 %vm440_vm0, %v2312_v11  ;;  %v2727_v4 = vpack.c.bf16 %v2717_v63, %v2715_v1  ;;  %v22588_v11 = vld [vmem:[%s30622_s2 + $0x1b8] sm:$0xff]   ;;  %v22603_v1 = vld [vmem:[%s30623_s3 + $0xa0] ss:$8 sps:$4 sm:$0xff]  }
 0x1ab   : > { %22048 = vmatprep.subr.bf16.mxu1 %v22572_v9  ;;  %v22600_v63 = vld [vmem:[%s30623_s3 + $0x90] ss:$8 sps:$4 sm:$0xff]  }
 0x1ac   : > { %3452 = vmatpush1.bf16.msra.mxu0 %v22600_v63  ;;  %v22638_v63 = vld [vmem:[%s30623_s3 + $0x54] ss:$8 sps:$4 sm:$0xff]  }
 0x1ad   : > { %3453 = vmatprep.subr.bf16.mxu0 %v22605_v2  ;;  %v22639_v2 = vld [vmem:[%s30623_s3 + $0x60] ss:$8 sps:$4 sm:$0xff]  }
 0x1ae   : > { %22049 = vmatpush3.bf16.msra.mxu1 %v22572_v9  ;;  %v2851_v9 = vld [vmem:[#allocation2 + $0x79] ss:$2 sm:$0xff] }
 0x1af   : > { %22058 = vmatprep.subr.bf16.mxu1 %v22573_v12  ;;  %v2864_v13 = vpack.c.bf16 %v2851_v9, %v2849_v10  ;;  %v22612_v9 = vld [vmem:[%s30623_s3 + $0xd0] ss:$8 sps:$4 sm:$0xff]   ;;  %v22617_v10 = vld [vmem:[%s30623_s3 + $0xe4] ss:$8 sps:$4 sm:$0xff]  }
 0x1b0   : > { %3454 = vmatpush1.bf16.msra.mxu0 %v22603_v1  ;;  %v22641_v1 = vld [vmem:[%s30623_s3 + $0x64] ss:$8 sps:$4 sm:$0xff]  }
 0x1b1   : > { %22051 = vmatmul.mubr.msk.bf16.vlgmr.msra.gmra.mrb[0].mxu1 %vm440_vm0, %v2313_v18  ;;  %v2857_v18 = vld [vmem:[#allocation2 + $0x109] ss:$2 sm:$0xff] }
 0x1b2   : > { %22059 = vmatpush3.bf16.msra.mxu1 %v22573_v12  ;;  %22054 = vmatprep.mubr.msk.bf16.mxu1 %vm440_vm0, %v2314_v21  ;;  %v2729_v12 = vpack.c.bf16 %v2725_v8, %v2723_v7  ;;  %v2866_v21 = vpack.c.bf16 %v2859_v16, %v2857_v18  ;;  %v22614_v7 = vld [vmem:[%s30623_s3 + $0xd4] ss:$8 sps:$4 sm:$0xff]   ;;  %v24646_v8 = vmov 0  }
 0x1b3   : > { %22060 = vmatprep.subr.bf16.mxu1 %v22574_v17  ;;  %3481 = vmatprep.mubr.bf16.mxu0 %v24646_v8  ;;  %516 = vst [vmem:[#allocation4] sm:$0x77] %v24646_v8  ;;  %517 = vst [vmem:[#allocation4 + $0x8] sm:$0x77] %v24646_v8 }
 0x1b4   : > { %518 = vst [vmem:[#allocation4 + $0x10] sm:$0x77] %v24646_v8  ;;  %519 = vst [vmem:[#allocation4 + $0x18] sm:$0x77] %v24646_v8 }
 0x1b5   : > { %520 = vst [vmem:[#allocation4 + $0x20] sm:$0x77] %v24646_v8  ;;  %521 = vst [vmem:[#allocation4 + $0x28] sm:$0x77] %v24646_v8 }
 0x1b6   : > { %22061 = vmatpush3.bf16.msra.mxu1 %v22574_v17  ;;  %v2853_v17 = vld [vmem:[#allocation2 + $0xa9] ss:$2 sm:$0xff] }
 0x1b7   : > { %22062 = vmatprep.subr.bf16.mxu1 %v22575_v22  ;;  %v2865_v20 = vpack.c.bf16 %v2855_v15, %v2853_v17 }
 0x1b9   : > { %22055 = vmatmul.mubr.msk.bf16.gmra.mrb[4].mxu1 %vm440_vm0, %v2315_v28  ;;  %v2867_v28 = vpack.c.bf16 %v2863_v24, %v2861_v23 }
 0x1ba   : > { %22063 = vmatpush3.bf16.msra.mxu1 %v22575_v22  ;;  %22066 = vmatprep.mubr.msk.bf16.mxu1 %vm440_vm0, %v2450_v31  ;;  %v22591_v22 = vld [vmem:[%s30622_s2 + $0x1d0] sm:$0xff]   ;;  %v3002_v31 = vpack.c.bf16 %v2989_v25, %v2987_v26 }
 0x1bb   : > { %22064 = vmatprep.subr.bf16.mxu1 %v22576_v27 }
 0x1be   : > { %22065 = vmatpush3.bf16.msra.mxu1 %v22576_v27  ;;  %v22592_v27 = vld [vmem:[%s30622_s2 + $0x1d8] sm:$0xff]  }
 0x1bf   : > { %22074 = vmatprep.subr.bf16.mxu1 %v22577_v32 }
 0x1c1   : > { %22067 = vmatmul.mubr.msk.bf16.vlgmr.msra.gmra.mrb[0].mxu1 %vm440_vm0, %v2451_v38  ;;  %v3003_v38 = vpack.c.bf16 %v2993_v33, %v2991_v35 }
 0x1c2   : > { %22075 = vmatpush3.bf16.msra.mxu1 %v22577_v32  ;;  %22070 = vmatprep.mubr.msk.bf16.mxu1 %vm440_vm0, %v2452_v29  ;;  %v22593_v32 = vld [vmem:[%s30622_s2 + $0x1e0] sm:$0xff]   ;;  %v3004_v29 = vpack.c.bf16 %v2997_v34, %v2995_v36 }
 0x1c3   : > { %22076 = vmatprep.subr.bf16.mxu1 %v22578_v37 }
 0x1c6   : > { %22077 = vmatpush3.bf16.msra.mxu1 %v22578_v37  ;;  %v22594_v37 = vld [vmem:[%s30622_s2 + $0x1e8] sm:$0xff]  }
 0x1c7   : > { %22078 = vmatprep.subr.bf16.mxu1 %v22579_v39 }
 0x1c9   : > { %22071 = vmatmul.mubr.msk.bf16.gmra.mrb[4].mxu1 %vm440_vm0, %v2453_v44  ;;  %v3005_v44 = vpack.c.bf16 %v3001_v40, %v2999_v30 }
 0x1ca   : > { %22079 = vmatpush3.bf16.msra.mxu1 %v22579_v39  ;;  %22082 = vmatprep.mubr.msk.bf16.mxu1 %vm440_vm0, %v2588_v45  ;;  %v22595_v39 = vld [vmem:[%s30622_s2 + $0x1f0] sm:$0xff]   ;;  %v3140_v45 = vpack.c.bf16 %v3127_v41, %v3125_v42 }
 0x1cb   : > { %22080 = vmatprep.subr.bf16.mxu1 %v22580_v43 }
 0x1ce   : > { %22081 = vmatpush3.bf16.msra.mxu1 %v22580_v43  ;;  %v22596_v43 = vld [vmem:[%s30622_s2 + $0x1f8] sm:$0xff]  }
 0x1cf   : > { %22090 = vmatprep.subr.bf16.mxu1 %v22581_v46 }
 0x1d1   : > { %22083 = vmatmul.mubr.msk.bf16.vlgmr.msra.gmra.mrb[0].mxu1 %vm440_vm0, %v2589_v53  ;;  %v3137_v53 = vld [vmem:[#allocation2 + $0x16b] ss:$2 sm:$0xff] }
 0x1d2   : > { %22091 = vmatpush3.bf16.msra.mxu1 %v22581_v46  ;;  %22086 = vmatprep.mubr.msk.bf16.mxu1 %vm440_vm0, %v2590_v54  ;;  %v3131_v46 = vld [vmem:[#allocation2 + $0xdb] ss:$2 sm:$0xff] }
 0x1d3   : > { %22092 = vmatprep.subr.bf16.mxu1 %v22582_v52  ;;  %v3141_v51 = vpack.c.bf16 %v3131_v46, %v3129_v48  ;;  %v3139_v54 = vld [vmem:[#allocation2 + $0x19b] ss:$2 sm:$0xff] }
 0x1d6   : > { %22093 = vmatpush3.bf16.msra.mxu1 %v22582_v52  ;;  %v3142_v52 = vpack.c.bf16 %v3135_v47, %v3133_v49  ;;  %v3336_v47 = vld [vmem:[#allocation3 + $0x1] ss:$2 sm:$0xf] }
 0x1d7   : > { %22094 = vmatprep.subr.bf16.mxu1 %v22583_v55 }
 0x1d9   : > { %22087 = vmatmul.mubr.msk.bf16.gmra.mrb[4].mxu1 %vm440_vm0, %v2591_v60 }
 0x1da   : > { %22095 = vmatpush3.bf16.msra.mxu1 %v22583_v55  ;;  %22098 = vmatprep.mubr.msk.bf16.mxu1 %vm440_vm0, %v2726_v61  ;;  %v3143_v55 = vpack.c.bf16 %v3139_v54, %v3137_v53  ;;  %v22621_v54 = vld [vmem:[%s30623_s3] ss:$8 sps:$4 sm:$0xff]  }
 0x1db   : > { %22096 = vmatprep.subr.bf16.mxu1 %v22584_v59 }
 0x1de   : > { %22097 = vmatpush3.bf16.msra.mxu1 %v22584_v59 }
 0x1df   : > { %22106 = vmatprep.subr.bf16.mxu1 %v22585_v62 }
 0x1e1   : > { %22099 = vmatmul.mubr.msk.bf16.vlgmr.msra.gmra.mrb[0].mxu1 %vm440_vm0, %v2727_v4  ;;  %v22608_v4 = vld [vmem:[%s30623_s3 + $0xb4] ss:$8 sps:$4 sm:$0xff]  }
 0x1e2   : > { %22107 = vmatpush3.bf16.msra.mxu1 %v22585_v62  ;;  %22102 = vmatprep.mubr.msk.bf16.mxu1 %vm440_vm0, %v2728_v5  ;;  %v22609_v5 = vld [vmem:[%s30623_s3 + $0xc0] ss:$8 sps:$4 sm:$0xff]  }
 0x1e3   : > { %22108 = vmatprep.subr.bf16.mxu1 %v22586_v3  ;;  %3455 = vmatprep.subr.bf16.mxu0 %v22608_v4 }
 0x1e6   : > { %22109 = vmatpush3.bf16.msra.mxu1 %v22586_v3  ;;  %v22606_v3 = vld [vmem:[%s30623_s3 + $0xb0] ss:$8 sps:$4 sm:$0xff]  }
 0x1e7   : > { %22110 = vmatprep.subr.bf16.mxu1 %v22587_v6  ;;  %3456 = vmatpush1.bf16.msra.mxu0 %v22606_v3  ;;  %v22644_v3 = vld [vmem:[%s30623_s3 + $0x74] ss:$8 sps:$4 sm:$0xff]  }
 0x1e9   : > { %22103 = vmatmul.mubr.msk.bf16.gmra.mrb[4].mxu1 %vm440_vm0, %v2729_v12  ;;  %v22620_v12 = vld [vmem:[%s30623_s3 + $0xf4] ss:$8 sps:$4 sm:$0xff]  }
 0x1ea   : > { %22111 = vmatpush3.bf16.msra.mxu1 %v22587_v6  ;;  %22114 = vmatprep.mubr.msk.bf16.mxu1 %vm440_vm0, %v2864_v13  ;;  %v22611_v6 = vld [vmem:[%s30623_s3 + $0xc4] ss:$8 sps:$4 sm:$0xff]   ;;  %v22618_v13 = vld [vmem:[%s30623_s3 + $0xf0] ss:$8 sps:$4 sm:$0xff]  }
 0x1eb   : > { %22112 = vmatprep.subr.bf16.mxu1 %v22588_v11  ;;  %3457 = vmatprep.subr.bf16.mxu0 %v22611_v6  ;;  %v3303_v6 = vld [vmem:[#allocation3] ss:$2 sm:$0xf] }
 0x1ec   : > { %3458 = vmatpush1.bf16.msra.mxu0 %v22609_v5  ;;  %v22642_v5 = vld [vmem:[%s30623_s3 + $0x70] ss:$8 sps:$4 sm:$0xff]  }
 0x1ed   : > { %3459 = vmatprep.subr.bf16.mxu0 %v22614_v7 }
 0x1ee   : > { %22113 = vmatpush3.bf16.msra.mxu1 %v22588_v11  ;;  %v22615_v11 = vld [vmem:[%s30623_s3 + $0xe0] ss:$8 sps:$4 sm:$0xff]  }
 0x1ef   : > { %22122 = vmatprep.subr.bf16.mxu1 %v22589_v14 }
 0x1f0   : > { %3460 = vmatpush1.bf16.msra.mxu0 %v22612_v9 }
 0x1f1   : > { %22115 = vmatmul.mubr.msk.bf16.vlgmr.msra.gmra.mrb[0].mxu1 %vm440_vm0, %v2865_v20  ;;  %3461 = vmatprep.subr.bf16.mxu0 %v22617_v10 }
 0x1f2   : > { %22123 = vmatpush3.bf16.msra.mxu1 %v22589_v14  ;;  %22118 = vmatprep.mubr.msk.bf16.mxu1 %vm440_vm0, %v2866_v21  ;;  %v22623_v14 = vld [vmem:[%s30623_s3 + $0x4] ss:$8 sps:$4 sm:$0xff]  }
 0x1f3   : > { %22124 = vmatprep.subr.bf16.mxu1 %v22590_v19 }
 0x1f4   : > { %3462 = vmatpush1.bf16.msra.mxu0 %v22615_v11  ;;  %v22647_v11 = vld [vmem:[%s30623_s3 + $0x104] ss:$8 sps:$4 sm:$0xff]  }
 0x1f5   : > { %3463 = vmatprep.subr.bf16.mxu0 %v22620_v12 }
 0x1f6   : > { %22125 = vmatpush3.bf16.msra.mxu1 %v22590_v19 }
 0x1f7   : > { %22126 = vmatprep.subr.bf16.mxu1 %v22591_v22 }
 0x1f8   : > { %3464 = vmatpush1.bf16.msra.mxu0 %v22618_v13  ;;  %v22645_v13 = vld [vmem:[%s30623_s3 + $0x100] ss:$8 sps:$4 sm:$0xff]  }
 0x1f9   : > { %22119 = vmatmul.mubr.msk.bf16.gmra.mrb[4].mxu1 %vm440_vm0, %v2867_v28  ;;  %3572 = vmatprep.subr.bf16.mxu0 %v22623_v14 }
 0x1fa   : > { %22127 = vmatpush3.bf16.msra.mxu1 %v22591_v22  ;;  %22130 = vmatprep.mubr.msk.bf16.mxu1 %vm440_vm0, %v3002_v31 }
 0x1fb   : > { %22128 = vmatprep.subr.bf16.mxu1 %v22592_v27 }
 0x1fe   : > { %22129 = vmatpush3.bf16.msra.mxu1 %v22592_v27 }
 0x1ff   : > { %22138 = vmatprep.subr.bf16.mxu1 %v22593_v32 }
 0x201   : > { %22131 = vmatmul.mubr.msk.bf16.vlgmr.msra.gmra.mrb[0].mxu1 %vm440_vm0, %v3003_v38 }
 0x202   : > { %22139 = vmatpush3.bf16.msra.mxu1 %v22593_v32  ;;  %22134 = vmatprep.mubr.msk.bf16.mxu1 %vm440_vm0, %v3004_v29 }
 0x203   : > { %22140 = vmatprep.subr.bf16.mxu1 %v22594_v37 }
 0x206   : > { %22141 = vmatpush3.bf16.msra.mxu1 %v22594_v37 }
 0x207   : > { %22142 = vmatprep.subr.bf16.mxu1 %v22595_v39 }
 0x209   : > { %22135 = vmatmul.mubr.msk.bf16.gmra.mrb[4].mxu1 %vm440_vm0, %v3005_v44 }
 0x20a   : > { %22143 = vmatpush3.bf16.msra.mxu1 %v22595_v39  ;;  %22146 = vmatprep.mubr.msk.bf16.mxu1 %vm440_vm0, %v3140_v45 }
 0x20b   : > { %22144 = vmatprep.subr.bf16.mxu1 %v22596_v43 }
 0x20e   : > { %22145 = vmatpush3.bf16.msra.mxu1 %v22596_v43 }
 0x211   : > { %22147 = vmatmul.mubr.msk.bf16.vlgmr.msra.gmra.mrb[0].mxu1 %vm440_vm0, %v3141_v51 }
 0x212   : > { %22150 = vmatprep.mubr.msk.bf16.mxu1 %vm440_vm0, %v3142_v52 }
 0x219   : > { %22151 = vmatmul.mubr.msk.bf16.gmra.mrb[4].mxu1 %vm440_vm0, %v3143_v55 }
 0x224   : > { %v21924_v56 = vpop.f32.mrb[32].mxu0 }
 0x225   : > { %v1300_v50 = vpop.f32.mrb[33].mxu0 }
 0x226   : > { %v21925_v57 = vpop.f32.mrb[34].mxu0 }
 0x227   : > { %v1303_v58 = vpop.f32.mrb[35].mxu0 }
 0x22c   : > { %v25333_v59 = vpop.f32.mrb[36].mxu0 }
 0x22d   : > { %v25335_v60 = vpop.f32.mrb[37].mxu0 }
 0x22e   : > { %v25337_v61 = vpop.f32.mrb[38].mxu0 }
 0x22f   : > { %v25339_v62 = vpop.f32.mrb[39].mxu0 }
 0x2e4   : > { %v22148_v15 = vpop.f32.mrb[0].mxu1 }
 0x2e5   : > { %v22154_v16 = vadd.f32 %v22148_v15, %v21924_v56  ;;  %v3223_v17 = vpop.f32.mrb[1].mxu1  ;;  %v22626_v56 = vld [vmem:[%s30623_s3 + $0x14] ss:$8 sps:$4 sm:$0xff]  }
 0x2e6   : > { %v22155_v18 = vadd.f32 %v3223_v17, %v1300_v50  ;;  %v22149_v19 = vpop.f32.mrb[2].mxu1  ;;  %v22624_v50 = vld [vmem:[%s30623_s3 + $0x10] ss:$8 sps:$4 sm:$0xff]   ;;  %v22650_v15 = vld [vmem:[%s30623_s3 + $0x114] ss:$8 sps:$4 sm:$0xff]  }
 0x2e7   : > { %vm3264_vm0 = vcmp.ge.f32.partialorder %v22154_v16, 0.0  ;;  %v3272_v20 = vmul.f32 0.2, %v22154_v16  ;;  %v22156_v21 = vadd.f32 %v22149_v19, %v21925_v57  ;;  %v3226_v22 = vpop.f32.mrb[3].mxu1  ;;  %v22629_v57 = vld [vmem:[%s30623_s3 + $0x24] ss:$8 sps:$4 sm:$0xff]  }
 0x2e8   : > { %vm3262_vm4 = vcmp.ge.f32.partialorder %v22155_v18, 0.0  ;;  %v3270_v23 = vmul.f32 0.2, %v22155_v18  ;;  %v22157_v24 = vadd.f32 %v3226_v22, %v1303_v58  ;;  %v22627_v58 = vld [vmem:[%s30623_s3 + $0x20] ss:$8 sps:$4 sm:$0xff]  }
 0x2e9   : > { %v3280_v25 = vsel %vm3264_vm0, %v22154_v16, %v3272_v20  ;;  %vm3265_vm5 = vcmp.ge.f32.partialorder %v22156_v21, 0.0  ;;  %v3273_v26 = vmul.f32 0.2, %v22156_v21  ;;  %v22648_v16 = vld [vmem:[%s30623_s3 + $0x110] ss:$8 sps:$4 sm:$0xff]  }
 0x2ea   : > { %3288 = vst [vmem:[%s25394_s22 + $0x10] sm:$0xff] %v3280_v25  ;;  %3297 = vst [vmem:[#allocation3 + $0x31] sm:$0xff] %v3280_v25  ;;  %v3278_v27 = vsel %vm3262_vm4, %v22155_v18, %v3270_v23  ;;  %vm3263_vm6 = vcmp.ge.f32.partialorder %v22157_v24, 0.0  ;;  %v3271_v28 = vmul.f32 0.2, %v22157_v24 }
 0x2eb   : > { %3286 = vst [vmem:[%s25394_s22] sm:$0xff] %v3278_v27  ;;  %3295 = vst [vmem:[#allocation3 + $0x11] sm:$0xff] %v3278_v27  ;;  %v3281_v31 = vsel %vm3265_vm5, %v22156_v21, %v3273_v26  ;;  %v22653_v17 = vld [vmem:[%s30623_s3 + $0x124] ss:$8 sps:$4 sm:$0xff]   ;;  %v22651_v18 = vld [vmem:[%s30623_s3 + $0x120] ss:$8 sps:$4 sm:$0xff]  }
 0x2ec   : > { %3289 = vst [vmem:[%s25394_s22 + $0x18] sm:$0xff] %v3281_v31  ;;  %3298 = vst [vmem:[#allocation3 + $0x41] sm:$0xff] %v3281_v31  ;;  %v3279_v32 = vsel %vm3263_vm6, %v22157_v24, %v3271_v28  ;;  %v22152_v33 = vpop.f32.mrb[4].mxu1  ;;  %v22656_v19 = vld [vmem:[%s30623_s3 + $0x134] ss:$8 sps:$4 sm:$0xff]  }
 0x2ed   : > { %3287 = vst [vmem:[%s25394_s22 + $0x8] sm:$0xff] %v3279_v32  ;;  %3296 = vst [vmem:[#allocation3 + $0x21] sm:$0xff] %v3279_v32  ;;  %v22158_v34 = vadd.f32 %v22152_v33, %v25333_v59  ;;  %v3239_v35 = vpop.f32.mrb[5].mxu1  ;;  %v22632_v59 = vld [vmem:[%s30623_s3 + $0x34] ss:$8 sps:$4 sm:$0xff]  }
 0x2ee   : > { %v22159_v36 = vadd.f32 %v3239_v35, %v25335_v60  ;;  %v22153_v37 = vpop.f32.mrb[6].mxu1  ;;  %v22630_v60 = vld [vmem:[%s30623_s3 + $0x30] ss:$8 sps:$4 sm:$0xff]   ;;  %v22659_v21 = vld [vmem:[%s30623_s3 + $0x144] ss:$8 sps:$4 sm:$0xff]   ;;  %vm5966_vm4 = vmand %vm522_vm11, %vm5965_vm3 }
 0x2ef   : > { %vm3268_vm7 = vcmp.ge.f32.partialorder %v22158_v34, 0.0  ;;  %v3276_v38 = vmul.f32 0.2, %v22158_v34  ;;  %v22160_v29 = vadd.f32 %v22153_v37, %v25337_v61  ;;  %v3242_v39 = vpop.f32.mrb[7].mxu1  ;;  %v22635_v61 = vld [vmem:[%s30623_s3 + $0x44] ss:$8 sps:$4 sm:$0xff]  }
 0x2f0   : > { %vm3266_vm8 = vcmp.ge.f32.partialorder %v22159_v36, 0.0  ;;  %v3274_v30 = vmul.f32 0.2, %v22159_v36  ;;  %v22161_v40 = vadd.f32 %v3242_v39, %v25339_v62  ;;  %v22633_v62 = vld [vmem:[%s30623_s3 + $0x40] ss:$8 sps:$4 sm:$0xff]  }
 0x2f1   : > { %v3284_v41 = vsel %vm3268_vm7, %v22158_v34, %v3276_v38  ;;  %vm3269_vm9 = vcmp.ge.f32.partialorder %v22160_v29, 0.0  ;;  %v3277_v42 = vmul.f32 0.2, %v22160_v29  ;;  %v22654_v20 = vld [vmem:[%s30623_s3 + $0x130] ss:$8 sps:$4 sm:$0xff]  }
 0x2f2   : > { %3292 = vst [vmem:[%s25394_s22 + $0x30] sm:$0xff] %v3284_v41  ;;  %3301 = vst [vmem:[#allocation3 + $0x71] sm:$0xff] %v3284_v41  ;;  %v3282_v43 = vsel %vm3266_vm8, %v22159_v36, %v3274_v30  ;;  %vm3267_vm10 = vcmp.ge.f32.partialorder %v22161_v40, 0.0  ;;  %v3275_v44 = vmul.f32 0.2, %v22161_v40 }
 0x2f3   : > { %3290 = vst [vmem:[%s25394_s22 + $0x20] sm:$0xff] %v3282_v43  ;;  %3299 = vst [vmem:[#allocation3 + $0x51] sm:$0xff] %v3282_v43  ;;  %v3285_v45 = vsel %vm3269_vm9, %v22160_v29, %v3277_v42  ;;  %v3340_v49 = vld [vmem:[#allocation3 + $0x41] ss:$2 sm:$0xf] }
 0x2f4   : > { %3293 = vst [vmem:[%s25394_s22 + $0x38] sm:$0xff] %v3285_v45  ;;  %3302 = vst [vmem:[#allocation3 + $0x81] sm:$0xff] %v3285_v45  ;;  %v3283_v46 = vsel %vm3267_vm10, %v22161_v40, %v3275_v44  ;;  %v3338_v48 = vld [vmem:[#allocation3 + $0x21] ss:$2 sm:$0xf] }
 0x2f5   : > { %3291 = vst [vmem:[%s25394_s22 + $0x28] sm:$0xff] %v3283_v46  ;;  %3300 = vst [vmem:[#allocation3 + $0x61] sm:$0xff] %v3283_v46  ;;  %v3347_v52 = vcombine.low %v3336_v47, %v3338_v48  ;;  %v3305_v7 = vld [vmem:[#allocation3 + $0x20] ss:$2 sm:$0xf] }
 0x2f6   : > { %v3307_v9 = vld [vmem:[#allocation3 + $0x40] ss:$2 sm:$0xf]  ;;  %v3314_v12 = vcombine.low %v3303_v6, %v3305_v7  ;;  %v22657_v22 = vld [vmem:[%s30623_s3 + $0x140] ss:$8 sps:$4 sm:$0xff]  }
 0x2f7   : > { %v22662_v23 = vld [vmem:[%s30623_s3 + $0x154] ss:$8 sps:$4 sm:$0xff]   ;;  %v22660_v24 = vld [vmem:[%s30623_s3 + $0x150] ss:$8 sps:$4 sm:$0xff]   ;;  %v22665_v25 = vld [vmem:[%s30623_s3 + $0x164] ss:$8 sps:$4 sm:$0xff]  }
 0x2f8   : > { %v22663_v26 = vld [vmem:[%s30623_s3 + $0x160] ss:$8 sps:$4 sm:$0xff]   ;;  %v22668_v27 = vld [vmem:[%s30623_s3 + $0x174] ss:$8 sps:$4 sm:$0xff]   ;;  %v22666_v31 = vld [vmem:[%s30623_s3 + $0x170] ss:$8 sps:$4 sm:$0xff]  }
 0x2f9   : > { %v3616_v32 = vld [vmem:[#allocation3 + $0x2] ss:$2 sm:$0xf]  ;;  %v22671_v36 = vld [vmem:[%s30623_s3 + $0x184] ss:$8 sps:$4 sm:$0xff]  }
 0x2fa   : > { %v3618_v33 = vld [vmem:[#allocation3 + $0x22] ss:$2 sm:$0xf]  ;;  %v22669_v38 = vld [vmem:[%s30623_s3 + $0x180] ss:$8 sps:$4 sm:$0xff]  }
 0x2fb   : > { %v3620_v34 = vld [vmem:[#allocation3 + $0x42] ss:$2 sm:$0xf]  ;;  %v3627_v37 = vcombine.low %v3616_v32, %v3618_v33  ;;  %v22677_v40 = vld [vmem:[%s30623_s3 + $0x1a4] ss:$8 sps:$4 sm:$0xff]  }
 0x2fc   : > { %v3342_v51 = vld [vmem:[#allocation3 + $0x61] ss:$2 sm:$0xf]  ;;  %v3309_v4 = vld [vmem:[#allocation3 + $0x60] ss:$2 sm:$0xf] }
 0x2fd   : > { %v3348_v53 = vcombine.low %v3340_v49, %v3342_v51  ;;  %v3315_v10 = vcombine.low %v3307_v9, %v3309_v4  ;;  %v3622_v28 = vld [vmem:[#allocation3 + $0x62] ss:$2 sm:$0xf]  ;;  %v22675_v41 = vld [vmem:[%s30623_s3 + $0x1a0] ss:$8 sps:$4 sm:$0xff]  }
 0x2fe   : > { %v3628_v35 = vcombine.low %v3620_v34, %v3622_v28  ;;  %v22674_v39 = vld [vmem:[%s30623_s3 + $0x194] ss:$8 sps:$4 sm:$0xff]   ;;  %v22672_v30 = vld [vmem:[%s30623_s3 + $0x190] ss:$8 sps:$4 sm:$0xff]   ;;  %v22683_v44 = vld [vmem:[%s30623_s3 + $0x1c4] ss:$8 sps:$4 sm:$0xff]  }
 0x2ff   : > { %v3351_v55 = vpack.c.bf16 %v3348_v53, %v3347_v52  ;;  %v3318_v14 = vpack.c.bf16 %v3315_v10, %v3314_v12  ;;  %v22680_v42 = vld [vmem:[%s30623_s3 + $0x1b4] ss:$8 sps:$4 sm:$0xff]   ;;  %v22678_v43 = vld [vmem:[%s30623_s3 + $0x1b0] ss:$8 sps:$4 sm:$0xff]   ;;  %v22681_v45 = vld [vmem:[%s30623_s3 + $0x1c0] ss:$8 sps:$4 sm:$0xff]  }
 0x300   : > { %v3631_v29 = vpack.c.bf16 %v3628_v35, %v3627_v37  ;;  %v22686_v46 = vld [vmem:[%s30623_s3 + $0x1d4] ss:$8 sps:$4 sm:$0xff]   ;;  %v22684_v47 = vld [vmem:[%s30623_s3 + $0x1d0] ss:$8 sps:$4 sm:$0xff]   ;;  %v22689_v48 = vld [vmem:[%s30623_s3 + $0x1e4] ss:$8 sps:$4 sm:$0xff]  }
 0x301   : > { %3482 = vmatmul.mubr.bf16.vlgmr.msra.gmra.mrb[40].mxu0 %v3351_v55  ;;  %v22687_v49 = vld [vmem:[%s30623_s3 + $0x1e0] ss:$8 sps:$4 sm:$0xff]   ;;  %v22692_v51 = vld [vmem:[%s30623_s3 + $0x1f4] ss:$8 sps:$4 sm:$0xff]   ;;  %v22690_v53 = vld [vmem:[%s30623_s3 + $0x1f0] ss:$8 sps:$4 sm:$0xff]  }
 0x302   : > { %3573 = vmatpush1.bf16.msra.mxu0 %v22621_v54  ;;  %3604 = vmatprep.mubr.bf16.mxu0 %v24646_v8  ;;  %v3783_v52 = vld [vmem:[#allocation3 + $0x63] ss:$2 sm:$0xf]  ;;  %v22705_v4 = vld [vmem:[%s30623_s3 + $0x240] ss:$8 sps:$4 sm:$0xff]  }
 0x303   : > { %3574 = vmatprep.subr.bf16.mxu0 %v22626_v56  ;;  %v3777_v54 = vld [vmem:[#allocation3 + $0x3] ss:$2 sm:$0xf]  ;;  %v22713_v7 = vld [vmem:[%s30623_s3 + $0x264] ss:$8 sps:$4 sm:$0xff]  }
 0x304   : > { %v3779_v55 = vld [vmem:[#allocation3 + $0x23] ss:$2 sm:$0xf]  ;;  %v22711_v9 = vld [vmem:[%s30623_s3 + $0x260] ss:$8 sps:$4 sm:$0xff]  }
 0x305   : > { %v3781_v56 = vld [vmem:[#allocation3 + $0x43] ss:$2 sm:$0xf]  ;;  %v3943_v12 = vld [vmem:[#allocation3 + $0x70] ss:$2 sm:$0xf] }
 0x306   : > { %3575 = vmatpush1.bf16.msra.mxu0 %v22624_v50  ;;  %v3789_v50 = vcombine.low %v3781_v56, %v3783_v52  ;;  %v22708_v6 = vld [vmem:[%s30623_s3 + $0x250] ss:$8 sps:$4 sm:$0xff]   ;;  %v22716_v10 = vld [vmem:[%s30623_s3 + $0x274] ss:$8 sps:$4 sm:$0xff]   ;;  %v22729_v28 = vld [vmem:[%s30623_s3 + $0x2c0] ss:$8 sps:$4 sm:$0xff]  }
 0x307   : > { %3576 = vmatprep.subr.bf16.mxu0 %v22629_v57  ;;  %v22695_v57 = vld [vmem:[%s30623_s3 + $0x204] ss:$8 sps:$4 sm:$0xff]   ;;  %v22732_v32 = vld [vmem:[%s30623_s3 + $0x2d0] ss:$8 sps:$4 sm:$0xff]   ;;  %v22735_v34 = vld [vmem:[%s30623_s3 + $0x2e0] ss:$8 sps:$4 sm:$0xff]  }
 0x308   : > { %v22737_v33 = vld [vmem:[%s30623_s3 + $0x2e4] ss:$8 sps:$4 sm:$0xff]   ;;  %v22740_v35 = vld [vmem:[%s30623_s3 + $0x2f4] ss:$8 sps:$4 sm:$0xff]   ;;  %v22753_v52 = vld [vmem:[%s30623_s3 + $0x340] ss:$8 sps:$4 sm:$0xff]  }
 0x309   : > { %v4104_v37 = vld [vmem:[#allocation3 + $0x71] ss:$2 sm:$0xf]  ;;  %vm5967_vm0 = vsmask.f32 6418 }
 0x30a   : > { %3577 = vmatpush1.bf16.msra.mxu0 %v22627_v58  ;;  %v3788_v58 = vcombine.low %v3777_v54, %v3779_v55  ;;  %v22756_v54 = vld [vmem:[%s30623_s3 + $0x350] ss:$8 sps:$4 sm:$0xff]   ;;  %v22761_v55 = vld [vmem:[%s30623_s3 + $0x364] ss:$8 sps:$4 sm:$0xff]   ;;  %v22759_v56 = vld [vmem:[%s30623_s3 + $0x360] ss:$8 sps:$4 sm:$0xff]  }
 0x30b   : > { %3578 = vmatprep.subr.bf16.mxu0 %v22632_v59  ;;  %v22693_v59 = vld [vmem:[%s30623_s3 + $0x200] ss:$8 sps:$4 sm:$0xff]   ;;  %vm5968_vm5 = vmand %vm525_vm15, %vm5967_vm0  ;;  %vm16503_vm15 = vsmask.f32 256  ;;  %vm16506_vm3 = vsmask.f32 2312 }
 0x30c   : > { %vm26234_vm6 = vmor %vm5968_vm5, %vm5966_vm4  ;;  %vm16508_vm4 = vsmask.f32 3340 }
 0x30e   : > { %3579 = vmatpush1.bf16.msra.mxu0 %v22630_v60  ;;  %v3792_v60 = vpack.c.bf16 %v3789_v50, %v3788_v58  ;;  %v22764_v50 = vld [vmem:[%s30623_s3 + $0x374] ss:$8 sps:$4 sm:$0xff]   ;;  %v4265_v58 = vld [vmem:[#allocation3 + $0x72] ss:$2 sm:$0xf] }
 0x30f   : > { %3580 = vmatprep.subr.bf16.mxu0 %v22635_v61  ;;  %v22698_v61 = vld [vmem:[%s30623_s3 + $0x214] ss:$8 sps:$4 sm:$0xff]  }
 0x312   : > { %3581 = vmatpush1.bf16.msra.mxu0 %v22633_v62  ;;  %v22696_v62 = vld [vmem:[%s30623_s3 + $0x210] ss:$8 sps:$4 sm:$0xff]  }
 0x313   : > { %3582 = vmatprep.subr.bf16.mxu0 %v22638_v63  ;;  %v22701_v63 = vld [vmem:[%s30623_s3 + $0x224] ss:$8 sps:$4 sm:$0xff]  }
 0x316   : > { %3583 = vmatpush1.bf16.msra.mxu0 %v22636_v0  ;;  %v22699_v0 = vld [vmem:[%s30623_s3 + $0x220] ss:$8 sps:$4 sm:$0xff]  }
 0x317   : > { %3584 = vmatprep.subr.bf16.mxu0 %v22641_v1  ;;  %v22704_v1 = vld [vmem:[%s30623_s3 + $0x234] ss:$8 sps:$4 sm:$0xff]  }
 0x31a   : > { %3585 = vmatpush1.bf16.msra.mxu0 %v22639_v2  ;;  %v22702_v2 = vld [vmem:[%s30623_s3 + $0x230] ss:$8 sps:$4 sm:$0xff]  }
 0x31b   : > { %3586 = vmatprep.subr.bf16.mxu0 %v22644_v3  ;;  %v22707_v3 = vld [vmem:[%s30623_s3 + $0x244] ss:$8 sps:$4 sm:$0xff]  }
 0x31e   : > { %3587 = vmatpush1.bf16.msra.mxu0 %v22642_v5  ;;  %v22710_v5 = vld [vmem:[%s30623_s3 + $0x254] ss:$8 sps:$4 sm:$0xff]  }
 0x31f   : > { %3729 = vmatprep.subr.bf16.mxu0 %v22647_v11  ;;  %v3941_v11 = vld [vmem:[#allocation3 + $0x50] ss:$2 sm:$0xf] }
 0x321   : > { %3605 = vmatmul.mubr.bf16.vlgmr.msra.gmra.mrb[40].mxu0 %v3318_v14  ;;  %v22714_v14 = vld [vmem:[%s30623_s3 + $0x270] ss:$8 sps:$4 sm:$0xff]  }
 0x322   : > { %3730 = vmatpush1.bf16.msra.mxu0 %v22645_v13  ;;  %3761 = vmatprep.mubr.bf16.mxu0 %v24646_v8  ;;  %v3939_v13 = vld [vmem:[#allocation3 + $0x30] ss:$2 sm:$0xf] }
 0x323   : > { %3731 = vmatprep.subr.bf16.mxu0 %v22650_v15  ;;  %v3937_v15 = vld [vmem:[#allocation3 + $0x10] ss:$2 sm:$0xf] }
 0x326   : > { %3732 = vmatpush1.bf16.msra.mxu0 %v22648_v16  ;;  %v3949_v16 = vcombine.low %v3941_v11, %v3943_v12  ;;  %v22777_v11 = vld [vmem:[%s30623_s3 + $0x3c0] ss:$8 sps:$4 sm:$0xff]   ;;  %v22782_v12 = vld [vmem:[%s30623_s3 + $0x3d4] ss:$8 sps:$4 sm:$0xff]  }
 0x327   : > { %3733 = vmatprep.subr.bf16.mxu0 %v22653_v17  ;;  %v22719_v17 = vld [vmem:[%s30623_s3 + $0x284] ss:$8 sps:$4 sm:$0xff]  }
 0x32a   : > { %3734 = vmatpush1.bf16.msra.mxu0 %v22651_v18  ;;  %v3948_v18 = vcombine.low %v3937_v15, %v3939_v13  ;;  %v22780_v13 = vld [vmem:[%s30623_s3 + $0x3d0] ss:$8 sps:$4 sm:$0xff]   ;;  %v22783_v15 = vld [vmem:[%s30623_s3 + $0x3e0] ss:$8 sps:$4 sm:$0xff]  }
 0x32b   : > { %3735 = vmatprep.subr.bf16.mxu0 %v22656_v19  ;;  %v22717_v19 = vld [vmem:[%s30623_s3 + $0x280] ss:$8 sps:$4 sm:$0xff]  }
 0x32e   : > { %3736 = vmatpush1.bf16.msra.mxu0 %v22654_v20  ;;  %v3952_v20 = vpack.c.bf16 %v3949_v16, %v3948_v18  ;;  %v22788_v16 = vld [vmem:[%s30623_s3 + $0x3f4] ss:$8 sps:$4 sm:$0xff]   ;;  %v4426_v18 = vld [vmem:[#allocation3 + $0x73] ss:$2 sm:$0xf] }
 0x32f   : > { %3737 = vmatprep.subr.bf16.mxu0 %v22659_v21  ;;  %v22722_v21 = vld [vmem:[%s30623_s3 + $0x294] ss:$8 sps:$4 sm:$0xff]  }
 0x332   : > { %3738 = vmatpush1.bf16.msra.mxu0 %v22657_v22  ;;  %v22720_v22 = vld [vmem:[%s30623_s3 + $0x290] ss:$8 sps:$4 sm:$0xff]  }
 0x333   : > { %3739 = vmatprep.subr.bf16.mxu0 %v22662_v23  ;;  %v22725_v23 = vld [vmem:[%s30623_s3 + $0x2a4] ss:$8 sps:$4 sm:$0xff]  }
 0x336   : > { %3740 = vmatpush1.bf16.msra.mxu0 %v22660_v24  ;;  %v22723_v24 = vld [vmem:[%s30623_s3 + $0x2a0] ss:$8 sps:$4 sm:$0xff]  }
 0x337   : > { %3741 = vmatprep.subr.bf16.mxu0 %v22665_v25  ;;  %v22728_v25 = vld [vmem:[%s30623_s3 + $0x2b4] ss:$8 sps:$4 sm:$0xff]  }
 0x33a   : > { %3742 = vmatpush1.bf16.msra.mxu0 %v22663_v26  ;;  %v22726_v26 = vld [vmem:[%s30623_s3 + $0x2b0] ss:$8 sps:$4 sm:$0xff]  }
 0x33b   : > { %3743 = vmatprep.subr.bf16.mxu0 %v22668_v27  ;;  %v22731_v27 = vld [vmem:[%s30623_s3 + $0x2c4] ss:$8 sps:$4 sm:$0xff]  }
 0x33e   : > { %3744 = vmatpush1.bf16.msra.mxu0 %v22666_v31  ;;  %v22734_v31 = vld [vmem:[%s30623_s3 + $0x2d4] ss:$8 sps:$4 sm:$0xff]  }
 0x33f   : > { %3890 = vmatprep.subr.bf16.mxu0 %v22671_v36  ;;  %v4102_v36 = vld [vmem:[#allocation3 + $0x51] ss:$2 sm:$0xf] }
 0x341   : > { %3762 = vmatmul.mubr.bf16.vlgmr.msra.gmra.mrb[40].mxu0 %v3631_v29  ;;  %v22738_v29 = vld [vmem:[%s30623_s3 + $0x2f0] ss:$8 sps:$4 sm:$0xff]  }
 0x342   : > { %3891 = vmatpush1.bf16.msra.mxu0 %v22669_v38  ;;  %3922 = vmatprep.mubr.bf16.mxu0 %v24646_v8  ;;  %v4098_v38 = vld [vmem:[#allocation3 + $0x11] ss:$2 sm:$0xf] }
 0x343   : > { %3892 = vmatprep.subr.bf16.mxu0 %v22674_v39  ;;  %v4100_v39 = vld [vmem:[#allocation3 + $0x31] ss:$2 sm:$0xf] }
 0x346   : > { %3893 = vmatpush1.bf16.msra.mxu0 %v22672_v30  ;;  %v4110_v30 = vcombine.low %v4102_v36, %v4104_v37  ;;  %v22801_v36 = vld [vmem:[%s30623_s3 + $0x440] ss:$8 sps:$4 sm:$0xff]   ;;  %v22806_v37 = vld [vmem:[%s30623_s3 + $0x454] ss:$8 sps:$4 sm:$0xff]  }
 0x347   : > { %3894 = vmatprep.subr.bf16.mxu0 %v22677_v40  ;;  %v22743_v40 = vld [vmem:[%s30623_s3 + $0x304] ss:$8 sps:$4 sm:$0xff]  }
 0x34a   : > { %3895 = vmatpush1.bf16.msra.mxu0 %v22675_v41  ;;  %v4109_v41 = vcombine.low %v4098_v38, %v4100_v39  ;;  %v22804_v38 = vld [vmem:[%s30623_s3 + $0x450] ss:$8 sps:$4 sm:$0xff]   ;;  %v22807_v39 = vld [vmem:[%s30623_s3 + $0x460] ss:$8 sps:$4 sm:$0xff]  }
 0x34b   : > { %3896 = vmatprep.subr.bf16.mxu0 %v22680_v42  ;;  %v22741_v42 = vld [vmem:[%s30623_s3 + $0x300] ss:$8 sps:$4 sm:$0xff]  }
 0x34e   : > { %3897 = vmatpush1.bf16.msra.mxu0 %v22678_v43  ;;  %v4113_v43 = vpack.c.bf16 %v4110_v30, %v4109_v41  ;;  %v22812_v30 = vld [vmem:[%s30623_s3 + $0x474] ss:$8 sps:$4 sm:$0xff]  }
 0x34f   : > { %3898 = vmatprep.subr.bf16.mxu0 %v22683_v44  ;;  %v22746_v44 = vld [vmem:[%s30623_s3 + $0x314] ss:$8 sps:$4 sm:$0xff]  }
 0x350   : > { %v4587_v41 = vld [vmem:[#allocation3 + $0x80] ss:$2 sm:$0xf] }
 0x352   : > { %3899 = vmatpush1.bf16.msra.mxu0 %v22681_v45  ;;  %v22744_v45 = vld [vmem:[%s30623_s3 + $0x310] ss:$8 sps:$4 sm:$0xff]  }
 0x353   : > { %3900 = vmatprep.subr.bf16.mxu0 %v22686_v46  ;;  %v22749_v46 = vld [vmem:[%s30623_s3 + $0x324] ss:$8 sps:$4 sm:$0xff]  }
 0x356   : > { %3901 = vmatpush1.bf16.msra.mxu0 %v22684_v47  ;;  %v22747_v47 = vld [vmem:[%s30623_s3 + $0x320] ss:$8 sps:$4 sm:$0xff]  }
 0x357   : > { %3902 = vmatprep.subr.bf16.mxu0 %v22689_v48  ;;  %v22752_v48 = vld [vmem:[%s30623_s3 + $0x334] ss:$8 sps:$4 sm:$0xff]  }
 0x35a   : > { %3903 = vmatpush1.bf16.msra.mxu0 %v22687_v49  ;;  %v22750_v49 = vld [vmem:[%s30623_s3 + $0x330] ss:$8 sps:$4 sm:$0xff]  }
 0x35b   : > { %3904 = vmatprep.subr.bf16.mxu0 %v22692_v51  ;;  %v22755_v51 = vld [vmem:[%s30623_s3 + $0x344] ss:$8 sps:$4 sm:$0xff]  }
 0x35e   : > { %3905 = vmatpush1.bf16.msra.mxu0 %v22690_v53  ;;  %v22758_v53 = vld [vmem:[%s30623_s3 + $0x354] ss:$8 sps:$4 sm:$0xff]  }
 0x35f   : > { %4050 = vmatprep.subr.bf16.mxu0 %v22695_v57  ;;  %v4263_v57 = vld [vmem:[#allocation3 + $0x52] ss:$2 sm:$0xf] }
 0x361   : > { %3923 = vmatmul.mubr.bf16.vlgmr.msra.gmra.mrb[40].mxu0 %v3792_v60  ;;  %v22762_v60 = vld [vmem:[%s30623_s3 + $0x370] ss:$8 sps:$4 sm:$0xff]  }
 0x362   : > { %4051 = vmatpush1.bf16.msra.mxu0 %v22693_v59  ;;  %4082 = vmatprep.mubr.bf16.mxu0 %v24646_v8  ;;  %v4259_v59 = vld [vmem:[#allocation3 + $0x12] ss:$2 sm:$0xf] }
 0x363   : > { %4052 = vmatprep.subr.bf16.mxu0 %v22698_v61  ;;  %v4261_v61 = vld [vmem:[#allocation3 + $0x32] ss:$2 sm:$0xf] }
 0x366   : > { %4053 = vmatpush1.bf16.msra.mxu0 %v22696_v62  ;;  %v4271_v62 = vcombine.low %v4263_v57, %v4265_v58  ;;  %v22825_v57 = vld [vmem:[%s30623_s3 + $0x4c0] ss:$8 sps:$4 sm:$0xff]   ;;  %v22830_v58 = vld [vmem:[%s30623_s3 + $0x4d4] ss:$8 sps:$4 sm:$0xff]  }
 0x367   : > { %4054 = vmatprep.subr.bf16.mxu0 %v22701_v63  ;;  %v22767_v63 = vld [vmem:[%s30623_s3 + $0x384] ss:$8 sps:$4 sm:$0xff]  }
 0x36a   : > { %4055 = vmatpush1.bf16.msra.mxu0 %v22699_v0  ;;  %v4270_v0 = vcombine.low %v4259_v59, %v4261_v61  ;;  %v22828_v59 = vld [vmem:[%s30623_s3 + $0x4d0] ss:$8 sps:$4 sm:$0xff]   ;;  %v22831_v61 = vld [vmem:[%s30623_s3 + $0x4e0] ss:$8 sps:$4 sm:$0xff]  }
 0x36b   : > { %4056 = vmatprep.subr.bf16.mxu0 %v22704_v1  ;;  %v22765_v1 = vld [vmem:[%s30623_s3 + $0x380] ss:$8 sps:$4 sm:$0xff]  }
 0x36e   : > { %4057 = vmatpush1.bf16.msra.mxu0 %v22702_v2  ;;  %v4274_v2 = vpack.c.bf16 %v4271_v62, %v4270_v0  ;;  %v22836_v62 = vld [vmem:[%s30623_s3 + $0x4f4] ss:$8 sps:$4 sm:$0xff]  }
 0x36f   : > { %4058 = vmatprep.subr.bf16.mxu0 %v22707_v3  ;;  %v22770_v3 = vld [vmem:[%s30623_s3 + $0x394] ss:$8 sps:$4 sm:$0xff]  }
 0x370   : > { %v4748_v0 = vld [vmem:[#allocation3 + $0x81] ss:$2 sm:$0xf] }
 0x372   : > { %4059 = vmatpush1.bf16.msra.mxu0 %v22705_v4  ;;  %v22768_v4 = vld [vmem:[%s30623_s3 + $0x390] ss:$8 sps:$4 sm:$0xff]  }
 0x373   : > { %4060 = vmatprep.subr.bf16.mxu0 %v22710_v5  ;;  %v22773_v5 = vld [vmem:[%s30623_s3 + $0x3a4] ss:$8 sps:$4 sm:$0xff]  }
 0x376   : > { %4061 = vmatpush1.bf16.msra.mxu0 %v22708_v6  ;;  %v22771_v6 = vld [vmem:[%s30623_s3 + $0x3a0] ss:$8 sps:$4 sm:$0xff]  }
 0x377   : > { %4062 = vmatprep.subr.bf16.mxu0 %v22713_v7  ;;  %v22776_v7 = vld [vmem:[%s30623_s3 + $0x3b4] ss:$8 sps:$4 sm:$0xff]  }
 0x37a   : > { %4063 = vmatpush1.bf16.msra.mxu0 %v22711_v9  ;;  %v22774_v9 = vld [vmem:[%s30623_s3 + $0x3b0] ss:$8 sps:$4 sm:$0xff]  }
 0x37b   : > { %4064 = vmatprep.subr.bf16.mxu0 %v22716_v10  ;;  %v22779_v10 = vld [vmem:[%s30623_s3 + $0x3c4] ss:$8 sps:$4 sm:$0xff]  }
 0x37e   : > { %4065 = vmatpush1.bf16.msra.mxu0 %v22714_v14  ;;  %v22785_v14 = vld [vmem:[%s30623_s3 + $0x3e4] ss:$8 sps:$4 sm:$0xff]  }
 0x37f   : > { %4211 = vmatprep.subr.bf16.mxu0 %v22719_v17  ;;  %v4424_v17 = vld [vmem:[#allocation3 + $0x53] ss:$2 sm:$0xf] }
 0x381   : > { %4083 = vmatmul.mubr.bf16.vlgmr.msra.gmra.mrb[40].mxu0 %v3952_v20  ;;  %v22786_v20 = vld [vmem:[%s30623_s3 + $0x3f0] ss:$8 sps:$4 sm:$0xff]  }
 0x382   : > { %4212 = vmatpush1.bf16.msra.mxu0 %v22717_v19  ;;  %4243 = vmatprep.mubr.bf16.mxu0 %v24646_v8  ;;  %v4420_v19 = vld [vmem:[#allocation3 + $0x13] ss:$2 sm:$0xf] }
 0x383   : > { %4213 = vmatprep.subr.bf16.mxu0 %v22722_v21  ;;  %v4422_v21 = vld [vmem:[#allocation3 + $0x33] ss:$2 sm:$0xf] }
 0x386   : > { %4214 = vmatpush1.bf16.msra.mxu0 %v22720_v22  ;;  %v4432_v22 = vcombine.low %v4424_v17, %v4426_v18  ;;  %v22849_v17 = vld [vmem:[%s30623_s3 + $0x540] ss:$8 sps:$4 sm:$0xff]   ;;  %v22854_v18 = vld [vmem:[%s30623_s3 + $0x554] ss:$8 sps:$4 sm:$0xff]  }
 0x387   : > { %4215 = vmatprep.subr.bf16.mxu0 %v22725_v23  ;;  %v22791_v23 = vld [vmem:[%s30623_s3 + $0x404] ss:$8 sps:$4 sm:$0xff]  }
 0x38a   : > { %4216 = vmatpush1.bf16.msra.mxu0 %v22723_v24  ;;  %v4431_v24 = vcombine.low %v4420_v19, %v4422_v21  ;;  %v22852_v19 = vld [vmem:[%s30623_s3 + $0x550] ss:$8 sps:$4 sm:$0xff]   ;;  %v22855_v21 = vld [vmem:[%s30623_s3 + $0x560] ss:$8 sps:$4 sm:$0xff]  }
 0x38b   : > { %4217 = vmatprep.subr.bf16.mxu0 %v22728_v25  ;;  %v22789_v25 = vld [vmem:[%s30623_s3 + $0x400] ss:$8 sps:$4 sm:$0xff]  }
 0x38e   : > { %4218 = vmatpush1.bf16.msra.mxu0 %v22726_v26  ;;  %v4435_v26 = vpack.c.bf16 %v4432_v22, %v4431_v24  ;;  %v22860_v22 = vld [vmem:[%s30623_s3 + $0x574] ss:$8 sps:$4 sm:$0xff]  }
 0x38f   : > { %4219 = vmatprep.subr.bf16.mxu0 %v22731_v27  ;;  %v22794_v27 = vld [vmem:[%s30623_s3 + $0x414] ss:$8 sps:$4 sm:$0xff]  }
 0x390   : > { %v4909_v24 = vld [vmem:[#allocation3 + $0x82] ss:$2 sm:$0xf] }
 0x392   : > { %4220 = vmatpush1.bf16.msra.mxu0 %v22729_v28  ;;  %v22792_v28 = vld [vmem:[%s30623_s3 + $0x410] ss:$8 sps:$4 sm:$0xff]  }
 0x393   : > { %4221 = vmatprep.subr.bf16.mxu0 %v22734_v31  ;;  %v22797_v31 = vld [vmem:[%s30623_s3 + $0x424] ss:$8 sps:$4 sm:$0xff]  }
 0x396   : > { %4222 = vmatpush1.bf16.msra.mxu0 %v22732_v32  ;;  %v22795_v32 = vld [vmem:[%s30623_s3 + $0x420] ss:$8 sps:$4 sm:$0xff]  }
 0x397   : > { %4223 = vmatprep.subr.bf16.mxu0 %v22737_v33  ;;  %v22800_v33 = vld [vmem:[%s30623_s3 + $0x434] ss:$8 sps:$4 sm:$0xff]  }
 0x39a   : > { %4224 = vmatpush1.bf16.msra.mxu0 %v22735_v34  ;;  %v22798_v34 = vld [vmem:[%s30623_s3 + $0x430] ss:$8 sps:$4 sm:$0xff]  }
 0x39b   : > { %4225 = vmatprep.subr.bf16.mxu0 %v22740_v35  ;;  %v22803_v35 = vld [vmem:[%s30623_s3 + $0x444] ss:$8 sps:$4 sm:$0xff]  }
 0x39e   : > { %4226 = vmatpush1.bf16.msra.mxu0 %v22738_v29  ;;  %v22809_v29 = vld [vmem:[%s30623_s3 + $0x464] ss:$8 sps:$4 sm:$0xff]  }
 0x39f   : > { %4372 = vmatprep.subr.bf16.mxu0 %v22743_v40  ;;  %v4585_v40 = vld [vmem:[#allocation3 + $0x60] ss:$2 sm:$0xf] }
 0x3a1   : > { %4244 = vmatmul.mubr.bf16.vlgmr.msra.gmra.mrb[40].mxu0 %v4113_v43  ;;  %v22810_v43 = vld [vmem:[%s30623_s3 + $0x470] ss:$8 sps:$4 sm:$0xff]  }
 0x3a2   : > { %4373 = vmatpush1.bf16.msra.mxu0 %v22741_v42  ;;  %4404 = vmatprep.mubr.bf16.mxu0 %v24646_v8  ;;  %v4581_v42 = vld [vmem:[#allocation3 + $0x20] ss:$2 sm:$0xf] }
 0x3a3   : > { %4374 = vmatprep.subr.bf16.mxu0 %v22746_v44  ;;  %v4583_v44 = vld [vmem:[#allocation3 + $0x40] ss:$2 sm:$0xf] }
 0x3a6   : > { %4375 = vmatpush1.bf16.msra.mxu0 %v22744_v45  ;;  %v4593_v45 = vcombine.low %v4585_v40, %v4587_v41  ;;  %v22873_v40 = vld [vmem:[%s30623_s3 + $0x5c0] ss:$8 sps:$4 sm:$0xff]   ;;  %v22878_v41 = vld [vmem:[%s30623_s3 + $0x5d4] ss:$8 sps:$4 sm:$0xff]  }
 0x3a7   : > { %4376 = vmatprep.subr.bf16.mxu0 %v22749_v46  ;;  %v22815_v46 = vld [vmem:[%s30623_s3 + $0x484] ss:$8 sps:$4 sm:$0xff]  }
 0x3aa   : > { %4377 = vmatpush1.bf16.msra.mxu0 %v22747_v47  ;;  %v4592_v47 = vcombine.low %v4581_v42, %v4583_v44  ;;  %v22876_v42 = vld [vmem:[%s30623_s3 + $0x5d0] ss:$8 sps:$4 sm:$0xff]   ;;  %v22879_v44 = vld [vmem:[%s30623_s3 + $0x5e0] ss:$8 sps:$4 sm:$0xff]  }
 0x3ab   : > { %4378 = vmatprep.subr.bf16.mxu0 %v22752_v48  ;;  %v22813_v48 = vld [vmem:[%s30623_s3 + $0x480] ss:$8 sps:$4 sm:$0xff]  }
 0x3ae   : > { %4379 = vmatpush1.bf16.msra.mxu0 %v22750_v49  ;;  %v4596_v49 = vpack.c.bf16 %v4593_v45, %v4592_v47  ;;  %v22884_v45 = vld [vmem:[%s30623_s3 + $0x5f4] ss:$8 sps:$4 sm:$0xff]  }
 0x3af   : > { %4380 = vmatprep.subr.bf16.mxu0 %v22755_v51  ;;  %v22818_v51 = vld [vmem:[%s30623_s3 + $0x494] ss:$8 sps:$4 sm:$0xff]  }
 0x3b0   : > { %v5070_v47 = vld [vmem:[#allocation3 + $0x83] ss:$2 sm:$0xf] }
 0x3b2   : > { %4381 = vmatpush1.bf16.msra.mxu0 %v22753_v52  ;;  %v22816_v52 = vld [vmem:[%s30623_s3 + $0x490] ss:$8 sps:$4 sm:$0xff]  }
 0x3b3   : > { %4382 = vmatprep.subr.bf16.mxu0 %v22758_v53  ;;  %v22821_v53 = vld [vmem:[%s30623_s3 + $0x4a4] ss:$8 sps:$4 sm:$0xff]  }
 0x3b6   : > { %4383 = vmatpush1.bf16.msra.mxu0 %v22756_v54  ;;  %v22819_v54 = vld [vmem:[%s30623_s3 + $0x4a0] ss:$8 sps:$4 sm:$0xff]  }
 0x3b7   : > { %4384 = vmatprep.subr.bf16.mxu0 %v22761_v55  ;;  %v22824_v55 = vld [vmem:[%s30623_s3 + $0x4b4] ss:$8 sps:$4 sm:$0xff]  }
 0x3ba   : > { %4385 = vmatpush1.bf16.msra.mxu0 %v22759_v56  ;;  %v22822_v56 = vld [vmem:[%s30623_s3 + $0x4b0] ss:$8 sps:$4 sm:$0xff]  }
 0x3bb   : > { %4386 = vmatprep.subr.bf16.mxu0 %v22764_v50  ;;  %v22827_v50 = vld [vmem:[%s30623_s3 + $0x4c4] ss:$8 sps:$4 sm:$0xff]  }
 0x3be   : > { %4387 = vmatpush1.bf16.msra.mxu0 %v22762_v60  ;;  %v22833_v60 = vld [vmem:[%s30623_s3 + $0x4e4] ss:$8 sps:$4 sm:$0xff]  }
 0x3bf   : > { %4533 = vmatprep.subr.bf16.mxu0 %v22767_v63  ;;  %v4746_v63 = vld [vmem:[#allocation3 + $0x61] ss:$2 sm:$0xf] }
 0x3c1   : > { %4405 = vmatmul.mubr.bf16.vlgmr.msra.gmra.mrb[40].mxu0 %v4274_v2  ;;  %v22834_v2 = vld [vmem:[%s30623_s3 + $0x4f0] ss:$8 sps:$4 sm:$0xff]  }
 0x3c2   : > { %4534 = vmatpush1.bf16.msra.mxu0 %v22765_v1  ;;  %4565 = vmatprep.mubr.bf16.mxu0 %v24646_v8  ;;  %v4742_v1 = vld [vmem:[#allocation3 + $0x21] ss:$2 sm:$0xf] }
 0x3c3   : > { %4535 = vmatprep.subr.bf16.mxu0 %v22770_v3  ;;  %v4744_v3 = vld [vmem:[#allocation3 + $0x41] ss:$2 sm:$0xf] }
 0x3c6   : > { %4536 = vmatpush1.bf16.msra.mxu0 %v22768_v4  ;;  %v4754_v4 = vcombine.low %v4746_v63, %v4748_v0  ;;  %v22992_v63 = vld [vmem:[%s30624_s4 + $0xc2c] ss:$16 sps:$4 sm:$0xff]  }
 0x3c7   : > { %4537 = vmatprep.subr.bf16.mxu0 %v22773_v5  ;;  %v22839_v5 = vld [vmem:[%s30623_s3 + $0x504] ss:$8 sps:$4 sm:$0xff]   ;;  %v22896_v0 = vld [vmem:[%s30623_s3 + $0x634] ss:$8 sps:$4 sm:$0xff]  }
 0x3ca   : > { %4538 = vmatpush1.bf16.msra.mxu0 %v22771_v6  ;;  %v4753_v6 = vcombine.low %v4742_v1, %v4744_v3  ;;  %v22894_v1 = vld [vmem:[%s30623_s3 + $0x630] ss:$8 sps:$4 sm:$0xff]   ;;  %v22998_v3 = vld [vmem:[%s30624_s4 + $0xc4c] ss:$16 sps:$4 sm:$0xff]  }
 0x3cb   : > { %4539 = vmatprep.subr.bf16.mxu0 %v22776_v7  ;;  %v22837_v7 = vld [vmem:[%s30623_s3 + $0x500] ss:$8 sps:$4 sm:$0xff]  }
 0x3ce   : > { %4540 = vmatpush1.bf16.msra.mxu0 %v22774_v9  ;;  %v4757_v9 = vpack.c.bf16 %v4754_v4, %v4753_v6  ;;  %v22899_v4 = vld [vmem:[%s30623_s3 + $0x644] ss:$8 sps:$4 sm:$0xff]   ;;  %v23002_v6 = vld [vmem:[%s30624_s4 + $0xc68] ss:$16 sps:$4 sm:$0xff]  }
 0x3cf   : > { %4541 = vmatprep.subr.bf16.mxu0 %v22779_v10  ;;  %v22842_v10 = vld [vmem:[%s30623_s3 + $0x514] ss:$8 sps:$4 sm:$0xff]  }
 0x3d2   : > { %4542 = vmatpush1.bf16.msra.mxu0 %v22777_v11  ;;  %v22840_v11 = vld [vmem:[%s30623_s3 + $0x510] ss:$8 sps:$4 sm:$0xff]  }
 0x3d3   : > { %4543 = vmatprep.subr.bf16.mxu0 %v22782_v12  ;;  %v22845_v12 = vld [vmem:[%s30623_s3 + $0x524] ss:$8 sps:$4 sm:$0xff]  }
 0x3d6   : > { %4544 = vmatpush1.bf16.msra.mxu0 %v22780_v13  ;;  %v22843_v13 = vld [vmem:[%s30623_s3 + $0x520] ss:$8 sps:$4 sm:$0xff]  }
 0x3d7   : > { %4545 = vmatprep.subr.bf16.mxu0 %v22785_v14  ;;  %v22848_v14 = vld [vmem:[%s30623_s3 + $0x534] ss:$8 sps:$4 sm:$0xff]  }
 0x3da   : > { %4546 = vmatpush1.bf16.msra.mxu0 %v22783_v15  ;;  %v22846_v15 = vld [vmem:[%s30623_s3 + $0x530] ss:$8 sps:$4 sm:$0xff]  }
 0x3db   : > { %4547 = vmatprep.subr.bf16.mxu0 %v22788_v16  ;;  %v22851_v16 = vld [vmem:[%s30623_s3 + $0x544] ss:$8 sps:$4 sm:$0xff]  }
 0x3de   : > { %4548 = vmatpush1.bf16.msra.mxu0 %v22786_v20  ;;  %v22857_v20 = vld [vmem:[%s30623_s3 + $0x564] ss:$8 sps:$4 sm:$0xff]  }
 0x3df   : > { %4694 = vmatprep.subr.bf16.mxu0 %v22791_v23  ;;  %v4907_v23 = vld [vmem:[#allocation3 + $0x62] ss:$2 sm:$0xf] }
 0x3e1   : > { %4566 = vmatmul.mubr.bf16.vlgmr.msra.gmra.mrb[40].mxu0 %v4435_v26  ;;  %v22858_v26 = vld [vmem:[%s30623_s3 + $0x570] ss:$8 sps:$4 sm:$0xff]  }
 0x3e2   : > { %4695 = vmatpush1.bf16.msra.mxu0 %v22789_v25  ;;  %4726 = vmatprep.mubr.bf16.mxu0 %v24646_v8  ;;  %v4903_v25 = vld [vmem:[#allocation3 + $0x22] ss:$2 sm:$0xf] }
 0x3e3   : > { %4696 = vmatprep.subr.bf16.mxu0 %v22794_v27  ;;  %v4905_v27 = vld [vmem:[#allocation3 + $0x42] ss:$2 sm:$0xf] }
 0x3e6   : > { %4697 = vmatpush1.bf16.msra.mxu0 %v22792_v28  ;;  %v4915_v28 = vcombine.low %v4907_v23, %v4909_v24 }
 0x3e7   : > { %4698 = vmatprep.subr.bf16.mxu0 %v22797_v31  ;;  %v22863_v31 = vld [vmem:[%s30623_s3 + $0x584] ss:$8 sps:$4 sm:$0xff]  }
 0x3ea   : > { %4699 = vmatpush1.bf16.msra.mxu0 %v22795_v32  ;;  %v4914_v32 = vcombine.low %v4903_v25, %v4905_v27  ;;  %v22911_v25 = vld [vmem:[%s30623_s3 + $0x684] ss:$8 sps:$4 sm:$0xff]  }
 0x3eb   : > { %4700 = vmatprep.subr.bf16.mxu0 %v22800_v33  ;;  %v22861_v33 = vld [vmem:[%s30623_s3 + $0x580] ss:$8 sps:$4 sm:$0xff]  }
 0x3ee   : > { %4701 = vmatpush1.bf16.msra.mxu0 %v22798_v34  ;;  %v4918_v34 = vpack.c.bf16 %v4915_v28, %v4914_v32  ;;  %v22914_v28 = vld [vmem:[%s30623_s3 + $0x694] ss:$8 sps:$4 sm:$0xff]   ;;  %v22917_v32 = vld [vmem:[%s30623_s3 + $0x6a4] ss:$8 sps:$4 sm:$0xff]  }
 0x3ef   : > { %4702 = vmatprep.subr.bf16.mxu0 %v22803_v35  ;;  %v22866_v35 = vld [vmem:[%s30623_s3 + $0x594] ss:$8 sps:$4 sm:$0xff]  }
 0x3f2   : > { %4703 = vmatpush1.bf16.msra.mxu0 %v22801_v36  ;;  %v22864_v36 = vld [vmem:[%s30623_s3 + $0x590] ss:$8 sps:$4 sm:$0xff]  }
 0x3f3   : > { %4704 = vmatprep.subr.bf16.mxu0 %v22806_v37  ;;  %v22869_v37 = vld [vmem:[%s30623_s3 + $0x5a4] ss:$8 sps:$4 sm:$0xff]  }
 0x3f6   : > { %4705 = vmatpush1.bf16.msra.mxu0 %v22804_v38  ;;  %v22867_v38 = vld [vmem:[%s30623_s3 + $0x5a0] ss:$8 sps:$4 sm:$0xff]  }
 0x3f7   : > { %4706 = vmatprep.subr.bf16.mxu0 %v22809_v29  ;;  %v22872_v29 = vld [vmem:[%s30623_s3 + $0x5b4] ss:$8 sps:$4 sm:$0xff]  }
 0x3fa   : > { %4707 = vmatpush1.bf16.msra.mxu0 %v22807_v39  ;;  %v22870_v39 = vld [vmem:[%s30623_s3 + $0x5b0] ss:$8 sps:$4 sm:$0xff]  }
 0x3fb   : > { %4708 = vmatprep.subr.bf16.mxu0 %v22812_v30  ;;  %v22875_v30 = vld [vmem:[%s30623_s3 + $0x5c4] ss:$8 sps:$4 sm:$0xff]  }
 0x3fe   : > { %4709 = vmatpush1.bf16.msra.mxu0 %v22810_v43  ;;  %v22881_v43 = vld [vmem:[%s30623_s3 + $0x5e4] ss:$8 sps:$4 sm:$0xff]  }
 0x3ff   : > { %4855 = vmatprep.subr.bf16.mxu0 %v22815_v46  ;;  %v5068_v46 = vld [vmem:[#allocation3 + $0x63] ss:$2 sm:$0xf] }
 0x401   : > { %4727 = vmatmul.mubr.bf16.vlgmr.msra.gmra.mrb[40].mxu0 %v4596_v49  ;;  %v22882_v49 = vld [vmem:[%s30623_s3 + $0x5f0] ss:$8 sps:$4 sm:$0xff]  }
 0x402   : > { %4856 = vmatpush1.bf16.msra.mxu0 %v22813_v48  ;;  %4887 = vmatprep.mubr.bf16.mxu0 %v24646_v8  ;;  %v5064_v48 = vld [vmem:[#allocation3 + $0x23] ss:$2 sm:$0xf] }
 0x403   : > { %4857 = vmatprep.subr.bf16.mxu0 %v22818_v51  ;;  %v5066_v51 = vld [vmem:[#allocation3 + $0x43] ss:$2 sm:$0xf] }
 0x406   : > { %4858 = vmatpush1.bf16.msra.mxu0 %v22816_v52  ;;  %v5076_v52 = vcombine.low %v5068_v46, %v5070_v47 }
 0x407   : > { %4859 = vmatprep.subr.bf16.mxu0 %v22821_v53  ;;  %v22887_v53 = vld [vmem:[%s30623_s3 + $0x604] ss:$8 sps:$4 sm:$0xff]  }
 0x40a   : > { %4860 = vmatpush1.bf16.msra.mxu0 %v22819_v54  ;;  %v5075_v54 = vcombine.low %v5064_v48, %v5066_v51  ;;  %v22935_v48 = vld [vmem:[%s30623_s3 + $0x704] ss:$8 sps:$4 sm:$0xff]  }
 0x40b   : > { %4861 = vmatprep.subr.bf16.mxu0 %v22824_v55  ;;  %v22885_v55 = vld [vmem:[%s30623_s3 + $0x600] ss:$8 sps:$4 sm:$0xff]  }
 0x40e   : > { %4862 = vmatpush1.bf16.msra.mxu0 %v22822_v56  ;;  %v5079_v56 = vpack.c.bf16 %v5076_v52, %v5075_v54  ;;  %v22938_v52 = vld [vmem:[%s30623_s3 + $0x714] ss:$8 sps:$4 sm:$0xff]   ;;  %v22941_v54 = vld [vmem:[%s30623_s3 + $0x724] ss:$8 sps:$4 sm:$0xff]  }
 0x40f   : > { %4863 = vmatprep.subr.bf16.mxu0 %v22827_v50  ;;  %v22890_v50 = vld [vmem:[%s30623_s3 + $0x614] ss:$8 sps:$4 sm:$0xff]  }
 0x412   : > { %4864 = vmatpush1.bf16.msra.mxu0 %v22825_v57  ;;  %v22888_v57 = vld [vmem:[%s30623_s3 + $0x610] ss:$8 sps:$4 sm:$0xff]  }
 0x413   : > { %4865 = vmatprep.subr.bf16.mxu0 %v22830_v58  ;;  %v22984_v58 = vld [vmem:[%s30624_s4 + $0xc08] ss:$16 sps:$4 sm:$0xff]  }
 0x416   : > { %4866 = vmatpush1.bf16.msra.mxu0 %v22828_v59  ;;  %v22986_v59 = vld [vmem:[%s30624_s4 + $0xc0c] ss:$16 sps:$4 sm:$0xff]  }
 0x417   : > { %4867 = vmatprep.subr.bf16.mxu0 %v22833_v60  ;;  %v22893_v60 = vld [vmem:[%s30623_s3 + $0x624] ss:$8 sps:$4 sm:$0xff]   ;;  %10206 = vmatprep.subr.bf16.mxu1 %v22986_v59  ;;  %v22950_v59 = vld [vmem:[%s30623_s3 + $0x754] ss:$8 sps:$4 sm:$0xff]  }
 0x418   : > { %10207 = vmatpush1.bf16.msra.mxu1 %v22984_v58  ;;  %v22945_v58 = vld [vmem:[%s30623_s3 + $0x740] ss:$8 sps:$4 sm:$0xff]  }
 0x419   : > { %10208 = vmatprep.subr.bf16.mxu1 %v22992_v63  ;;  %v22956_v63 = vld [vmem:[%s30623_s3 + $0x774] ss:$8 sps:$4 sm:$0xff]  }
 0x41a   : > { %4868 = vmatpush1.bf16.msra.mxu0 %v22831_v61  ;;  %v22891_v61 = vld [vmem:[%s30623_s3 + $0x620] ss:$8 sps:$4 sm:$0xff]  }
 0x41b   : > { %4869 = vmatprep.subr.bf16.mxu0 %v22836_v62  ;;  %v22990_v62 = vld [vmem:[%s30624_s4 + $0xc28] ss:$16 sps:$4 sm:$0xff]  }
 0x41c   : > { %10209 = vmatpush1.bf16.msra.mxu1 %v22990_v62  ;;  %v22951_v62 = vld [vmem:[%s30623_s3 + $0x760] ss:$8 sps:$4 sm:$0xff]  }
 0x41d   : > { %10210 = vmatprep.subr.bf16.mxu1 %v22998_v3  ;;  %v22954_v3 = vld [vmem:[%s30623_s3 + $0x770] ss:$8 sps:$4 sm:$0xff]  }
 0x41e   : > { %4870 = vmatpush1.bf16.msra.mxu0 %v22834_v2  ;;  %v22996_v2 = vld [vmem:[%s30624_s4 + $0xc48] ss:$16 sps:$4 sm:$0xff]  }
 0x41f   : > { %5016 = vmatprep.subr.bf16.mxu0 %v22839_v5  ;;  %v22897_v5 = vld [vmem:[%s30623_s3 + $0x640] ss:$8 sps:$4 sm:$0xff]  }
 0x420   : > { %10211 = vmatpush1.bf16.msra.mxu1 %v22996_v2  ;;  %v5551_v2 = vld [vmem:[#allocation3 + $0x72] ss:$2 sm:$0xf] }
 0x421   : > { %4888 = vmatmul.mubr.bf16.vlgmr.msra.gmra.mrb[40].mxu0 %v4757_v9  ;;  %v22902_v9 = vld [vmem:[%s30623_s3 + $0x654] ss:$8 sps:$4 sm:$0xff]  }
 0x422   : > { %5017 = vmatpush1.bf16.msra.mxu0 %v22837_v7  ;;  %5048 = vmatprep.mubr.bf16.mxu0 %v24646_v8  ;;  %v23004_v7 = vld [vmem:[%s30624_s4 + $0xc6c] ss:$16 sps:$4 sm:$0xff]  }
 0x423   : > { %5018 = vmatprep.subr.bf16.mxu0 %v22842_v10  ;;  %10212 = vmatprep.subr.bf16.mxu1 %v23004_v7  ;;  %v22900_v10 = vld [vmem:[%s30623_s3 + $0x650] ss:$8 sps:$4 sm:$0xff]   ;;  %v22959_v7 = vld [vmem:[%s30623_s3 + $0x784] ss:$8 sps:$4 sm:$0xff]  }
 0x424   : > { %10213 = vmatpush1.bf16.msra.mxu1 %v23002_v6 }
 0x426   : > { %5019 = vmatpush1.bf16.msra.mxu0 %v22840_v11  ;;  %v23008_v11 = vld [vmem:[%s30624_s4 + $0xc88] ss:$16 sps:$4 sm:$0xff]  }
 0x427   : > { %5020 = vmatprep.subr.bf16.mxu0 %v22845_v12  ;;  %v23010_v12 = vld [vmem:[%s30624_s4 + $0xc8c] ss:$16 sps:$4 sm:$0xff]  }
 0x428   : > { %10214 = vmatprep.subr.bf16.mxu1 %v23010_v12  ;;  %v22960_v12 = vld [vmem:[%s30623_s3 + $0x790] ss:$8 sps:$4 sm:$0xff]  }
 0x429   : > { %10215 = vmatpush1.bf16.msra.mxu1 %v23008_v11  ;;  %v22962_v11 = vld [vmem:[%s30623_s3 + $0x794] ss:$8 sps:$4 sm:$0xff]  }
 0x42a   : > { %5021 = vmatpush1.bf16.msra.mxu0 %v22843_v13  ;;  %v22905_v13 = vld [vmem:[%s30623_s3 + $0x664] ss:$8 sps:$4 sm:$0xff]  }
 0x42b   : > { %5022 = vmatprep.subr.bf16.mxu0 %v22848_v14  ;;  %v22903_v14 = vld [vmem:[%s30623_s3 + $0x660] ss:$8 sps:$4 sm:$0xff]  }
 0x42e   : > { %5023 = vmatpush1.bf16.msra.mxu0 %v22846_v15  ;;  %v23014_v15 = vld [vmem:[%s30624_s4 + $0xca8] ss:$16 sps:$4 sm:$0xff]  }
 0x42f   : > { %5024 = vmatprep.subr.bf16.mxu0 %v22851_v16  ;;  %v23016_v16 = vld [vmem:[%s30624_s4 + $0xcac] ss:$16 sps:$4 sm:$0xff]  }
 0x430   : > { %10216 = vmatprep.subr.bf16.mxu1 %v23016_v16  ;;  %v22971_v16 = vld [vmem:[%s30623_s3 + $0x7c4] ss:$8 sps:$4 sm:$0xff]  }
 0x431   : > { %10217 = vmatpush1.bf16.msra.mxu1 %v23014_v15  ;;  %v22968_v15 = vld [vmem:[%s30623_s3 + $0x7b4] ss:$8 sps:$4 sm:$0xff]  }
 0x432   : > { %5025 = vmatpush1.bf16.msra.mxu0 %v22849_v17  ;;  %v22908_v17 = vld [vmem:[%s30623_s3 + $0x674] ss:$8 sps:$4 sm:$0xff]  }
 0x433   : > { %5026 = vmatprep.subr.bf16.mxu0 %v22854_v18  ;;  %v5231_v18 = vld [vmem:[#allocation3 + $0x90] ss:$2 sm:$0xf] }
 0x436   : > { %5027 = vmatpush1.bf16.msra.mxu0 %v22852_v19  ;;  %v5227_v19 = vld [vmem:[#allocation3 + $0x50] ss:$2 sm:$0xf] }
 0x437   : > { %5028 = vmatprep.subr.bf16.mxu0 %v22857_v20  ;;  %v5229_v20 = vld [vmem:[#allocation3 + $0x70] ss:$2 sm:$0xf] }
 0x438   : > { %v5237_v24 = vcombine.low %v5229_v20, %v5231_v18  ;;  %v22974_v18 = vld [vmem:[%s30623_s3 + $0x7d4] ss:$8 sps:$4 sm:$0xff]   ;;  %v22977_v20 = vld [vmem:[%s30623_s3 + $0x7e4] ss:$8 sps:$4 sm:$0xff]  }
 0x43a   : > { %5029 = vmatpush1.bf16.msra.mxu0 %v22855_v21  ;;  %v22906_v21 = vld [vmem:[%s30623_s3 + $0x670] ss:$8 sps:$4 sm:$0xff]  }
 0x43b   : > { %5030 = vmatprep.subr.bf16.mxu0 %v22860_v22  ;;  %v5225_v22 = vld [vmem:[#allocation3 + $0x30] ss:$2 sm:$0xf] }
 0x43c   : > { %v5236_v23 = vcombine.low %v5225_v22, %v5227_v19  ;;  %v22972_v19 = vld [vmem:[%s30623_s3 + $0x7d0] ss:$8 sps:$4 sm:$0xff]   ;;  %v22980_v22 = vld [vmem:[%s30623_s3 + $0x7f4] ss:$8 sps:$4 sm:$0xff]  }
 0x43e   : > { %5031 = vmatpush1.bf16.msra.mxu0 %v22858_v26  ;;  %v22909_v26 = vld [vmem:[%s30623_s3 + $0x680] ss:$8 sps:$4 sm:$0xff]   ;;  %v5240_v27 = vpack.c.bf16 %v5237_v24, %v5236_v23 }
 0x43f   : > { %5177 = vmatprep.subr.bf16.mxu0 %v22863_v31  ;;  %v22912_v31 = vld [vmem:[%s30623_s3 + $0x690] ss:$8 sps:$4 sm:$0xff]   ;;  %v5714_v23 = vld [vmem:[#allocation3 + $0x93] ss:$2 sm:$0xf] }
 0x440   : > { %v5710_v24 = vld [vmem:[#allocation3 + $0x53] ss:$2 sm:$0xf] }
 0x441   : > { %5049 = vmatmul.mubr.bf16.vlgmr.msra.gmra.mrb[40].mxu0 %v4918_v34  ;;  %v22920_v34 = vld [vmem:[%s30623_s3 + $0x6b4] ss:$8 sps:$4 sm:$0xff]  }
 0x442   : > { %5178 = vmatpush1.bf16.msra.mxu0 %v22861_v33  ;;  %5209 = vmatprep.mubr.bf16.mxu0 %v24646_v8  ;;  %v22915_v33 = vld [vmem:[%s30623_s3 + $0x6a0] ss:$8 sps:$4 sm:$0xff]  }
 0x443   : > { %5179 = vmatprep.subr.bf16.mxu0 %v22866_v35  ;;  %v22918_v35 = vld [vmem:[%s30623_s3 + $0x6b0] ss:$8 sps:$4 sm:$0xff]  }
 0x446   : > { %5180 = vmatpush1.bf16.msra.mxu0 %v22864_v36  ;;  %v22923_v36 = vld [vmem:[%s30623_s3 + $0x6c4] ss:$8 sps:$4 sm:$0xff]  }
 0x447   : > { %5181 = vmatprep.subr.bf16.mxu0 %v22869_v37  ;;  %v22921_v37 = vld [vmem:[%s30623_s3 + $0x6c0] ss:$8 sps:$4 sm:$0xff]  }
 0x44a   : > { %5182 = vmatpush1.bf16.msra.mxu0 %v22867_v38  ;;  %v22926_v38 = vld [vmem:[%s30623_s3 + $0x6d4] ss:$8 sps:$4 sm:$0xff]  }
 0x44b   : > { %5183 = vmatprep.subr.bf16.mxu0 %v22872_v29  ;;  %v22924_v29 = vld [vmem:[%s30623_s3 + $0x6d0] ss:$8 sps:$4 sm:$0xff]  }
 0x44e   : > { %5184 = vmatpush1.bf16.msra.mxu0 %v22870_v39  ;;  %v22929_v39 = vld [vmem:[%s30623_s3 + $0x6e4] ss:$8 sps:$4 sm:$0xff]  }
 0x44f   : > { %5185 = vmatprep.subr.bf16.mxu0 %v22875_v30  ;;  %v22927_v30 = vld [vmem:[%s30623_s3 + $0x6e0] ss:$8 sps:$4 sm:$0xff]  }
 0x452   : > { %5186 = vmatpush1.bf16.msra.mxu0 %v22873_v40  ;;  %v22932_v40 = vld [vmem:[%s30623_s3 + $0x6f4] ss:$8 sps:$4 sm:$0xff]  }
 0x453   : > { %5187 = vmatprep.subr.bf16.mxu0 %v22878_v41  ;;  %v5392_v41 = vld [vmem:[#allocation3 + $0x91] ss:$2 sm:$0xf] }
 0x456   : > { %5188 = vmatpush1.bf16.msra.mxu0 %v22876_v42  ;;  %v5388_v42 = vld [vmem:[#allocation3 + $0x51] ss:$2 sm:$0xf] }
 0x457   : > { %5189 = vmatprep.subr.bf16.mxu0 %v22881_v43  ;;  %v5390_v43 = vld [vmem:[#allocation3 + $0x71] ss:$2 sm:$0xf] }
 0x458   : > { %v5398_v47 = vcombine.low %v5390_v43, %v5392_v41  ;;  %v23013_v41 = vld [vmem:[%s30624_s4 + $0x2a4] ss:$16 sps:$4 sm:$0xff]   ;;  %v23017_v43 = vld [vmem:[%s30624_s4 + $0x2c0] ss:$16 sps:$4 sm:$0xff]  }
 0x45a   : > { %5190 = vmatpush1.bf16.msra.mxu0 %v22879_v44  ;;  %v22930_v44 = vld [vmem:[%s30623_s3 + $0x6f0] ss:$8 sps:$4 sm:$0xff]  }
 0x45b   : > { %5191 = vmatprep.subr.bf16.mxu0 %v22884_v45  ;;  %v5386_v45 = vld [vmem:[#allocation3 + $0x31] ss:$2 sm:$0xf] }
 0x45c   : > { %v5397_v46 = vcombine.low %v5386_v45, %v5388_v42  ;;  %v23011_v42 = vld [vmem:[%s30624_s4 + $0x2a0] ss:$16 sps:$4 sm:$0xff]  }
 0x45d   : > { %v529_v45 = vld [vmem:[#allocation5] sm:$0x77] }
 0x45e   : > { %5192 = vmatpush1.bf16.msra.mxu0 %v22882_v49  ;;  %v22933_v49 = vld [vmem:[%s30623_s3 + $0x700] ss:$8 sps:$4 sm:$0xff]   ;;  %v5401_v51 = vpack.c.bf16 %v5398_v47, %v5397_v46 }
 0x45f   : > { %5338 = vmatprep.subr.bf16.mxu0 %v22887_v53  ;;  %v22936_v53 = vld [vmem:[%s30623_s3 + $0x710] ss:$8 sps:$4 sm:$0xff]   ;;  %v532_v46 = vld [vmem:[#allocation5 + $0x8] sm:$0x77]  ;;  %v553_v47 = vld [vmem:[#allocation5 + $0x40] sm:$0x77] }
 0x461   : > { %5210 = vmatmul.mubr.bf16.vlgmr.msra.gmra.mrb[40].mxu0 %v5079_v56  ;;  %v22944_v56 = vld [vmem:[%s30623_s3 + $0x734] ss:$8 sps:$4 sm:$0xff]  }
 0x462   : > { %5339 = vmatpush1.bf16.msra.mxu0 %v22885_v55  ;;  %5370 = vmatprep.mubr.bf16.mxu0 %v24646_v8  ;;  %v22939_v55 = vld [vmem:[%s30623_s3 + $0x720] ss:$8 sps:$4 sm:$0xff]  }
 0x463   : > { %5340 = vmatprep.subr.bf16.mxu0 %v22890_v50  ;;  %v22942_v50 = vld [vmem:[%s30623_s3 + $0x730] ss:$8 sps:$4 sm:$0xff]  }
 0x466   : > { %5341 = vmatpush1.bf16.msra.mxu0 %v22888_v57  ;;  %v22947_v57 = vld [vmem:[%s30623_s3 + $0x744] ss:$8 sps:$4 sm:$0xff]  }
 0x467   : > { %5342 = vmatprep.subr.bf16.mxu0 %v22893_v60  ;;  %v22948_v60 = vld [vmem:[%s30623_s3 + $0x750] ss:$8 sps:$4 sm:$0xff]  }
 0x46a   : > { %5343 = vmatpush1.bf16.msra.mxu0 %v22891_v61  ;;  %v22953_v61 = vld [vmem:[%s30623_s3 + $0x764] ss:$8 sps:$4 sm:$0xff]  }
 0x46b   : > { %5344 = vmatprep.subr.bf16.mxu0 %v22896_v0  ;;  %v5553_v0 = vld [vmem:[#allocation3 + $0x92] ss:$2 sm:$0xf] }
 0x46c   : > { %v5559_v6 = vcombine.low %v5551_v2, %v5553_v0  ;;  %v23037_v0 = vld [vmem:[%s30624_s4 + $0x324] ss:$16 sps:$4 sm:$0xff]   ;;  %v23040_v2 = vld [vmem:[%s30624_s4 + $0xd2c] ss:$16 sps:$4 sm:$0xff]  }
 0x46e   : > { %5345 = vmatpush1.bf16.msra.mxu0 %v22894_v1  ;;  %v5549_v1 = vld [vmem:[#allocation3 + $0x52] ss:$2 sm:$0xf] }
 0x46f   : > { %5346 = vmatprep.subr.bf16.mxu0 %v22899_v4  ;;  %v5547_v4 = vld [vmem:[#allocation3 + $0x32] ss:$2 sm:$0xf] }
 0x472   : > { %5347 = vmatpush1.bf16.msra.mxu0 %v22897_v5  ;;  %v5558_v5 = vcombine.low %v5547_v4, %v5549_v1  ;;  %v23032_v1 = vld [vmem:[%s30624_s4 + $0xd08] ss:$16 sps:$4 sm:$0xff]   ;;  %v23043_v4 = vld [vmem:[%s30624_s4 + $0x344] ss:$16 sps:$4 sm:$0xff]  }
 0x473   : > { %5348 = vmatprep.subr.bf16.mxu0 %v22902_v9  ;;  %v22957_v9 = vld [vmem:[%s30623_s3 + $0x780] ss:$8 sps:$4 sm:$0xff]  }
 0x476   : > { %5349 = vmatpush1.bf16.msra.mxu0 %v22900_v10  ;;  %v5562_v10 = vpack.c.bf16 %v5559_v6, %v5558_v5  ;;  %v23038_v5 = vld [vmem:[%s30624_s4 + $0xd28] ss:$16 sps:$4 sm:$0xff]   ;;  %v23046_v6 = vld [vmem:[%s30624_s4 + $0xd4c] ss:$16 sps:$4 sm:$0xff]  }
 0x477   : > { %5350 = vmatprep.subr.bf16.mxu0 %v22905_v13  ;;  %v22965_v13 = vld [vmem:[%s30623_s3 + $0x7a4] ss:$8 sps:$4 sm:$0xff]  }
 0x47a   : > { %5351 = vmatpush1.bf16.msra.mxu0 %v22903_v14  ;;  %v22963_v14 = vld [vmem:[%s30623_s3 + $0x7a0] ss:$8 sps:$4 sm:$0xff]  }
 0x47b   : > { %5352 = vmatprep.subr.bf16.mxu0 %v22908_v17  ;;  %v22969_v17 = vld [vmem:[%s30623_s3 + $0x7c0] ss:$8 sps:$4 sm:$0xff]  }
 0x47e   : > { %5353 = vmatpush1.bf16.msra.mxu0 %v22906_v21  ;;  %v22975_v21 = vld [vmem:[%s30623_s3 + $0x7e0] ss:$8 sps:$4 sm:$0xff]  }
 0x47f   : > { %5499 = vmatprep.subr.bf16.mxu0 %v22911_v25  ;;  %v5712_v25 = vld [vmem:[#allocation3 + $0x73] ss:$2 sm:$0xf] }
 0x481   : > { %5371 = vmatmul.mubr.bf16.vlgmr.msra.gmra.mrb[40].mxu0 %v5240_v27  ;;  %v5708_v27 = vld [vmem:[#allocation3 + $0x33] ss:$2 sm:$0xf] }
 0x482   : > { %5500 = vmatpush1.bf16.msra.mxu0 %v22909_v26  ;;  %5531 = vmatprep.mubr.bf16.mxu0 %v24646_v8  ;;  %v22978_v26 = vld [vmem:[%s30623_s3 + $0x7f0] ss:$8 sps:$4 sm:$0xff]  }
 0x483   : > { %5501 = vmatprep.subr.bf16.mxu0 %v22914_v28  ;;  %v5719_v28 = vcombine.low %v5708_v27, %v5710_v24  ;;  %v23073_v24 = vld [vmem:[%s30624_s4 + $0x3e4] ss:$16 sps:$4 sm:$0xff]   ;;  %v23071_v27 = vld [vmem:[%s30624_s4 + $0x3e0] ss:$16 sps:$4 sm:$0xff]  }
 0x486   : > { %5502 = vmatpush1.bf16.msra.mxu0 %v22912_v31  ;;  %v5720_v31 = vcombine.low %v5712_v25, %v5714_v23  ;;  %v23065_v23 = vld [vmem:[%s30624_s4 + $0x3c0] ss:$16 sps:$4 sm:$0xff]   ;;  %v23068_v25 = vld [vmem:[%s30624_s4 + $0xdc8] ss:$16 sps:$4 sm:$0xff]  }
 0x487   : > { %5503 = vmatprep.subr.bf16.mxu0 %v22917_v32  ;;  %v22983_v32 = vld [vmem:[%s30624_s4 + $0x204] ss:$16 sps:$4 sm:$0xff]  }
 0x48a   : > { %5504 = vmatpush1.bf16.msra.mxu0 %v22915_v33  ;;  %v22981_v33 = vld [vmem:[%s30624_s4 + $0x200] ss:$16 sps:$4 sm:$0xff]  }
 0x48b   : > { %5505 = vmatprep.subr.bf16.mxu0 %v22920_v34  ;;  %v5723_v34 = vpack.c.bf16 %v5720_v31, %v5719_v28  ;;  %v23079_v28 = vld [vmem:[%s30624_s4 + $0x20c] ss:$16 sps:$4 sm:$0xff]   ;;  %v23074_v31 = vld [vmem:[%s30624_s4 + $0xde8] ss:$16 sps:$4 sm:$0xff]  }
 0x48e   : > { %5506 = vmatpush1.bf16.msra.mxu0 %v22918_v35  ;;  %v22989_v35 = vld [vmem:[%s30624_s4 + $0x224] ss:$16 sps:$4 sm:$0xff]  }
 0x48f   : > { %5507 = vmatprep.subr.bf16.mxu0 %v22923_v36  ;;  %v22987_v36 = vld [vmem:[%s30624_s4 + $0x220] ss:$16 sps:$4 sm:$0xff]  }
 0x492   : > { %5508 = vmatpush1.bf16.msra.mxu0 %v22921_v37  ;;  %v22995_v37 = vld [vmem:[%s30624_s4 + $0x244] ss:$16 sps:$4 sm:$0xff]  }
 0x493   : > { %5509 = vmatprep.subr.bf16.mxu0 %v22926_v38  ;;  %v22993_v38 = vld [vmem:[%s30624_s4 + $0x240] ss:$16 sps:$4 sm:$0xff]  }
 0x496   : > { %5510 = vmatpush1.bf16.msra.mxu0 %v22924_v29  ;;  %v23001_v29 = vld [vmem:[%s30624_s4 + $0x264] ss:$16 sps:$4 sm:$0xff]  }
 0x497   : > { %5511 = vmatprep.subr.bf16.mxu0 %v22929_v39  ;;  %v22999_v39 = vld [vmem:[%s30624_s4 + $0x260] ss:$16 sps:$4 sm:$0xff]  }
 0x49a   : > { %5512 = vmatpush1.bf16.msra.mxu0 %v22927_v30  ;;  %v23007_v30 = vld [vmem:[%s30624_s4 + $0x284] ss:$16 sps:$4 sm:$0xff]  }
 0x49b   : > { %5513 = vmatprep.subr.bf16.mxu0 %v22932_v40  ;;  %v23005_v40 = vld [vmem:[%s30624_s4 + $0x280] ss:$16 sps:$4 sm:$0xff]  }
 0x49e   : > { %5514 = vmatpush1.bf16.msra.mxu0 %v22930_v44  ;;  %v23019_v44 = vld [vmem:[%s30624_s4 + $0x2c4] ss:$16 sps:$4 sm:$0xff]  }
 0x49f   : > { %5660 = vmatprep.subr.bf16.mxu0 %v22935_v48  ;;  %v556_v48 = vld [vmem:[#allocation5 + $0x48] sm:$0x77] }
 0x4a1   : > { %5532 = vmatmul.mubr.bf16.vlgmr.msra.gmra.mrb[40].mxu0 %v5401_v51  ;;  %v530_v51 = vsel %vm26220_vm2, 0, %v529_v45 }
 0x4a2   : > { %5661 = vmatpush1.bf16.msra.mxu0 %v22933_v49  ;;  %5692 = vmatprep.mubr.bf16.mxu0 %v24646_v8  ;;  %v30625_v49 = vmov 0  ;;  %531 = vst [vmem:[#allocation5] sm:$0x77] %v530_v51 }
 0x4a3   : > { %5662 = vmatprep.subr.bf16.mxu0 %v22938_v52  ;;  %v30626_v49 = vsel %vm26220_vm2, 4294967295, %v30625_v49  ;;  %v533_v52 = vsel %vm26220_vm2, 0, %v532_v46 }
 0x4a4   : > { %30627 = vst [vmem:[#allocation14_spill] sm:$0xff] %v30626_v49  ;;  %534 = vst [vmem:[#allocation5 + $0x8] sm:$0x77] %v533_v52 }
 0x4a6   : > { %5663 = vmatpush1.bf16.msra.mxu0 %v22936_v53  ;;  %v554_v53 = vsel %vm26220_vm2, 0, %v553_v47 }
 0x4a7   : > { %5664 = vmatprep.subr.bf16.mxu0 %v22941_v54  ;;  %v557_v54 = vsel %vm26220_vm2, 0, %v556_v48  ;;  %555 = vst [vmem:[#allocation5 + $0x40] sm:$0x77] %v554_v53 }
 0x4a8   : > { %558 = vst [vmem:[#allocation5 + $0x48] sm:$0x77] %v557_v54 }
 0x4aa   : > { %5665 = vmatpush1.bf16.msra.mxu0 %v22939_v55 }
 0x4ab   : > { %5666 = vmatprep.subr.bf16.mxu0 %v22944_v56  ;;  %v23020_v56 = vld [vmem:[%s30624_s4 + $0xcc8] ss:$16 sps:$4 sm:$0xff]  }
 0x4ae   : > { %5667 = vmatpush1.bf16.msra.mxu0 %v22942_v50  ;;  %v23022_v50 = vld [vmem:[%s30624_s4 + $0xccc] ss:$16 sps:$4 sm:$0xff]  }
 0x4af   : > { %5668 = vmatprep.subr.bf16.mxu0 %v22947_v57  ;;  %10218 = vmatprep.subr.bf16.mxu1 %v23022_v50  ;;  %v23023_v57 = vld [vmem:[%s30624_s4 + $0x2e0] ss:$16 sps:$4 sm:$0xff]  }
 0x4b0   : > { %10219 = vmatpush1.bf16.msra.mxu1 %v23020_v56 }
 0x4b2   : > { %5669 = vmatpush1.bf16.msra.mxu0 %v22945_v58  ;;  %v23025_v58 = vld [vmem:[%s30624_s4 + $0x2e4] ss:$16 sps:$4 sm:$0xff]  }
 0x4b3   : > { %5670 = vmatprep.subr.bf16.mxu0 %v22950_v59  ;;  %v23026_v59 = vld [vmem:[%s30624_s4 + $0xce8] ss:$16 sps:$4 sm:$0xff]  }
 0x4b6   : > { %5671 = vmatpush1.bf16.msra.mxu0 %v22948_v60  ;;  %v23028_v60 = vld [vmem:[%s30624_s4 + $0xcec] ss:$16 sps:$4 sm:$0xff]  }
 0x4b7   : > { %5672 = vmatprep.subr.bf16.mxu0 %v22953_v61  ;;  %v23031_v61 = vld [vmem:[%s30624_s4 + $0x304] ss:$16 sps:$4 sm:$0xff]   ;;  %10220 = vmatprep.subr.bf16.mxu1 %v23028_v60 }
 0x4b8   : > { %10221 = vmatpush1.bf16.msra.mxu1 %v23026_v59 }
 0x4ba   : > { %5673 = vmatpush1.bf16.msra.mxu0 %v22951_v62  ;;  %v23034_v62 = vld [vmem:[%s30624_s4 + $0xd0c] ss:$16 sps:$4 sm:$0xff]  }
 0x4bb   : > { %5674 = vmatprep.subr.bf16.mxu0 %v22956_v63  ;;  %v23029_v63 = vld [vmem:[%s30624_s4 + $0x300] ss:$16 sps:$4 sm:$0xff]   ;;  %10222 = vmatprep.subr.bf16.mxu1 %v23034_v62  ;;  %v5970_v62 = vld [vmem:[#allocation4 + $0x8] sm:$0x77] }
 0x4bc   : > { %10223 = vmatpush1.bf16.msra.mxu1 %v23032_v1 }
 0x4bd   : > { %10224 = vmatprep.subr.bf16.mxu1 %v23040_v2 }
 0x4be   : > { %5675 = vmatpush1.bf16.msra.mxu0 %v22954_v3  ;;  %v23035_v3 = vld [vmem:[%s30624_s4 + $0x320] ss:$16 sps:$4 sm:$0xff]  }
 0x4bf   : > { %5821 = vmatprep.subr.bf16.mxu0 %v22959_v7  ;;  %v23041_v7 = vld [vmem:[%s30624_s4 + $0x340] ss:$16 sps:$4 sm:$0xff]  }
 0x4c0   : > { %10225 = vmatpush1.bf16.msra.mxu1 %v23038_v5 }
 0x4c1   : > { %5693 = vmatmul.mubr.bf16.vlgmr.msra.gmra.mrb[40].mxu0 %v5562_v10  ;;  %v23044_v10 = vld [vmem:[%s30624_s4 + $0xd48] ss:$16 sps:$4 sm:$0xff]   ;;  %10226 = vmatprep.subr.bf16.mxu1 %v23046_v6  ;;  %v5973_v6 = vld [vmem:[#allocation4 + $0x10] sm:$0x77] }
 0x4c2   : > { %5822 = vmatpush1.bf16.msra.mxu0 %v22957_v9  ;;  %5853 = vmatprep.mubr.bf16.mxu0 %v24646_v8  ;;  %v22966_v8 = vld [vmem:[%s30623_s3 + $0x7b0] ss:$8 sps:$4 sm:$0xff]   ;;  %v23049_v9 = vld [vmem:[%s30624_s4 + $0x364] ss:$16 sps:$4 sm:$0xff]   ;;  %s22454_s3 = smul.u32 48, %s24777_s14 }
 0x4c3   : > { %5823 = vmatprep.subr.bf16.mxu0 %v22962_v11  ;;  %v23052_v11 = vld [vmem:[%s30624_s4 + $0xd6c] ss:$16 sps:$4 sm:$0xff]  }
 0x4c4   : > { %10227 = vmatpush1.bf16.msra.mxu1 %v23044_v10  ;;  %v19514_v10 = vld.sshfl [vmem:[#allocation4] sm:$0x55 pattern:$0x75316420]  ;;  %s30163_s24 = scalar_lea.vmem %s30593_s10, %s22454_s3  ;;  %s18370_s3 = sshll.u32 %s26361_s13, 4  ;;  %s30445_s3 = int_to_ptr.vmem [resolvable:$true] %s18370_s3 }
 0x4c5   : > { %10228 = vmatprep.subr.bf16.mxu1 %v23052_v11 }
 0x4c6   : > { %5824 = vmatpush1.bf16.msra.mxu0 %v22960_v12  ;;  %v23047_v12 = vld [vmem:[%s30624_s4 + $0x360] ss:$16 sps:$4 sm:$0xff]  }
 0x4c7   : > { %5825 = vmatprep.subr.bf16.mxu0 %v22965_v13  ;;  %v23055_v13 = vld [vmem:[%s30624_s4 + $0x384] ss:$16 sps:$4 sm:$0xff]  }
 0x4ca   : > { %5826 = vmatpush1.bf16.msra.mxu0 %v22963_v14  ;;  %v23050_v14 = vld [vmem:[%s30624_s4 + $0xd68] ss:$16 sps:$4 sm:$0xff]  }
 0x4cb   : > { %5827 = vmatprep.subr.bf16.mxu0 %v22968_v15  ;;  %v23058_v15 = vld [vmem:[%s30624_s4 + $0xd8c] ss:$16 sps:$4 sm:$0xff]   ;;  %10229 = vmatpush1.bf16.msra.mxu1 %v23050_v14 }
 0x4cc   : > { %10230 = vmatprep.subr.bf16.mxu1 %v23058_v15 }
 0x4ce   : > { %5828 = vmatpush1.bf16.msra.mxu0 %v22966_v8  ;;  %v23053_v8 = vld [vmem:[%s30624_s4 + $0x380] ss:$16 sps:$4 sm:$0xff]  }
 0x4cf   : > { %5829 = vmatprep.subr.bf16.mxu0 %v22971_v16  ;;  %v23061_v16 = vld [vmem:[%s30624_s4 + $0x3a4] ss:$16 sps:$4 sm:$0xff]  }
 0x4d2   : > { %5830 = vmatpush1.bf16.msra.mxu0 %v22969_v17  ;;  %v23056_v17 = vld [vmem:[%s30624_s4 + $0xd88] ss:$16 sps:$4 sm:$0xff]  }
 0x4d3   : > { %5831 = vmatprep.subr.bf16.mxu0 %v22974_v18  ;;  %v23064_v18 = vld [vmem:[%s30624_s4 + $0xdac] ss:$16 sps:$4 sm:$0xff]   ;;  %10231 = vmatpush1.bf16.msra.mxu1 %v23056_v17 }
 0x4d4   : > { %10232 = vmatprep.subr.bf16.mxu1 %v23064_v18 }
 0x4d6   : > { %5832 = vmatpush1.bf16.msra.mxu0 %v22972_v19  ;;  %v23059_v19 = vld [vmem:[%s30624_s4 + $0x3a0] ss:$16 sps:$4 sm:$0xff]  }
 0x4d7   : > { %5833 = vmatprep.subr.bf16.mxu0 %v22977_v20  ;;  %v23067_v20 = vld [vmem:[%s30624_s4 + $0x3c4] ss:$16 sps:$4 sm:$0xff]  }
 0x4da   : > { %5834 = vmatpush1.bf16.msra.mxu0 %v22975_v21  ;;  %v23062_v21 = vld [vmem:[%s30624_s4 + $0xda8] ss:$16 sps:$4 sm:$0xff]  }
 0x4db   : > { %5835 = vmatprep.subr.bf16.mxu0 %v22980_v22  ;;  %v23070_v22 = vld [vmem:[%s30624_s4 + $0xdcc] ss:$16 sps:$4 sm:$0xff]   ;;  %10233 = vmatpush1.bf16.msra.mxu1 %v23062_v21  ;;  %v5995_v21 = vcombine.high %v19514_v10, %v19514_v10 }
 0x4dc   : > { %10234 = vmatprep.subr.bf16.mxu1 %v23070_v22 }
 0x4de   : > { %5836 = vmatpush1.bf16.msra.mxu0 %v22978_v26  ;;  %v23076_v26 = vld [vmem:[%s30624_s4 + $0xdec] ss:$16 sps:$4 sm:$0xff]  }
 0x4df   : > { %6578 = vmatprep.subr.bf16.mxu0 %v22983_v32  ;;  %10235 = vmatpush1.bf16.msra.mxu1 %v23068_v25  ;;  %v23082_v32 = vld [vmem:[%s30624_s4 + $0xe04] ss:$16 sps:$4 sm:$0xff]  }
 0x4e0   : > { %10236 = vmatprep.subr.bf16.mxu1 %v23076_v26 }
 0x4e1   : > { %5854 = vmatmul.mubr.bf16.vlgmr.msra.gmra.mrb[40].mxu0 %v5723_v34 }
 0x4e2   : > { %6579 = vmatpush1.bf16.msra.mxu0 %v22981_v33 }
 0x4e3   : > { %6580 = vmatprep.subr.bf16.mxu0 %v22989_v35  ;;  %10237 = vmatpush1.bf16.msra.mxu1 %v23074_v31 }
 0x4e4   : > { %10789 = vmatprep.subr.bf16.mxu1 %v23082_v32 }
 0x4e6   : > { %6581 = vmatpush1.bf16.msra.mxu0 %v22987_v36 }
 0x4e7   : > { %6582 = vmatprep.subr.bf16.mxu0 %v22995_v37 }
 0x4ea   : > { %6583 = vmatpush1.bf16.msra.mxu0 %v22993_v38  ;;  %v24647_v38 = vmov 1966171168  }
 0x4eb   : > { %6584 = vmatprep.subr.bf16.mxu0 %v23001_v29  ;;  %v5997_v29 = vunpack.c.l.s4 %v24647_v38 }
 0x4ed   : > { %v5998_v52 = vunpack.c.0.s8 %v5997_v29 }
 0x4ee   : > { %6585 = vmatpush1.bf16.msra.mxu0 %v22999_v39  ;;  %v5999_v39 = vlaneseq }
 0x4ef   : > { %6586 = vmatprep.subr.bf16.mxu0 %v23007_v30 }
 0x4f0   : > { %v26359_v53 = vshrl.u32 %v5999_v39, 7 }
 0x4f2   : > { %6587 = vmatpush1.bf16.msra.mxu0 %v23005_v40  ;;  %30630 = vst [vmem:[#allocation15_spill] sm:$0xff] %v26359_v53  ;;  %v26368_v1 = vsub.s32 %v5998_v52, %v26359_v53 }
 0x4f3   : > { %6588 = vmatprep.subr.bf16.mxu0 %v23013_v41 }
 0x4f4   : > { %v26375_v22 = vrot.slane %v19514_v10, %v26368_v1  ;;  %v26382_v31 = vrot.slane %v5995_v21, %v26368_v1 }
 0x4f6   : > { %6589 = vmatpush1.bf16.msra.mxu0 %v23011_v42  ;;  %v6055_v32 = vunpack.i.h.s16 %v26375_v22  ;;  %v6127_v55 = vunpack.i.h.s16 %v26382_v31 }
 0x4f7   : > { %6590 = vmatprep.subr.bf16.mxu0 %v23019_v44 }
 0x4f8   : > { %v19581_v38 = vpack.i.b16 %v26382_v31, %v6055_v32 }
 0x4fa   : > { %6591 = vmatpush1.bf16.msra.mxu0 %v23017_v43 }
 0x4fb   : > { %6592 = vmatprep.subr.bf16.mxu0 %v23025_v58 }
 0x4fe   : > { %6593 = vmatpush1.bf16.msra.mxu0 %v23023_v57 }
 0x4ff   : > { %6594 = vmatprep.subr.bf16.mxu0 %v23031_v61 }
 0x502   : > { %6595 = vmatpush1.bf16.msra.mxu0 %v23029_v63 }
 0x503   : > { %6596 = vmatprep.subr.bf16.mxu0 %v23037_v0 }
 0x506   : > { %6597 = vmatpush1.bf16.msra.mxu0 %v23035_v3 }
 0x507   : > { %6598 = vmatprep.subr.bf16.mxu0 %v23043_v4 }
 0x50a   : > { %6599 = vmatpush1.bf16.msra.mxu0 %v23041_v7 }
 0x50b   : > { %6600 = vmatprep.subr.bf16.mxu0 %v23049_v9 }
 0x50e   : > { %6601 = vmatpush1.bf16.msra.mxu0 %v23047_v12 }
 0x50f   : > { %6602 = vmatprep.subr.bf16.mxu0 %v23055_v13  ;;  %v19713_v13 = vld.sshfl [vmem:[#allocation4] sm:$0x5a pattern:$0x75316420] }
 0x510   : > { %v7146_v25 = vcombine.high %v19713_v13, %v19713_v13 }
 0x512   : > { %6603 = vmatpush1.bf16.msra.mxu0 %v23053_v8 }
 0x513   : > { %6604 = vmatprep.subr.bf16.mxu0 %v23061_v16 }
 0x516   : > { %6605 = vmatpush1.bf16.msra.mxu0 %v23059_v19  ;;  %v5976_v19 = vld [vmem:[#allocation4 + $0x18] sm:$0x77] }
 0x517   : > { %6606 = vmatprep.subr.bf16.mxu0 %v23067_v20  ;;  %v5979_v20 = vld [vmem:[#allocation4 + $0x20] sm:$0x77] }
 0x51a   : > { %6607 = vmatpush1.bf16.msra.mxu0 %v23065_v23 }
 0x51b   : > { %6608 = vmatprep.subr.bf16.mxu0 %v23073_v24 }
 0x51e   : > { %6609 = vmatpush1.bf16.msra.mxu0 %v23071_v27 }
 0x51f   : > { %6621 = vmatprep.subr.bf16.mxu0 %v23079_v28  ;;  %v21045_v28 = vld.sshfl [vmem:[#allocation4 + $0x28] sm:$0x55 pattern:$0x75316420] }
 0x5b4   : > { %v5855_v33 = vpop.f32.mrb[40].mxu0 }
 0x5b5   : > { %vm5868_vm7 = vcmp.ge.f32.partialorder %v5855_v33, 0.0  ;;  %v5872_v34 = vmul.f32 0.2, %v5855_v33  ;;  %v5857_v35 = vpop.f32.mrb[41].mxu0 }
 0x5b6   : > { %vm5869_vm8 = vcmp.ge.f32.partialorder %v5857_v35, 0.0  ;;  %v5873_v36 = vmul.f32 0.2, %v5857_v35  ;;  %v5859_v37 = vpop.f32.mrb[42].mxu0 }
 0x5b7   : > { %v5876_v30 = vsel %vm5868_vm7, %v5855_v33, %v5872_v34  ;;  %vm5870_vm9 = vcmp.ge.f32.partialorder %v5859_v37, 0.0  ;;  %v5874_v40 = vmul.f32 0.2, %v5859_v37  ;;  %v5861_v41 = vpop.f32.mrb[43].mxu0  ;;  %v7153_v33 = vrot.slane %v19713_v13, %v26368_v1 }
 0x5b8   : > { %v5877_v42 = vsel %vm5869_vm8, %v5857_v35, %v5873_v36  ;;  %vm5871_vm10 = vcmp.ge.f32.partialorder %v5861_v41, 0.0  ;;  %v5875_v43 = vmul.f32 0.2, %v5861_v41  ;;  %v26387_v34 = vrot.slane %v7146_v25, %v26368_v1 }
 0x5b9   : > { %v5884_v44 = vcombine.low %v5876_v30, %v5877_v42  ;;  %v5885_v45 = vcombine.high %v5876_v30, %v5877_v42  ;;  %v19506_v46 = vcombine.low %v5877_v42, %v5877_v42  ;;  %v19507_v47 = vcombine.high %v5877_v42, %v5877_v42 }
 0x5ba   : > { %v5878_v48 = vsel %vm5870_vm9, %v5859_v37, %v5874_v40  ;;  %v5879_v51 = vsel %vm5871_vm10, %v5861_v41, %v5875_v43  ;;  %v13440_v35 = vcombine.high %v21045_v28, %v21045_v28  ;;  %v26390_v36 = vrot.slane %v21045_v28, %v26368_v1 }
 0x5bb   : > { %5892 = vst [vmem:[%s26361_s13] sm:$0xff] %v5884_v44  ;;  %5893 = vst [vmem:[%s26361_s13 + $0x8] sm:$0xff] %v5885_v45  ;;  %v21697_v54 = vpack.c.bf16 %v19506_v46, %v5884_v44  ;;  %v21698_v56 = vpack.c.bf16 %v19507_v47, %v5885_v45  ;;  %v5886_v50 = vcombine.low %v5878_v48, %v5879_v51  ;;  %v7834_v41 = vunpack.i.h.s16 %v26387_v34 }
 0x5bc   : > { %v5887_v57 = vcombine.high %v5878_v48, %v5879_v51  ;;  %v19508_v58 = vcombine.low %v5879_v51, %v5879_v51  ;;  %v19509_v59 = vcombine.high %v5879_v51, %v5879_v51  ;;  %v26397_v40 = vcombine.high %v7153_v33, %v7153_v33 }
 0x5bd   : > { %v5933_v60 = vshrl.u32 %v21697_v54, 16  ;;  %v5940_v61 = vshrl.u32 %v21698_v56, 16  ;;  %5894 = vst [vmem:[%s26361_s13 + $0x10] sm:$0xff] %v5886_v50  ;;  %v5936_v3 = vshll.u32 %v21697_v54, 16  ;;  %v5943_v5 = vshll.u32 %v21698_v56, 16 }
 0x5be   : > { %5895 = vst [vmem:[%s26361_s13 + $0x18] sm:$0xff] %v5887_v57  ;;  %v21699_v63 = vpack.c.bf16 %v19508_v58, %v5886_v50  ;;  %v21700_v0 = vpack.c.bf16 %v19509_v59, %v5887_v57  ;;  %v26404_v45 = vrot.slane %v13440_v35, %v26368_v1  ;;  %v14084_v46 = vunpack.i.h.s16 %v26390_v36  ;;  %s24650_s13 = smov [#allocation8]  }
 0x5bf   : > { %v5935_v2 = vrot.slane %v5933_v60, 7  ;;  %v5942_v4 = vrot.slane %v5940_v61, 7  ;;  %vm16512_vm8 = vsmask.f32 5396  ;;  %vm16514_vm10 = vsmask.f32 6424 }
 0x5c0   : > { %v5947_v7 = vshrl.u32 %v21699_v63, 16  ;;  %v5954_v9 = vshrl.u32 %v21700_v0, 16  ;;  %v5950_v15 = vshll.u32 %v21699_v63, 16  ;;  %v5957_v16 = vshll.u32 %v21700_v0, 16  ;;  %s24525_s15 = sshll.u32 %s24650_s13, 4  ;;  %s24526_s15 = int_to_ptr.vmem [resolvable:$false] %s24525_s15 }
 0x5c1   : > { %v5938_v11 = vor.u32 %v5936_v3, %v5935_v2  ;;  %v5945_v12 = vor.u32 %v5943_v5, %v5942_v4 }
 0x5c2   : > { %v5949_v14 = vrot.slane %v5947_v7, 7  ;;  %v5956_v8 = vrot.slane %v5954_v9, 7 }
 0x5c3   : > { %v5971_v17 = vsel %vm26234_vm6, %v5938_v11, %v5970_v62  ;;  %v5974_v18 = vsel %vm26234_vm6, %v5945_v12, %v5973_v6 }
 0x5c4   : > { %5972 = vst [vmem:[#allocation4 + $0x8] sm:$0x77] %v5971_v17  ;;  %5975 = vst [vmem:[#allocation4 + $0x10] sm:$0x77] %v5974_v18  ;;  %v5952_v23 = vor.u32 %v5950_v15, %v5949_v14  ;;  %v5959_v24 = vor.u32 %v5957_v16, %v5956_v8 }
 0x5c6   : > { %v5977_v26 = vsel %vm26234_vm6, %v5952_v23, %v5976_v19  ;;  %v5980_v27 = vsel %vm26234_vm6, %v5959_v24, %v5979_v20  ;;  %vm16510_vm6 = vsmask.f32 4368 }
 0x5c7   : > { %5978 = vst [vmem:[#allocation4 + $0x18] sm:$0x77] %v5977_v26  ;;  %5981 = vst [vmem:[#allocation4 + $0x20] sm:$0x77] %v5980_v27 }
 0x5cb   : > { %v19515_v37 = vld.sshfl [vmem:[#allocation4 + $0x8] sm:$0x55 pattern:$0x75316420] }
 0x5cc   : > { %v19516_v29 = vld.sshfl [vmem:[#allocation4 + $0x10] sm:$0x55 pattern:$0x75316420]  ;;  %v6017_v39 = vcombine.high %v19515_v37, %v19515_v37  ;;  %v26395_v30 = vrot.slane %v19515_v37, %v26368_v1 }
 0x5cd   : > { %v6039_v42 = vcombine.high %v19516_v29, %v19516_v29  ;;  %v26401_v43 = vrot.slane %v19516_v29, %v26368_v1  ;;  %v20245_v44 = vld.sshfl [vmem:[#allocation4 + $0x8] sm:$0x5a pattern:$0x75316420] }
 0x5ce   : > { %v26408_v47 = vrot.slane %v6017_v39, %v26368_v1  ;;  %v6058_v48 = vunpack.i.h.s16 %v26395_v30  ;;  %v20246_v51 = vld.sshfl [vmem:[#allocation4 + $0x10] sm:$0x5a pattern:$0x75316420]  ;;  %v9644_v52 = vcombine.high %v20245_v44, %v20245_v44  ;;  %v9651_v54 = vrot.slane %v20245_v44, %v26368_v1 }
 0x5cf   : > { %v26413_v56 = vrot.slane %v6039_v42, %v26368_v1  ;;  %v6061_v50 = vunpack.i.h.s16 %v26401_v43  ;;  %v20247_v57 = vld.sshfl [vmem:[#allocation4 + $0x18] sm:$0x5a pattern:$0x75316420]  ;;  %v9667_v58 = vcombine.high %v20246_v51, %v20246_v51  ;;  %v9674_v59 = vrot.slane %v20246_v51, %v26368_v1 }
 0x5d0   : > { %v6196_v60 = vpack.i.b16 %v6058_v48, %v6127_v55  ;;  %v9658_v61 = vrot.slane %v9644_v52, %v26368_v1  ;;  %v9659_v62 = vcombine.high %v9651_v54, %v9651_v54  ;;  %v9690_v63 = vcombine.high %v20247_v57, %v20247_v57 }
 0x5d1   : > { %v6129_v0 = vunpack.i.h.s16 %v26413_v56  ;;  %v19582_v2 = vpack.i.b16 %v26413_v56, %v6061_v50  ;;  %v9681_v3 = vrot.slane %v9667_v58, %v26368_v1  ;;  %v9682_v4 = vcombine.high %v9674_v59, %v9674_v59 }
 0x5d2   : > { %v6200_v5 = vcombine.low %v19581_v38, %v6196_v60  ;;  %v9697_v6 = vrot.slane %v20247_v57, %v26368_v1  ;;  %v9704_v7 = vrot.slane %v9690_v63, %v26368_v1  ;;  %v10332_v9 = vunpack.i.h.s16 %v9658_v61  ;;  %v23077_v57 = vld [vmem:[%s30624_s4 + $0x208] ss:$16 sps:$4 sm:$0xff]  }
 0x5d3   : > { %v6201_v10 = vcombine.low %v26408_v47, %v19582_v2  ;;  %v6222_v11 = vrot.slane %v6129_v0, %v26368_v1  ;;  %v9710_v12 = vunpack.i.h.s16 %v9681_v3  ;;  %v20312_v13 = vpack.i.b16 %v9681_v3, %v9659_v62 }
 0x5d4   : > { %v6208_v14 = vrot.slane %v6200_v5, %v26368_v1  ;;  %v9705_v15 = vcombine.high %v9697_v6, %v9697_v6  ;;  %v10334_v8 = vunpack.i.h.s16 %v9659_v62  ;;  %v10338_v16 = vunpack.i.h.s16 %v9704_v7 }
 0x5d5   : > { %v6215_v17 = vrot.slane %v6201_v10, %v26368_v1  ;;  %v6225_v18 = vcombine.high %v6222_v11, %v6222_v11  ;;  %v6246_v19 = vrot.slane %v6222_v11, %v26368_v1  ;;  %v20313_v20 = vpack.i.b16 %v9682_v4, %v9710_v12  ;;  %v20511_v11 = vld.sshfl [vmem:[#allocation4 + $0x10] sm:$0x55 pattern:$0x75316420] }
 0x5d6   : > { %v9714_v21 = vunpack.i.l.s16 %v9705_v15  ;;  %v9785_v23 = vcombine.low %v9658_v61, %v20312_v13  ;;  %v10340_v24 = vunpack.i.h.s16 %v9705_v15  ;;  %v20445_v25 = vpack.i.b16 %v9659_v62, %v10332_v9  ;;  %v23085_v62 = vld [vmem:[%s30624_s4 + $0x22c] ss:$16 sps:$4 sm:$0xff]  }
 0x5d7   : > { %v6224_v26 = vcombine.high %v6208_v14, %v6215_v17  ;;  %v6253_v27 = vrot.slane %v6225_v18, %v26368_v1  ;;  %v6223_v28 = vcombine.low %v6208_v14, %v6215_v17  ;;  %v9786_v32 = vcombine.low %v20313_v20, %v9704_v7  ;;  %v26462_v7 = vld.sshfl [vmem:[#allocation4 + $0x28] sm:$0x5a pattern:$0x75316420]  ;;  %v23088_v14 = vld [vmem:[%s30624_s4 + $0xe24] ss:$16 sps:$4 sm:$0xff]  }
 0x5d8   : > { %v9793_v33 = vrot.slane %v9785_v23, %v26368_v1  ;;  %v9807_v35 = vrot.slane %v9714_v21, %v26368_v1  ;;  %v10407_v37 = vpack.i.b16 %v9710_v12, %v10334_v8  ;;  %v20446_v55 = vpack.i.b16 %v9705_v15, %v10338_v16  ;;  %v20512_v16 = vld.sshfl [vmem:[#allocation4 + $0x18] sm:$0x55 pattern:$0x75316420] }
 0x5d9   : > { %v6239_v38 = vrot.slane %v6224_v26, %v26368_v1  ;;  %v6232_v29 = vrot.slane %v6223_v28, %v26368_v1  ;;  %v9800_v39 = vrot.slane %v9786_v32, %v26368_v1  ;;  %v26437_v42 = vrot.slane %v10340_v24, %v26368_v1  ;;  %v23091_v17 = vld [vmem:[%s30624_s4 + $0x24c] ss:$16 sps:$4 sm:$0xff]   ;;  %v23089_v23 = vld [vmem:[%s30624_s4 + $0x248] ss:$16 sps:$4 sm:$0xff]  }
 0x5da   : > { %v9810_v44 = vcombine.high %v9807_v35, %v9807_v35  ;;  %v9831_v51 = vrot.slane %v9807_v35, %v26368_v1  ;;  %v10411_v52 = vcombine.low %v20445_v25, %v10407_v37  ;;  %v10412_v54 = vcombine.low %v9682_v4, %v20446_v55  ;;  %v20513_v26 = vld.sshfl [vmem:[#allocation4 + $0x20] sm:$0x55 pattern:$0x75316420]  ;;  %v23097_v37 = vld [vmem:[%s30624_s4 + $0x26c] ss:$16 sps:$4 sm:$0xff]  }
 0x5db   : > { %v6255_v50 = vcombine.low %v6239_v38, %v6253_v27  ;;  %v26443_v58 = vcombine.low %v6232_v29, %v6246_v19  ;;  %v9808_v59 = vcombine.low %v9793_v33, %v9800_v39  ;;  %v9809_v60 = vcombine.high %v9793_v33, %v9800_v39  ;;  %v19714_v35 = vld.sshfl [vmem:[#allocation4 + $0x8] sm:$0x5a pattern:$0x75316420] }
 0x5dc   : > { %v9838_v61 = vrot.slane %v9810_v44, %v26368_v1  ;;  %v26450_v63 = vrot.slane %v10411_v52, %v26368_v1  ;;  %v26453_v0 = vrot.slane %v10412_v54, %v26368_v1  ;;  %v10436_v2 = vcombine.high %v26437_v42, %v26437_v42  ;;  %v19715_v39 = vld.sshfl [vmem:[#allocation4 + $0x10] sm:$0x5a pattern:$0x75316420] }
 0x5dd   : > { %6610 = vmatprep.mubr.bf16.mxu0 %v6255_v50  ;;  %v9824_v3 = vrot.slane %v9809_v60, %v26368_v1  ;;  %v9817_v4 = vrot.slane %v9808_v59, %v26368_v1  ;;  %v6062_v5 = vunpack.i.l.s16 %v26413_v56  ;;  %v19647_v6 = vpack.i.b16 %v26395_v30, %v26382_v31  ;;  %v23080_v56 = vld [vmem:[%s30624_s4 + $0xe00] ss:$16 sps:$4 sm:$0xff]   ;;  %v23083_v30 = vld [vmem:[%s30624_s4 + $0x228] ss:$16 sps:$4 sm:$0xff]  }
 0x5de   : > { %6611 = vmatmul.mubr.bf16.vlgmr.msra.gmra.mrb[44].mxu0 %v26443_v58  ;;  %v10435_v9 = vcombine.high %v26450_v63, %v26453_v0  ;;  %v19648_v10 = vpack.i.b16 %v26408_v47, %v6058_v48  ;;  %v26473_v12 = vpack.i.b16 %v26397_v40, %v7834_v41  ;;  %v10464_v48 = vrot.slane %v10436_v2, %v26368_v1 }
 0x5df   : > { %6622 = vmatpush1.bf16.msra.mxu0 %v23077_v57  ;;  %6653 = vmatprep.mubr.bf16.mxu0 %v6255_v50  ;;  %v26475_v31 = vcombine.low %v9824_v3, %v9838_v61  ;;  %v26480_v13 = vcombine.low %v9817_v4, %v9831_v51  ;;  %v6669_v47 = vcombine.low %v26375_v22, %v19647_v6  ;;  %v23086_v22 = vld [vmem:[%s30624_s4 + $0xe20] ss:$16 sps:$4 sm:$0xff]   ;;  %v23100_v6 = vld [vmem:[%s30624_s4 + $0xe64] ss:$16 sps:$4 sm:$0xff]  }
 0x5e0   : > { %6623 = vmatprep.subr.bf16.mxu0 %v23085_v62  ;;  %v10450_v41 = vrot.slane %v10435_v9, %v26368_v1  ;;  %v6670_v15 = vcombine.low %v19648_v10, %v26401_v43  ;;  %v6691_v8 = vrot.slane %v6062_v5, %v26368_v1  ;;  %v10897_v19 = vcombine.high %v20511_v11, %v20511_v11  ;;  %v23092_v61 = vld [vmem:[%s30624_s4 + $0xe40] ss:$16 sps:$4 sm:$0xff]   ;;  %v23095_v62 = vld [vmem:[%s30624_s4 + $0x268] ss:$16 sps:$4 sm:$0xff]   ;;  %v23103_v9 = vld [vmem:[%s30624_s4 + $0x28c] ss:$16 sps:$4 sm:$0xff]  }
 0x5e1   : > { %30631 = vst [vmem:[#allocation16_spill] sm:$0xff] %v26475_v31  ;;  %30632 = vst [vmem:[#allocation17_spill] sm:$0xff] %v26480_v13  ;;  %10238 = vmatprep.mubr.bf16.mxu1 %v26475_v31  ;;  %v6677_v18 = vrot.slane %v6669_v47, %v26368_v1  ;;  %v26504_v43 = vpack.i.b16 %v26404_v45, %v14084_v46  ;;  %v14688_v20 = vcombine.high %v26462_v7, %v26462_v7  ;;  %v23094_v46 = vld [vmem:[%s30624_s4 + $0xe44] ss:$16 sps:$4 sm:$0xff]  }
 0x5e2   : > { %10239 = vmatmul.mubr.bf16.vlgmr.msra.gmra.mrb[8].mxu1 %v26480_v13  ;;  %v26509_v21 = vcombine.low %v10450_v41, %v10464_v48  ;;  %v6684_v24 = vrot.slane %v6670_v15, %v26368_v1  ;;  %v6694_v25 = vcombine.high %v6691_v8, %v6691_v8  ;;  %v26516_v27 = vrot.slane %v20511_v11, %v26368_v1 }
 0x5e3   : > { %10790 = vmatpush1.bf16.msra.mxu1 %v23080_v56  ;;  %6624 = vmatpush1.bf16.msra.mxu0 %v23083_v30  ;;  %v6715_v28 = vrot.slane %v6691_v8, %v26368_v1  ;;  %v26523_v32 = vrot.slane %v10897_v19, %v26368_v1  ;;  %v10919_v33 = vcombine.high %v20512_v16, %v20512_v16 }
 0x5e4   : > { %10821 = vmatprep.mubr.bf16.mxu1 %v26509_v21  ;;  %10791 = vmatprep.subr.bf16.mxu1 %v23088_v14  ;;  %v6693_v55 = vcombine.high %v6677_v18, %v6684_v24  ;;  %v6722_v38 = vrot.slane %v6694_v25, %v26368_v1  ;;  %v6692_v29 = vcombine.low %v6677_v18, %v6684_v24  ;;  %v11579_v30 = vunpack.i.h.s16 %v26516_v27  ;;  %v23101_v18 = vld [vmem:[%s30624_s4 + $0x288] ss:$16 sps:$4 sm:$0xff]   ;;  %v23106_v25 = vld [vmem:[%s30624_s4 + $0xe84] ss:$16 sps:$4 sm:$0xff]  }
 0x5e5   : > { %6625 = vmatprep.subr.bf16.mxu0 %v23091_v17  ;;  %v10926_v44 = vrot.slane %v20512_v16, %v26368_v1  ;;  %v26532_v51 = vrot.slane %v10919_v33, %v26368_v1  ;;  %v10941_v52 = vcombine.high %v20513_v26, %v20513_v26  ;;  %v26535_v54 = vrot.slane %v20513_v26, %v26368_v1  ;;  %v23098_v17 = vld [vmem:[%s30624_s4 + $0xe60] ss:$16 sps:$4 sm:$0xff]   ;;  %v23109_v26 = vld [vmem:[%s30624_s4 + $0x2ac] ss:$16 sps:$4 sm:$0xff]  }
 0x5e6   : > { %v6708_v50 = vrot.slane %v6693_v55, %v26368_v1  ;;  %v6701_v57 = vrot.slane %v6692_v29, %v26368_v1  ;;  %v7169_v59 = vcombine.high %v19714_v35, %v19714_v35  ;;  %v7176_v60 = vrot.slane %v19714_v35, %v26368_v1 }
 0x5e7   : > { %10792 = vmatpush1.bf16.msra.mxu1 %v23086_v22  ;;  %6626 = vmatpush1.bf16.msra.mxu0 %v23089_v23  ;;  %v26547_v2 = vrot.slane %v10941_v52, %v26368_v1  ;;  %v10960_v3 = vunpack.i.h.s16 %v10926_v44  ;;  %v20578_v4 = vpack.i.b16 %v10926_v44, %v26523_v32  ;;  %v7192_v5 = vcombine.high %v19715_v39, %v19715_v39 }
 0x5e8   : > { %10793 = vmatprep.subr.bf16.mxu1 %v23094_v46  ;;  %6627 = vmatprep.subr.bf16.mxu0 %v23097_v37  ;;  %v26556_v10 = vcombine.low %v6708_v50, %v6722_v38  ;;  %v26558_v11 = vcombine.low %v6701_v57, %v6715_v28  ;;  %v26561_v56 = vrot.slane %v7169_v59, %v26368_v1  ;;  %v11581_v14 = vunpack.i.h.s16 %v26523_v32 }
 0x5e9   : > { %v10964_v47 = vunpack.i.l.s16 %v26547_v2  ;;  %v20579_v41 = vpack.i.b16 %v26532_v51, %v10960_v3  ;;  %v11035_v48 = vcombine.low %v26516_v27, %v20578_v4  ;;  %v26568_v15 = vcombine.high %v7176_v60, %v7176_v60  ;;  %v23112_v60 = vld [vmem:[%s30624_s4 + $0xea4] ss:$16 sps:$4 sm:$0xff]  }
 0x5ea   : > { %v7199_v8 = vrot.slane %v19715_v39, %v26368_v1  ;;  %v7212_v16 = vunpack.i.h.s16 %v26561_v56  ;;  %v19780_v22 = vpack.i.b16 %v26561_v56, %v26397_v40  ;;  %v26585_v24 = vrot.slane %v7192_v5, %v26368_v1  ;;  %v23124_v56 = vld [vmem:[%s30624_s4 + $0xee4] ss:$16 sps:$4 sm:$0xff]  }
 0x5eb   : > { %10794 = vmatpush1.bf16.msra.mxu1 %v23092_v61  ;;  %6628 = vmatpush1.bf16.msra.mxu0 %v23095_v62  ;;  %v11036_v19 = vcombine.low %v20579_v41, %v26535_v54  ;;  %v26582_v23 = vrot.slane %v11035_v48, %v26368_v1  ;;  %v11585_v33 = vunpack.i.h.s16 %v26535_v54  ;;  %v26602_v37 = vrot.slane %v10964_v47, %v26368_v1  ;;  %v23107_v54 = vld [vmem:[%s30624_s4 + $0x2a8] ss:$16 sps:$4 sm:$0xff]   ;;  %v23115_v61 = vld [vmem:[%s30624_s4 + $0x2cc] ss:$16 sps:$4 sm:$0xff]  }
 0x5ec   : > { %10795 = vmatprep.subr.bf16.mxu1 %v23100_v6  ;;  %6629 = vmatprep.subr.bf16.mxu0 %v23103_v9  ;;  %v7207_v27 = vcombine.high %v7199_v8, %v7199_v8  ;;  %v19781_v46 = vpack.i.b16 %v26568_v15, %v7212_v16  ;;  %v7287_v28 = vcombine.low %v26387_v34, %v19780_v22  ;;  %v11587_v55 = vunpack.i.h.s16 %v26547_v2  ;;  %v23104_v34 = vld [vmem:[%s30624_s4 + $0xe80] ss:$16 sps:$4 sm:$0xff]   ;;  %v23113_v48 = vld [vmem:[%s30624_s4 + $0x2c8] ss:$16 sps:$4 sm:$0xff]  }
 0x5ed   : > { %v26599_v35 = vrot.slane %v11036_v19, %v26368_v1  ;;  %v20711_v38 = vpack.i.b16 %v26523_v32, %v11579_v30  ;;  %v11654_v44 = vpack.i.b16 %v10960_v3, %v11581_v14  ;;  %v14695_v52 = vrot.slane %v26462_v7, %v26368_v1 }
 0x5ee   : > { %v7216_v29 = vunpack.i.l.s16 %v7207_v27  ;;  %v7288_v39 = vcombine.low %v19781_v46, %v26585_v24  ;;  %v26616_v50 = vrot.slane %v7287_v28, %v26368_v1  ;;  %v7836_v57 = vunpack.i.h.s16 %v26397_v40  ;;  %v23116_v28 = vld [vmem:[%s30624_s4 + $0xec0] ss:$16 sps:$4 sm:$0xff]  }
 0x5ef   : > { %10796 = vmatpush1.bf16.msra.mxu1 %v23098_v17  ;;  %6630 = vmatpush1.bf16.msra.mxu0 %v23101_v18  ;;  %v11058_v32 = vcombine.low %v26582_v23, %v26599_v35  ;;  %v26625_v59 = vrot.slane %v14688_v20, %v26368_v1  ;;  %v20712_v7 = vpack.i.b16 %v26547_v2, %v11585_v33  ;;  %v13463_v20 = vunpack.i.l.s16 %v26404_v45  ;;  %v23110_v2 = vld [vmem:[%s30624_s4 + $0xea0] ss:$16 sps:$4 sm:$0xff]   ;;  %v23121_v17 = vld [vmem:[%s30624_s4 + $0x2ec] ss:$16 sps:$4 sm:$0xff]   ;;  %v23119_v33 = vld [vmem:[%s30624_s4 + $0x2e8] ss:$16 sps:$4 sm:$0xff]  }
 0x5f0   : > { %10797 = vmatprep.subr.bf16.mxu1 %v23106_v25  ;;  %6631 = vmatprep.subr.bf16.mxu0 %v23109_v26  ;;  %v26634_v62 = vrot.slane %v7288_v39, %v26368_v1  ;;  %v26637_v40 = vrot.slane %v7216_v29, %v26368_v1  ;;  %v11081_v4 = vrot.slane %v26602_v37, %v26368_v1  ;;  %v7840_v30 = vunpack.i.h.s16 %v26585_v24 }
 0x5f1   : > { %v11067_v3 = vrot.slane %v11058_v32, %v26368_v1  ;;  %v11658_v5 = vcombine.low %v20711_v38, %v11654_v44  ;;  %v26645_v6 = vrot.slane %v11587_v55, %v26368_v1  ;;  %v7842_v47 = vunpack.i.h.s16 %v7207_v27 }
 0x5f2   : > { %v7310_v9 = vcombine.low %v26616_v50, %v26634_v62  ;;  %v14086_v41 = vunpack.i.h.s16 %v26404_v45  ;;  %v11659_v8 = vcombine.low %v26532_v51, %v20712_v7  ;;  %v26660_v22 = vcombine.high %v14695_v52, %v14695_v52  ;;  %v23118_v45 = vld [vmem:[%s30624_s4 + $0xec4] ss:$16 sps:$4 sm:$0xff]  }
 0x5f3   : > { %10798 = vmatpush1.bf16.msra.mxu1 %v23104_v34  ;;  %6632 = vmatpush1.bf16.msra.mxu0 %v23107_v54  ;;  %v26657_v14 = vcombine.low %v11067_v3, %v11081_v4  ;;  %v7333_v19 = vrot.slane %v26637_v40, %v26368_v1  ;;  %v26672_v24 = vrot.slane %v13463_v20, %v26368_v1  ;;  %v20777_v34 = vld.sshfl [vmem:[#allocation4 + $0x10] sm:$0x5a pattern:$0x75316420] }
 0x5f4   : > { %10799 = vmatprep.subr.bf16.mxu1 %v23112_v60  ;;  %6633 = vmatprep.subr.bf16.mxu0 %v23115_v61  ;;  %v7319_v18 = vrot.slane %v7310_v9, %v26368_v1  ;;  %v11666_v51 = vrot.slane %v11658_v5, %v26368_v1  ;;  %v11673_v25 = vrot.slane %v11659_v8, %v26368_v1  ;;  %v20778_v60 = vld.sshfl [vmem:[#allocation4 + $0x18] sm:$0x5a pattern:$0x75316420]  ;;  %v23122_v3 = vld [vmem:[%s30624_s4 + $0xee0] ss:$16 sps:$4 sm:$0xff]  }
 0x5f5   : > { %v11683_v26 = vcombine.high %v26645_v6, %v26645_v6  ;;  %v7909_v46 = vpack.i.b16 %v7212_v16, %v7836_v57  ;;  %v19914_v38 = vpack.i.b16 %v7207_v27, %v7840_v30  ;;  %v26689_v29 = vrot.slane %v7842_v47, %v26368_v1  ;;  %v23127_v27 = vld [vmem:[%s30624_s4 + $0x30c] ss:$16 sps:$4 sm:$0xff]  }
 0x5f6   : > { %v26686_v55 = vcombine.low %v7319_v18, %v7333_v19  ;;  %v26692_v39 = vrot.slane %v14086_v41, %v26368_v1  ;;  %v11682_v16 = vcombine.high %v11666_v51, %v11673_v25  ;;  %v11681_v57 = vcombine.low %v11666_v51, %v11673_v25  ;;  %v20779_v41 = vld.sshfl [vmem:[#allocation4 + $0x20] sm:$0x5a pattern:$0x75316420]  ;;  %v23133_v8 = vld [vmem:[%s30624_s4 + $0x32c] ss:$16 sps:$4 sm:$0xff]  }
 0x5f7   : > { %10800 = vmatpush1.bf16.msra.mxu1 %v23110_v2  ;;  %6634 = vmatpush1.bf16.msra.mxu0 %v23113_v48  ;;  %v11711_v44 = vrot.slane %v11683_v26, %v26368_v1  ;;  %v7913_v52 = vcombine.low %v26473_v12, %v7909_v46  ;;  %v7914_v54 = vcombine.low %v26568_v15, %v19914_v38  ;;  %v23125_v15 = vld [vmem:[%s30624_s4 + $0x308] ss:$16 sps:$4 sm:$0xff]   ;;  %v15336_v51 = vunpack.i.h.s16 %v26625_v59 }
 0x5f8   : > { %10801 = vmatprep.subr.bf16.mxu1 %v23118_v45  ;;  %6635 = vmatprep.subr.bf16.mxu0 %v23121_v17  ;;  %v7938_v32 = vcombine.high %v26689_v29, %v26689_v29  ;;  %v11697_v61 = vrot.slane %v11682_v16, %v26368_v1  ;;  %v11704_v12 = vrot.slane %v26645_v6, %v26368_v1  ;;  %v23130_v6 = vld [vmem:[%s30624_s4 + $0xf04] ss:$16 sps:$4 sm:$0xff]   ;;  %v19979_v19 = vld.sshfl [vmem:[#allocation4 + $0x8] sm:$0x55 pattern:$0x75316420] }
 0x5f9   : > { %v7921_v7 = vrot.slane %v7913_v52, %v26368_v1  ;;  %v7959_v20 = vrot.slane %v26689_v29, %v26368_v1  ;;  %v7928_v4 = vrot.slane %v7914_v54, %v26368_v1  ;;  %v11690_v9 = vrot.slane %v11681_v57, %v26368_v1  ;;  %v23131_v52 = vld [vmem:[%s30624_s4 + $0x328] ss:$16 sps:$4 sm:$0xff]  }
 0x5fa   : > { %v7966_v5 = vrot.slane %v7938_v32, %v26368_v1  ;;  %v12143_v30 = vcombine.high %v20777_v34, %v20777_v34  ;;  %v26723_v47 = vcombine.low %v11697_v61, %v11711_v44  ;;  %v12150_v2 = vrot.slane %v20777_v34, %v26368_v1  ;;  %v19980_v44 = vld.sshfl [vmem:[#allocation4 + $0x10] sm:$0x55 pattern:$0x75316420]  ;;  %v23139_v61 = vld [vmem:[%s30624_s4 + $0x34c] ss:$16 sps:$4 sm:$0xff]  }
 0x5fb   : > { %10802 = vmatpush1.bf16.msra.mxu1 %v23116_v28  ;;  %6636 = vmatpush1.bf16.msra.mxu0 %v23119_v33  ;;  %v12166_v48 = vcombine.high %v20778_v60, %v20778_v60  ;;  %v7937_v45 = vcombine.high %v7921_v7, %v7928_v4  ;;  %v26729_v17 = vcombine.low %v11690_v9, %v11704_v12  ;;  %v23128_v33 = vld [vmem:[%s30624_s4 + $0xf00] ss:$16 sps:$4 sm:$0xff]   ;;  %v19981_v32 = vld.sshfl [vmem:[#allocation4 + $0x18] sm:$0x55 pattern:$0x75316420] }
 0x5fc   : > { %10803 = vmatprep.subr.bf16.mxu1 %v23124_v56  ;;  %6637 = vmatprep.subr.bf16.mxu0 %v23127_v27  ;;  %v7936_v18 = vcombine.low %v7921_v7, %v7928_v4  ;;  %v26733_v25 = vrot.slane %v12143_v30, %v26368_v1  ;;  %v26735_v26 = vcombine.high %v12150_v2, %v12150_v2  ;;  %v23134_v2 = vld [vmem:[%s30624_s4 + $0xf20] ss:$16 sps:$4 sm:$0xff]  }
 0x5fd   : > { %v12173_v46 = vrot.slane %v20778_v60, %v26368_v1  ;;  %v26739_v28 = vrot.slane %v12166_v48, %v26368_v1  ;;  %v7952_v38 = vrot.slane %v7937_v45, %v26368_v1  ;;  %v12189_v56 = vcombine.high %v20779_v41, %v20779_v41  ;;  %v23136_v60 = vld [vmem:[%s30624_s4 + $0xf24] ss:$16 sps:$4 sm:$0xff]   ;;  %v23137_v48 = vld [vmem:[%s30624_s4 + $0x348] ss:$16 sps:$4 sm:$0xff]  }
 0x5fe   : > { %v7945_v29 = vrot.slane %v7936_v18, %v26368_v1  ;;  %v12196_v16 = vrot.slane %v20779_v41, %v26368_v1  ;;  %v8398_v57 = vcombine.high %v19979_v19, %v19979_v19  ;;  %v8442_v41 = vcombine.high %v19981_v32, %v19981_v32 }
 0x5ff   : > { %10804 = vmatpush1.bf16.msra.mxu1 %v23122_v3  ;;  %6638 = vmatpush1.bf16.msra.mxu0 %v23125_v15  ;;  %v26750_v34 = vcombine.high %v12173_v46, %v12173_v46  ;;  %v30596_v27 = vunpack.i.h.s16 %v26739_v28  ;;  %v20844_v54 = vpack.i.b16 %v26739_v28, %v26735_v26  ;;  %v26761_v7 = vcombine.low %v7952_v38, %v7966_v5  ;;  %v23142_v46 = vld [vmem:[%s30624_s4 + $0xf44] ss:$16 sps:$4 sm:$0xff]  }
 0x600   : > { %10805 = vmatprep.subr.bf16.mxu1 %v23130_v6  ;;  %6639 = vmatprep.subr.bf16.mxu0 %v23133_v8  ;;  %v26763_v12 = vcombine.low %v7945_v29, %v7959_v20  ;;  %v26766_v3 = vpack.i.b16 %v26660_v22, %v15336_v51  ;;  %v26769_v15 = vrot.slane %v12189_v56, %v26368_v1 }
 0x601   : > { %v26771_v4 = vcombine.high %v12196_v16, %v12196_v16  ;;  %v20845_v9 = vpack.i.b16 %v26750_v34, %v30596_v27  ;;  %v12284_v30 = vcombine.low %v26733_v25, %v20844_v54  ;;  %v26778_v6 = vrot.slane %v8398_v57, %v26368_v1 }
 0x602   : > { %v8420_v5 = vcombine.high %v19980_v44, %v19980_v44  ;;  %v26781_v20 = vrot.slane %v19980_v44, %v26368_v1  ;;  %v8405_v18 = vrot.slane %v19979_v19, %v26368_v1  ;;  %v14182_v51 = vcombine.high %v26692_v39, %v26692_v39 }
 0x603   : > { %10806 = vmatpush1.bf16.msra.mxu1 %v23128_v33  ;;  %6640 = vmatpush1.bf16.msra.mxu0 %v23131_v52  ;;  %v12213_v8 = vunpack.i.l.s16 %v26771_v4  ;;  %v12285_v45 = vcombine.low %v20845_v9, %v26769_v15  ;;  %v23145_v33 = vld [vmem:[%s30624_s4 + $0x36c] ss:$16 sps:$4 sm:$0xff]   ;;  %v26804_v29 = vrot.slane %v8442_v41, %v26368_v1  ;;  %v26810_v16 = vrot.slane %v12284_v30, %v26368_v1  ;;  %v23140_v30 = vld [vmem:[%s30624_s4 + $0xf40] ss:$16 sps:$4 sm:$0xff]  }
 0x604   : > { %10807 = vmatprep.subr.bf16.mxu1 %v23136_v60  ;;  %6641 = vmatprep.subr.bf16.mxu0 %v23139_v61  ;;  %v26801_v38 = vrot.slane %v8420_v5, %v26368_v1  ;;  %v8461_v19 = vunpack.i.h.s16 %v26781_v20  ;;  %v20046_v56 = vpack.i.b16 %v26781_v20, %v26778_v6  ;;  %v12831_v54 = vunpack.i.h.s16 %v26733_v25  ;;  %v23143_v5 = vld [vmem:[%s30624_s4 + $0x368] ss:$16 sps:$4 sm:$0xff]  }
 0x605   : > { %v26813_v44 = vrot.slane %v12285_v45, %v26368_v1  ;;  %v26816_v52 = vrot.slane %v12213_v8, %v26368_v1  ;;  %v8449_v57 = vrot.slane %v19981_v32, %v26368_v1  ;;  %v8465_v60 = vunpack.i.l.s16 %v26804_v29 }
 0x606   : > { %v20047_v61 = vpack.i.b16 %v26801_v38, %v8461_v19  ;;  %v8536_v9 = vcombine.low %v8405_v18, %v20046_v56  ;;  %v26833_v20 = vrot.slane %v14182_v51, %v26368_v1  ;;  %v15338_v41 = vunpack.i.h.s16 %v26660_v22 }
 0x607   : > { %10808 = vmatpush1.bf16.msra.mxu1 %v23134_v2  ;;  %6642 = vmatpush1.bf16.msra.mxu0 %v23137_v48  ;;  %v12307_v25 = vcombine.low %v26810_v16, %v26813_v44  ;;  %v23148_v2 = vld [vmem:[%s30624_s4 + $0xf64] ss:$16 sps:$4 sm:$0xff]   ;;  %v23151_v48 = vld [vmem:[%s30624_s4 + $0x38c] ss:$16 sps:$4 sm:$0xff]   ;;  %v12833_v56 = vunpack.i.h.s16 %v26735_v26  ;;  %v12837_v51 = vunpack.i.h.s16 %v26769_v15  ;;  %v9080_v27 = vunpack.i.h.s16 %v8405_v18  ;;  %v23146_v15 = vld [vmem:[%s30624_s4 + $0xf60] ss:$16 sps:$4 sm:$0xff]  }
 0x608   : > { %10809 = vmatprep.subr.bf16.mxu1 %v23142_v46  ;;  %6643 = vmatprep.subr.bf16.mxu0 %v23145_v33  ;;  %v8537_v8 = vcombine.low %v20047_v61, %v8449_v57  ;;  %v26843_v45 = vrot.slane %v8536_v9, %v26368_v1  ;;  %v12330_v46 = vrot.slane %v26816_v52, %v26368_v1  ;;  %v12839_v33 = vunpack.i.h.s16 %v26771_v4  ;;  %v23149_v18 = vld [vmem:[%s30624_s4 + $0x388] ss:$16 sps:$4 sm:$0xff]  }
 0x609   : > { %v12316_v32 = vrot.slane %v12307_v25, %v26368_v1  ;;  %v26855_v61 = vrot.slane %v8465_v60, %v26368_v1  ;;  %v20977_v9 = vpack.i.b16 %v26735_v26, %v12831_v54  ;;  %v9082_v49 = vunpack.i.h.s16 %v26778_v6  ;;  %v23154_v54 = vld [vmem:[%s30624_s4 + $0xf84] ss:$16 sps:$4 sm:$0xff]  }
 0x60a   : > { %v26852_v53 = vrot.slane %v8537_v8, %v26368_v1  ;;  %v30634_v8 = vunpack.i.h.s16 %v26739_v28  ;;  %v9086_v13 = vunpack.i.h.s16 %v8449_v57  ;;  %v9088_v57 = vunpack.i.h.s16 %v26804_v29 }
 0x60b   : > { %10810 = vmatpush1.bf16.msra.mxu1 %v23140_v30  ;;  %6644 = vmatpush1.bf16.msra.mxu0 %v23143_v5  ;;  %v26865_v25 = vcombine.low %v12316_v32, %v12330_v46  ;;  %v23157_v30 = vld [vmem:[%s30624_s4 + $0x3ac] ss:$16 sps:$4 sm:$0xff]   ;;  %v10434_v5 = vcombine.low %v26450_v63, %v26453_v0  ;;  %v26883_v32 = vrot.slane %v15338_v41, %v26368_v1  ;;  %v23152_v63 = vld [vmem:[%s30624_s4 + $0xf80] ss:$16 sps:$4 sm:$0xff]  }
 0x60c   : > { %v12906_v60 = vpack.i.b16 %v30634_v8, %v12833_v56  ;;  %10811 = vmatprep.subr.bf16.mxu1 %v23148_v2  ;;  %6645 = vmatprep.subr.bf16.mxu0 %v23151_v48  ;;  %v8559_v28 = vcombine.low %v26843_v45, %v26852_v53  ;;  %v20978_v2 = vpack.i.b16 %v26771_v4, %v12837_v51  ;;  %v23155_v4 = vld [vmem:[%s30624_s4 + $0x3a8] ss:$16 sps:$4 sm:$0xff]  }
 0x60d   : > { %30633 = vst [vmem:[#allocation18_spill] sm:$0xff] %v26865_v25  ;;  %v26887_v56 = vrot.slane %v12839_v33, %v26368_v1  ;;  %v20179_v46 = vpack.i.b16 %v26778_v6, %v9080_v27  ;;  %v8582_v8 = vrot.slane %v26855_v61, %v26368_v1  ;;  %v9155_v26 = vpack.i.b16 %v8461_v19, %v9082_v49  ;;  %v21043_v33 = vld.sshfl [vmem:[#allocation4 + $0x18] sm:$0x55 pattern:$0x75316420] }
 0x60e   : > { %v12910_v48 = vcombine.low %v20977_v9, %v12906_v60  ;;  %v8568_v0 = vrot.slane %v8559_v28, %v26368_v1  ;;  %v20180_v41 = vpack.i.b16 %v26804_v29, %v9086_v13  ;;  %v12911_v27 = vcombine.low %v26750_v34, %v20978_v2  ;;  %v23160_v49 = vld [vmem:[%s30624_s4 + $0xfa4] ss:$16 sps:$4 sm:$0xff]   ;;  %v23163_v13 = vld [vmem:[%s30624_s4 + $0x3cc] ss:$16 sps:$4 sm:$0xff]  }
 0x60f   : > { %10812 = vmatpush1.bf16.msra.mxu1 %v23146_v15  ;;  %6646 = vmatpush1.bf16.msra.mxu0 %v23149_v18  ;;  %v12935_v51 = vcombine.high %v26887_v56, %v26887_v56  ;;  %v26911_v29 = vrot.slane %v10434_v5, %v26368_v1  ;;  %v9159_v19 = vcombine.low %v20179_v46, %v9155_v26  ;;  %v21044_v46 = vld.sshfl [vmem:[#allocation4 + $0x20] sm:$0x55 pattern:$0x75316420] }
 0x610   : > { %v12918_v6 = vrot.slane %v12910_v48, %v26368_v1  ;;  %10813 = vmatprep.subr.bf16.mxu1 %v23154_v54  ;;  %6647 = vmatprep.subr.bf16.mxu0 %v23157_v30  ;;  %v26913_v34 = vcombine.low %v8568_v0, %v8582_v8  ;;  %v12925_v9 = vrot.slane %v12911_v27, %v26368_v1  ;;  %v23158_v54 = vld [vmem:[%s30624_s4 + $0xfa0] ss:$16 sps:$4 sm:$0xff]  }
 0x611   : > { %v12963_v15 = vrot.slane %v12935_v51, %v26368_v1  ;;  %v9160_v18 = vcombine.low %v26801_v38, %v20180_v41  ;;  %v9181_v60 = vrot.slane %v9088_v57, %v26368_v1  ;;  %v9167_v30 = vrot.slane %v9159_v19, %v26368_v1  ;;  %v23161_v38 = vld [vmem:[%s30624_s4 + $0x3c8] ss:$16 sps:$4 sm:$0xff]  }
 0x612   : > { %30635 = vst [vmem:[#allocation19_spill] sm:$0xff] %v26913_v34  ;;  %v12956_v5 = vrot.slane %v26887_v56, %v26368_v1  ;;  %v13396_v28 = vcombine.high %v21043_v33, %v21043_v33  ;;  %v13403_v26 = vrot.slane %v21043_v33, %v26368_v1  ;;  %v12934_v2 = vcombine.high %v12918_v6, %v12925_v9  ;;  %v23166_v56 = vld [vmem:[%s30624_s4 + $0xfc4] ss:$16 sps:$4 sm:$0xff]  }
 0x613   : > { %10814 = vmatpush1.bf16.msra.mxu1 %v23152_v63  ;;  %6648 = vmatpush1.bf16.msra.mxu0 %v23155_v4  ;;  %v9174_v57 = vrot.slane %v9160_v18, %v26368_v1  ;;  %v9184_v48 = vcombine.high %v9181_v60, %v9181_v60  ;;  %v23169_v63 = vld [vmem:[%s30624_s4 + $0x3ec] ss:$16 sps:$4 sm:$0xff]   ;;  %v12933_v0 = vcombine.low %v12918_v6, %v12925_v9  ;;  %v23164_v6 = vld [vmem:[%s30624_s4 + $0xfc0] ss:$16 sps:$4 sm:$0xff]   ;;  %v23167_v9 = vld [vmem:[%s30624_s4 + $0x3e8] ss:$16 sps:$4 sm:$0xff]  }
 0x614   : > { %10815 = vmatprep.subr.bf16.mxu1 %v23160_v49  ;;  %6649 = vmatprep.subr.bf16.mxu0 %v23163_v13  ;;  %v9205_v8 = vrot.slane %v9181_v60, %v26368_v1  ;;  %v13410_v41 = vrot.slane %v13396_v28, %v26368_v1  ;;  %v14078_v4 = vunpack.i.h.s16 %v13403_v26  ;;  %v12949_v27 = vrot.slane %v12934_v2, %v26368_v1  ;;  %v21309_v34 = vld.sshfl [vmem:[#allocation4 + $0x18] sm:$0x5a pattern:$0x75316420]  ;;  %v23172_v60 = vld [vmem:[%s30624_s4 + $0xfe4] ss:$16 sps:$4 sm:$0xff]  }
 0x615   : > { %v9183_v51 = vcombine.high %v9167_v30, %v9174_v57  ;;  %v9212_v33 = vrot.slane %v9184_v48, %v26368_v1  ;;  %v9182_v49 = vcombine.low %v9167_v30, %v9174_v57  ;;  %v12942_v13 = vrot.slane %v12933_v0, %v26368_v1  ;;  %v21310_v0 = vld.sshfl [vmem:[#allocation4 + $0x20] sm:$0x5a pattern:$0x75316420] }
 0x616   : > { %v13418_v19 = vcombine.high %v21044_v46, %v21044_v46  ;;  %v13425_v18 = vrot.slane %v21044_v46, %v26368_v1  ;;  %v14080_v31 = vunpack.i.h.s16 %v13410_v41  ;;  %v26951_v30 = vcombine.low %v12949_v27, %v12963_v15 }
 0x617   : > { %10816 = vmatpush1.bf16.msra.mxu1 %v23158_v54  ;;  %6650 = vmatpush1.bf16.msra.mxu0 %v23161_v38  ;;  %v9198_v28 = vrot.slane %v9183_v51, %v26368_v1  ;;  %v9191_v2 = vrot.slane %v9182_v49, %v26368_v1  ;;  %v23175_v54 = vld [vmem:[%s30624_s4 + $0x4] ss:$16 sps:$4 sm:$0xff]   ;;  %v26958_v38 = vcombine.low %v12942_v13, %v12956_v5  ;;  %v23170_v5 = vld [vmem:[%s30624_s4 + $0xfe0] ss:$16 sps:$4 sm:$0xff]  }
 0x618   : > { %30636 = vst [vmem:[#allocation20_spill] sm:$0xff] %v26951_v30  ;;  %10817 = vmatprep.subr.bf16.mxu1 %v23166_v56  ;;  %6651 = vmatprep.subr.bf16.mxu0 %v23169_v63  ;;  %v13432_v57 = vrot.slane %v13418_v19, %v26368_v1  ;;  %v13459_v48 = vunpack.i.h.s16 %v13425_v18  ;;  %v21110_v46 = vpack.i.b16 %v13425_v18, %v13410_v41  ;;  %v14712_v19 = vunpack.i.l.s16 %v26660_v22  ;;  %v23181_v18 = vld [vmem:[%s30624_s4 + $0x24] ss:$16 sps:$4 sm:$0xff]  }
 0x619   : > { %v26961_v25 = vcombine.low %v9198_v28, %v9212_v33  ;;  %v26963_v15 = vcombine.low %v9191_v2, %v9205_v8  ;;  %v21243_v27 = vpack.i.b16 %v13410_v41, %v14078_v4  ;;  %v14642_v51 = vcombine.high %v21309_v34, %v21309_v34  ;;  %v23173_v33 = vld [vmem:[%s30624_s4] ss:$16 sps:$4 sm:$0xff]  }
 0x61a   : > { %v21111_v49 = vpack.i.b16 %v13432_v57, %v13459_v48  ;;  %v13534_v56 = vcombine.low %v13403_v26, %v21110_v46  ;;  %v14153_v63 = vpack.i.b16 %v13459_v48, %v14080_v31  ;;  %v14158_v30 = vcombine.low %v13432_v57, %v26504_v43  ;;  %v23178_v31 = vld [vmem:[%s30624_s4 + $0xe0c] ss:$16 sps:$4 sm:$0xff]  }
 0x61b   : > { %10818 = vmatpush1.bf16.msra.mxu1 %v23164_v6  ;;  %6652 = vmatpush1.bf16.msra.mxu0 %v23167_v9  ;;  %v14649_v8 = vrot.slane %v21309_v34, %v26368_v1  ;;  %v14656_v41 = vrot.slane %v14642_v51, %v26368_v1  ;;  %v14665_v4 = vcombine.high %v21310_v0, %v21310_v0 }
 0x61c   : > { %10819 = vmatprep.subr.bf16.mxu1 %v23172_v60  ;;  %7047 = vmatprep.subr.bf16.mxu0 %v23175_v54  ;;  %v13535_v43 = vcombine.low %v21111_v49, %v26390_v36  ;;  %v26979_v26 = vrot.slane %v13534_v56, %v26368_v1  ;;  %v14157_v13 = vcombine.low %v21243_v27, %v14153_v63  ;;  %v23187_v49 = vld [vmem:[%s30624_s4 + $0x44] ss:$16 sps:$4 sm:$0xff]  }
 0x61d   : > { %v10457_v34 = vrot.slane %v26437_v42, %v26368_v1  ;;  %v14657_v6 = vcombine.high %v14649_v8, %v14649_v8  ;;  %v14672_v9 = vrot.slane %v21310_v0, %v26368_v1  ;;  %v14679_v60 = vrot.slane %v14665_v4, %v26368_v1  ;;  %v23176_v42 = vld [vmem:[%s30624_s4 + $0xe08] ss:$16 sps:$4 sm:$0xff]   ;;  %v23184_v0 = vld [vmem:[%s30624_s4 + $0xe2c] ss:$16 sps:$4 sm:$0xff]  }
 0x61e   : > { %6654 = vmatmul.mubr.bf16.vlgmr.msra.gmra.mrb[48].mxu0 %v26443_v58  ;;  %v26991_v36 = vrot.slane %v13535_v43, %v26368_v1  ;;  %v14165_v28 = vrot.slane %v14157_v13, %v26368_v1  ;;  %v14172_v22 = vrot.slane %v14158_v30, %v26368_v1  ;;  %v15330_v2 = vunpack.i.h.s16 %v14656_v41  ;;  %v23179_v30 = vld [vmem:[%s30624_s4 + $0x20] ss:$16 sps:$4 sm:$0xff]   ;;  %v23182_v43 = vld [vmem:[%s30624_s4 + $0xe28] ss:$16 sps:$4 sm:$0xff]  }
 0x61f   : > { %10820 = vmatpush1.bf16.msra.mxu1 %v23170_v5  ;;  %7048 = vmatpush1.bf16.msra.mxu0 %v23173_v33  ;;  %v14680_v54 = vcombine.high %v14672_v9, %v14672_v9  ;;  %v14708_v57 = vunpack.i.h.s16 %v14679_v60  ;;  %v21376_v48 = vpack.i.b16 %v14679_v60, %v14657_v6  ;;  %v15332_v46 = vunpack.i.h.s16 %v14657_v6  ;;  %v23193_v60 = vld [vmem:[%s30624_s4 + $0x64] ss:$16 sps:$4 sm:$0xff]  }
 0x620   : > { %7079 = vmatprep.mubr.bf16.mxu0 %v26556_v10  ;;  %v27000_v58 = vcombine.low %v26911_v29, %v10457_v34  ;;  %10832 = vmatprep.subr.bf16.mxu1 %v23178_v31  ;;  %v13557_v27 = vcombine.low %v26979_v26, %v26991_v36  ;;  %v14181_v51 = vcombine.high %v14165_v28, %v14172_v22 }
 0x621   : > { %7049 = vmatprep.subr.bf16.mxu0 %v23181_v18  ;;  %v14180_v29 = vcombine.low %v14165_v28, %v14172_v22  ;;  %v21377_v56 = vpack.i.b16 %v14680_v54, %v14708_v57  ;;  %v14783_v63 = vcombine.low %v14656_v41, %v21376_v48  ;;  %v21509_v5 = vpack.i.b16 %v14657_v6, %v15330_v2 }
 0x622   : > { %10822 = vmatmul.mubr.bf16.vlgmr.msra.gmra.mrb[12].mxu1 %v27000_v58  ;;  %v13566_v33 = vrot.slane %v13557_v27, %v26368_v1  ;;  %v14196_v8 = vrot.slane %v14181_v51, %v26368_v1  ;;  %v27017_v4 = vrot.slane %v14712_v19, %v26368_v1  ;;  %v15405_v31 = vpack.i.b16 %v14708_v57, %v15332_v46  ;;  %v23185_v19 = vld [vmem:[%s30624_s4 + $0x40] ss:$16 sps:$4 sm:$0xff]   ;;  %v23188_v57 = vld [vmem:[%s30624_s4 + $0xe48] ss:$16 sps:$4 sm:$0xff]   ;;  %v23199_v27 = vld [vmem:[%s30624_s4 + $0x84] ss:$16 sps:$4 sm:$0xff]  }
 0x623   : > { %10833 = vmatpush1.bf16.msra.mxu1 %v23176_v42  ;;  %10864 = vmatprep.mubr.bf16.mxu1 %v26509_v21  ;;  %v14189_v41 = vrot.slane %v14180_v29, %v26368_v1  ;;  %v14784_v13 = vcombine.low %v21377_v56, %v26625_v59  ;;  %v15434_v34 = vcombine.high %v26883_v32, %v26883_v32  ;;  %v23190_v21 = vld [vmem:[%s30624_s4 + $0xe4c] ss:$16 sps:$4 sm:$0xff]  }
 0x624   : > { %7050 = vmatpush1.bf16.msra.mxu0 %v23179_v30  ;;  %10834 = vmatprep.subr.bf16.mxu1 %v23184_v0  ;;  %v30637_v18 = vrot.slane %v26672_v24, %v26368_v1  ;;  %v27039_v59 = vcombine.low %v14196_v8, %v26833_v20  ;;  %v27042_v9 = vrot.slane %v14783_v63, %v26368_v1  ;;  %v23194_v63 = vld [vmem:[%s30624_s4 + $0xe68] ss:$16 sps:$4 sm:$0xff]  }
 0x625   : > { %7051 = vmatprep.subr.bf16.mxu0 %v23187_v49  ;;  %v30638_v28 = vrot.slane %v26692_v39, %v26368_v1  ;;  %v27053_v2 = vrot.slane %v14784_v13, %v26368_v1  ;;  %v15409_v42 = vcombine.low %v21509_v5, %v15405_v31  ;;  %v15410_v20 = vcombine.low %v14680_v54, %v26766_v3  ;;  %v23191_v3 = vld [vmem:[%s30624_s4 + $0x60] ss:$16 sps:$4 sm:$0xff]   ;;  %v23196_v54 = vld [vmem:[%s30624_s4 + $0xe6c] ss:$16 sps:$4 sm:$0xff]  }
 0x626   : > { %v27036_v6 = vcombine.low %v13566_v33, %v30637_v18  ;;  %v14829_v46 = vrot.slane %v27017_v4, %v26368_v1  ;;  %v15462_v0 = vrot.slane %v15434_v34, %v26368_v1  ;;  %v15455_v56 = vrot.slane %v26883_v32, %v26368_v1  ;;  %v23197_v31 = vld [vmem:[%s30624_s4 + $0x80] ss:$16 sps:$4 sm:$0xff]   ;;  %v23202_v32 = vld [vmem:[%s30624_s4 + $0xe8c] ss:$16 sps:$4 sm:$0xff]   ;;  %v23200_v34 = vld [vmem:[%s30624_s4 + $0xe88] ss:$16 sps:$4 sm:$0xff]  }
 0x627   : > { %v27050_v22 = vcombine.low %v14189_v41, %v30638_v28  ;;  %10835 = vmatpush1.bf16.msra.mxu1 %v23182_v43  ;;  %v14806_v48 = vcombine.low %v27042_v9, %v27053_v2  ;;  %v15417_v39 = vrot.slane %v15409_v42, %v26368_v1  ;;  %v15424_v30 = vrot.slane %v15410_v20, %v26368_v1  ;;  %v23205_v43 = vld [vmem:[%s30624_s4 + $0xa4] ss:$16 sps:$4 sm:$0xff]   ;;  %v23209_v28 = vld [vmem:[%s30624_s4 + $0xc0] ss:$16 sps:$4 sm:$0xff]   ;;  %v23214_v42 = vld [vmem:[%s30624_s4 + $0xecc] ss:$16 sps:$4 sm:$0xff]  }
 0x628   : > { %7052 = vmatpush1.bf16.msra.mxu0 %v23185_v19  ;;  %10836 = vmatprep.subr.bf16.mxu1 %v23190_v21  ;;  %v23203_v19 = vld [vmem:[%s30624_s4 + $0xa0] ss:$16 sps:$4 sm:$0xff]   ;;  %v23208_v21 = vld [vmem:[%s30624_s4 + $0xeac] ss:$16 sps:$4 sm:$0xff]   ;;  %v23211_v18 = vld [vmem:[%s30624_s4 + $0xc4] ss:$16 sps:$4 sm:$0xff]  }
 0x629   : > { %7053 = vmatprep.subr.bf16.mxu0 %v23193_v60  ;;  %v14815_v51 = vrot.slane %v14806_v48, %v26368_v1  ;;  %v15433_v49 = vcombine.high %v15417_v39, %v15424_v30  ;;  %v15432_v29 = vcombine.low %v15417_v39, %v15424_v30  ;;  %v23206_v60 = vld [vmem:[%s30624_s4 + $0xea8] ss:$16 sps:$4 sm:$0xff]   ;;  %v23217_v20 = vld [vmem:[%s30624_s4 + $0xe4] ss:$16 sps:$4 sm:$0xff]   ;;  %v23215_v48 = vld [vmem:[%s30624_s4 + $0xe0] ss:$16 sps:$4 sm:$0xff]  }
 0x62a   : > { %v23223_v39 = vld [vmem:[%s30624_s4 + $0x104] ss:$16 sps:$4 sm:$0xff]   ;;  %v23218_v30 = vld [vmem:[%s30624_s4 + $0xee8] ss:$16 sps:$4 sm:$0xff]  }
 0x62b   : > { %10837 = vmatpush1.bf16.msra.mxu1 %v23188_v57  ;;  %v27081_v5 = vcombine.low %v14815_v51, %v14829_v46  ;;  %v15448_v33 = vrot.slane %v15433_v49, %v26368_v1  ;;  %v15441_v8 = vrot.slane %v15432_v29, %v26368_v1  ;;  %v23212_v57 = vld [vmem:[%s30624_s4 + $0xec8] ss:$16 sps:$4 sm:$0xff]   ;;  %v23220_v46 = vld [vmem:[%s30624_s4 + $0xeec] ss:$16 sps:$4 sm:$0xff]   ;;  %v23227_v51 = vld [vmem:[%s30624_s4 + $0x120] ss:$16 sps:$4 sm:$0xff]  }
 0x62c   : > { %7054 = vmatpush1.bf16.msra.mxu0 %v23191_v3  ;;  %10838 = vmatprep.subr.bf16.mxu1 %v23196_v54  ;;  %v23221_v3 = vld [vmem:[%s30624_s4 + $0x100] ss:$16 sps:$4 sm:$0xff]   ;;  %v23226_v54 = vld [vmem:[%s30624_s4 + $0xf0c] ss:$16 sps:$4 sm:$0xff]   ;;  %v23235_v29 = vld [vmem:[%s30624_s4 + $0x144] ss:$16 sps:$4 sm:$0xff]  }
 0x62d   : > { %7055 = vmatprep.subr.bf16.mxu0 %v23199_v27  ;;  %v27094_v41 = vcombine.low %v15448_v33, %v15462_v0  ;;  %v27096_v13 = vcombine.low %v15441_v8, %v15455_v56  ;;  %v23229_v0 = vld [vmem:[%s30624_s4 + $0x124] ss:$16 sps:$4 sm:$0xff]   ;;  %v23224_v27 = vld [vmem:[%s30624_s4 + $0xf08] ss:$16 sps:$4 sm:$0xff]   ;;  %v23232_v49 = vld [vmem:[%s30624_s4 + $0xf2c] ss:$16 sps:$4 sm:$0xff]  }
 0x62e   : > { %v23230_v56 = vld [vmem:[%s30624_s4 + $0xf28] ss:$16 sps:$4 sm:$0xff]   ;;  %v23238_v33 = vld [vmem:[%s30624_s4 + $0xf4c] ss:$16 sps:$4 sm:$0xff]   ;;  %v23241_v8 = vld [vmem:[%s30624_s4 + $0x164] ss:$16 sps:$4 sm:$0xff]  }
 0x62f   : > { %10839 = vmatpush1.bf16.msra.mxu1 %v23194_v63  ;;  %v23233_v63 = vld [vmem:[%s30624_s4 + $0x140] ss:$16 sps:$4 sm:$0xff]  }
 0x630   : > { %7056 = vmatpush1.bf16.msra.mxu0 %v23197_v31  ;;  %10840 = vmatprep.subr.bf16.mxu1 %v23202_v32  ;;  %v23236_v31 = vld [vmem:[%s30624_s4 + $0xf48] ss:$16 sps:$4 sm:$0xff]   ;;  %v23239_v32 = vld [vmem:[%s30624_s4 + $0x160] ss:$16 sps:$4 sm:$0xff]  }
 0x631   : > { %7057 = vmatprep.subr.bf16.mxu0 %v23205_v43  ;;  %v23244_v43 = vld [vmem:[%s30624_s4 + $0xf6c] ss:$16 sps:$4 sm:$0xff]  }
 0x633   : > { %10841 = vmatpush1.bf16.msra.mxu1 %v23200_v34  ;;  %v23247_v34 = vld [vmem:[%s30624_s4 + $0x184] ss:$16 sps:$4 sm:$0xff]  }
 0x634   : > { %7058 = vmatpush1.bf16.msra.mxu0 %v23203_v19  ;;  %10842 = vmatprep.subr.bf16.mxu1 %v23208_v21  ;;  %v23242_v19 = vld [vmem:[%s30624_s4 + $0xf68] ss:$16 sps:$4 sm:$0xff]   ;;  %v23245_v21 = vld [vmem:[%s30624_s4 + $0x180] ss:$16 sps:$4 sm:$0xff]  }
 0x635   : > { %7059 = vmatprep.subr.bf16.mxu0 %v23211_v18  ;;  %v23250_v18 = vld [vmem:[%s30624_s4 + $0xf8c] ss:$16 sps:$4 sm:$0xff]  }
 0x637   : > { %10843 = vmatpush1.bf16.msra.mxu1 %v23206_v60  ;;  %v23253_v60 = vld [vmem:[%s30624_s4 + $0x1a4] ss:$16 sps:$4 sm:$0xff]  }
 0x638   : > { %7060 = vmatpush1.bf16.msra.mxu0 %v23209_v28  ;;  %10844 = vmatprep.subr.bf16.mxu1 %v23214_v42  ;;  %v23248_v28 = vld [vmem:[%s30624_s4 + $0xf88] ss:$16 sps:$4 sm:$0xff]   ;;  %v23251_v42 = vld [vmem:[%s30624_s4 + $0x1a0] ss:$16 sps:$4 sm:$0xff]  }
 0x639   : > { %7061 = vmatprep.subr.bf16.mxu0 %v23217_v20  ;;  %v23256_v20 = vld [vmem:[%s30624_s4 + $0xfac] ss:$16 sps:$4 sm:$0xff]  }
 0x63b   : > { %10845 = vmatpush1.bf16.msra.mxu1 %v23212_v57  ;;  %v23259_v57 = vld [vmem:[%s30624_s4 + $0x1c4] ss:$16 sps:$4 sm:$0xff]  }
 0x63c   : > { %7062 = vmatpush1.bf16.msra.mxu0 %v23215_v48  ;;  %10846 = vmatprep.subr.bf16.mxu1 %v23220_v46  ;;  %v23254_v48 = vld [vmem:[%s30624_s4 + $0xfa8] ss:$16 sps:$4 sm:$0xff]   ;;  %v23257_v46 = vld [vmem:[%s30624_s4 + $0x1c0] ss:$16 sps:$4 sm:$0xff]  }
 0x63d   : > { %7063 = vmatprep.subr.bf16.mxu0 %v23223_v39  ;;  %v23262_v39 = vld [vmem:[%s30624_s4 + $0xfcc] ss:$16 sps:$4 sm:$0xff]  }
 0x63f   : > { %10847 = vmatpush1.bf16.msra.mxu1 %v23218_v30  ;;  %v23265_v30 = vld [vmem:[%s30624_s4 + $0x1e4] ss:$16 sps:$4 sm:$0xff]  }
 0x640   : > { %7064 = vmatpush1.bf16.msra.mxu0 %v23221_v3  ;;  %10848 = vmatprep.subr.bf16.mxu1 %v23226_v54  ;;  %v23260_v3 = vld [vmem:[%s30624_s4 + $0xfc8] ss:$16 sps:$4 sm:$0xff]   ;;  %v23263_v54 = vld [vmem:[%s30624_s4 + $0x1e0] ss:$16 sps:$4 sm:$0xff]  }
 0x641   : > { %7065 = vmatprep.subr.bf16.mxu0 %v23229_v0  ;;  %v23268_v0 = vld [vmem:[%s30624_s4 + $0xfec] ss:$16 sps:$4 sm:$0xff]  }
 0x643   : > { %10849 = vmatpush1.bf16.msra.mxu1 %v23224_v27  ;;  %v23271_v27 = vld [vmem:[%s30624_s4 + $0xc] ss:$16 sps:$4 sm:$0xff]  }
 0x644   : > { %7066 = vmatpush1.bf16.msra.mxu0 %v23227_v51  ;;  %10850 = vmatprep.subr.bf16.mxu1 %v23232_v49  ;;  %v11059_v51 = vcombine.high %v26582_v23, %v26599_v35  ;;  %v23266_v49 = vld [vmem:[%s30624_s4 + $0xfe8] ss:$16 sps:$4 sm:$0xff]   ;;  %v23277_v35 = vld [vmem:[%s30624_s4 + $0x2c] ss:$16 sps:$4 sm:$0xff]  }
 0x645   : > { %7067 = vmatprep.subr.bf16.mxu0 %v23235_v29  ;;  %v11060_v29 = vcombine.high %v26602_v37, %v26602_v37  ;;  %v23272_v37 = vld [vmem:[%s30624_s4 + $0x1000] ss:$16 sps:$4 sm:$0xff]  }
 0x646   : > { %v11074_v23 = vrot.slane %v11059_v51, %v26368_v1  ;;  %v23313_v51 = vld [vmem:[%s30624_s4 + $0xec] ss:$16 sps:$4 sm:$0xff]  }
 0x647   : > { %10851 = vmatpush1.bf16.msra.mxu1 %v23230_v56  ;;  %v23269_v56 = vld [vmem:[%s30624_s4 + $0x8] ss:$16 sps:$4 sm:$0xff]  }
 0x648   : > { %7068 = vmatpush1.bf16.msra.mxu0 %v23233_v63  ;;  %10852 = vmatprep.subr.bf16.mxu1 %v23238_v33  ;;  %v23274_v63 = vld [vmem:[%s30624_s4 + $0x1004] ss:$16 sps:$4 sm:$0xff]   ;;  %v11088_v33 = vrot.slane %v11060_v29, %v26368_v1  ;;  %v23311_v29 = vld [vmem:[%s30624_s4 + $0xe8] ss:$16 sps:$4 sm:$0xff]  }
 0x649   : > { %7069 = vmatprep.subr.bf16.mxu0 %v23241_v8  ;;  %v23275_v8 = vld [vmem:[%s30624_s4 + $0x28] ss:$16 sps:$4 sm:$0xff]  }
 0x64b   : > { %10853 = vmatpush1.bf16.msra.mxu1 %v23236_v31  ;;  %v23280_v31 = vld [vmem:[%s30624_s4 + $0x1024] ss:$16 sps:$4 sm:$0xff]  }
 0x64c   : > { %7070 = vmatpush1.bf16.msra.mxu0 %v23239_v32  ;;  %10854 = vmatprep.subr.bf16.mxu1 %v23244_v43  ;;  %v27259_v32 = vcombine.low %v11074_v23, %v11088_v33  ;;  %v23283_v43 = vld [vmem:[%s30624_s4 + $0x4c] ss:$16 sps:$4 sm:$0xff]   ;;  %v23314_v23 = vld [vmem:[%s30624_s4 + $0x10e0] ss:$16 sps:$4 sm:$0xff]  }
 0x64d   : > { %7071 = vmatprep.subr.bf16.mxu0 %v23247_v34  ;;  %v23281_v34 = vld [vmem:[%s30624_s4 + $0x48] ss:$16 sps:$4 sm:$0xff]   ;;  %v23325_v33 = vld [vmem:[%s30624_s4 + $0x12c] ss:$16 sps:$4 sm:$0xff]  }
 0x64f   : > { %10855 = vmatpush1.bf16.msra.mxu1 %v23242_v19  ;;  %v23286_v19 = vld [vmem:[%s30624_s4 + $0x1044] ss:$16 sps:$4 sm:$0xff]  }
 0x650   : > { %7072 = vmatpush1.bf16.msra.mxu0 %v23245_v21  ;;  %10856 = vmatprep.subr.bf16.mxu1 %v23250_v18  ;;  %v23284_v21 = vld [vmem:[%s30624_s4 + $0x1040] ss:$16 sps:$4 sm:$0xff]   ;;  %v23287_v18 = vld [vmem:[%s30624_s4 + $0x68] ss:$16 sps:$4 sm:$0xff]  }
 0x651   : > { %7073 = vmatprep.subr.bf16.mxu0 %v23253_v60  ;;  %v23292_v60 = vld [vmem:[%s30624_s4 + $0x1064] ss:$16 sps:$4 sm:$0xff]  }
 0x653   : > { %10857 = vmatpush1.bf16.msra.mxu1 %v23248_v28  ;;  %v23295_v28 = vld [vmem:[%s30624_s4 + $0x8c] ss:$16 sps:$4 sm:$0xff]  }
 0x654   : > { %7074 = vmatpush1.bf16.msra.mxu0 %v23251_v42  ;;  %10858 = vmatprep.subr.bf16.mxu1 %v23256_v20  ;;  %v23290_v42 = vld [vmem:[%s30624_s4 + $0x1060] ss:$16 sps:$4 sm:$0xff]   ;;  %v23293_v20 = vld [vmem:[%s30624_s4 + $0x88] ss:$16 sps:$4 sm:$0xff]  }
 0x655   : > { %7075 = vmatprep.subr.bf16.mxu0 %v23259_v57  ;;  %v23298_v57 = vld [vmem:[%s30624_s4 + $0x1084] ss:$16 sps:$4 sm:$0xff]  }
 0x657   : > { %10859 = vmatpush1.bf16.msra.mxu1 %v23254_v48  ;;  %v23301_v48 = vld [vmem:[%s30624_s4 + $0xac] ss:$16 sps:$4 sm:$0xff]  }
 0x658   : > { %7076 = vmatpush1.bf16.msra.mxu0 %v23257_v46  ;;  %10860 = vmatprep.subr.bf16.mxu1 %v23262_v39  ;;  %v23296_v46 = vld [vmem:[%s30624_s4 + $0x1080] ss:$16 sps:$4 sm:$0xff]   ;;  %v23299_v39 = vld [vmem:[%s30624_s4 + $0xa8] ss:$16 sps:$4 sm:$0xff]  }
 0x659   : > { %7077 = vmatprep.subr.bf16.mxu0 %v23265_v30  ;;  %v23304_v30 = vld [vmem:[%s30624_s4 + $0x10a4] ss:$16 sps:$4 sm:$0xff]  }
 0x65b   : > { %10861 = vmatpush1.bf16.msra.mxu1 %v23260_v3  ;;  %v23307_v3 = vld [vmem:[%s30624_s4 + $0xcc] ss:$16 sps:$4 sm:$0xff]  }
 0x65c   : > { %7078 = vmatpush1.bf16.msra.mxu0 %v23263_v54  ;;  %10862 = vmatprep.subr.bf16.mxu1 %v23268_v0  ;;  %v23302_v54 = vld [vmem:[%s30624_s4 + $0x10a0] ss:$16 sps:$4 sm:$0xff]   ;;  %v23305_v0 = vld [vmem:[%s30624_s4 + $0xc8] ss:$16 sps:$4 sm:$0xff]  }
 0x65d   : > { %7090 = vmatprep.subr.bf16.mxu0 %v23271_v27  ;;  %v23310_v27 = vld [vmem:[%s30624_s4 + $0x10c4] ss:$16 sps:$4 sm:$0xff]  }
 0x65f   : > { %10863 = vmatpush1.bf16.msra.mxu1 %v23266_v49  ;;  %7080 = vmatmul.mubr.bf16.vlgmr.msra.gmra.mrb[44].mxu0 %v26558_v11  ;;  %v23308_v49 = vld [vmem:[%s30624_s4 + $0x10c0] ss:$16 sps:$4 sm:$0xff]  }
 0x660   : > { %7091 = vmatpush1.bf16.msra.mxu0 %v23269_v56  ;;  %7122 = vmatprep.mubr.bf16.mxu0 %v26556_v10  ;;  %v23278_v10 = vld [vmem:[%s30624_s4 + $0x1020] ss:$16 sps:$4 sm:$0xff]   ;;  %v23316_v56 = vld [vmem:[%s30624_s4 + $0x10e4] ss:$16 sps:$4 sm:$0xff]  }
 0x661   : > { %11413 = vmatprep.subr.bf16.mxu1 %v23274_v63  ;;  %7092 = vmatprep.subr.bf16.mxu0 %v23277_v35  ;;  %v23319_v63 = vld [vmem:[%s30624_s4 + $0x10c] ss:$16 sps:$4 sm:$0xff]   ;;  %v23317_v35 = vld [vmem:[%s30624_s4 + $0x108] ss:$16 sps:$4 sm:$0xff]  }
 0x662   : > { %10865 = vmatmul.mubr.bf16.vlgmr.msra.gmra.mrb[8].mxu1 %v27000_v58  ;;  %v23289_v58 = vld [vmem:[%s30624_s4 + $0x6c] ss:$16 sps:$4 sm:$0xff]  }
 0x663   : > { %11414 = vmatpush1.bf16.msra.mxu1 %v23272_v37  ;;  %11445 = vmatprep.mubr.bf16.mxu1 %v27259_v32  ;;  %v23322_v37 = vld [vmem:[%s30624_s4 + $0x1104] ss:$16 sps:$4 sm:$0xff]  }
 0x664   : > { %7093 = vmatpush1.bf16.msra.mxu0 %v23275_v8  ;;  %11415 = vmatprep.subr.bf16.mxu1 %v23280_v31  ;;  %v23320_v8 = vld [vmem:[%s30624_s4 + $0x1100] ss:$16 sps:$4 sm:$0xff]   ;;  %v23323_v31 = vld [vmem:[%s30624_s4 + $0x128] ss:$16 sps:$4 sm:$0xff]  }
 0x665   : > { %7094 = vmatprep.subr.bf16.mxu0 %v23283_v43  ;;  %v23328_v43 = vld [vmem:[%s30624_s4 + $0x1124] ss:$16 sps:$4 sm:$0xff]  }
 0x667   : > { %11416 = vmatpush1.bf16.msra.mxu1 %v23278_v10  ;;  %v23331_v10 = vld [vmem:[%s30624_s4 + $0x14c] ss:$16 sps:$4 sm:$0xff]  }
 0x668   : > { %7095 = vmatpush1.bf16.msra.mxu0 %v23281_v34  ;;  %11417 = vmatprep.subr.bf16.mxu1 %v23286_v19  ;;  %v23326_v34 = vld [vmem:[%s30624_s4 + $0x1120] ss:$16 sps:$4 sm:$0xff]   ;;  %v23329_v19 = vld [vmem:[%s30624_s4 + $0x148] ss:$16 sps:$4 sm:$0xff]  }
 0x669   : > { %7096 = vmatprep.subr.bf16.mxu0 %v23289_v58  ;;  %v23334_v58 = vld [vmem:[%s30624_s4 + $0x1144] ss:$16 sps:$4 sm:$0xff]  }
 0x66b   : > { %11418 = vmatpush1.bf16.msra.mxu1 %v23284_v21  ;;  %v23337_v21 = vld [vmem:[%s30624_s4 + $0x16c] ss:$16 sps:$4 sm:$0xff]  }
 0x66c   : > { %7097 = vmatpush1.bf16.msra.mxu0 %v23287_v18  ;;  %11419 = vmatprep.subr.bf16.mxu1 %v23292_v60  ;;  %v23332_v18 = vld [vmem:[%s30624_s4 + $0x1140] ss:$16 sps:$4 sm:$0xff]   ;;  %v23335_v60 = vld [vmem:[%s30624_s4 + $0x168] ss:$16 sps:$4 sm:$0xff]  }
 0x66d   : > { %7098 = vmatprep.subr.bf16.mxu0 %v23295_v28  ;;  %v23340_v28 = vld [vmem:[%s30624_s4 + $0x1164] ss:$16 sps:$4 sm:$0xff]  }
 0x66f   : > { %11420 = vmatpush1.bf16.msra.mxu1 %v23290_v42  ;;  %v23343_v42 = vld [vmem:[%s30624_s4 + $0x18c] ss:$16 sps:$4 sm:$0xff]  }
 0x670   : > { %7099 = vmatpush1.bf16.msra.mxu0 %v23293_v20  ;;  %11421 = vmatprep.subr.bf16.mxu1 %v23298_v57  ;;  %v23338_v20 = vld [vmem:[%s30624_s4 + $0x1160] ss:$16 sps:$4 sm:$0xff]   ;;  %v23341_v57 = vld [vmem:[%s30624_s4 + $0x188] ss:$16 sps:$4 sm:$0xff]  }
 0x671   : > { %7100 = vmatprep.subr.bf16.mxu0 %v23301_v48  ;;  %v23346_v48 = vld [vmem:[%s30624_s4 + $0x1184] ss:$16 sps:$4 sm:$0xff]  }
 0x673   : > { %11422 = vmatpush1.bf16.msra.mxu1 %v23296_v46  ;;  %v23349_v46 = vld [vmem:[%s30624_s4 + $0x1ac] ss:$16 sps:$4 sm:$0xff]  }
 0x674   : > { %7101 = vmatpush1.bf16.msra.mxu0 %v23299_v39  ;;  %11423 = vmatprep.subr.bf16.mxu1 %v23304_v30  ;;  %v23344_v39 = vld [vmem:[%s30624_s4 + $0x1180] ss:$16 sps:$4 sm:$0xff]   ;;  %v23347_v30 = vld [vmem:[%s30624_s4 + $0x1a8] ss:$16 sps:$4 sm:$0xff]  }
 0x675   : > { %7102 = vmatprep.subr.bf16.mxu0 %v23307_v3  ;;  %v23352_v3 = vld [vmem:[%s30624_s4 + $0x11a4] ss:$16 sps:$4 sm:$0xff]  }
 0x677   : > { %11424 = vmatpush1.bf16.msra.mxu1 %v23302_v54  ;;  %v23355_v54 = vld [vmem:[%s30624_s4 + $0x1cc] ss:$16 sps:$4 sm:$0xff]  }
 0x678   : > { %7103 = vmatpush1.bf16.msra.mxu0 %v23305_v0  ;;  %11425 = vmatprep.subr.bf16.mxu1 %v23310_v27  ;;  %v23350_v0 = vld [vmem:[%s30624_s4 + $0x11a0] ss:$16 sps:$4 sm:$0xff]   ;;  %v23353_v27 = vld [vmem:[%s30624_s4 + $0x1c8] ss:$16 sps:$4 sm:$0xff]  }
 0x679   : > { %7104 = vmatprep.subr.bf16.mxu0 %v23313_v51  ;;  %v23358_v51 = vld [vmem:[%s30624_s4 + $0x11c4] ss:$16 sps:$4 sm:$0xff]  }
 0x67b   : > { %11426 = vmatpush1.bf16.msra.mxu1 %v23308_v49  ;;  %v23361_v49 = vld [vmem:[%s30624_s4 + $0x1ec] ss:$16 sps:$4 sm:$0xff]  }
 0x67c   : > { %7105 = vmatpush1.bf16.msra.mxu0 %v23311_v29  ;;  %11427 = vmatprep.subr.bf16.mxu1 %v23316_v56  ;;  %v7311_v29 = vcombine.high %v26616_v50, %v26634_v62  ;;  %v23356_v56 = vld [vmem:[%s30624_s4 + $0x11c0] ss:$16 sps:$4 sm:$0xff]   ;;  %v23367_v50 = vld [vmem:[%s30624_s4 + $0x404] ss:$16 sps:$4 sm:$0xff]  }
 0x67d   : > { %7106 = vmatprep.subr.bf16.mxu0 %v23319_v63  ;;  %v23359_v63 = vld [vmem:[%s30624_s4 + $0x1e8] ss:$16 sps:$4 sm:$0xff]  }
 0x67e   : > { %v7326_v62 = vrot.slane %v7311_v29, %v26368_v1  ;;  %v23409_v29 = vld [vmem:[%s30624_s4 + $0x4e4] ss:$16 sps:$4 sm:$0xff]  }
 0x67f   : > { %11428 = vmatpush1.bf16.msra.mxu1 %v23314_v23  ;;  %v23364_v23 = vld [vmem:[%s30624_s4 + $0x11e4] ss:$16 sps:$4 sm:$0xff]  }
 0x680   : > { %7107 = vmatpush1.bf16.msra.mxu0 %v23317_v35  ;;  %11429 = vmatprep.subr.bf16.mxu1 %v23322_v37  ;;  %v7312_v35 = vcombine.high %v26637_v40, %v26637_v40  ;;  %v23362_v37 = vld [vmem:[%s30624_s4 + $0x11e0] ss:$16 sps:$4 sm:$0xff]  }
 0x681   : > { %7108 = vmatprep.subr.bf16.mxu0 %v23325_v33  ;;  %v23365_v33 = vld [vmem:[%s30624_s4 + $0x400] ss:$16 sps:$4 sm:$0xff]  }
 0x682   : > { %v7340_v40 = vrot.slane %v7312_v35, %v26368_v1  ;;  %v23415_v35 = vld [vmem:[%s30624_s4 + $0x504] ss:$16 sps:$4 sm:$0xff]  }
 0x683   : > { %11430 = vmatpush1.bf16.msra.mxu1 %v23320_v8  ;;  %v23370_v8 = vld [vmem:[%s30624_s4 + $0x100c] ss:$16 sps:$4 sm:$0xff]  }
 0x684   : > { %7109 = vmatpush1.bf16.msra.mxu0 %v23323_v31  ;;  %11431 = vmatprep.subr.bf16.mxu1 %v23328_v43  ;;  %v23373_v31 = vld [vmem:[%s30624_s4 + $0x424] ss:$16 sps:$4 sm:$0xff]   ;;  %v27452_v43 = vcombine.low %v7326_v62, %v7340_v40  ;;  %v23413_v62 = vld [vmem:[%s30624_s4 + $0x500] ss:$16 sps:$4 sm:$0xff]   ;;  %v23416_v40 = vld [vmem:[%s30624_s4 + $0x1108] ss:$16 sps:$4 sm:$0xff]  }
 0x685   : > { %7110 = vmatprep.subr.bf16.mxu0 %v23331_v10  ;;  %v23368_v10 = vld [vmem:[%s30624_s4 + $0x1008] ss:$16 sps:$4 sm:$0xff]  }
 0x687   : > { %11432 = vmatpush1.bf16.msra.mxu1 %v23326_v34  ;;  %v23371_v34 = vld [vmem:[%s30624_s4 + $0x420] ss:$16 sps:$4 sm:$0xff]  }
 0x688   : > { %7111 = vmatpush1.bf16.msra.mxu0 %v23329_v19  ;;  %11433 = vmatprep.subr.bf16.mxu1 %v23334_v58  ;;  %v23376_v19 = vld [vmem:[%s30624_s4 + $0x102c] ss:$16 sps:$4 sm:$0xff]   ;;  %v23374_v58 = vld [vmem:[%s30624_s4 + $0x1028] ss:$16 sps:$4 sm:$0xff]  }
 0x689   : > { %7112 = vmatprep.subr.bf16.mxu0 %v23337_v21  ;;  %v23377_v21 = vld [vmem:[%s30624_s4 + $0x440] ss:$16 sps:$4 sm:$0xff]  }
 0x68b   : > { %11434 = vmatpush1.bf16.msra.mxu1 %v23332_v18  ;;  %v23382_v18 = vld [vmem:[%s30624_s4 + $0x104c] ss:$16 sps:$4 sm:$0xff]  }
 0x68c   : > { %7113 = vmatpush1.bf16.msra.mxu0 %v23335_v60  ;;  %11435 = vmatprep.subr.bf16.mxu1 %v23340_v28  ;;  %v23385_v60 = vld [vmem:[%s30624_s4 + $0x464] ss:$16 sps:$4 sm:$0xff]   ;;  %v23383_v28 = vld [vmem:[%s30624_s4 + $0x460] ss:$16 sps:$4 sm:$0xff]  }
 0x68d   : > { %7114 = vmatprep.subr.bf16.mxu0 %v23343_v42  ;;  %v23388_v42 = vld [vmem:[%s30624_s4 + $0x106c] ss:$16 sps:$4 sm:$0xff]  }
 0x68f   : > { %11436 = vmatpush1.bf16.msra.mxu1 %v23338_v20  ;;  %v23391_v20 = vld [vmem:[%s30624_s4 + $0x484] ss:$16 sps:$4 sm:$0xff]  }
 0x690   : > { %7115 = vmatpush1.bf16.msra.mxu0 %v23341_v57  ;;  %11437 = vmatprep.subr.bf16.mxu1 %v23346_v48  ;;  %v23386_v57 = vld [vmem:[%s30624_s4 + $0x1068] ss:$16 sps:$4 sm:$0xff]   ;;  %v23389_v48 = vld [vmem:[%s30624_s4 + $0x480] ss:$16 sps:$4 sm:$0xff]  }
 0x691   : > { %7116 = vmatprep.subr.bf16.mxu0 %v23349_v46  ;;  %v23394_v46 = vld [vmem:[%s30624_s4 + $0x108c] ss:$16 sps:$4 sm:$0xff]  }
 0x693   : > { %11438 = vmatpush1.bf16.msra.mxu1 %v23344_v39  ;;  %v23397_v39 = vld [vmem:[%s30624_s4 + $0x4a4] ss:$16 sps:$4 sm:$0xff]  }
 0x694   : > { %7117 = vmatpush1.bf16.msra.mxu0 %v23347_v30  ;;  %11439 = vmatprep.subr.bf16.mxu1 %v23352_v3  ;;  %v23392_v30 = vld [vmem:[%s30624_s4 + $0x1088] ss:$16 sps:$4 sm:$0xff]   ;;  %v23395_v3 = vld [vmem:[%s30624_s4 + $0x4a0] ss:$16 sps:$4 sm:$0xff]  }
 0x695   : > { %7118 = vmatprep.subr.bf16.mxu0 %v23355_v54  ;;  %v23400_v54 = vld [vmem:[%s30624_s4 + $0x10ac] ss:$16 sps:$4 sm:$0xff]  }
 0x697   : > { %11440 = vmatpush1.bf16.msra.mxu1 %v23350_v0  ;;  %v23403_v0 = vld [vmem:[%s30624_s4 + $0x4c4] ss:$16 sps:$4 sm:$0xff]  }
 0x698   : > { %7119 = vmatpush1.bf16.msra.mxu0 %v23353_v27  ;;  %11441 = vmatprep.subr.bf16.mxu1 %v23358_v51  ;;  %v23398_v27 = vld [vmem:[%s30624_s4 + $0x10a8] ss:$16 sps:$4 sm:$0xff]   ;;  %v23401_v51 = vld [vmem:[%s30624_s4 + $0x4c0] ss:$16 sps:$4 sm:$0xff]  }
 0x699   : > { %7120 = vmatprep.subr.bf16.mxu0 %v23361_v49  ;;  %v23406_v49 = vld [vmem:[%s30624_s4 + $0x10cc] ss:$16 sps:$4 sm:$0xff]  }
 0x69b   : > { %11442 = vmatpush1.bf16.msra.mxu1 %v23356_v56  ;;  %v23404_v56 = vld [vmem:[%s30624_s4 + $0x10c8] ss:$16 sps:$4 sm:$0xff]  }
 0x69c   : > { %7121 = vmatpush1.bf16.msra.mxu0 %v23359_v63  ;;  %11443 = vmatprep.subr.bf16.mxu1 %v23364_v23  ;;  %v23407_v63 = vld [vmem:[%s30624_s4 + $0x4e0] ss:$16 sps:$4 sm:$0xff]   ;;  %v23412_v23 = vld [vmem:[%s30624_s4 + $0x10ec] ss:$16 sps:$4 sm:$0xff]  }
 0x69d   : > { %7665 = vmatprep.subr.bf16.mxu0 %v23367_v50  ;;  %v23410_v50 = vld [vmem:[%s30624_s4 + $0x10e8] ss:$16 sps:$4 sm:$0xff]  }
 0x69f   : > { %11444 = vmatpush1.bf16.msra.mxu1 %v23362_v37  ;;  %7123 = vmatmul.mubr.bf16.vlgmr.msra.gmra.mrb[48].mxu0 %v26558_v11  ;;  %v23379_v11 = vld [vmem:[%s30624_s4 + $0x444] ss:$16 sps:$4 sm:$0xff]   ;;  %v23418_v37 = vld [vmem:[%s30624_s4 + $0x110c] ss:$16 sps:$4 sm:$0xff]  }
 0x6a0   : > { %7666 = vmatpush1.bf16.msra.mxu0 %v23365_v33  ;;  %7697 = vmatprep.mubr.bf16.mxu0 %v27452_v43  ;;  %v23421_v33 = vld [vmem:[%s30624_s4 + $0x524] ss:$16 sps:$4 sm:$0xff]  }
 0x6a1   : > { %11456 = vmatprep.subr.bf16.mxu1 %v23370_v8  ;;  %7667 = vmatprep.subr.bf16.mxu0 %v23373_v31  ;;  %v23419_v8 = vld [vmem:[%s30624_s4 + $0x520] ss:$16 sps:$4 sm:$0xff]   ;;  %v23424_v31 = vld [vmem:[%s30624_s4 + $0x112c] ss:$16 sps:$4 sm:$0xff]  }
 0x6a2   : > { %11446 = vmatmul.mubr.bf16.vlgmr.msra.gmra.mrb[12].mxu1 %v26657_v14 }
 0x6a3   : > { %11457 = vmatpush1.bf16.msra.mxu1 %v23368_v10  ;;  %11488 = vmatprep.mubr.bf16.mxu1 %v27259_v32  ;;  %v23380_v32 = vld [vmem:[%s30624_s4 + $0x1048] ss:$16 sps:$4 sm:$0xff]   ;;  %v23427_v10 = vld [vmem:[%s30624_s4 + $0x544] ss:$16 sps:$4 sm:$0xff]  }
 0x6a4   : > { %7668 = vmatpush1.bf16.msra.mxu0 %v23371_v34  ;;  %11458 = vmatprep.subr.bf16.mxu1 %v23376_v19  ;;  %v23422_v34 = vld [vmem:[%s30624_s4 + $0x1128] ss:$16 sps:$4 sm:$0xff]   ;;  %v23425_v19 = vld [vmem:[%s30624_s4 + $0x540] ss:$16 sps:$4 sm:$0xff]  }
 0x6a5   : > { %7669 = vmatprep.subr.bf16.mxu0 %v23379_v11  ;;  %v23430_v11 = vld [vmem:[%s30624_s4 + $0x114c] ss:$16 sps:$4 sm:$0xff]  }
 0x6a7   : > { %11459 = vmatpush1.bf16.msra.mxu1 %v23374_v58  ;;  %v23433_v58 = vld [vmem:[%s30624_s4 + $0x564] ss:$16 sps:$4 sm:$0xff]  }
 0x6a8   : > { %7670 = vmatpush1.bf16.msra.mxu0 %v23377_v21  ;;  %11460 = vmatprep.subr.bf16.mxu1 %v23382_v18  ;;  %v23428_v21 = vld [vmem:[%s30624_s4 + $0x1148] ss:$16 sps:$4 sm:$0xff]   ;;  %v23431_v18 = vld [vmem:[%s30624_s4 + $0x560] ss:$16 sps:$4 sm:$0xff]  }
 0x6a9   : > { %7671 = vmatprep.subr.bf16.mxu0 %v23385_v60  ;;  %v23436_v60 = vld [vmem:[%s30624_s4 + $0x116c] ss:$16 sps:$4 sm:$0xff]  }
 0x6ab   : > { %11461 = vmatpush1.bf16.msra.mxu1 %v23380_v32  ;;  %v23439_v32 = vld [vmem:[%s30624_s4 + $0x584] ss:$16 sps:$4 sm:$0xff]  }
 0x6ac   : > { %7672 = vmatpush1.bf16.msra.mxu0 %v23383_v28  ;;  %11462 = vmatprep.subr.bf16.mxu1 %v23388_v42  ;;  %v23434_v28 = vld [vmem:[%s30624_s4 + $0x1168] ss:$16 sps:$4 sm:$0xff]   ;;  %v23437_v42 = vld [vmem:[%s30624_s4 + $0x580] ss:$16 sps:$4 sm:$0xff]  }
 0x6ad   : > { %7673 = vmatprep.subr.bf16.mxu0 %v23391_v20  ;;  %v23442_v20 = vld [vmem:[%s30624_s4 + $0x118c] ss:$16 sps:$4 sm:$0xff]  }
 0x6af   : > { %11463 = vmatpush1.bf16.msra.mxu1 %v23386_v57  ;;  %v23445_v57 = vld [vmem:[%s30624_s4 + $0x5a4] ss:$16 sps:$4 sm:$0xff]  }
 0x6b0   : > { %7674 = vmatpush1.bf16.msra.mxu0 %v23389_v48  ;;  %11464 = vmatprep.subr.bf16.mxu1 %v23394_v46  ;;  %v23440_v48 = vld [vmem:[%s30624_s4 + $0x1188] ss:$16 sps:$4 sm:$0xff]   ;;  %v23443_v46 = vld [vmem:[%s30624_s4 + $0x5a0] ss:$16 sps:$4 sm:$0xff]  }
 0x6b1   : > { %7675 = vmatprep.subr.bf16.mxu0 %v23397_v39  ;;  %v23448_v39 = vld [vmem:[%s30624_s4 + $0x11ac] ss:$16 sps:$4 sm:$0xff]  }
 0x6b3   : > { %11465 = vmatpush1.bf16.msra.mxu1 %v23392_v30  ;;  %v23451_v30 = vld [vmem:[%s30624_s4 + $0x5c4] ss:$16 sps:$4 sm:$0xff]  }
 0x6b4   : > { %7676 = vmatpush1.bf16.msra.mxu0 %v23395_v3  ;;  %11466 = vmatprep.subr.bf16.mxu1 %v23400_v54  ;;  %v23446_v3 = vld [vmem:[%s30624_s4 + $0x11a8] ss:$16 sps:$4 sm:$0xff]   ;;  %v23449_v54 = vld [vmem:[%s30624_s4 + $0x5c0] ss:$16 sps:$4 sm:$0xff]  }
 0x6b5   : > { %7677 = vmatprep.subr.bf16.mxu0 %v23403_v0  ;;  %v23454_v0 = vld [vmem:[%s30624_s4 + $0x11cc] ss:$16 sps:$4 sm:$0xff]  }
 0x6b7   : > { %11467 = vmatpush1.bf16.msra.mxu1 %v23398_v27  ;;  %v23457_v27 = vld [vmem:[%s30624_s4 + $0x5e4] ss:$16 sps:$4 sm:$0xff]  }
 0x6b8   : > { %7678 = vmatpush1.bf16.msra.mxu0 %v23401_v51  ;;  %11468 = vmatprep.subr.bf16.mxu1 %v23406_v49  ;;  %v23452_v51 = vld [vmem:[%s30624_s4 + $0x11c8] ss:$16 sps:$4 sm:$0xff]   ;;  %v23455_v49 = vld [vmem:[%s30624_s4 + $0x5e0] ss:$16 sps:$4 sm:$0xff]  }
 0x6b9   : > { %7679 = vmatprep.subr.bf16.mxu0 %v23409_v29  ;;  %v23460_v29 = vld [vmem:[%s30624_s4 + $0x11ec] ss:$16 sps:$4 sm:$0xff]  }
 0x6bb   : > { %11469 = vmatpush1.bf16.msra.mxu1 %v23404_v56  ;;  %v23463_v56 = vld [vmem:[%s30624_s4 + $0x40c] ss:$16 sps:$4 sm:$0xff]  }
 0x6bc   : > { %7680 = vmatpush1.bf16.msra.mxu0 %v23407_v63  ;;  %11470 = vmatprep.subr.bf16.mxu1 %v23412_v23  ;;  %v23458_v63 = vld [vmem:[%s30624_s4 + $0x11e8] ss:$16 sps:$4 sm:$0xff]  }
 0x6bd   : > { %7681 = vmatprep.subr.bf16.mxu0 %v23415_v35  ;;  %v23461_v23 = vld [vmem:[%s30624_s4 + $0x408] ss:$16 sps:$4 sm:$0xff]   ;;  %v23466_v35 = vld [vmem:[%s30624_s4 + $0x1204] ss:$16 sps:$4 sm:$0xff]  }
 0x6bf   : > { %11471 = vmatpush1.bf16.msra.mxu1 %v23410_v50  ;;  %v23469_v50 = vld [vmem:[%s30624_s4 + $0x42c] ss:$16 sps:$4 sm:$0xff]  }
 0x6c0   : > { %7682 = vmatpush1.bf16.msra.mxu0 %v23413_v62  ;;  %11472 = vmatprep.subr.bf16.mxu1 %v23418_v37  ;;  %v23464_v62 = vld [vmem:[%s30624_s4 + $0x1200] ss:$16 sps:$4 sm:$0xff]   ;;  %v23467_v37 = vld [vmem:[%s30624_s4 + $0x428] ss:$16 sps:$4 sm:$0xff]  }
 0x6c1   : > { %7683 = vmatprep.subr.bf16.mxu0 %v23421_v33  ;;  %v23472_v33 = vld [vmem:[%s30624_s4 + $0x1224] ss:$16 sps:$4 sm:$0xff]  }
 0x6c3   : > { %11473 = vmatpush1.bf16.msra.mxu1 %v23416_v40  ;;  %v23475_v40 = vld [vmem:[%s30624_s4 + $0x44c] ss:$16 sps:$4 sm:$0xff]  }
 0x6c4   : > { %7684 = vmatpush1.bf16.msra.mxu0 %v23419_v8  ;;  %11474 = vmatprep.subr.bf16.mxu1 %v23424_v31  ;;  %v23473_v8 = vld [vmem:[%s30624_s4 + $0x448] ss:$16 sps:$4 sm:$0xff]   ;;  %v23478_v31 = vld [vmem:[%s30624_s4 + $0x1244] ss:$16 sps:$4 sm:$0xff]  }
 0x6c5   : > { %7685 = vmatprep.subr.bf16.mxu0 %v23427_v10  ;;  %v23476_v10 = vld [vmem:[%s30624_s4 + $0x1240] ss:$16 sps:$4 sm:$0xff]  }
 0x6c7   : > { %11475 = vmatpush1.bf16.msra.mxu1 %v23422_v34  ;;  %v23479_v34 = vld [vmem:[%s30624_s4 + $0x468] ss:$16 sps:$4 sm:$0xff]  }
 0x6c8   : > { %7686 = vmatpush1.bf16.msra.mxu0 %v23425_v19  ;;  %11476 = vmatprep.subr.bf16.mxu1 %v23430_v11  ;;  %v23484_v19 = vld [vmem:[%s30624_s4 + $0x1264] ss:$16 sps:$4 sm:$0xff]   ;;  %v23487_v11 = vld [vmem:[%s30624_s4 + $0x48c] ss:$16 sps:$4 sm:$0xff]  }
 0x6c9   : > { %7687 = vmatprep.subr.bf16.mxu0 %v23433_v58  ;;  %v23482_v58 = vld [vmem:[%s30624_s4 + $0x1260] ss:$16 sps:$4 sm:$0xff]  }
 0x6cb   : > { %11477 = vmatpush1.bf16.msra.mxu1 %v23428_v21  ;;  %v23485_v21 = vld [vmem:[%s30624_s4 + $0x488] ss:$16 sps:$4 sm:$0xff]  }
 0x6cc   : > { %7688 = vmatpush1.bf16.msra.mxu0 %v23431_v18  ;;  %11478 = vmatprep.subr.bf16.mxu1 %v23436_v60  ;;  %v23490_v18 = vld [vmem:[%s30624_s4 + $0x1284] ss:$16 sps:$4 sm:$0xff]   ;;  %v23493_v60 = vld [vmem:[%s30624_s4 + $0x4ac] ss:$16 sps:$4 sm:$0xff]  }
 0x6cd   : > { %7689 = vmatprep.subr.bf16.mxu0 %v23439_v32  ;;  %v23488_v32 = vld [vmem:[%s30624_s4 + $0x1280] ss:$16 sps:$4 sm:$0xff]  }
 0x6cf   : > { %11479 = vmatpush1.bf16.msra.mxu1 %v23434_v28  ;;  %v23491_v28 = vld [vmem:[%s30624_s4 + $0x4a8] ss:$16 sps:$4 sm:$0xff]  }
 0x6d0   : > { %7690 = vmatpush1.bf16.msra.mxu0 %v23437_v42  ;;  %11480 = vmatprep.subr.bf16.mxu1 %v23442_v20  ;;  %v23496_v42 = vld [vmem:[%s30624_s4 + $0x12a4] ss:$16 sps:$4 sm:$0xff]   ;;  %v23499_v20 = vld [vmem:[%s30624_s4 + $0x4cc] ss:$16 sps:$4 sm:$0xff]  }
 0x6d1   : > { %7691 = vmatprep.subr.bf16.mxu0 %v23445_v57  ;;  %v23494_v57 = vld [vmem:[%s30624_s4 + $0x12a0] ss:$16 sps:$4 sm:$0xff]  }
 0x6d3   : > { %11481 = vmatpush1.bf16.msra.mxu1 %v23440_v48  ;;  %v23497_v48 = vld [vmem:[%s30624_s4 + $0x4c8] ss:$16 sps:$4 sm:$0xff]  }
 0x6d4   : > { %7692 = vmatpush1.bf16.msra.mxu0 %v23443_v46  ;;  %11482 = vmatprep.subr.bf16.mxu1 %v23448_v39  ;;  %v23502_v46 = vld [vmem:[%s30624_s4 + $0x12c4] ss:$16 sps:$4 sm:$0xff]   ;;  %v23505_v39 = vld [vmem:[%s30624_s4 + $0x4ec] ss:$16 sps:$4 sm:$0xff]  }
 0x6d5   : > { %7693 = vmatprep.subr.bf16.mxu0 %v23451_v30  ;;  %v23500_v30 = vld [vmem:[%s30624_s4 + $0x12c0] ss:$16 sps:$4 sm:$0xff]  }
 0x6d7   : > { %11483 = vmatpush1.bf16.msra.mxu1 %v23446_v3  ;;  %v23503_v3 = vld [vmem:[%s30624_s4 + $0x4e8] ss:$16 sps:$4 sm:$0xff]  }
 0x6d8   : > { %7694 = vmatpush1.bf16.msra.mxu0 %v23449_v54  ;;  %11484 = vmatprep.subr.bf16.mxu1 %v23454_v0  ;;  %v23508_v54 = vld [vmem:[%s30624_s4 + $0x12e4] ss:$16 sps:$4 sm:$0xff]   ;;  %v23511_v0 = vld [vmem:[%s30624_s4 + $0x50c] ss:$16 sps:$4 sm:$0xff]  }
 0x6d9   : > { %7695 = vmatprep.subr.bf16.mxu0 %v23457_v27  ;;  %v23506_v27 = vld [vmem:[%s30624_s4 + $0x12e0] ss:$16 sps:$4 sm:$0xff]  }
 0x6db   : > { %11485 = vmatpush1.bf16.msra.mxu1 %v23452_v51  ;;  %v23509_v51 = vld [vmem:[%s30624_s4 + $0x508] ss:$16 sps:$4 sm:$0xff]  }
 0x6dc   : > { %7696 = vmatpush1.bf16.msra.mxu0 %v23455_v49  ;;  %11486 = vmatprep.subr.bf16.mxu1 %v23460_v29  ;;  %v23514_v49 = vld [vmem:[%s30624_s4 + $0x1304] ss:$16 sps:$4 sm:$0xff]   ;;  %v23517_v29 = vld [vmem:[%s30624_s4 + $0x52c] ss:$16 sps:$4 sm:$0xff]  }
 0x6dd   : > { %7708 = vmatprep.subr.bf16.mxu0 %v23463_v56  ;;  %v23512_v56 = vld [vmem:[%s30624_s4 + $0x1300] ss:$16 sps:$4 sm:$0xff]  }
 0x6df   : > { %11487 = vmatpush1.bf16.msra.mxu1 %v23458_v63  ;;  %7698 = vmatmul.mubr.bf16.vlgmr.msra.gmra.mrb[44].mxu0 %v26686_v55  ;;  %v23515_v63 = vld [vmem:[%s30624_s4 + $0x528] ss:$16 sps:$4 sm:$0xff]  }
 0x6e0   : > { %7709 = vmatpush1.bf16.msra.mxu0 %v23461_v23  ;;  %7740 = vmatprep.mubr.bf16.mxu0 %v27452_v43  ;;  %v23470_v43 = vld [vmem:[%s30624_s4 + $0x1220] ss:$16 sps:$4 sm:$0xff]   ;;  %v23520_v23 = vld [vmem:[%s30624_s4 + $0x1324] ss:$16 sps:$4 sm:$0xff]  }
 0x6e1   : > { %12036 = vmatprep.subr.bf16.mxu1 %v23466_v35  ;;  %7710 = vmatprep.subr.bf16.mxu0 %v23469_v50  ;;  %v23523_v35 = vld [vmem:[%s30624_s4 + $0x54c] ss:$16 sps:$4 sm:$0xff]   ;;  %v23518_v50 = vld [vmem:[%s30624_s4 + $0x1320] ss:$16 sps:$4 sm:$0xff]  }
 0x6e2   : > { %11489 = vmatmul.mubr.bf16.vlgmr.msra.gmra.mrb[8].mxu1 %v26657_v14  ;;  %v23481_v14 = vld [vmem:[%s30624_s4 + $0x46c] ss:$16 sps:$4 sm:$0xff]  }
 0x6e3   : > { %12037 = vmatpush1.bf16.msra.mxu1 %v23464_v62  ;;  %12068 = vmatprep.mubr.bf16.mxu1 %v26723_v47  ;;  %v23521_v62 = vld [vmem:[%s30624_s4 + $0x548] ss:$16 sps:$4 sm:$0xff]  }
 0x6e4   : > { %7711 = vmatpush1.bf16.msra.mxu0 %v23467_v37  ;;  %12038 = vmatprep.subr.bf16.mxu1 %v23472_v33  ;;  %v23526_v37 = vld [vmem:[%s30624_s4 + $0x1344] ss:$16 sps:$4 sm:$0xff]   ;;  %v23529_v33 = vld [vmem:[%s30624_s4 + $0x56c] ss:$16 sps:$4 sm:$0xff]  }
 0x6e5   : > { %7712 = vmatprep.subr.bf16.mxu0 %v23475_v40  ;;  %v23524_v40 = vld [vmem:[%s30624_s4 + $0x1340] ss:$16 sps:$4 sm:$0xff]  }
 0x6e7   : > { %12039 = vmatpush1.bf16.msra.mxu1 %v23470_v43  ;;  %v23527_v43 = vld [vmem:[%s30624_s4 + $0x568] ss:$16 sps:$4 sm:$0xff]  }
 0x6e8   : > { %7713 = vmatpush1.bf16.msra.mxu0 %v23473_v8  ;;  %12040 = vmatprep.subr.bf16.mxu1 %v23478_v31  ;;  %v23532_v8 = vld [vmem:[%s30624_s4 + $0x1364] ss:$16 sps:$4 sm:$0xff]   ;;  %v23535_v31 = vld [vmem:[%s30624_s4 + $0x58c] ss:$16 sps:$4 sm:$0xff]  }
 0x6e9   : > { %7714 = vmatprep.subr.bf16.mxu0 %v23481_v14  ;;  %v23530_v14 = vld [vmem:[%s30624_s4 + $0x1360] ss:$16 sps:$4 sm:$0xff]  }
 0x6eb   : > { %12041 = vmatpush1.bf16.msra.mxu1 %v23476_v10  ;;  %v23533_v10 = vld [vmem:[%s30624_s4 + $0x588] ss:$16 sps:$4 sm:$0xff]  }
 0x6ec   : > { %7715 = vmatpush1.bf16.msra.mxu0 %v23479_v34  ;;  %12042 = vmatprep.subr.bf16.mxu1 %v23484_v19  ;;  %v23538_v34 = vld [vmem:[%s30624_s4 + $0x1384] ss:$16 sps:$4 sm:$0xff]   ;;  %v23541_v19 = vld [vmem:[%s30624_s4 + $0x5ac] ss:$16 sps:$4 sm:$0xff]  }
 0x6ed   : > { %7716 = vmatprep.subr.bf16.mxu0 %v23487_v11  ;;  %v23536_v11 = vld [vmem:[%s30624_s4 + $0x1380] ss:$16 sps:$4 sm:$0xff]  }
 0x6ef   : > { %12043 = vmatpush1.bf16.msra.mxu1 %v23482_v58  ;;  %v23539_v58 = vld [vmem:[%s30624_s4 + $0x5a8] ss:$16 sps:$4 sm:$0xff]  }
 0x6f0   : > { %7717 = vmatpush1.bf16.msra.mxu0 %v23485_v21  ;;  %12044 = vmatprep.subr.bf16.mxu1 %v23490_v18  ;;  %v23544_v21 = vld [vmem:[%s30624_s4 + $0x13a4] ss:$16 sps:$4 sm:$0xff]   ;;  %v23547_v18 = vld [vmem:[%s30624_s4 + $0x5cc] ss:$16 sps:$4 sm:$0xff]  }
 0x6f1   : > { %7718 = vmatprep.subr.bf16.mxu0 %v23493_v60  ;;  %v23542_v60 = vld [vmem:[%s30624_s4 + $0x13a0] ss:$16 sps:$4 sm:$0xff]  }
 0x6f3   : > { %12045 = vmatpush1.bf16.msra.mxu1 %v23488_v32  ;;  %v23545_v32 = vld [vmem:[%s30624_s4 + $0x5c8] ss:$16 sps:$4 sm:$0xff]  }
 0x6f4   : > { %7719 = vmatpush1.bf16.msra.mxu0 %v23491_v28  ;;  %12046 = vmatprep.subr.bf16.mxu1 %v23496_v42  ;;  %v23550_v28 = vld [vmem:[%s30624_s4 + $0x13c4] ss:$16 sps:$4 sm:$0xff]   ;;  %v23553_v42 = vld [vmem:[%s30624_s4 + $0x5ec] ss:$16 sps:$4 sm:$0xff]  }
 0x6f5   : > { %7720 = vmatprep.subr.bf16.mxu0 %v23499_v20  ;;  %v23548_v20 = vld [vmem:[%s30624_s4 + $0x13c0] ss:$16 sps:$4 sm:$0xff]  }
 0x6f7   : > { %12047 = vmatpush1.bf16.msra.mxu1 %v23494_v57  ;;  %v23551_v57 = vld [vmem:[%s30624_s4 + $0x5e8] ss:$16 sps:$4 sm:$0xff]  }
 0x6f8   : > { %7721 = vmatpush1.bf16.msra.mxu0 %v23497_v48  ;;  %12048 = vmatprep.subr.bf16.mxu1 %v23502_v46  ;;  %v23556_v48 = vld [vmem:[%s30624_s4 + $0x13e4] ss:$16 sps:$4 sm:$0xff]  }
 0x6f9   : > { %7722 = vmatprep.subr.bf16.mxu0 %v23505_v39  ;;  %v23559_v46 = vld [vmem:[%s30624_s4 + $0x604] ss:$16 sps:$4 sm:$0xff]   ;;  %v23554_v39 = vld [vmem:[%s30624_s4 + $0x13e0] ss:$16 sps:$4 sm:$0xff]  }
 0x6fb   : > { %12049 = vmatpush1.bf16.msra.mxu1 %v23500_v30  ;;  %v23557_v30 = vld [vmem:[%s30624_s4 + $0x600] ss:$16 sps:$4 sm:$0xff]  }
 0x6fc   : > { %7723 = vmatpush1.bf16.msra.mxu0 %v23503_v3  ;;  %12050 = vmatprep.subr.bf16.mxu1 %v23508_v54  ;;  %v23562_v3 = vld [vmem:[%s30624_s4 + $0x120c] ss:$16 sps:$4 sm:$0xff]   ;;  %v23565_v54 = vld [vmem:[%s30624_s4 + $0x624] ss:$16 sps:$4 sm:$0xff]  }
 0x6fd   : > { %7724 = vmatprep.subr.bf16.mxu0 %v23511_v0  ;;  %v23560_v0 = vld [vmem:[%s30624_s4 + $0x1208] ss:$16 sps:$4 sm:$0xff]  }
 0x6ff   : > { %12051 = vmatpush1.bf16.msra.mxu1 %v23506_v27  ;;  %v23563_v27 = vld [vmem:[%s30624_s4 + $0x620] ss:$16 sps:$4 sm:$0xff]  }
 0x700   : > { %7725 = vmatpush1.bf16.msra.mxu0 %v23509_v51  ;;  %12052 = vmatprep.subr.bf16.mxu1 %v23514_v49  ;;  %v23568_v51 = vld [vmem:[%s30624_s4 + $0x122c] ss:$16 sps:$4 sm:$0xff]   ;;  %v23566_v49 = vld [vmem:[%s30624_s4 + $0x1228] ss:$16 sps:$4 sm:$0xff]  }
 0x701   : > { %7726 = vmatprep.subr.bf16.mxu0 %v23517_v29  ;;  %v23569_v29 = vld [vmem:[%s30624_s4 + $0x640] ss:$16 sps:$4 sm:$0xff]  }
 0x703   : > { %12053 = vmatpush1.bf16.msra.mxu1 %v23512_v56  ;;  %v23574_v56 = vld [vmem:[%s30624_s4 + $0x124c] ss:$16 sps:$4 sm:$0xff]  }
 0x704   : > { %7727 = vmatpush1.bf16.msra.mxu0 %v23515_v63  ;;  %12054 = vmatprep.subr.bf16.mxu1 %v23520_v23  ;;  %v23577_v63 = vld [vmem:[%s30624_s4 + $0x664] ss:$16 sps:$4 sm:$0xff]   ;;  %v23575_v23 = vld [vmem:[%s30624_s4 + $0x660] ss:$16 sps:$4 sm:$0xff]  }
 0x705   : > { %7728 = vmatprep.subr.bf16.mxu0 %v23523_v35  ;;  %v23580_v35 = vld [vmem:[%s30624_s4 + $0x126c] ss:$16 sps:$4 sm:$0xff]  }
 0x707   : > { %12055 = vmatpush1.bf16.msra.mxu1 %v23518_v50  ;;  %v23583_v50 = vld [vmem:[%s30624_s4 + $0x684] ss:$16 sps:$4 sm:$0xff]  }
 0x708   : > { %7729 = vmatpush1.bf16.msra.mxu0 %v23521_v62  ;;  %12056 = vmatprep.subr.bf16.mxu1 %v23526_v37  ;;  %v23578_v62 = vld [vmem:[%s30624_s4 + $0x1268] ss:$16 sps:$4 sm:$0xff]   ;;  %v23581_v37 = vld [vmem:[%s30624_s4 + $0x680] ss:$16 sps:$4 sm:$0xff]  }
 0x709   : > { %7730 = vmatprep.subr.bf16.mxu0 %v23529_v33  ;;  %v23586_v33 = vld [vmem:[%s30624_s4 + $0x128c] ss:$16 sps:$4 sm:$0xff]  }
 0x70b   : > { %12057 = vmatpush1.bf16.msra.mxu1 %v23524_v40  ;;  %v23589_v40 = vld [vmem:[%s30624_s4 + $0x6a4] ss:$16 sps:$4 sm:$0xff]  }
 0x70c   : > { %7731 = vmatpush1.bf16.msra.mxu0 %v23527_v43  ;;  %12058 = vmatprep.subr.bf16.mxu1 %v23532_v8  ;;  %v23584_v43 = vld [vmem:[%s30624_s4 + $0x1288] ss:$16 sps:$4 sm:$0xff]   ;;  %v23587_v8 = vld [vmem:[%s30624_s4 + $0x6a0] ss:$16 sps:$4 sm:$0xff]  }
 0x70d   : > { %7732 = vmatprep.subr.bf16.mxu0 %v23535_v31  ;;  %v23592_v31 = vld [vmem:[%s30624_s4 + $0x12ac] ss:$16 sps:$4 sm:$0xff]  }
 0x70f   : > { %12059 = vmatpush1.bf16.msra.mxu1 %v23530_v14  ;;  %v23595_v14 = vld [vmem:[%s30624_s4 + $0x6c4] ss:$16 sps:$4 sm:$0xff]  }
 0x710   : > { %7733 = vmatpush1.bf16.msra.mxu0 %v23533_v10  ;;  %12060 = vmatprep.subr.bf16.mxu1 %v23538_v34  ;;  %v23590_v10 = vld [vmem:[%s30624_s4 + $0x12a8] ss:$16 sps:$4 sm:$0xff]   ;;  %v23593_v34 = vld [vmem:[%s30624_s4 + $0x6c0] ss:$16 sps:$4 sm:$0xff]  }
 0x711   : > { %7734 = vmatprep.subr.bf16.mxu0 %v23541_v19  ;;  %v23598_v19 = vld [vmem:[%s30624_s4 + $0x12cc] ss:$16 sps:$4 sm:$0xff]  }
 0x713   : > { %12061 = vmatpush1.bf16.msra.mxu1 %v23536_v11  ;;  %v23601_v11 = vld [vmem:[%s30624_s4 + $0x6e4] ss:$16 sps:$4 sm:$0xff]  }
 0x714   : > { %7735 = vmatpush1.bf16.msra.mxu0 %v23539_v58  ;;  %12062 = vmatprep.subr.bf16.mxu1 %v23544_v21  ;;  %v23596_v58 = vld [vmem:[%s30624_s4 + $0x12c8] ss:$16 sps:$4 sm:$0xff]   ;;  %v23599_v21 = vld [vmem:[%s30624_s4 + $0x6e0] ss:$16 sps:$4 sm:$0xff]  }
 0x715   : > { %7736 = vmatprep.subr.bf16.mxu0 %v23547_v18  ;;  %v23604_v18 = vld [vmem:[%s30624_s4 + $0x12ec] ss:$16 sps:$4 sm:$0xff]  }
 0x717   : > { %12063 = vmatpush1.bf16.msra.mxu1 %v23542_v60  ;;  %v23607_v60 = vld [vmem:[%s30624_s4 + $0x704] ss:$16 sps:$4 sm:$0xff]  }
 0x718   : > { %7737 = vmatpush1.bf16.msra.mxu0 %v23545_v32  ;;  %12064 = vmatprep.subr.bf16.mxu1 %v23550_v28  ;;  %v23602_v32 = vld [vmem:[%s30624_s4 + $0x12e8] ss:$16 sps:$4 sm:$0xff]   ;;  %v23605_v28 = vld [vmem:[%s30624_s4 + $0x700] ss:$16 sps:$4 sm:$0xff]  }
 0x719   : > { %7738 = vmatprep.subr.bf16.mxu0 %v23553_v42  ;;  %v23610_v42 = vld [vmem:[%s30624_s4 + $0x130c] ss:$16 sps:$4 sm:$0xff]  }
 0x71b   : > { %12065 = vmatpush1.bf16.msra.mxu1 %v23548_v20  ;;  %v23613_v20 = vld [vmem:[%s30624_s4 + $0x724] ss:$16 sps:$4 sm:$0xff]  }
 0x71c   : > { %7739 = vmatpush1.bf16.msra.mxu0 %v23551_v57  ;;  %12066 = vmatprep.subr.bf16.mxu1 %v23556_v48  ;;  %v23608_v57 = vld [vmem:[%s30624_s4 + $0x1308] ss:$16 sps:$4 sm:$0xff]   ;;  %v23611_v48 = vld [vmem:[%s30624_s4 + $0x720] ss:$16 sps:$4 sm:$0xff]  }
 0x71d   : > { %8291 = vmatprep.subr.bf16.mxu0 %v23559_v46  ;;  %v23616_v46 = vld [vmem:[%s30624_s4 + $0x132c] ss:$16 sps:$4 sm:$0xff]  }
 0x71f   : > { %12067 = vmatpush1.bf16.msra.mxu1 %v23554_v39  ;;  %7741 = vmatmul.mubr.bf16.vlgmr.msra.gmra.mrb[48].mxu0 %v26686_v55  ;;  %v23571_v55 = vld [vmem:[%s30624_s4 + $0x644] ss:$16 sps:$4 sm:$0xff]  }
 0x720   : > { %8292 = vmatpush1.bf16.msra.mxu0 %v23557_v30  ;;  %8323 = vmatprep.mubr.bf16.mxu0 %v26761_v7  ;;  %v23619_v39 = vld [vmem:[%s30624_s4 + $0x744] ss:$16 sps:$4 sm:$0xff]   ;;  %v23614_v30 = vld [vmem:[%s30624_s4 + $0x1328] ss:$16 sps:$4 sm:$0xff]  }
 0x721   : > { %12079 = vmatprep.subr.bf16.mxu1 %v23562_v3  ;;  %8293 = vmatprep.subr.bf16.mxu0 %v23565_v54  ;;  %v23617_v3 = vld [vmem:[%s30624_s4 + $0x740] ss:$16 sps:$4 sm:$0xff]   ;;  %v23622_v54 = vld [vmem:[%s30624_s4 + $0x134c] ss:$16 sps:$4 sm:$0xff]  }
 0x722   : > { %12069 = vmatmul.mubr.bf16.vlgmr.msra.gmra.mrb[12].mxu1 %v26729_v17 }
 0x723   : > { %12080 = vmatpush1.bf16.msra.mxu1 %v23560_v0  ;;  %12111 = vmatprep.mubr.bf16.mxu1 %v26723_v47  ;;  %v23572_v47 = vld [vmem:[%s30624_s4 + $0x1248] ss:$16 sps:$4 sm:$0xff]   ;;  %v23625_v0 = vld [vmem:[%s30624_s4 + $0x764] ss:$16 sps:$4 sm:$0xff]  }
 0x724   : > { %8294 = vmatpush1.bf16.msra.mxu0 %v23563_v27  ;;  %12081 = vmatprep.subr.bf16.mxu1 %v23568_v51  ;;  %v23620_v27 = vld [vmem:[%s30624_s4 + $0x1348] ss:$16 sps:$4 sm:$0xff]   ;;  %v23623_v51 = vld [vmem:[%s30624_s4 + $0x760] ss:$16 sps:$4 sm:$0xff]  }
 0x725   : > { %8295 = vmatprep.subr.bf16.mxu0 %v23571_v55  ;;  %v23628_v55 = vld [vmem:[%s30624_s4 + $0x136c] ss:$16 sps:$4 sm:$0xff]  }
 0x727   : > { %12082 = vmatpush1.bf16.msra.mxu1 %v23566_v49  ;;  %v23631_v49 = vld [vmem:[%s30624_s4 + $0x784] ss:$16 sps:$4 sm:$0xff]  }
 0x728   : > { %8296 = vmatpush1.bf16.msra.mxu0 %v23569_v29  ;;  %12083 = vmatprep.subr.bf16.mxu1 %v23574_v56  ;;  %v23626_v29 = vld [vmem:[%s30624_s4 + $0x1368] ss:$16 sps:$4 sm:$0xff]   ;;  %v23629_v56 = vld [vmem:[%s30624_s4 + $0x780] ss:$16 sps:$4 sm:$0xff]  }
 0x729   : > { %8297 = vmatprep.subr.bf16.mxu0 %v23577_v63  ;;  %v23634_v63 = vld [vmem:[%s30624_s4 + $0x138c] ss:$16 sps:$4 sm:$0xff]  }
 0x72b   : > { %12084 = vmatpush1.bf16.msra.mxu1 %v23572_v47  ;;  %v23637_v47 = vld [vmem:[%s30624_s4 + $0x7a4] ss:$16 sps:$4 sm:$0xff]  }
 0x72c   : > { %8298 = vmatpush1.bf16.msra.mxu0 %v23575_v23  ;;  %12085 = vmatprep.subr.bf16.mxu1 %v23580_v35  ;;  %v23632_v23 = vld [vmem:[%s30624_s4 + $0x1388] ss:$16 sps:$4 sm:$0xff]   ;;  %v23635_v35 = vld [vmem:[%s30624_s4 + $0x7a0] ss:$16 sps:$4 sm:$0xff]  }
 0x72d   : > { %8299 = vmatprep.subr.bf16.mxu0 %v23583_v50  ;;  %v23640_v50 = vld [vmem:[%s30624_s4 + $0x13ac] ss:$16 sps:$4 sm:$0xff]  }
 0x72f   : > { %12086 = vmatpush1.bf16.msra.mxu1 %v23578_v62  ;;  %v23643_v62 = vld [vmem:[%s30624_s4 + $0x7c4] ss:$16 sps:$4 sm:$0xff]  }
 0x730   : > { %8300 = vmatpush1.bf16.msra.mxu0 %v23581_v37  ;;  %12087 = vmatprep.subr.bf16.mxu1 %v23586_v33  ;;  %v23638_v37 = vld [vmem:[%s30624_s4 + $0x13a8] ss:$16 sps:$4 sm:$0xff]   ;;  %v23641_v33 = vld [vmem:[%s30624_s4 + $0x7c0] ss:$16 sps:$4 sm:$0xff]  }
 0x731   : > { %8301 = vmatprep.subr.bf16.mxu0 %v23589_v40  ;;  %v23646_v40 = vld [vmem:[%s30624_s4 + $0x13cc] ss:$16 sps:$4 sm:$0xff]  }
 0x733   : > { %12088 = vmatpush1.bf16.msra.mxu1 %v23584_v43  ;;  %v23649_v43 = vld [vmem:[%s30624_s4 + $0x7e4] ss:$16 sps:$4 sm:$0xff]  }
 0x734   : > { %8302 = vmatpush1.bf16.msra.mxu0 %v23587_v8  ;;  %12089 = vmatprep.subr.bf16.mxu1 %v23592_v31  ;;  %v23644_v8 = vld [vmem:[%s30624_s4 + $0x13c8] ss:$16 sps:$4 sm:$0xff]   ;;  %v23647_v31 = vld [vmem:[%s30624_s4 + $0x7e0] ss:$16 sps:$4 sm:$0xff]  }
 0x735   : > { %8303 = vmatprep.subr.bf16.mxu0 %v23595_v14  ;;  %v23652_v14 = vld [vmem:[%s30624_s4 + $0x13ec] ss:$16 sps:$4 sm:$0xff]  }
 0x737   : > { %12090 = vmatpush1.bf16.msra.mxu1 %v23590_v10  ;;  %v23655_v10 = vld [vmem:[%s30624_s4 + $0x60c] ss:$16 sps:$4 sm:$0xff]  }
 0x738   : > { %8304 = vmatpush1.bf16.msra.mxu0 %v23593_v34  ;;  %12091 = vmatprep.subr.bf16.mxu1 %v23598_v19  ;;  %v12308_v34 = vcombine.high %v26810_v16, %v26813_v44  ;;  %v23650_v19 = vld [vmem:[%s30624_s4 + $0x13e8] ss:$16 sps:$4 sm:$0xff]   ;;  %v23661_v44 = vld [vmem:[%s30624_s4 + $0x62c] ss:$16 sps:$4 sm:$0xff]  }
 0x739   : > { %8305 = vmatprep.subr.bf16.mxu0 %v23601_v11  ;;  %v12309_v11 = vcombine.high %v26816_v52, %v26816_v52  ;;  %v23656_v52 = vld [vmem:[%s30624_s4 + $0x1400] ss:$16 sps:$4 sm:$0xff]  }
 0x73a   : > { %v12323_v16 = vrot.slane %v12308_v34, %v26368_v1  ;;  %v23715_v34 = vld [vmem:[%s30624_s4 + $0x74c] ss:$16 sps:$4 sm:$0xff]  }
 0x73b   : > { %12092 = vmatpush1.bf16.msra.mxu1 %v23596_v58  ;;  %v23653_v58 = vld [vmem:[%s30624_s4 + $0x608] ss:$16 sps:$4 sm:$0xff]  }
 0x73c   : > { %8306 = vmatpush1.bf16.msra.mxu0 %v23599_v21  ;;  %12093 = vmatprep.subr.bf16.mxu1 %v23604_v18  ;;  %v23658_v21 = vld [vmem:[%s30624_s4 + $0x1404] ss:$16 sps:$4 sm:$0xff]   ;;  %v12337_v18 = vrot.slane %v12309_v11, %v26368_v1  ;;  %v23713_v11 = vld [vmem:[%s30624_s4 + $0x748] ss:$16 sps:$4 sm:$0xff]  }
 0x73d   : > { %8307 = vmatprep.subr.bf16.mxu0 %v23607_v60  ;;  %v23659_v60 = vld [vmem:[%s30624_s4 + $0x628] ss:$16 sps:$4 sm:$0xff]  }
 0x73f   : > { %12094 = vmatpush1.bf16.msra.mxu1 %v23602_v32  ;;  %v23664_v32 = vld [vmem:[%s30624_s4 + $0x1424] ss:$16 sps:$4 sm:$0xff]  }
 0x740   : > { %8308 = vmatpush1.bf16.msra.mxu0 %v23605_v28  ;;  %12095 = vmatprep.subr.bf16.mxu1 %v23610_v42  ;;  %v28059_v28 = vcombine.low %v12323_v16, %v12337_v18  ;;  %v23667_v42 = vld [vmem:[%s30624_s4 + $0x64c] ss:$16 sps:$4 sm:$0xff]   ;;  %v23716_v16 = vld [vmem:[%s30624_s4 + $0x1540] ss:$16 sps:$4 sm:$0xff]  }
 0x741   : > { %8309 = vmatprep.subr.bf16.mxu0 %v23613_v20  ;;  %v23665_v20 = vld [vmem:[%s30624_s4 + $0x648] ss:$16 sps:$4 sm:$0xff]   ;;  %v23727_v18 = vld [vmem:[%s30624_s4 + $0x78c] ss:$16 sps:$4 sm:$0xff]  }
 0x743   : > { %12096 = vmatpush1.bf16.msra.mxu1 %v23608_v57  ;;  %v23670_v57 = vld [vmem:[%s30624_s4 + $0x1444] ss:$16 sps:$4 sm:$0xff]  }
 0x744   : > { %8310 = vmatpush1.bf16.msra.mxu0 %v23611_v48  ;;  %12097 = vmatprep.subr.bf16.mxu1 %v23616_v46  ;;  %v23668_v48 = vld [vmem:[%s30624_s4 + $0x1440] ss:$16 sps:$4 sm:$0xff]   ;;  %v23671_v46 = vld [vmem:[%s30624_s4 + $0x668] ss:$16 sps:$4 sm:$0xff]  }
 0x745   : > { %8311 = vmatprep.subr.bf16.mxu0 %v23619_v39  ;;  %v23676_v39 = vld [vmem:[%s30624_s4 + $0x1464] ss:$16 sps:$4 sm:$0xff]  }
 0x747   : > { %12098 = vmatpush1.bf16.msra.mxu1 %v23614_v30  ;;  %v23679_v30 = vld [vmem:[%s30624_s4 + $0x68c] ss:$16 sps:$4 sm:$0xff]  }
 0x748   : > { %8312 = vmatpush1.bf16.msra.mxu0 %v23617_v3  ;;  %12099 = vmatprep.subr.bf16.mxu1 %v23622_v54  ;;  %v23674_v3 = vld [vmem:[%s30624_s4 + $0x1460] ss:$16 sps:$4 sm:$0xff]   ;;  %v23677_v54 = vld [vmem:[%s30624_s4 + $0x688] ss:$16 sps:$4 sm:$0xff]  }
 0x749   : > { %8313 = vmatprep.subr.bf16.mxu0 %v23625_v0  ;;  %v23682_v0 = vld [vmem:[%s30624_s4 + $0x1484] ss:$16 sps:$4 sm:$0xff]  }
 0x74b   : > { %12100 = vmatpush1.bf16.msra.mxu1 %v23620_v27  ;;  %v23685_v27 = vld [vmem:[%s30624_s4 + $0x6ac] ss:$16 sps:$4 sm:$0xff]  }
 0x74c   : > { %8314 = vmatpush1.bf16.msra.mxu0 %v23623_v51  ;;  %12101 = vmatprep.subr.bf16.mxu1 %v23628_v55  ;;  %v23680_v51 = vld [vmem:[%s30624_s4 + $0x1480] ss:$16 sps:$4 sm:$0xff]   ;;  %v23683_v55 = vld [vmem:[%s30624_s4 + $0x6a8] ss:$16 sps:$4 sm:$0xff]  }
 0x74d   : > { %8315 = vmatprep.subr.bf16.mxu0 %v23631_v49  ;;  %v23688_v49 = vld [vmem:[%s30624_s4 + $0x14a4] ss:$16 sps:$4 sm:$0xff]  }
 0x74f   : > { %12102 = vmatpush1.bf16.msra.mxu1 %v23626_v29  ;;  %v23691_v29 = vld [vmem:[%s30624_s4 + $0x6cc] ss:$16 sps:$4 sm:$0xff]  }
 0x750   : > { %8316 = vmatpush1.bf16.msra.mxu0 %v23629_v56  ;;  %12103 = vmatprep.subr.bf16.mxu1 %v23634_v63  ;;  %v23686_v56 = vld [vmem:[%s30624_s4 + $0x14a0] ss:$16 sps:$4 sm:$0xff]   ;;  %v23689_v63 = vld [vmem:[%s30624_s4 + $0x6c8] ss:$16 sps:$4 sm:$0xff]  }
 0x751   : > { %8317 = vmatprep.subr.bf16.mxu0 %v23637_v47  ;;  %v23694_v47 = vld [vmem:[%s30624_s4 + $0x14c4] ss:$16 sps:$4 sm:$0xff]  }
 0x753   : > { %12104 = vmatpush1.bf16.msra.mxu1 %v23632_v23  ;;  %v23697_v23 = vld [vmem:[%s30624_s4 + $0x6ec] ss:$16 sps:$4 sm:$0xff]  }
 0x754   : > { %8318 = vmatpush1.bf16.msra.mxu0 %v23635_v35  ;;  %12105 = vmatprep.subr.bf16.mxu1 %v23640_v50  ;;  %v23692_v35 = vld [vmem:[%s30624_s4 + $0x14c0] ss:$16 sps:$4 sm:$0xff]   ;;  %v23695_v50 = vld [vmem:[%s30624_s4 + $0x6e8] ss:$16 sps:$4 sm:$0xff]  }
 0x755   : > { %8319 = vmatprep.subr.bf16.mxu0 %v23643_v62  ;;  %v23700_v62 = vld [vmem:[%s30624_s4 + $0x14e4] ss:$16 sps:$4 sm:$0xff]  }
 0x757   : > { %12106 = vmatpush1.bf16.msra.mxu1 %v23638_v37  ;;  %v23703_v37 = vld [vmem:[%s30624_s4 + $0x70c] ss:$16 sps:$4 sm:$0xff]  }
 0x758   : > { %8320 = vmatpush1.bf16.msra.mxu0 %v23641_v33  ;;  %12107 = vmatprep.subr.bf16.mxu1 %v23646_v40  ;;  %v23698_v33 = vld [vmem:[%s30624_s4 + $0x14e0] ss:$16 sps:$4 sm:$0xff]   ;;  %v23701_v40 = vld [vmem:[%s30624_s4 + $0x708] ss:$16 sps:$4 sm:$0xff]  }
 0x759   : > { %8321 = vmatprep.subr.bf16.mxu0 %v23649_v43  ;;  %v23706_v43 = vld [vmem:[%s30624_s4 + $0x1504] ss:$16 sps:$4 sm:$0xff]  }
 0x75b   : > { %12108 = vmatpush1.bf16.msra.mxu1 %v23644_v8  ;;  %v23709_v8 = vld [vmem:[%s30624_s4 + $0x72c] ss:$16 sps:$4 sm:$0xff]  }
 0x75c   : > { %8322 = vmatpush1.bf16.msra.mxu0 %v23647_v31  ;;  %12109 = vmatprep.subr.bf16.mxu1 %v23652_v14  ;;  %v23704_v31 = vld [vmem:[%s30624_s4 + $0x1500] ss:$16 sps:$4 sm:$0xff]   ;;  %v23707_v14 = vld [vmem:[%s30624_s4 + $0x728] ss:$16 sps:$4 sm:$0xff]  }
 0x75d   : > { %8334 = vmatprep.subr.bf16.mxu0 %v23655_v10  ;;  %v23712_v10 = vld [vmem:[%s30624_s4 + $0x1524] ss:$16 sps:$4 sm:$0xff]  }
 0x75f   : > { %12110 = vmatpush1.bf16.msra.mxu1 %v23650_v19  ;;  %8324 = vmatmul.mubr.bf16.vlgmr.msra.gmra.mrb[44].mxu0 %v26763_v12  ;;  %v23710_v19 = vld [vmem:[%s30624_s4 + $0x1520] ss:$16 sps:$4 sm:$0xff]  }
 0x760   : > { %8335 = vmatpush1.bf16.msra.mxu0 %v23653_v58  ;;  %8366 = vmatprep.mubr.bf16.mxu0 %v26761_v7  ;;  %v23662_v7 = vld [vmem:[%s30624_s4 + $0x1420] ss:$16 sps:$4 sm:$0xff]   ;;  %v23718_v58 = vld [vmem:[%s30624_s4 + $0x1544] ss:$16 sps:$4 sm:$0xff]  }
 0x761   : > { %12662 = vmatprep.subr.bf16.mxu1 %v23658_v21  ;;  %8336 = vmatprep.subr.bf16.mxu0 %v23661_v44  ;;  %v23721_v21 = vld [vmem:[%s30624_s4 + $0x76c] ss:$16 sps:$4 sm:$0xff]   ;;  %v23719_v44 = vld [vmem:[%s30624_s4 + $0x768] ss:$16 sps:$4 sm:$0xff]  }
 0x762   : > { %12112 = vmatmul.mubr.bf16.vlgmr.msra.gmra.mrb[8].mxu1 %v26729_v17  ;;  %v23673_v17 = vld [vmem:[%s30624_s4 + $0x66c] ss:$16 sps:$4 sm:$0xff]  }
 0x763   : > { %12663 = vmatpush1.bf16.msra.mxu1 %v23656_v52  ;;  %12694 = vmatprep.mubr.bf16.mxu1 %v28059_v28  ;;  %v23724_v52 = vld [vmem:[%s30624_s4 + $0x1564] ss:$16 sps:$4 sm:$0xff]  }
 0x764   : > { %8337 = vmatpush1.bf16.msra.mxu0 %v23659_v60  ;;  %12664 = vmatprep.subr.bf16.mxu1 %v23664_v32  ;;  %v23722_v60 = vld [vmem:[%s30624_s4 + $0x1560] ss:$16 sps:$4 sm:$0xff]   ;;  %v23725_v32 = vld [vmem:[%s30624_s4 + $0x788] ss:$16 sps:$4 sm:$0xff]  }
 0x765   : > { %8338 = vmatprep.subr.bf16.mxu0 %v23667_v42  ;;  %v23730_v42 = vld [vmem:[%s30624_s4 + $0x1584] ss:$16 sps:$4 sm:$0xff]  }
 0x767   : > { %12665 = vmatpush1.bf16.msra.mxu1 %v23662_v7  ;;  %v23733_v7 = vld [vmem:[%s30624_s4 + $0x7ac] ss:$16 sps:$4 sm:$0xff]  }
 0x768   : > { %8339 = vmatpush1.bf16.msra.mxu0 %v23665_v20  ;;  %12666 = vmatprep.subr.bf16.mxu1 %v23670_v57  ;;  %v23728_v20 = vld [vmem:[%s30624_s4 + $0x1580] ss:$16 sps:$4 sm:$0xff]   ;;  %v23731_v57 = vld [vmem:[%s30624_s4 + $0x7a8] ss:$16 sps:$4 sm:$0xff]  }
 0x769   : > { %8340 = vmatprep.subr.bf16.mxu0 %v23673_v17  ;;  %v23736_v17 = vld [vmem:[%s30624_s4 + $0x15a4] ss:$16 sps:$4 sm:$0xff]  }
 0x76b   : > { %12667 = vmatpush1.bf16.msra.mxu1 %v23668_v48  ;;  %v23739_v48 = vld [vmem:[%s30624_s4 + $0x7cc] ss:$16 sps:$4 sm:$0xff]  }
 0x76c   : > { %8341 = vmatpush1.bf16.msra.mxu0 %v23671_v46  ;;  %12668 = vmatprep.subr.bf16.mxu1 %v23676_v39  ;;  %v23734_v46 = vld [vmem:[%s30624_s4 + $0x15a0] ss:$16 sps:$4 sm:$0xff]   ;;  %v23737_v39 = vld [vmem:[%s30624_s4 + $0x7c8] ss:$16 sps:$4 sm:$0xff]  }
 0x76d   : > { %8342 = vmatprep.subr.bf16.mxu0 %v23679_v30  ;;  %v23742_v30 = vld [vmem:[%s30624_s4 + $0x15c4] ss:$16 sps:$4 sm:$0xff]  }
 0x76f   : > { %12669 = vmatpush1.bf16.msra.mxu1 %v23674_v3  ;;  %v23745_v3 = vld [vmem:[%s30624_s4 + $0x7ec] ss:$16 sps:$4 sm:$0xff]  }
 0x770   : > { %8343 = vmatpush1.bf16.msra.mxu0 %v23677_v54  ;;  %12670 = vmatprep.subr.bf16.mxu1 %v23682_v0  ;;  %v8560_v54 = vcombine.high %v26843_v45, %v26852_v53  ;;  %v8561_v0 = vcombine.high %v26855_v61, %v26855_v61  ;;  %v23751_v53 = vld [vmem:[%s30624_s4 + $0x804] ss:$16 sps:$4 sm:$0xff]  }
 0x771   : > { %8344 = vmatprep.subr.bf16.mxu0 %v23685_v27  ;;  %v23740_v27 = vld [vmem:[%s30624_s4 + $0x15c0] ss:$16 sps:$4 sm:$0xff]  }
 0x772   : > { %v8575_v45 = vrot.slane %v8560_v54, %v26368_v1  ;;  %v8589_v61 = vrot.slane %v8561_v0, %v26368_v1  ;;  %v23808_v54 = vld [vmem:[%s30624_s4 + $0x152c] ss:$16 sps:$4 sm:$0xff]   ;;  %v23811_v0 = vld [vmem:[%s30624_s4 + $0x944] ss:$16 sps:$4 sm:$0xff]  }
 0x773   : > { %12671 = vmatpush1.bf16.msra.mxu1 %v23680_v51  ;;  %v23743_v51 = vld [vmem:[%s30624_s4 + $0x7e8] ss:$16 sps:$4 sm:$0xff]  }
 0x774   : > { %8345 = vmatpush1.bf16.msra.mxu0 %v23683_v55  ;;  %12672 = vmatprep.subr.bf16.mxu1 %v23688_v49  ;;  %v23748_v55 = vld [vmem:[%s30624_s4 + $0x15e4] ss:$16 sps:$4 sm:$0xff]   ;;  %v23746_v49 = vld [vmem:[%s30624_s4 + $0x15e0] ss:$16 sps:$4 sm:$0xff]  }
 0x775   : > { %8346 = vmatprep.subr.bf16.mxu0 %v23691_v29  ;;  %v23749_v29 = vld [vmem:[%s30624_s4 + $0x800] ss:$16 sps:$4 sm:$0xff]  }
 0x777   : > { %12673 = vmatpush1.bf16.msra.mxu1 %v23686_v56  ;;  %v23754_v56 = vld [vmem:[%s30624_s4 + $0x140c] ss:$16 sps:$4 sm:$0xff]  }
 0x778   : > { %8347 = vmatpush1.bf16.msra.mxu0 %v23689_v63  ;;  %12674 = vmatprep.subr.bf16.mxu1 %v23694_v47  ;;  %v23757_v63 = vld [vmem:[%s30624_s4 + $0x824] ss:$16 sps:$4 sm:$0xff]   ;;  %v28252_v47 = vcombine.low %v8575_v45, %v8589_v61  ;;  %v23812_v45 = vld [vmem:[%s30624_s4 + $0x1548] ss:$16 sps:$4 sm:$0xff]   ;;  %v23815_v61 = vld [vmem:[%s30624_s4 + $0x960] ss:$16 sps:$4 sm:$0xff]  }
 0x779   : > { %8348 = vmatprep.subr.bf16.mxu0 %v23697_v23  ;;  %v23752_v23 = vld [vmem:[%s30624_s4 + $0x1408] ss:$16 sps:$4 sm:$0xff]  }
 0x77b   : > { %12675 = vmatpush1.bf16.msra.mxu1 %v23692_v35  ;;  %v23755_v35 = vld [vmem:[%s30624_s4 + $0x820] ss:$16 sps:$4 sm:$0xff]  }
 0x77c   : > { %8349 = vmatpush1.bf16.msra.mxu0 %v23695_v50  ;;  %12676 = vmatprep.subr.bf16.mxu1 %v23700_v62  ;;  %v23760_v50 = vld [vmem:[%s30624_s4 + $0x142c] ss:$16 sps:$4 sm:$0xff]   ;;  %v30639_v62 = vld [vmem:[#allocation18_spill] sm:$0xff] }
 0x77d   : > { %8350 = vmatprep.subr.bf16.mxu0 %v23703_v37  ;;  %v23758_v37 = vld [vmem:[%s30624_s4 + $0x1428] ss:$16 sps:$4 sm:$0xff]  }
 0x77f   : > { %12677 = vmatpush1.bf16.msra.mxu1 %v23698_v33  ;;  %v23761_v33 = vld [vmem:[%s30624_s4 + $0x840] ss:$16 sps:$4 sm:$0xff]  }
 0x780   : > { %8351 = vmatpush1.bf16.msra.mxu0 %v23701_v40  ;;  %12678 = vmatprep.subr.bf16.mxu1 %v23706_v43  ;;  %v23766_v40 = vld [vmem:[%s30624_s4 + $0x144c] ss:$16 sps:$4 sm:$0xff]   ;;  %v23769_v43 = vld [vmem:[%s30624_s4 + $0x864] ss:$16 sps:$4 sm:$0xff]  }
 0x781   : > { %8352 = vmatprep.subr.bf16.mxu0 %v23709_v8  ;;  %v23767_v8 = vld [vmem:[%s30624_s4 + $0x860] ss:$16 sps:$4 sm:$0xff]  }
 0x783   : > { %12679 = vmatpush1.bf16.msra.mxu1 %v23704_v31  ;;  %v23772_v31 = vld [vmem:[%s30624_s4 + $0x146c] ss:$16 sps:$4 sm:$0xff]  }
 0x784   : > { %8353 = vmatpush1.bf16.msra.mxu0 %v23707_v14  ;;  %12680 = vmatprep.subr.bf16.mxu1 %v23712_v10  ;;  %v23775_v14 = vld [vmem:[%s30624_s4 + $0x884] ss:$16 sps:$4 sm:$0xff]   ;;  %v23770_v10 = vld [vmem:[%s30624_s4 + $0x1468] ss:$16 sps:$4 sm:$0xff]  }
 0x785   : > { %8354 = vmatprep.subr.bf16.mxu0 %v23715_v34  ;;  %v23773_v34 = vld [vmem:[%s30624_s4 + $0x880] ss:$16 sps:$4 sm:$0xff]  }
 0x787   : > { %12681 = vmatpush1.bf16.msra.mxu1 %v23710_v19  ;;  %v23778_v19 = vld [vmem:[%s30624_s4 + $0x148c] ss:$16 sps:$4 sm:$0xff]  }
 0x788   : > { %8355 = vmatpush1.bf16.msra.mxu0 %v23713_v11  ;;  %12682 = vmatprep.subr.bf16.mxu1 %v23718_v58  ;;  %v23781_v11 = vld [vmem:[%s30624_s4 + $0x8a4] ss:$16 sps:$4 sm:$0xff]   ;;  %v23776_v58 = vld [vmem:[%s30624_s4 + $0x1488] ss:$16 sps:$4 sm:$0xff]  }
 0x789   : > { %8356 = vmatprep.subr.bf16.mxu0 %v23721_v21  ;;  %v23779_v21 = vld [vmem:[%s30624_s4 + $0x8a0] ss:$16 sps:$4 sm:$0xff]  }
 0x78b   : > { %12683 = vmatpush1.bf16.msra.mxu1 %v23716_v16  ;;  %v23784_v16 = vld [vmem:[%s30624_s4 + $0x14ac] ss:$16 sps:$4 sm:$0xff]  }
 0x78c   : > { %8357 = vmatpush1.bf16.msra.mxu0 %v23719_v44  ;;  %12684 = vmatprep.subr.bf16.mxu1 %v23724_v52  ;;  %v23787_v44 = vld [vmem:[%s30624_s4 + $0x8c4] ss:$16 sps:$4 sm:$0xff]   ;;  %v23782_v52 = vld [vmem:[%s30624_s4 + $0x14a8] ss:$16 sps:$4 sm:$0xff]  }
 0x78d   : > { %8358 = vmatprep.subr.bf16.mxu0 %v23727_v18  ;;  %v23785_v18 = vld [vmem:[%s30624_s4 + $0x8c0] ss:$16 sps:$4 sm:$0xff]  }
 0x78f   : > { %12685 = vmatpush1.bf16.msra.mxu1 %v23722_v60  ;;  %v23790_v60 = vld [vmem:[%s30624_s4 + $0x14cc] ss:$16 sps:$4 sm:$0xff]  }
 0x790   : > { %8359 = vmatpush1.bf16.msra.mxu0 %v23725_v32  ;;  %12686 = vmatprep.subr.bf16.mxu1 %v23730_v42  ;;  %v23793_v32 = vld [vmem:[%s30624_s4 + $0x8e4] ss:$16 sps:$4 sm:$0xff]   ;;  %v23788_v42 = vld [vmem:[%s30624_s4 + $0x14c8] ss:$16 sps:$4 sm:$0xff]  }
 0x791   : > { %8360 = vmatprep.subr.bf16.mxu0 %v23733_v7  ;;  %v23791_v7 = vld [vmem:[%s30624_s4 + $0x8e0] ss:$16 sps:$4 sm:$0xff]  }
 0x793   : > { %12687 = vmatpush1.bf16.msra.mxu1 %v23728_v20  ;;  %v23796_v20 = vld [vmem:[%s30624_s4 + $0x14ec] ss:$16 sps:$4 sm:$0xff]  }
 0x794   : > { %8361 = vmatpush1.bf16.msra.mxu0 %v23731_v57  ;;  %12688 = vmatprep.subr.bf16.mxu1 %v23736_v17  ;;  %v23799_v57 = vld [vmem:[%s30624_s4 + $0x904] ss:$16 sps:$4 sm:$0xff]   ;;  %v23794_v17 = vld [vmem:[%s30624_s4 + $0x14e8] ss:$16 sps:$4 sm:$0xff]  }
 0x795   : > { %8362 = vmatprep.subr.bf16.mxu0 %v23739_v48  ;;  %v23797_v48 = vld [vmem:[%s30624_s4 + $0x900] ss:$16 sps:$4 sm:$0xff]  }
 0x797   : > { %12689 = vmatpush1.bf16.msra.mxu1 %v23734_v46  ;;  %v23802_v46 = vld [vmem:[%s30624_s4 + $0x150c] ss:$16 sps:$4 sm:$0xff]  }
 0x798   : > { %8363 = vmatpush1.bf16.msra.mxu0 %v23737_v39  ;;  %12690 = vmatprep.subr.bf16.mxu1 %v23742_v30  ;;  %v23805_v39 = vld [vmem:[%s30624_s4 + $0x924] ss:$16 sps:$4 sm:$0xff]   ;;  %v23800_v30 = vld [vmem:[%s30624_s4 + $0x1508] ss:$16 sps:$4 sm:$0xff]  }
 0x799   : > { %8364 = vmatprep.subr.bf16.mxu0 %v23745_v3  ;;  %v23803_v3 = vld [vmem:[%s30624_s4 + $0x920] ss:$16 sps:$4 sm:$0xff]  }
 0x79b   : > { %12691 = vmatpush1.bf16.msra.mxu1 %v23740_v27  ;;  %v23806_v27 = vld [vmem:[%s30624_s4 + $0x1528] ss:$16 sps:$4 sm:$0xff]  }
 0x79c   : > { %8365 = vmatpush1.bf16.msra.mxu0 %v23743_v51  ;;  %12692 = vmatprep.subr.bf16.mxu1 %v23748_v55  ;;  %v23809_v51 = vld [vmem:[%s30624_s4 + $0x940] ss:$16 sps:$4 sm:$0xff]   ;;  %v23814_v55 = vld [vmem:[%s30624_s4 + $0x154c] ss:$16 sps:$4 sm:$0xff]  }
 0x79d   : > { %8914 = vmatprep.subr.bf16.mxu0 %v23751_v53  ;;  %v23817_v53 = vld [vmem:[%s30624_s4 + $0x964] ss:$16 sps:$4 sm:$0xff]  }
 0x79f   : > { %12693 = vmatpush1.bf16.msra.mxu1 %v23746_v49  ;;  %8367 = vmatmul.mubr.bf16.vlgmr.msra.gmra.mrb[48].mxu0 %v26763_v12  ;;  %v23763_v12 = vld [vmem:[%s30624_s4 + $0x844] ss:$16 sps:$4 sm:$0xff]   ;;  %v23820_v49 = vld [vmem:[%s30624_s4 + $0x156c] ss:$16 sps:$4 sm:$0xff]  }
 0x7a0   : > { %8915 = vmatpush1.bf16.msra.mxu0 %v23749_v29  ;;  %8946 = vmatprep.mubr.bf16.mxu0 %v28252_v47  ;;  %v23823_v29 = vld [vmem:[%s30624_s4 + $0x984] ss:$16 sps:$4 sm:$0xff]  }
 0x7a1   : > { %12705 = vmatprep.subr.bf16.mxu1 %v23754_v56  ;;  %8916 = vmatprep.subr.bf16.mxu0 %v23757_v63  ;;  %v23818_v56 = vld [vmem:[%s30624_s4 + $0x1568] ss:$16 sps:$4 sm:$0xff]   ;;  %v23821_v63 = vld [vmem:[%s30624_s4 + $0x980] ss:$16 sps:$4 sm:$0xff]  }
 0x7a2   : > { %12695 = vmatmul.mubr.bf16.vlgmr.msra.gmra.mrb[12].mxu1 %v30639_v62 }
 0x7a3   : > { %12706 = vmatpush1.bf16.msra.mxu1 %v23752_v23  ;;  %12737 = vmatprep.mubr.bf16.mxu1 %v28059_v28  ;;  %v23764_v28 = vld [vmem:[%s30624_s4 + $0x1448] ss:$16 sps:$4 sm:$0xff]   ;;  %v23826_v23 = vld [vmem:[%s30624_s4 + $0x158c] ss:$16 sps:$4 sm:$0xff]  }
 0x7a4   : > { %8917 = vmatpush1.bf16.msra.mxu0 %v23755_v35  ;;  %12707 = vmatprep.subr.bf16.mxu1 %v23760_v50  ;;  %v23829_v35 = vld [vmem:[%s30624_s4 + $0x9a4] ss:$16 sps:$4 sm:$0xff]   ;;  %v23824_v50 = vld [vmem:[%s30624_s4 + $0x1588] ss:$16 sps:$4 sm:$0xff]  }
 0x7a5   : > { %8918 = vmatprep.subr.bf16.mxu0 %v23763_v12  ;;  %v23827_v12 = vld [vmem:[%s30624_s4 + $0x9a0] ss:$16 sps:$4 sm:$0xff]  }
 0x7a7   : > { %12708 = vmatpush1.bf16.msra.mxu1 %v23758_v37  ;;  %v23832_v37 = vld [vmem:[%s30624_s4 + $0x15ac] ss:$16 sps:$4 sm:$0xff]  }
 0x7a8   : > { %8919 = vmatpush1.bf16.msra.mxu0 %v23761_v33  ;;  %12709 = vmatprep.subr.bf16.mxu1 %v23766_v40  ;;  %v23835_v33 = vld [vmem:[%s30624_s4 + $0x9c4] ss:$16 sps:$4 sm:$0xff]   ;;  %v23830_v40 = vld [vmem:[%s30624_s4 + $0x15a8] ss:$16 sps:$4 sm:$0xff]  }
 0x7a9   : > { %8920 = vmatprep.subr.bf16.mxu0 %v23769_v43  ;;  %v23833_v43 = vld [vmem:[%s30624_s4 + $0x9c0] ss:$16 sps:$4 sm:$0xff]  }
 0x7ab   : > { %12710 = vmatpush1.bf16.msra.mxu1 %v23764_v28  ;;  %v23838_v28 = vld [vmem:[%s30624_s4 + $0x15cc] ss:$16 sps:$4 sm:$0xff]  }
 0x7ac   : > { %8921 = vmatpush1.bf16.msra.mxu0 %v23767_v8  ;;  %12711 = vmatprep.subr.bf16.mxu1 %v23772_v31  ;;  %v23841_v8 = vld [vmem:[%s30624_s4 + $0x9e4] ss:$16 sps:$4 sm:$0xff]   ;;  %v23836_v31 = vld [vmem:[%s30624_s4 + $0x15c8] ss:$16 sps:$4 sm:$0xff]  }
 0x7ad   : > { %8922 = vmatprep.subr.bf16.mxu0 %v23775_v14  ;;  %v23839_v14 = vld [vmem:[%s30624_s4 + $0x9e0] ss:$16 sps:$4 sm:$0xff]  }
 0x7af   : > { %12712 = vmatpush1.bf16.msra.mxu1 %v23770_v10  ;;  %v23844_v10 = vld [vmem:[%s30624_s4 + $0x15ec] ss:$16 sps:$4 sm:$0xff]  }
 0x7b0   : > { %8923 = vmatpush1.bf16.msra.mxu0 %v23773_v34  ;;  %12713 = vmatprep.subr.bf16.mxu1 %v23778_v19  ;;  %v23847_v34 = vld [vmem:[%s30624_s4 + $0x80c] ss:$16 sps:$4 sm:$0xff]   ;;  %v23842_v19 = vld [vmem:[%s30624_s4 + $0x15e8] ss:$16 sps:$4 sm:$0xff]  }
 0x7b1   : > { %8924 = vmatprep.subr.bf16.mxu0 %v23781_v11  ;;  %v23845_v11 = vld [vmem:[%s30624_s4 + $0x808] ss:$16 sps:$4 sm:$0xff]  }
 0x7b3   : > { %12714 = vmatpush1.bf16.msra.mxu1 %v23776_v58  ;;  %v23850_v58 = vld [vmem:[%s30624_s4 + $0x1604] ss:$16 sps:$4 sm:$0xff]  }
 0x7b4   : > { %8925 = vmatpush1.bf16.msra.mxu0 %v23779_v21  ;;  %12715 = vmatprep.subr.bf16.mxu1 %v23784_v16  ;;  %v23853_v21 = vld [vmem:[%s30624_s4 + $0x82c] ss:$16 sps:$4 sm:$0xff]  }
 0x7b5   : > { %8926 = vmatprep.subr.bf16.mxu0 %v23787_v44  ;;  %v30640_v16 = vld [vmem:[#allocation19_spill] sm:$0xff]  ;;  %v23848_v44 = vld [vmem:[%s30624_s4 + $0x1600] ss:$16 sps:$4 sm:$0xff]  }
 0x7b7   : > { %12716 = vmatpush1.bf16.msra.mxu1 %v23782_v52  ;;  %v23851_v52 = vld [vmem:[%s30624_s4 + $0x828] ss:$16 sps:$4 sm:$0xff]  }
 0x7b8   : > { %8927 = vmatpush1.bf16.msra.mxu0 %v23785_v18  ;;  %12717 = vmatprep.subr.bf16.mxu1 %v23790_v60  ;;  %v23856_v18 = vld [vmem:[%s30624_s4 + $0x1624] ss:$16 sps:$4 sm:$0xff]   ;;  %v23859_v60 = vld [vmem:[%s30624_s4 + $0x84c] ss:$16 sps:$4 sm:$0xff]  }
 0x7b9   : > { %8928 = vmatprep.subr.bf16.mxu0 %v23793_v32  ;;  %v30641_v32 = vld [vmem:[#allocation20_spill] sm:$0xff] }
 0x7bb   : > { %12718 = vmatpush1.bf16.msra.mxu1 %v23788_v42  ;;  %v23857_v42 = vld [vmem:[%s30624_s4 + $0x848] ss:$16 sps:$4 sm:$0xff]  }
 0x7bc   : > { %8929 = vmatpush1.bf16.msra.mxu0 %v23791_v7  ;;  %12719 = vmatprep.subr.bf16.mxu1 %v23796_v20  ;;  %v23862_v7 = vld [vmem:[%s30624_s4 + $0x1644] ss:$16 sps:$4 sm:$0xff]   ;;  %v23860_v20 = vld [vmem:[%s30624_s4 + $0x1640] ss:$16 sps:$4 sm:$0xff]  }
 0x7bd   : > { %8930 = vmatprep.subr.bf16.mxu0 %v23799_v57  ;;  %v23863_v57 = vld [vmem:[%s30624_s4 + $0x868] ss:$16 sps:$4 sm:$0xff]  }
 0x7bf   : > { %12720 = vmatpush1.bf16.msra.mxu1 %v23794_v17  ;;  %v23868_v17 = vld [vmem:[%s30624_s4 + $0x1664] ss:$16 sps:$4 sm:$0xff]  }
 0x7c0   : > { %8931 = vmatpush1.bf16.msra.mxu0 %v23797_v48  ;;  %12721 = vmatprep.subr.bf16.mxu1 %v23802_v46  ;;  %v23871_v48 = vld [vmem:[%s30624_s4 + $0x88c] ss:$16 sps:$4 sm:$0xff]   ;;  %v23866_v46 = vld [vmem:[%s30624_s4 + $0x1660] ss:$16 sps:$4 sm:$0xff]  }
 0x7c1   : > { %8932 = vmatprep.subr.bf16.mxu0 %v23805_v39  ;;  %v23869_v39 = vld [vmem:[%s30624_s4 + $0x888] ss:$16 sps:$4 sm:$0xff]  }
 0x7c3   : > { %12722 = vmatpush1.bf16.msra.mxu1 %v23800_v30  ;;  %v23874_v30 = vld [vmem:[%s30624_s4 + $0x1684] ss:$16 sps:$4 sm:$0xff]  }
 0x7c4   : > { %8933 = vmatpush1.bf16.msra.mxu0 %v23803_v3  ;;  %12723 = vmatprep.subr.bf16.mxu1 %v23808_v54  ;;  %v23877_v3 = vld [vmem:[%s30624_s4 + $0x8ac] ss:$16 sps:$4 sm:$0xff]   ;;  %v23872_v54 = vld [vmem:[%s30624_s4 + $0x1680] ss:$16 sps:$4 sm:$0xff]  }
 0x7c5   : > { %8934 = vmatprep.subr.bf16.mxu0 %v23811_v0  ;;  %v23875_v0 = vld [vmem:[%s30624_s4 + $0x8a8] ss:$16 sps:$4 sm:$0xff]  }
 0x7c7   : > { %12724 = vmatpush1.bf16.msra.mxu1 %v23806_v27  ;;  %v23880_v27 = vld [vmem:[%s30624_s4 + $0x16a4] ss:$16 sps:$4 sm:$0xff]  }
 0x7c8   : > { %8935 = vmatpush1.bf16.msra.mxu0 %v23809_v51  ;;  %12725 = vmatprep.subr.bf16.mxu1 %v23814_v55  ;;  %v23883_v51 = vld [vmem:[%s30624_s4 + $0x8cc] ss:$16 sps:$4 sm:$0xff]   ;;  %v23878_v55 = vld [vmem:[%s30624_s4 + $0x16a0] ss:$16 sps:$4 sm:$0xff]  }
 0x7c9   : > { %8936 = vmatprep.subr.bf16.mxu0 %v23817_v53  ;;  %v23881_v53 = vld [vmem:[%s30624_s4 + $0x8c8] ss:$16 sps:$4 sm:$0xff]  }
 0x7cb   : > { %12726 = vmatpush1.bf16.msra.mxu1 %v23812_v45  ;;  %v23886_v45 = vld [vmem:[%s30624_s4 + $0x16c4] ss:$16 sps:$4 sm:$0xff]  }
 0x7cc   : > { %8937 = vmatpush1.bf16.msra.mxu0 %v23815_v61  ;;  %12727 = vmatprep.subr.bf16.mxu1 %v23820_v49  ;;  %v23889_v61 = vld [vmem:[%s30624_s4 + $0x8ec] ss:$16 sps:$4 sm:$0xff]   ;;  %v23884_v49 = vld [vmem:[%s30624_s4 + $0x16c0] ss:$16 sps:$4 sm:$0xff]  }
 0x7cd   : > { %8938 = vmatprep.subr.bf16.mxu0 %v23823_v29  ;;  %v23887_v29 = vld [vmem:[%s30624_s4 + $0x8e8] ss:$16 sps:$4 sm:$0xff]  }
 0x7cf   : > { %12728 = vmatpush1.bf16.msra.mxu1 %v23818_v56  ;;  %v23892_v56 = vld [vmem:[%s30624_s4 + $0x16e4] ss:$16 sps:$4 sm:$0xff]  }
 0x7d0   : > { %8939 = vmatpush1.bf16.msra.mxu0 %v23821_v63  ;;  %12729 = vmatprep.subr.bf16.mxu1 %v23826_v23  ;;  %v23895_v63 = vld [vmem:[%s30624_s4 + $0x90c] ss:$16 sps:$4 sm:$0xff]   ;;  %v23890_v23 = vld [vmem:[%s30624_s4 + $0x16e0] ss:$16 sps:$4 sm:$0xff]  }
 0x7d1   : > { %8940 = vmatprep.subr.bf16.mxu0 %v23829_v35  ;;  %v23893_v35 = vld [vmem:[%s30624_s4 + $0x908] ss:$16 sps:$4 sm:$0xff]  }
 0x7d3   : > { %12730 = vmatpush1.bf16.msra.mxu1 %v23824_v50  ;;  %v23898_v50 = vld [vmem:[%s30624_s4 + $0x1704] ss:$16 sps:$4 sm:$0xff]  }
 0x7d4   : > { %8941 = vmatpush1.bf16.msra.mxu0 %v23827_v12  ;;  %12731 = vmatprep.subr.bf16.mxu1 %v23832_v37  ;;  %v23901_v12 = vld [vmem:[%s30624_s4 + $0x92c] ss:$16 sps:$4 sm:$0xff]   ;;  %v23896_v37 = vld [vmem:[%s30624_s4 + $0x1700] ss:$16 sps:$4 sm:$0xff]  }
 0x7d5   : > { %8942 = vmatprep.subr.bf16.mxu0 %v23835_v33  ;;  %v23899_v33 = vld [vmem:[%s30624_s4 + $0x928] ss:$16 sps:$4 sm:$0xff]  }
 0x7d7   : > { %12732 = vmatpush1.bf16.msra.mxu1 %v23830_v40  ;;  %v23904_v40 = vld [vmem:[%s30624_s4 + $0x1724] ss:$16 sps:$4 sm:$0xff]  }
 0x7d8   : > { %8943 = vmatpush1.bf16.msra.mxu0 %v23833_v43  ;;  %12733 = vmatprep.subr.bf16.mxu1 %v23838_v28  ;;  %v23907_v43 = vld [vmem:[%s30624_s4 + $0x94c] ss:$16 sps:$4 sm:$0xff]   ;;  %v23902_v28 = vld [vmem:[%s30624_s4 + $0x1720] ss:$16 sps:$4 sm:$0xff]  }
 0x7d9   : > { %8944 = vmatprep.subr.bf16.mxu0 %v23841_v8  ;;  %v23905_v8 = vld [vmem:[%s30624_s4 + $0x948] ss:$16 sps:$4 sm:$0xff]  }
 0x7db   : > { %12734 = vmatpush1.bf16.msra.mxu1 %v23836_v31  ;;  %v23910_v31 = vld [vmem:[%s30624_s4 + $0x1744] ss:$16 sps:$4 sm:$0xff]  }
 0x7dc   : > { %8945 = vmatpush1.bf16.msra.mxu0 %v23839_v14  ;;  %12735 = vmatprep.subr.bf16.mxu1 %v23844_v10  ;;  %v23913_v14 = vld [vmem:[%s30624_s4 + $0x96c] ss:$16 sps:$4 sm:$0xff]   ;;  %v23908_v10 = vld [vmem:[%s30624_s4 + $0x1740] ss:$16 sps:$4 sm:$0xff]  }
 0x7dd   : > { %8957 = vmatprep.subr.bf16.mxu0 %v23847_v34  ;;  %v23911_v34 = vld [vmem:[%s30624_s4 + $0x968] ss:$16 sps:$4 sm:$0xff]  }
 0x7df   : > { %12736 = vmatpush1.bf16.msra.mxu1 %v23842_v19  ;;  %8947 = vmatmul.mubr.bf16.vlgmr.msra.gmra.mrb[44].mxu0 %v30640_v16  ;;  %v23916_v19 = vld [vmem:[%s30624_s4 + $0x1764] ss:$16 sps:$4 sm:$0xff]  }
 0x7e0   : > { %8958 = vmatpush1.bf16.msra.mxu0 %v23845_v11  ;;  %8989 = vmatprep.mubr.bf16.mxu0 %v28252_v47  ;;  %v23854_v47 = vld [vmem:[%s30624_s4 + $0x1620] ss:$16 sps:$4 sm:$0xff]   ;;  %v23919_v11 = vld [vmem:[%s30624_s4 + $0x98c] ss:$16 sps:$4 sm:$0xff]  }
 0x7e1   : > { %13288 = vmatprep.subr.bf16.mxu1 %v23850_v58  ;;  %8959 = vmatprep.subr.bf16.mxu0 %v23853_v21  ;;  %v23914_v58 = vld [vmem:[%s30624_s4 + $0x1760] ss:$16 sps:$4 sm:$0xff]   ;;  %v23917_v21 = vld [vmem:[%s30624_s4 + $0x988] ss:$16 sps:$4 sm:$0xff]  }
 0x7e2   : > { %12738 = vmatmul.mubr.bf16.vlgmr.msra.gmra.mrb[8].mxu1 %v30639_v62  ;;  %v23865_v62 = vld [vmem:[%s30624_s4 + $0x86c] ss:$16 sps:$4 sm:$0xff]  }
 0x7e3   : > { %13289 = vmatpush1.bf16.msra.mxu1 %v23848_v44  ;;  %13320 = vmatprep.mubr.bf16.mxu1 %v30641_v32  ;;  %v23922_v44 = vld [vmem:[%s30624_s4 + $0x1784] ss:$16 sps:$4 sm:$0xff]  }
 0x7e4   : > { %8960 = vmatpush1.bf16.msra.mxu0 %v23851_v52  ;;  %13290 = vmatprep.subr.bf16.mxu1 %v23856_v18  ;;  %v23925_v52 = vld [vmem:[%s30624_s4 + $0x9ac] ss:$16 sps:$4 sm:$0xff]   ;;  %v23920_v18 = vld [vmem:[%s30624_s4 + $0x1780] ss:$16 sps:$4 sm:$0xff]  }
 0x7e5   : > { %8961 = vmatprep.subr.bf16.mxu0 %v23859_v60  ;;  %v23923_v60 = vld [vmem:[%s30624_s4 + $0x9a8] ss:$16 sps:$4 sm:$0xff]  }
 0x7e7   : > { %13291 = vmatpush1.bf16.msra.mxu1 %v23854_v47  ;;  %v23928_v47 = vld [vmem:[%s30624_s4 + $0x17a4] ss:$16 sps:$4 sm:$0xff]  }
 0x7e8   : > { %8962 = vmatpush1.bf16.msra.mxu0 %v23857_v42  ;;  %13292 = vmatprep.subr.bf16.mxu1 %v23862_v7  ;;  %v23931_v42 = vld [vmem:[%s30624_s4 + $0x9cc] ss:$16 sps:$4 sm:$0xff]   ;;  %v23926_v7 = vld [vmem:[%s30624_s4 + $0x17a0] ss:$16 sps:$4 sm:$0xff]  }
 0x7e9   : > { %8963 = vmatprep.subr.bf16.mxu0 %v23865_v62  ;;  %v23929_v62 = vld [vmem:[%s30624_s4 + $0x9c8] ss:$16 sps:$4 sm:$0xff]  }
 0x7eb   : > { %13293 = vmatpush1.bf16.msra.mxu1 %v23860_v20  ;;  %v23934_v20 = vld [vmem:[%s30624_s4 + $0x17c4] ss:$16 sps:$4 sm:$0xff]  }
 0x7ec   : > { %8964 = vmatpush1.bf16.msra.mxu0 %v23863_v57  ;;  %13294 = vmatprep.subr.bf16.mxu1 %v23868_v17  ;;  %v23937_v57 = vld [vmem:[%s30624_s4 + $0x9ec] ss:$16 sps:$4 sm:$0xff]   ;;  %v23932_v17 = vld [vmem:[%s30624_s4 + $0x17c0] ss:$16 sps:$4 sm:$0xff]  }
 0x7ed   : > { %8965 = vmatprep.subr.bf16.mxu0 %v23871_v48  ;;  %v23935_v48 = vld [vmem:[%s30624_s4 + $0x9e8] ss:$16 sps:$4 sm:$0xff]  }
 0x7ef   : > { %13295 = vmatpush1.bf16.msra.mxu1 %v23866_v46  ;;  %v23940_v46 = vld [vmem:[%s30624_s4 + $0x17e4] ss:$16 sps:$4 sm:$0xff]  }
 0x7f0   : > { %8966 = vmatpush1.bf16.msra.mxu0 %v23869_v39  ;;  %13296 = vmatprep.subr.bf16.mxu1 %v23874_v30  ;;  %v23943_v39 = vld [vmem:[%s30624_s4 + $0xa04] ss:$16 sps:$4 sm:$0xff]   ;;  %v23938_v30 = vld [vmem:[%s30624_s4 + $0x17e0] ss:$16 sps:$4 sm:$0xff]  }
 0x7f1   : > { %8967 = vmatprep.subr.bf16.mxu0 %v23877_v3  ;;  %v23941_v3 = vld [vmem:[%s30624_s4 + $0xa00] ss:$16 sps:$4 sm:$0xff]  }
 0x7f3   : > { %13297 = vmatpush1.bf16.msra.mxu1 %v23872_v54  ;;  %v23946_v54 = vld [vmem:[%s30624_s4 + $0x160c] ss:$16 sps:$4 sm:$0xff]  }
 0x7f4   : > { %8968 = vmatpush1.bf16.msra.mxu0 %v23875_v0  ;;  %13298 = vmatprep.subr.bf16.mxu1 %v23880_v27  ;;  %v23949_v0 = vld [vmem:[%s30624_s4 + $0xa24] ss:$16 sps:$4 sm:$0xff]   ;;  %v23944_v27 = vld [vmem:[%s30624_s4 + $0x1608] ss:$16 sps:$4 sm:$0xff]  }
 0x7f5   : > { %8969 = vmatprep.subr.bf16.mxu0 %v23883_v51  ;;  %v23947_v51 = vld [vmem:[%s30624_s4 + $0xa20] ss:$16 sps:$4 sm:$0xff]  }
 0x7f7   : > { %13299 = vmatpush1.bf16.msra.mxu1 %v23878_v55  ;;  %v23952_v55 = vld [vmem:[%s30624_s4 + $0x162c] ss:$16 sps:$4 sm:$0xff]  }
 0x7f8   : > { %8970 = vmatpush1.bf16.msra.mxu0 %v23881_v53  ;;  %13300 = vmatprep.subr.bf16.mxu1 %v23886_v45  ;;  %v23950_v53 = vld [vmem:[%s30624_s4 + $0x1628] ss:$16 sps:$4 sm:$0xff]   ;;  %v23953_v45 = vld [vmem:[%s30624_s4 + $0xa40] ss:$16 sps:$4 sm:$0xff]  }
 0x7f9   : > { %8971 = vmatprep.subr.bf16.mxu0 %v23889_v61  ;;  %v23958_v61 = vld [vmem:[%s30624_s4 + $0x164c] ss:$16 sps:$4 sm:$0xff]  }
 0x7fb   : > { %13301 = vmatpush1.bf16.msra.mxu1 %v23884_v49  ;;  %v23961_v49 = vld [vmem:[%s30624_s4 + $0xa64] ss:$16 sps:$4 sm:$0xff]  }
 0x7fc   : > { %8972 = vmatpush1.bf16.msra.mxu0 %v23887_v29  ;;  %13302 = vmatprep.subr.bf16.mxu1 %v23892_v56  ;;  %v23959_v29 = vld [vmem:[%s30624_s4 + $0xa60] ss:$16 sps:$4 sm:$0xff]   ;;  %v23964_v56 = vld [vmem:[%s30624_s4 + $0x166c] ss:$16 sps:$4 sm:$0xff]  }
 0x7fd   : > { %8973 = vmatprep.subr.bf16.mxu0 %v23895_v63  ;;  %v23967_v63 = vld [vmem:[%s30624_s4 + $0xa84] ss:$16 sps:$4 sm:$0xff]  }
 0x7ff   : > { %13303 = vmatpush1.bf16.msra.mxu1 %v23890_v23  ;;  %v23962_v23 = vld [vmem:[%s30624_s4 + $0x1668] ss:$16 sps:$4 sm:$0xff]  }
 0x800   : > { %8974 = vmatpush1.bf16.msra.mxu0 %v23893_v35  ;;  %13304 = vmatprep.subr.bf16.mxu1 %v23898_v50  ;;  %v23965_v35 = vld [vmem:[%s30624_s4 + $0xa80] ss:$16 sps:$4 sm:$0xff]   ;;  %v23970_v50 = vld [vmem:[%s30624_s4 + $0x168c] ss:$16 sps:$4 sm:$0xff]  }
 0x801   : > { %8975 = vmatprep.subr.bf16.mxu0 %v23901_v12  ;;  %v23973_v12 = vld [vmem:[%s30624_s4 + $0xaa4] ss:$16 sps:$4 sm:$0xff]  }
 0x803   : > { %13305 = vmatpush1.bf16.msra.mxu1 %v23896_v37  ;;  %v23968_v37 = vld [vmem:[%s30624_s4 + $0x1688] ss:$16 sps:$4 sm:$0xff]  }
 0x804   : > { %8976 = vmatpush1.bf16.msra.mxu0 %v23899_v33  ;;  %13306 = vmatprep.subr.bf16.mxu1 %v23904_v40  ;;  %v23971_v33 = vld [vmem:[%s30624_s4 + $0xaa0] ss:$16 sps:$4 sm:$0xff]   ;;  %v23976_v40 = vld [vmem:[%s30624_s4 + $0x16ac] ss:$16 sps:$4 sm:$0xff]  }
 0x805   : > { %8977 = vmatprep.subr.bf16.mxu0 %v23907_v43  ;;  %v23979_v43 = vld [vmem:[%s30624_s4 + $0xac4] ss:$16 sps:$4 sm:$0xff]  }
 0x807   : > { %13307 = vmatpush1.bf16.msra.mxu1 %v23902_v28  ;;  %v23974_v28 = vld [vmem:[%s30624_s4 + $0x16a8] ss:$16 sps:$4 sm:$0xff]  }
 0x808   : > { %8978 = vmatpush1.bf16.msra.mxu0 %v23905_v8  ;;  %13308 = vmatprep.subr.bf16.mxu1 %v23910_v31  ;;  %v23977_v8 = vld [vmem:[%s30624_s4 + $0xac0] ss:$16 sps:$4 sm:$0xff]   ;;  %v23982_v31 = vld [vmem:[%s30624_s4 + $0x16cc] ss:$16 sps:$4 sm:$0xff]  }
 0x809   : > { %8979 = vmatprep.subr.bf16.mxu0 %v23913_v14  ;;  %v23985_v14 = vld [vmem:[%s30624_s4 + $0xae4] ss:$16 sps:$4 sm:$0xff]  }
 0x80b   : > { %13309 = vmatpush1.bf16.msra.mxu1 %v23908_v10  ;;  %v23980_v10 = vld [vmem:[%s30624_s4 + $0x16c8] ss:$16 sps:$4 sm:$0xff]  }
 0x80c   : > { %8980 = vmatpush1.bf16.msra.mxu0 %v23911_v34  ;;  %13310 = vmatprep.subr.bf16.mxu1 %v23916_v19  ;;  %v23983_v34 = vld [vmem:[%s30624_s4 + $0xae0] ss:$16 sps:$4 sm:$0xff]   ;;  %v23988_v19 = vld [vmem:[%s30624_s4 + $0x16ec] ss:$16 sps:$4 sm:$0xff]  }
 0x80d   : > { %8981 = vmatprep.subr.bf16.mxu0 %v23919_v11  ;;  %v23991_v11 = vld [vmem:[%s30624_s4 + $0xb04] ss:$16 sps:$4 sm:$0xff]  }
 0x80f   : > { %13311 = vmatpush1.bf16.msra.mxu1 %v23914_v58  ;;  %v23986_v58 = vld [vmem:[%s30624_s4 + $0x16e8] ss:$16 sps:$4 sm:$0xff]  }
 0x810   : > { %8982 = vmatpush1.bf16.msra.mxu0 %v23917_v21  ;;  %13312 = vmatprep.subr.bf16.mxu1 %v23922_v44  ;;  %v23989_v21 = vld [vmem:[%s30624_s4 + $0xb00] ss:$16 sps:$4 sm:$0xff]   ;;  %v23994_v44 = vld [vmem:[%s30624_s4 + $0x170c] ss:$16 sps:$4 sm:$0xff]  }
 0x811   : > { %8983 = vmatprep.subr.bf16.mxu0 %v23925_v52  ;;  %v23997_v52 = vld [vmem:[%s30624_s4 + $0xb24] ss:$16 sps:$4 sm:$0xff]  }
 0x813   : > { %13313 = vmatpush1.bf16.msra.mxu1 %v23920_v18  ;;  %v23992_v18 = vld [vmem:[%s30624_s4 + $0x1708] ss:$16 sps:$4 sm:$0xff]  }
 0x814   : > { %8984 = vmatpush1.bf16.msra.mxu0 %v23923_v60  ;;  %13314 = vmatprep.subr.bf16.mxu1 %v23928_v47  ;;  %v23995_v60 = vld [vmem:[%s30624_s4 + $0xb20] ss:$16 sps:$4 sm:$0xff]   ;;  %v24000_v47 = vld [vmem:[%s30624_s4 + $0x172c] ss:$16 sps:$4 sm:$0xff]  }
 0x815   : > { %8985 = vmatprep.subr.bf16.mxu0 %v23931_v42  ;;  %v24003_v42 = vld [vmem:[%s30624_s4 + $0xb44] ss:$16 sps:$4 sm:$0xff]  }
 0x817   : > { %13315 = vmatpush1.bf16.msra.mxu1 %v23926_v7  ;;  %v23998_v7 = vld [vmem:[%s30624_s4 + $0x1728] ss:$16 sps:$4 sm:$0xff]  }
 0x818   : > { %8986 = vmatpush1.bf16.msra.mxu0 %v23929_v62  ;;  %13316 = vmatprep.subr.bf16.mxu1 %v23934_v20  ;;  %v24001_v62 = vld [vmem:[%s30624_s4 + $0xb40] ss:$16 sps:$4 sm:$0xff]   ;;  %v24006_v20 = vld [vmem:[%s30624_s4 + $0x174c] ss:$16 sps:$4 sm:$0xff]  }
 0x819   : > { %8987 = vmatprep.subr.bf16.mxu0 %v23937_v57  ;;  %v24009_v57 = vld [vmem:[%s30624_s4 + $0xb64] ss:$16 sps:$4 sm:$0xff]  }
 0x81b   : > { %13317 = vmatpush1.bf16.msra.mxu1 %v23932_v17  ;;  %v24004_v17 = vld [vmem:[%s30624_s4 + $0x1748] ss:$16 sps:$4 sm:$0xff]  }
 0x81c   : > { %8988 = vmatpush1.bf16.msra.mxu0 %v23935_v48  ;;  %13318 = vmatprep.subr.bf16.mxu1 %v23940_v46  ;;  %v24007_v48 = vld [vmem:[%s30624_s4 + $0xb60] ss:$16 sps:$4 sm:$0xff]   ;;  %v24012_v46 = vld [vmem:[%s30624_s4 + $0x176c] ss:$16 sps:$4 sm:$0xff]  }
 0x81d   : > { %9537 = vmatprep.subr.bf16.mxu0 %v23943_v39  ;;  %v24015_v39 = vld [vmem:[%s30624_s4 + $0xb84] ss:$16 sps:$4 sm:$0xff]  }
 0x81f   : > { %13319 = vmatpush1.bf16.msra.mxu1 %v23938_v30  ;;  %8990 = vmatmul.mubr.bf16.vlgmr.msra.gmra.mrb[48].mxu0 %v30640_v16  ;;  %v23955_v16 = vld [vmem:[%s30624_s4 + $0xa44] ss:$16 sps:$4 sm:$0xff]   ;;  %v24010_v30 = vld [vmem:[%s30624_s4 + $0x1768] ss:$16 sps:$4 sm:$0xff]  }
 0x820   : > { %9538 = vmatpush1.bf16.msra.mxu0 %v23941_v3  ;;  %9569 = vmatprep.mubr.bf16.mxu0 %v26961_v25  ;;  %v24013_v3 = vld [vmem:[%s30624_s4 + $0xb80] ss:$16 sps:$4 sm:$0xff]  }
 0x821   : > { %13331 = vmatprep.subr.bf16.mxu1 %v23946_v54  ;;  %9539 = vmatprep.subr.bf16.mxu0 %v23949_v0  ;;  %v24018_v54 = vld [vmem:[%s30624_s4 + $0x178c] ss:$16 sps:$4 sm:$0xff]   ;;  %v24021_v0 = vld [vmem:[%s30624_s4 + $0xba4] ss:$16 sps:$4 sm:$0xff]  }
 0x822   : > { %13321 = vmatmul.mubr.bf16.vlgmr.msra.gmra.mrb[12].mxu1 %v26958_v38 }
 0x823   : > { %13332 = vmatpush1.bf16.msra.mxu1 %v23944_v27  ;;  %13363 = vmatprep.mubr.bf16.mxu1 %v30641_v32  ;;  %v23956_v32 = vld [vmem:[%s30624_s4 + $0x1648] ss:$16 sps:$4 sm:$0xff]  }
 0x824   : > { %9540 = vmatpush1.bf16.msra.mxu0 %v23947_v51  ;;  %13333 = vmatprep.subr.bf16.mxu1 %v23952_v55  ;;  %v24016_v27 = vld [vmem:[%s30624_s4 + $0x1788] ss:$16 sps:$4 sm:$0xff]   ;;  %v24019_v51 = vld [vmem:[%s30624_s4 + $0xba0] ss:$16 sps:$4 sm:$0xff]   ;;  %v24024_v55 = vld [vmem:[%s30624_s4 + $0x17ac] ss:$16 sps:$4 sm:$0xff]  }
 0x825   : > { %9541 = vmatprep.subr.bf16.mxu0 %v23955_v16  ;;  %v24027_v16 = vld [vmem:[%s30624_s4 + $0xbc4] ss:$16 sps:$4 sm:$0xff]  }
 0x827   : > { %13334 = vmatpush1.bf16.msra.mxu1 %v23950_v53  ;;  %v24022_v53 = vld [vmem:[%s30624_s4 + $0x17a8] ss:$16 sps:$4 sm:$0xff]  }
 0x828   : > { %9542 = vmatpush1.bf16.msra.mxu0 %v23953_v45  ;;  %13335 = vmatprep.subr.bf16.mxu1 %v23958_v61  ;;  %v24025_v45 = vld [vmem:[%s30624_s4 + $0xbc0] ss:$16 sps:$4 sm:$0xff]   ;;  %v24030_v61 = vld [vmem:[%s30624_s4 + $0x17cc] ss:$16 sps:$4 sm:$0xff]  }
 0x829   : > { %9543 = vmatprep.subr.bf16.mxu0 %v23961_v49  ;;  %v24033_v49 = vld [vmem:[%s30624_s4 + $0xbe4] ss:$16 sps:$4 sm:$0xff]  }
 0x82b   : > { %13336 = vmatpush1.bf16.msra.mxu1 %v23956_v32  ;;  %v24028_v32 = vld [vmem:[%s30624_s4 + $0x17c8] ss:$16 sps:$4 sm:$0xff]  }
 0x82c   : > { %9544 = vmatpush1.bf16.msra.mxu0 %v23959_v29  ;;  %13337 = vmatprep.subr.bf16.mxu1 %v23964_v56  ;;  %v24031_v29 = vld [vmem:[%s30624_s4 + $0xbe0] ss:$16 sps:$4 sm:$0xff]   ;;  %v24036_v56 = vld [vmem:[%s30624_s4 + $0x17ec] ss:$16 sps:$4 sm:$0xff]  }
 0x82d   : > { %9545 = vmatprep.subr.bf16.mxu0 %v23967_v63  ;;  %v24039_v63 = vld [vmem:[%s30624_s4 + $0xa0c] ss:$16 sps:$4 sm:$0xff]  }
 0x82f   : > { %13338 = vmatpush1.bf16.msra.mxu1 %v23962_v23  ;;  %v13558_v23 = vcombine.high %v26979_v26, %v26991_v36  ;;  %v24045_v36 = vld [vmem:[%s30624_s4 + $0xa2c] ss:$16 sps:$4 sm:$0xff]  }
 0x830   : > { %9546 = vmatpush1.bf16.msra.mxu0 %v23965_v35  ;;  %13339 = vmatprep.subr.bf16.mxu1 %v23970_v50  ;;  %v13559_v35 = vcombine.high %v26672_v24, %v26672_v24  ;;  %v24034_v50 = vld [vmem:[%s30624_s4 + $0x17e8] ss:$16 sps:$4 sm:$0xff]  }
 0x831   : > { %9547 = vmatprep.subr.bf16.mxu0 %v23973_v12  ;;  %v24037_v12 = vld [vmem:[%s30624_s4 + $0xa08] ss:$16 sps:$4 sm:$0xff]   ;;  %v13573_v26 = vrot.slane %v13558_v23, %v26368_v1  ;;  %v24106_v23 = vld [vmem:[%s30624_s4 + $0x1960] ss:$16 sps:$4 sm:$0xff]  }
 0x832   : > { %v13587_v24 = vrot.slane %v13559_v35, %v26368_v1  ;;  %v24109_v35 = vld [vmem:[%s30624_s4 + $0xb88] ss:$16 sps:$4 sm:$0xff]  }
 0x833   : > { %13340 = vmatpush1.bf16.msra.mxu1 %v23968_v37  ;;  %v24042_v37 = vld [vmem:[%s30624_s4 + $0x1804] ss:$16 sps:$4 sm:$0xff]  }
 0x834   : > { %9548 = vmatpush1.bf16.msra.mxu0 %v23971_v33  ;;  %13341 = vmatprep.subr.bf16.mxu1 %v23976_v40  ;;  %v24040_v33 = vld [vmem:[%s30624_s4 + $0x1800] ss:$16 sps:$4 sm:$0xff]   ;;  %v24043_v40 = vld [vmem:[%s30624_s4 + $0xa28] ss:$16 sps:$4 sm:$0xff]  }
 0x835   : > { %9549 = vmatprep.subr.bf16.mxu0 %v23979_v43  ;;  %v24048_v43 = vld [vmem:[%s30624_s4 + $0x1824] ss:$16 sps:$4 sm:$0xff]  }
 0x837   : > { %13342 = vmatpush1.bf16.msra.mxu1 %v23974_v28  ;;  %v28859_v28 = vcombine.low %v13573_v26, %v13587_v24  ;;  %v24115_v26 = vld [vmem:[%s30624_s4 + $0xba8] ss:$16 sps:$4 sm:$0xff]   ;;  %v24120_v24 = vld [vmem:[%s30624_s4 + $0x19a4] ss:$16 sps:$4 sm:$0xff]  }
 0x838   : > { %9550 = vmatpush1.bf16.msra.mxu0 %v23977_v8  ;;  %13343 = vmatprep.subr.bf16.mxu1 %v23982_v31  ;;  %v24051_v8 = vld [vmem:[%s30624_s4 + $0xa4c] ss:$16 sps:$4 sm:$0xff]   ;;  %v24049_v31 = vld [vmem:[%s30624_s4 + $0xa48] ss:$16 sps:$4 sm:$0xff]  }
 0x839   : > { %9551 = vmatprep.subr.bf16.mxu0 %v23985_v14  ;;  %v24054_v14 = vld [vmem:[%s30624_s4 + $0x1844] ss:$16 sps:$4 sm:$0xff]  }
 0x83b   : > { %13344 = vmatpush1.bf16.msra.mxu1 %v23980_v10  ;;  %v24052_v10 = vld [vmem:[%s30624_s4 + $0x1840] ss:$16 sps:$4 sm:$0xff]  }
 0x83c   : > { %9552 = vmatpush1.bf16.msra.mxu0 %v23983_v34  ;;  %13345 = vmatprep.subr.bf16.mxu1 %v23988_v19  ;;  %v24055_v34 = vld [vmem:[%s30624_s4 + $0xa68] ss:$16 sps:$4 sm:$0xff]   ;;  %v24060_v19 = vld [vmem:[%s30624_s4 + $0x1864] ss:$16 sps:$4 sm:$0xff]  }
 0x83d   : > { %9553 = vmatprep.subr.bf16.mxu0 %v23991_v11  ;;  %v24063_v11 = vld [vmem:[%s30624_s4 + $0xa8c] ss:$16 sps:$4 sm:$0xff]  }
 0x83f   : > { %13346 = vmatpush1.bf16.msra.mxu1 %v23986_v58  ;;  %v24058_v58 = vld [vmem:[%s30624_s4 + $0x1860] ss:$16 sps:$4 sm:$0xff]  }
 0x840   : > { %9554 = vmatpush1.bf16.msra.mxu0 %v23989_v21  ;;  %13347 = vmatprep.subr.bf16.mxu1 %v23994_v44  ;;  %v24061_v21 = vld [vmem:[%s30624_s4 + $0xa88] ss:$16 sps:$4 sm:$0xff]   ;;  %v24066_v44 = vld [vmem:[%s30624_s4 + $0x1884] ss:$16 sps:$4 sm:$0xff]  }
 0x841   : > { %9555 = vmatprep.subr.bf16.mxu0 %v23997_v52  ;;  %v24069_v52 = vld [vmem:[%s30624_s4 + $0xaac] ss:$16 sps:$4 sm:$0xff]  }
 0x843   : > { %13348 = vmatpush1.bf16.msra.mxu1 %v23992_v18  ;;  %v24064_v18 = vld [vmem:[%s30624_s4 + $0x1880] ss:$16 sps:$4 sm:$0xff]  }
 0x844   : > { %9556 = vmatpush1.bf16.msra.mxu0 %v23995_v60  ;;  %13349 = vmatprep.subr.bf16.mxu1 %v24000_v47  ;;  %v24067_v60 = vld [vmem:[%s30624_s4 + $0xaa8] ss:$16 sps:$4 sm:$0xff]   ;;  %v24072_v47 = vld [vmem:[%s30624_s4 + $0x18a4] ss:$16 sps:$4 sm:$0xff]  }
 0x845   : > { %9557 = vmatprep.subr.bf16.mxu0 %v24003_v42  ;;  %v24075_v42 = vld [vmem:[%s30624_s4 + $0xacc] ss:$16 sps:$4 sm:$0xff]  }
 0x847   : > { %13350 = vmatpush1.bf16.msra.mxu1 %v23998_v7  ;;  %v24070_v7 = vld [vmem:[%s30624_s4 + $0x18a0] ss:$16 sps:$4 sm:$0xff]  }
 0x848   : > { %9558 = vmatpush1.bf16.msra.mxu0 %v24001_v62  ;;  %13351 = vmatprep.subr.bf16.mxu1 %v24006_v20  ;;  %v24073_v62 = vld [vmem:[%s30624_s4 + $0xac8] ss:$16 sps:$4 sm:$0xff]   ;;  %v24078_v20 = vld [vmem:[%s30624_s4 + $0x18c4] ss:$16 sps:$4 sm:$0xff]  }
 0x849   : > { %9559 = vmatprep.subr.bf16.mxu0 %v24009_v57  ;;  %v24081_v57 = vld [vmem:[%s30624_s4 + $0xaec] ss:$16 sps:$4 sm:$0xff]  }
 0x84b   : > { %13352 = vmatpush1.bf16.msra.mxu1 %v24004_v17  ;;  %v24076_v17 = vld [vmem:[%s30624_s4 + $0x18c0] ss:$16 sps:$4 sm:$0xff]  }
 0x84c   : > { %9560 = vmatpush1.bf16.msra.mxu0 %v24007_v48  ;;  %13353 = vmatprep.subr.bf16.mxu1 %v24012_v46  ;;  %v24079_v48 = vld [vmem:[%s30624_s4 + $0xae8] ss:$16 sps:$4 sm:$0xff]   ;;  %v24084_v46 = vld [vmem:[%s30624_s4 + $0x18e4] ss:$16 sps:$4 sm:$0xff]  }
 0x84d   : > { %9561 = vmatprep.subr.bf16.mxu0 %v24015_v39  ;;  %v24087_v39 = vld [vmem:[%s30624_s4 + $0xb0c] ss:$16 sps:$4 sm:$0xff]  }
 0x84f   : > { %13354 = vmatpush1.bf16.msra.mxu1 %v24010_v30  ;;  %v24082_v30 = vld [vmem:[%s30624_s4 + $0x18e0] ss:$16 sps:$4 sm:$0xff]  }
 0x850   : > { %9562 = vmatpush1.bf16.msra.mxu0 %v24013_v3  ;;  %13355 = vmatprep.subr.bf16.mxu1 %v24018_v54  ;;  %v24085_v3 = vld [vmem:[%s30624_s4 + $0xb08] ss:$16 sps:$4 sm:$0xff]   ;;  %v24090_v54 = vld [vmem:[%s30624_s4 + $0x1904] ss:$16 sps:$4 sm:$0xff]  }
 0x851   : > { %9563 = vmatprep.subr.bf16.mxu0 %v24021_v0  ;;  %v24093_v0 = vld [vmem:[%s30624_s4 + $0xb2c] ss:$16 sps:$4 sm:$0xff]  }
 0x853   : > { %13356 = vmatpush1.bf16.msra.mxu1 %v24016_v27  ;;  %v24088_v27 = vld [vmem:[%s30624_s4 + $0x1900] ss:$16 sps:$4 sm:$0xff]  }
 0x854   : > { %9564 = vmatpush1.bf16.msra.mxu0 %v24019_v51  ;;  %13357 = vmatprep.subr.bf16.mxu1 %v24024_v55  ;;  %v24091_v51 = vld [vmem:[%s30624_s4 + $0xb28] ss:$16 sps:$4 sm:$0xff]   ;;  %v24096_v55 = vld [vmem:[%s30624_s4 + $0x1924] ss:$16 sps:$4 sm:$0xff]  }
 0x855   : > { %9565 = vmatprep.subr.bf16.mxu0 %v24027_v16  ;;  %v24099_v16 = vld [vmem:[%s30624_s4 + $0xb4c] ss:$16 sps:$4 sm:$0xff]  }
 0x857   : > { %13358 = vmatpush1.bf16.msra.mxu1 %v24022_v53  ;;  %v24094_v53 = vld [vmem:[%s30624_s4 + $0x1920] ss:$16 sps:$4 sm:$0xff]  }
 0x858   : > { %9566 = vmatpush1.bf16.msra.mxu0 %v24025_v45  ;;  %13359 = vmatprep.subr.bf16.mxu1 %v24030_v61  ;;  %v24097_v45 = vld [vmem:[%s30624_s4 + $0xb48] ss:$16 sps:$4 sm:$0xff]   ;;  %v24102_v61 = vld [vmem:[%s30624_s4 + $0x1944] ss:$16 sps:$4 sm:$0xff]  }
 0x859   : > { %9567 = vmatprep.subr.bf16.mxu0 %v24033_v49  ;;  %v24105_v49 = vld [vmem:[%s30624_s4 + $0xb6c] ss:$16 sps:$4 sm:$0xff]  }
 0x85b   : > { %13360 = vmatpush1.bf16.msra.mxu1 %v24028_v32  ;;  %v24100_v32 = vld [vmem:[%s30624_s4 + $0x1940] ss:$16 sps:$4 sm:$0xff]  }
 0x85c   : > { %9568 = vmatpush1.bf16.msra.mxu0 %v24031_v29  ;;  %13361 = vmatprep.subr.bf16.mxu1 %v24036_v56  ;;  %v24103_v29 = vld [vmem:[%s30624_s4 + $0xb68] ss:$16 sps:$4 sm:$0xff]   ;;  %v24108_v56 = vld [vmem:[%s30624_s4 + $0x1964] ss:$16 sps:$4 sm:$0xff]  }
 0x85d   : > { %9580 = vmatprep.subr.bf16.mxu0 %v24039_v63  ;;  %v24111_v63 = vld [vmem:[%s30624_s4 + $0xb8c] ss:$16 sps:$4 sm:$0xff]  }
 0x85f   : > { %13362 = vmatpush1.bf16.msra.mxu1 %v24034_v50  ;;  %9570 = vmatmul.mubr.bf16.vlgmr.msra.gmra.mrb[44].mxu0 %v26963_v15  ;;  %v24114_v50 = vld [vmem:[%s30624_s4 + $0x1984] ss:$16 sps:$4 sm:$0xff]  }
 0x860   : > { %9581 = vmatpush1.bf16.msra.mxu0 %v24037_v12  ;;  %9612 = vmatprep.mubr.bf16.mxu0 %v26961_v25  ;;  %v24046_v25 = vld [vmem:[%s30624_s4 + $0x1820] ss:$16 sps:$4 sm:$0xff]   ;;  %v24117_v12 = vld [vmem:[%s30624_s4 + $0xbac] ss:$16 sps:$4 sm:$0xff]  }
 0x861   : > { %13912 = vmatprep.subr.bf16.mxu1 %v24042_v37  ;;  %9582 = vmatprep.subr.bf16.mxu0 %v24045_v36  ;;  %v24112_v37 = vld [vmem:[%s30624_s4 + $0x1980] ss:$16 sps:$4 sm:$0xff]   ;;  %v24123_v36 = vld [vmem:[%s30624_s4 + $0xbcc] ss:$16 sps:$4 sm:$0xff]  }
 0x862   : > { %13364 = vmatmul.mubr.bf16.vlgmr.msra.gmra.mrb[8].mxu1 %v26958_v38  ;;  %v24057_v38 = vld [vmem:[%s30624_s4 + $0xa6c] ss:$16 sps:$4 sm:$0xff]  }
 0x863   : > { %13913 = vmatpush1.bf16.msra.mxu1 %v24040_v33  ;;  %13944 = vmatprep.mubr.bf16.mxu1 %v28859_v28  ;;  %v24118_v33 = vld [vmem:[%s30624_s4 + $0x19a0] ss:$16 sps:$4 sm:$0xff]  }
 0x864   : > { %9583 = vmatpush1.bf16.msra.mxu0 %v24043_v40  ;;  %13914 = vmatprep.subr.bf16.mxu1 %v24048_v43  ;;  %v24121_v40 = vld [vmem:[%s30624_s4 + $0xbc8] ss:$16 sps:$4 sm:$0xff]   ;;  %v24126_v43 = vld [vmem:[%s30624_s4 + $0x19c4] ss:$16 sps:$4 sm:$0xff]  }
 0x865   : > { %9584 = vmatprep.subr.bf16.mxu0 %v24051_v8  ;;  %v24129_v8 = vld [vmem:[%s30624_s4 + $0xbec] ss:$16 sps:$4 sm:$0xff]  }
 0x867   : > { %13915 = vmatpush1.bf16.msra.mxu1 %v24046_v25  ;;  %v24124_v25 = vld [vmem:[%s30624_s4 + $0x19c0] ss:$16 sps:$4 sm:$0xff]  }
 0x868   : > { %9585 = vmatpush1.bf16.msra.mxu0 %v24049_v31  ;;  %13916 = vmatprep.subr.bf16.mxu1 %v24054_v14  ;;  %v24127_v31 = vld [vmem:[%s30624_s4 + $0xbe8] ss:$16 sps:$4 sm:$0xff]   ;;  %v24132_v14 = vld [vmem:[%s30624_s4 + $0x19e4] ss:$16 sps:$4 sm:$0xff]  }
 0x869   : > { %9586 = vmatprep.subr.bf16.mxu0 %v24057_v38  ;;  %v24135_v38 = vld [vmem:[%s30624_s4 + $0xc04] ss:$16 sps:$4 sm:$0xff]  }
 0x86b   : > { %13917 = vmatpush1.bf16.msra.mxu1 %v24052_v10  ;;  %v24130_v10 = vld [vmem:[%s30624_s4 + $0x19e0] ss:$16 sps:$4 sm:$0xff]  }
 0x86c   : > { %9587 = vmatpush1.bf16.msra.mxu0 %v24055_v34  ;;  %13918 = vmatprep.subr.bf16.mxu1 %v24060_v19  ;;  %v24133_v34 = vld [vmem:[%s30624_s4 + $0xc00] ss:$16 sps:$4 sm:$0xff]   ;;  %v24138_v19 = vld [vmem:[%s30624_s4 + $0x180c] ss:$16 sps:$4 sm:$0xff]  }
 0x86d   : > { %9588 = vmatprep.subr.bf16.mxu0 %v24063_v11  ;;  %v24141_v11 = vld [vmem:[%s30624_s4 + $0xc24] ss:$16 sps:$4 sm:$0xff]  }
 0x86f   : > { %13919 = vmatpush1.bf16.msra.mxu1 %v24058_v58  ;;  %v24136_v58 = vld [vmem:[%s30624_s4 + $0x1808] ss:$16 sps:$4 sm:$0xff]  }
 0x870   : > { %9589 = vmatpush1.bf16.msra.mxu0 %v24061_v21  ;;  %13920 = vmatprep.subr.bf16.mxu1 %v24066_v44  ;;  %v30642_v21 = vld [vmem:[#allocation16_spill] sm:$0xff] }
 0x871   : > { %9590 = vmatprep.subr.bf16.mxu0 %v24069_v52  ;;  %v24139_v44 = vld [vmem:[%s30624_s4 + $0xc20] ss:$16 sps:$4 sm:$0xff]   ;;  %v24144_v52 = vld [vmem:[%s30624_s4 + $0x182c] ss:$16 sps:$4 sm:$0xff]  }
 0x873   : > { %13921 = vmatpush1.bf16.msra.mxu1 %v24064_v18  ;;  %v24142_v18 = vld [vmem:[%s30624_s4 + $0x1828] ss:$16 sps:$4 sm:$0xff]  }
 0x874   : > { %9591 = vmatpush1.bf16.msra.mxu0 %v24067_v60  ;;  %13922 = vmatprep.subr.bf16.mxu1 %v24072_v47  ;;  %v24145_v60 = vld [vmem:[%s30624_s4 + $0xc40] ss:$16 sps:$4 sm:$0xff]   ;;  %v24150_v47 = vld [vmem:[%s30624_s4 + $0x184c] ss:$16 sps:$4 sm:$0xff]  }
 0x875   : > { %9592 = vmatprep.subr.bf16.mxu0 %v24075_v42  ;;  %v24153_v42 = vld [vmem:[%s30624_s4 + $0xc64] ss:$16 sps:$4 sm:$0xff]  }
 0x877   : > { %13923 = vmatpush1.bf16.msra.mxu1 %v24070_v7  ;;  %v24151_v7 = vld [vmem:[%s30624_s4 + $0xc60] ss:$16 sps:$4 sm:$0xff]  }
 0x878   : > { %9593 = vmatpush1.bf16.msra.mxu0 %v24073_v62  ;;  %13924 = vmatprep.subr.bf16.mxu1 %v24078_v20  ;;  %v24156_v62 = vld [vmem:[%s30624_s4 + $0x186c] ss:$16 sps:$4 sm:$0xff]   ;;  %v24159_v20 = vld [vmem:[%s30624_s4 + $0xc84] ss:$16 sps:$4 sm:$0xff]  }
 0x879   : > { %9594 = vmatprep.subr.bf16.mxu0 %v24081_v57  ;;  %v24154_v57 = vld [vmem:[%s30624_s4 + $0x1868] ss:$16 sps:$4 sm:$0xff]  }
 0x87b   : > { %13925 = vmatpush1.bf16.msra.mxu1 %v24076_v17  ;;  %v24157_v17 = vld [vmem:[%s30624_s4 + $0xc80] ss:$16 sps:$4 sm:$0xff]  }
 0x87c   : > { %9595 = vmatpush1.bf16.msra.mxu0 %v24079_v48  ;;  %13926 = vmatprep.subr.bf16.mxu1 %v24084_v46  ;;  %v24162_v48 = vld [vmem:[%s30624_s4 + $0x188c] ss:$16 sps:$4 sm:$0xff]   ;;  %v24165_v46 = vld [vmem:[%s30624_s4 + $0xca4] ss:$16 sps:$4 sm:$0xff]  }
 0x87d   : > { %9596 = vmatprep.subr.bf16.mxu0 %v24087_v39  ;;  %v24160_v39 = vld [vmem:[%s30624_s4 + $0x1888] ss:$16 sps:$4 sm:$0xff]  }
 0x87f   : > { %13927 = vmatpush1.bf16.msra.mxu1 %v24082_v30  ;;  %v24163_v30 = vld [vmem:[%s30624_s4 + $0xca0] ss:$16 sps:$4 sm:$0xff]  }
 0x880   : > { %9597 = vmatpush1.bf16.msra.mxu0 %v24085_v3  ;;  %13928 = vmatprep.subr.bf16.mxu1 %v24090_v54  ;;  %v24168_v3 = vld [vmem:[%s30624_s4 + $0x18ac] ss:$16 sps:$4 sm:$0xff]   ;;  %v24171_v54 = vld [vmem:[%s30624_s4 + $0xcc4] ss:$16 sps:$4 sm:$0xff]  }
 0x881   : > { %9598 = vmatprep.subr.bf16.mxu0 %v24093_v0  ;;  %v24166_v0 = vld [vmem:[%s30624_s4 + $0x18a8] ss:$16 sps:$4 sm:$0xff]  }
 0x883   : > { %13929 = vmatpush1.bf16.msra.mxu1 %v24088_v27  ;;  %v24169_v27 = vld [vmem:[%s30624_s4 + $0xcc0] ss:$16 sps:$4 sm:$0xff]  }
 0x884   : > { %9599 = vmatpush1.bf16.msra.mxu0 %v24091_v51  ;;  %13930 = vmatprep.subr.bf16.mxu1 %v24096_v55  ;;  %v24174_v51 = vld [vmem:[%s30624_s4 + $0x18cc] ss:$16 sps:$4 sm:$0xff]   ;;  %v24177_v55 = vld [vmem:[%s30624_s4 + $0xce4] ss:$16 sps:$4 sm:$0xff]  }
 0x885   : > { %9600 = vmatprep.subr.bf16.mxu0 %v24099_v16  ;;  %v24172_v16 = vld [vmem:[%s30624_s4 + $0x18c8] ss:$16 sps:$4 sm:$0xff]  }
 0x887   : > { %13931 = vmatpush1.bf16.msra.mxu1 %v24094_v53  ;;  %v24175_v53 = vld [vmem:[%s30624_s4 + $0xce0] ss:$16 sps:$4 sm:$0xff]  }
 0x888   : > { %9601 = vmatpush1.bf16.msra.mxu0 %v24097_v45  ;;  %13932 = vmatprep.subr.bf16.mxu1 %v24102_v61  ;;  %v24180_v45 = vld [vmem:[%s30624_s4 + $0x18ec] ss:$16 sps:$4 sm:$0xff]   ;;  %v24183_v61 = vld [vmem:[%s30624_s4 + $0xd04] ss:$16 sps:$4 sm:$0xff]  }
 0x889   : > { %9602 = vmatprep.subr.bf16.mxu0 %v24105_v49  ;;  %v24178_v49 = vld [vmem:[%s30624_s4 + $0x18e8] ss:$16 sps:$4 sm:$0xff]  }
 0x88b   : > { %13933 = vmatpush1.bf16.msra.mxu1 %v24100_v32  ;;  %v24181_v32 = vld [vmem:[%s30624_s4 + $0xd00] ss:$16 sps:$4 sm:$0xff]  }
 0x88c   : > { %9603 = vmatpush1.bf16.msra.mxu0 %v24103_v29  ;;  %13934 = vmatprep.subr.bf16.mxu1 %v24108_v56  ;;  %v24186_v29 = vld [vmem:[%s30624_s4 + $0x190c] ss:$16 sps:$4 sm:$0xff]   ;;  %v24189_v56 = vld [vmem:[%s30624_s4 + $0xd24] ss:$16 sps:$4 sm:$0xff]  }
 0x88d   : > { %9604 = vmatprep.subr.bf16.mxu0 %v24111_v63  ;;  %v24184_v63 = vld [vmem:[%s30624_s4 + $0x1908] ss:$16 sps:$4 sm:$0xff]  }
 0x88f   : > { %13935 = vmatpush1.bf16.msra.mxu1 %v24106_v23  ;;  %v24187_v23 = vld [vmem:[%s30624_s4 + $0xd20] ss:$16 sps:$4 sm:$0xff]  }
 0x890   : > { %9605 = vmatpush1.bf16.msra.mxu0 %v24109_v35  ;;  %13936 = vmatprep.subr.bf16.mxu1 %v24114_v50  ;;  %v24192_v35 = vld [vmem:[%s30624_s4 + $0x192c] ss:$16 sps:$4 sm:$0xff]   ;;  %v24195_v50 = vld [vmem:[%s30624_s4 + $0xd44] ss:$16 sps:$4 sm:$0xff]  }
 0x891   : > { %9606 = vmatprep.subr.bf16.mxu0 %v24117_v12  ;;  %v24190_v12 = vld [vmem:[%s30624_s4 + $0x1928] ss:$16 sps:$4 sm:$0xff]  }
 0x893   : > { %13937 = vmatpush1.bf16.msra.mxu1 %v24112_v37  ;;  %v24193_v37 = vld [vmem:[%s30624_s4 + $0xd40] ss:$16 sps:$4 sm:$0xff]  }
 0x894   : > { %9607 = vmatpush1.bf16.msra.mxu0 %v24115_v26  ;;  %13938 = vmatprep.subr.bf16.mxu1 %v24120_v24  ;;  %v24198_v26 = vld [vmem:[%s30624_s4 + $0x194c] ss:$16 sps:$4 sm:$0xff]   ;;  %v24201_v24 = vld [vmem:[%s30624_s4 + $0xd64] ss:$16 sps:$4 sm:$0xff]  }
 0x895   : > { %9608 = vmatprep.subr.bf16.mxu0 %v24123_v36  ;;  %v24196_v36 = vld [vmem:[%s30624_s4 + $0x1948] ss:$16 sps:$4 sm:$0xff]  }
 0x897   : > { %13939 = vmatpush1.bf16.msra.mxu1 %v24118_v33  ;;  %v24199_v33 = vld [vmem:[%s30624_s4 + $0xd60] ss:$16 sps:$4 sm:$0xff]  }
 0x898   : > { %9609 = vmatpush1.bf16.msra.mxu0 %v24121_v40  ;;  %13940 = vmatprep.subr.bf16.mxu1 %v24126_v43  ;;  %v24204_v40 = vld [vmem:[%s30624_s4 + $0x196c] ss:$16 sps:$4 sm:$0xff]   ;;  %v24207_v43 = vld [vmem:[%s30624_s4 + $0xd84] ss:$16 sps:$4 sm:$0xff]  }
 0x899   : > { %9610 = vmatprep.subr.bf16.mxu0 %v24129_v8  ;;  %v24202_v8 = vld [vmem:[%s30624_s4 + $0x1968] ss:$16 sps:$4 sm:$0xff]  }
 0x89b   : > { %13941 = vmatpush1.bf16.msra.mxu1 %v24124_v25  ;;  %v24205_v25 = vld [vmem:[%s30624_s4 + $0xd80] ss:$16 sps:$4 sm:$0xff]  }
 0x89c   : > { %9611 = vmatpush1.bf16.msra.mxu0 %v24127_v31  ;;  %13942 = vmatprep.subr.bf16.mxu1 %v24132_v14  ;;  %v24210_v31 = vld [vmem:[%s30624_s4 + $0x198c] ss:$16 sps:$4 sm:$0xff]   ;;  %v24213_v14 = vld [vmem:[%s30624_s4 + $0xda4] ss:$16 sps:$4 sm:$0xff]  }
 0x89d   : > { %10163 = vmatprep.subr.bf16.mxu0 %v24135_v38  ;;  %v24208_v38 = vld [vmem:[%s30624_s4 + $0x1988] ss:$16 sps:$4 sm:$0xff]  }
 0x89f   : > { %13943 = vmatpush1.bf16.msra.mxu1 %v24130_v10  ;;  %9613 = vmatmul.mubr.bf16.vlgmr.msra.gmra.mrb[48].mxu0 %v26963_v15  ;;  %v24147_v15 = vld [vmem:[%s30624_s4 + $0xc44] ss:$16 sps:$4 sm:$0xff]   ;;  %v24211_v10 = vld [vmem:[%s30624_s4 + $0xda0] ss:$16 sps:$4 sm:$0xff]  }
 0x8a0   : > { %10164 = vmatpush1.bf16.msra.mxu0 %v24133_v34  ;;  %10195 = vmatprep.mubr.bf16.mxu0 %v30642_v21  ;;  %v24216_v34 = vld [vmem:[%s30624_s4 + $0x19ac] ss:$16 sps:$4 sm:$0xff]  }
 0x8a1   : > { %13955 = vmatprep.subr.bf16.mxu1 %v24138_v19  ;;  %10165 = vmatprep.subr.bf16.mxu0 %v24141_v11  ;;  %v24219_v19 = vld [vmem:[%s30624_s4 + $0xdc4] ss:$16 sps:$4 sm:$0xff]   ;;  %v24214_v11 = vld [vmem:[%s30624_s4 + $0x19a8] ss:$16 sps:$4 sm:$0xff]   ;;  %v24222_v21 = vld [vmem:[%s30624_s4 + $0x19cc] ss:$16 sps:$4 sm:$0xff]  }
 0x8a2   : > { %13945 = vmatmul.mubr.bf16.vlgmr.msra.gmra.mrb[12].mxu1 %v27036_v6 }
 0x8a3   : > { %13956 = vmatpush1.bf16.msra.mxu1 %v24136_v58  ;;  %13987 = vmatprep.mubr.bf16.mxu1 %v28859_v28  ;;  %v24148_v28 = vld [vmem:[%s30624_s4 + $0x1848] ss:$16 sps:$4 sm:$0xff]   ;;  %v24217_v58 = vld [vmem:[%s30624_s4 + $0xdc0] ss:$16 sps:$4 sm:$0xff]  }
 0x8a4   : > { %10166 = vmatpush1.bf16.msra.mxu0 %v24139_v44  ;;  %13957 = vmatprep.subr.bf16.mxu1 %v24144_v52  ;;  %v24225_v44 = vld [vmem:[%s30624_s4 + $0xde4] ss:$16 sps:$4 sm:$0xff]   ;;  %v24220_v52 = vld [vmem:[%s30624_s4 + $0x19c8] ss:$16 sps:$4 sm:$0xff]  }
 0x8a5   : > { %10167 = vmatprep.subr.bf16.mxu0 %v24147_v15  ;;  %v24223_v15 = vld [vmem:[%s30624_s4 + $0xde0] ss:$16 sps:$4 sm:$0xff]  }
 0x8a7   : > { %13958 = vmatpush1.bf16.msra.mxu1 %v24142_v18  ;;  %v24228_v18 = vld [vmem:[%s30624_s4 + $0x19ec] ss:$16 sps:$4 sm:$0xff]  }
 0x8a8   : > { %10168 = vmatpush1.bf16.msra.mxu0 %v24145_v60  ;;  %13959 = vmatprep.subr.bf16.mxu1 %v24150_v47  ;;  %v24226_v60 = vld [vmem:[%s30624_s4 + $0x19e8] ss:$16 sps:$4 sm:$0xff]   ;;  %v24231_v47 = vld [vmem:[%s30624_s4 + $0x1a04] ss:$16 sps:$4 sm:$0xff]  }
 0x8a9   : > { %10169 = vmatprep.subr.bf16.mxu0 %v24153_v42  ;;  %v30643_v42 = vld [vmem:[#allocation17_spill] sm:$0xff] }
 0x8ab   : > { %13960 = vmatpush1.bf16.msra.mxu1 %v24148_v28  ;;  %v24229_v28 = vld [vmem:[%s30624_s4 + $0x1a00] ss:$16 sps:$4 sm:$0xff]  }
 0x8ac   : > { %10170 = vmatpush1.bf16.msra.mxu0 %v24151_v7  ;;  %13961 = vmatprep.subr.bf16.mxu1 %v24156_v62  ;;  %v24234_v7 = vld [vmem:[%s30624_s4 + $0x1a24] ss:$16 sps:$4 sm:$0xff]   ;;  %v24232_v62 = vld [vmem:[%s30624_s4 + $0x1a20] ss:$16 sps:$4 sm:$0xff]  }
 0x8ad   : > { %10171 = vmatprep.subr.bf16.mxu0 %v24159_v20  ;;  %v24237_v20 = vld [vmem:[%s30624_s4 + $0x1a44] ss:$16 sps:$4 sm:$0xff]  }
 0x8af   : > { %13962 = vmatpush1.bf16.msra.mxu1 %v24154_v57  ;;  %v24235_v57 = vld [vmem:[%s30624_s4 + $0x1a40] ss:$16 sps:$4 sm:$0xff]  }
 0x8b0   : > { %10172 = vmatpush1.bf16.msra.mxu0 %v24157_v17  ;;  %13963 = vmatprep.subr.bf16.mxu1 %v24162_v48  ;;  %v24238_v17 = vld [vmem:[%s30624_s4 + $0x1a60] ss:$16 sps:$4 sm:$0xff]   ;;  %v24243_v48 = vld [vmem:[%s30624_s4 + $0x1a84] ss:$16 sps:$4 sm:$0xff]  }
 0x8b1   : > { %10173 = vmatprep.subr.bf16.mxu0 %v24165_v46  ;;  %v24241_v46 = vld [vmem:[%s30624_s4 + $0x1a80] ss:$16 sps:$4 sm:$0xff]  }
 0x8b3   : > { %13964 = vmatpush1.bf16.msra.mxu1 %v24160_v39  ;;  %v24246_v39 = vld [vmem:[%s30624_s4 + $0x1aa4] ss:$16 sps:$4 sm:$0xff]  }
 0x8b4   : > { %10174 = vmatpush1.bf16.msra.mxu0 %v24163_v30  ;;  %13965 = vmatprep.subr.bf16.mxu1 %v24168_v3  ;;  %v24244_v30 = vld [vmem:[%s30624_s4 + $0x1aa0] ss:$16 sps:$4 sm:$0xff]   ;;  %v24249_v3 = vld [vmem:[%s30624_s4 + $0x1ac4] ss:$16 sps:$4 sm:$0xff]  }
 0x8b5   : > { %10175 = vmatprep.subr.bf16.mxu0 %v24171_v54  ;;  %v24247_v54 = vld [vmem:[%s30624_s4 + $0x1ac0] ss:$16 sps:$4 sm:$0xff]  }
 0x8b7   : > { %13966 = vmatpush1.bf16.msra.mxu1 %v24166_v0  ;;  %v24252_v0 = vld [vmem:[%s30624_s4 + $0x1ae4] ss:$16 sps:$4 sm:$0xff]  }
 0x8b8   : > { %10176 = vmatpush1.bf16.msra.mxu0 %v24169_v27  ;;  %13967 = vmatprep.subr.bf16.mxu1 %v24174_v51  ;;  %v24250_v27 = vld [vmem:[%s30624_s4 + $0x1ae0] ss:$16 sps:$4 sm:$0xff]   ;;  %v24255_v51 = vld [vmem:[%s30624_s4 + $0x1b04] ss:$16 sps:$4 sm:$0xff]  }
 0x8b9   : > { %10177 = vmatprep.subr.bf16.mxu0 %v24177_v55  ;;  %v24253_v55 = vld [vmem:[%s30624_s4 + $0x1b00] ss:$16 sps:$4 sm:$0xff]  }
 0x8bb   : > { %13968 = vmatpush1.bf16.msra.mxu1 %v24172_v16  ;;  %v24258_v16 = vld [vmem:[%s30624_s4 + $0x1b24] ss:$16 sps:$4 sm:$0xff]  }
 0x8bc   : > { %10178 = vmatpush1.bf16.msra.mxu0 %v24175_v53  ;;  %13969 = vmatprep.subr.bf16.mxu1 %v24180_v45  ;;  %v24256_v53 = vld [vmem:[%s30624_s4 + $0x1b20] ss:$16 sps:$4 sm:$0xff]   ;;  %v24261_v45 = vld [vmem:[%s30624_s4 + $0x1b44] ss:$16 sps:$4 sm:$0xff]  }
 0x8bd   : > { %10179 = vmatprep.subr.bf16.mxu0 %v24183_v61  ;;  %v24259_v61 = vld [vmem:[%s30624_s4 + $0x1b40] ss:$16 sps:$4 sm:$0xff]  }
 0x8bf   : > { %13970 = vmatpush1.bf16.msra.mxu1 %v24178_v49  ;;  %v24264_v49 = vld [vmem:[%s30624_s4 + $0x1b64] ss:$16 sps:$4 sm:$0xff]  }
 0x8c0   : > { %10180 = vmatpush1.bf16.msra.mxu0 %v24181_v32  ;;  %13971 = vmatprep.subr.bf16.mxu1 %v24186_v29  ;;  %v24262_v32 = vld [vmem:[%s30624_s4 + $0x1b60] ss:$16 sps:$4 sm:$0xff]   ;;  %v24267_v29 = vld [vmem:[%s30624_s4 + $0x1b84] ss:$16 sps:$4 sm:$0xff]  }
 0x8c1   : > { %10181 = vmatprep.subr.bf16.mxu0 %v24189_v56  ;;  %v24265_v56 = vld [vmem:[%s30624_s4 + $0x1b80] ss:$16 sps:$4 sm:$0xff]  }
 0x8c3   : > { %13972 = vmatpush1.bf16.msra.mxu1 %v24184_v63  ;;  %v24270_v63 = vld [vmem:[%s30624_s4 + $0x1ba4] ss:$16 sps:$4 sm:$0xff]  }
 0x8c4   : > { %10182 = vmatpush1.bf16.msra.mxu0 %v24187_v23  ;;  %13973 = vmatprep.subr.bf16.mxu1 %v24192_v35  ;;  %v24268_v23 = vld [vmem:[%s30624_s4 + $0x1ba0] ss:$16 sps:$4 sm:$0xff]   ;;  %v24273_v35 = vld [vmem:[%s30624_s4 + $0x1bc4] ss:$16 sps:$4 sm:$0xff]  }
 0x8c5   : > { %10183 = vmatprep.subr.bf16.mxu0 %v24195_v50  ;;  %v24271_v50 = vld [vmem:[%s30624_s4 + $0x1bc0] ss:$16 sps:$4 sm:$0xff]  }
 0x8c7   : > { %13974 = vmatpush1.bf16.msra.mxu1 %v24190_v12  ;;  %v24276_v12 = vld [vmem:[%s30624_s4 + $0x1be4] ss:$16 sps:$4 sm:$0xff]  }
 0x8c8   : > { %10184 = vmatpush1.bf16.msra.mxu0 %v24193_v37  ;;  %13975 = vmatprep.subr.bf16.mxu1 %v24198_v26  ;;  %v24274_v37 = vld [vmem:[%s30624_s4 + $0x1be0] ss:$16 sps:$4 sm:$0xff]   ;;  %v24279_v26 = vld [vmem:[%s30624_s4 + $0x1a0c] ss:$16 sps:$4 sm:$0xff]  }
 0x8c9   : > { %10185 = vmatprep.subr.bf16.mxu0 %v24201_v24  ;;  %v24277_v24 = vld [vmem:[%s30624_s4 + $0x1a08] ss:$16 sps:$4 sm:$0xff]  }
 0x8cb   : > { %13976 = vmatpush1.bf16.msra.mxu1 %v24196_v36  ;;  %v24282_v36 = vld [vmem:[%s30624_s4 + $0x1a2c] ss:$16 sps:$4 sm:$0xff]  }
 0x8cc   : > { %10186 = vmatpush1.bf16.msra.mxu0 %v24199_v33  ;;  %13977 = vmatprep.subr.bf16.mxu1 %v24204_v40  ;;  %v24280_v33 = vld [vmem:[%s30624_s4 + $0x1a28] ss:$16 sps:$4 sm:$0xff]   ;;  %v24285_v40 = vld [vmem:[%s30624_s4 + $0x1a4c] ss:$16 sps:$4 sm:$0xff]  }
 0x8cd   : > { %10187 = vmatprep.subr.bf16.mxu0 %v24207_v43  ;;  %v24283_v43 = vld [vmem:[%s30624_s4 + $0x1a48] ss:$16 sps:$4 sm:$0xff]  }
 0x8cf   : > { %13978 = vmatpush1.bf16.msra.mxu1 %v24202_v8  ;;  %v24288_v8 = vld [vmem:[%s30624_s4 + $0x1a6c] ss:$16 sps:$4 sm:$0xff]  }
 0x8d0   : > { %10188 = vmatpush1.bf16.msra.mxu0 %v24205_v25  ;;  %13979 = vmatprep.subr.bf16.mxu1 %v24210_v31  ;;  %v24291_v25 = vld [vmem:[%s30624_s4 + $0x1a8c] ss:$16 sps:$4 sm:$0xff]   ;;  %v24289_v31 = vld [vmem:[%s30624_s4 + $0x1a88] ss:$16 sps:$4 sm:$0xff]  }
 0x8d1   : > { %10189 = vmatprep.subr.bf16.mxu0 %v24213_v14  ;;  %v24294_v14 = vld [vmem:[%s30624_s4 + $0x1aac] ss:$16 sps:$4 sm:$0xff]  }
 0x8d3   : > { %13980 = vmatpush1.bf16.msra.mxu1 %v24208_v38  ;;  %v24292_v38 = vld [vmem:[%s30624_s4 + $0x1aa8] ss:$16 sps:$4 sm:$0xff]  }
 0x8d4   : > { %10190 = vmatpush1.bf16.msra.mxu0 %v24211_v10  ;;  %13981 = vmatprep.subr.bf16.mxu1 %v24216_v34  ;;  %v24297_v10 = vld [vmem:[%s30624_s4 + $0x1acc] ss:$16 sps:$4 sm:$0xff]   ;;  %v24295_v34 = vld [vmem:[%s30624_s4 + $0x1ac8] ss:$16 sps:$4 sm:$0xff]  }
 0x8d5   : > { %10191 = vmatprep.subr.bf16.mxu0 %v24219_v19  ;;  %v24300_v19 = vld [vmem:[%s30624_s4 + $0x1aec] ss:$16 sps:$4 sm:$0xff]  }
 0x8d7   : > { %13982 = vmatpush1.bf16.msra.mxu1 %v24214_v11  ;;  %v24298_v11 = vld [vmem:[%s30624_s4 + $0x1ae8] ss:$16 sps:$4 sm:$0xff]  }
 0x8d8   : > { %10192 = vmatpush1.bf16.msra.mxu0 %v24217_v58  ;;  %13983 = vmatprep.subr.bf16.mxu1 %v24222_v21  ;;  %v24303_v58 = vld [vmem:[%s30624_s4 + $0x1b0c] ss:$16 sps:$4 sm:$0xff]   ;;  %v24301_v21 = vld [vmem:[%s30624_s4 + $0x1b08] ss:$16 sps:$4 sm:$0xff]  }
 0x8d9   : > { %10193 = vmatprep.subr.bf16.mxu0 %v24225_v44  ;;  %v24306_v44 = vld [vmem:[%s30624_s4 + $0x1b2c] ss:$16 sps:$4 sm:$0xff]  }
 0x8db   : > { %13984 = vmatpush1.bf16.msra.mxu1 %v24220_v52  ;;  %v24304_v52 = vld [vmem:[%s30624_s4 + $0x1b28] ss:$16 sps:$4 sm:$0xff]  }
 0x8dc   : > { %10194 = vmatpush1.bf16.msra.mxu0 %v24223_v15  ;;  %13985 = vmatprep.subr.bf16.mxu1 %v24228_v18  ;;  %v24309_v15 = vld [vmem:[%s30624_s4 + $0x1b4c] ss:$16 sps:$4 sm:$0xff]   ;;  %v24307_v18 = vld [vmem:[%s30624_s4 + $0x1b48] ss:$16 sps:$4 sm:$0xff]  }
 0x8df   : > { %13986 = vmatpush1.bf16.msra.mxu1 %v24226_v60  ;;  %10196 = vmatmul.mubr.bf16.vlgmr.msra.gmra.mrb[44].mxu0 %v30643_v42  ;;  %v24312_v60 = vld [vmem:[%s30624_s4 + $0x1b6c] ss:$16 sps:$4 sm:$0xff]  }
 0x8e0   : > { %14535 = vmatprep.subr.bf16.mxu1 %v24231_v47  ;;  %v24310_v47 = vld [vmem:[%s30624_s4 + $0x1b68] ss:$16 sps:$4 sm:$0xff]   ;;  %v24315_v42 = vld [vmem:[%s30624_s4 + $0x1b8c] ss:$16 sps:$4 sm:$0xff]  }
 0x8e2   : > { %13988 = vmatmul.mubr.bf16.vlgmr.msra.gmra.mrb[8].mxu1 %v27036_v6  ;;  %v24240_v6 = vld [vmem:[%s30624_s4 + $0x1a64] ss:$16 sps:$4 sm:$0xff]  }
 0x8e3   : > { %14536 = vmatpush1.bf16.msra.mxu1 %v24229_v28  ;;  %14567 = vmatprep.mubr.bf16.mxu1 %v27039_v59  ;;  %v24313_v28 = vld [vmem:[%s30624_s4 + $0x1b88] ss:$16 sps:$4 sm:$0xff]  }
 0x8e4   : > { %14537 = vmatprep.subr.bf16.mxu1 %v24234_v7  ;;  %v24318_v7 = vld [vmem:[%s30624_s4 + $0x1bac] ss:$16 sps:$4 sm:$0xff]  }
 0x8e7   : > { %14538 = vmatpush1.bf16.msra.mxu1 %v24232_v62  ;;  %v24316_v62 = vld [vmem:[%s30624_s4 + $0x1ba8] ss:$16 sps:$4 sm:$0xff]  }
 0x8e8   : > { %14539 = vmatprep.subr.bf16.mxu1 %v24237_v20  ;;  %v24321_v20 = vld [vmem:[%s30624_s4 + $0x1bcc] ss:$16 sps:$4 sm:$0xff]  }
 0x8eb   : > { %14540 = vmatpush1.bf16.msra.mxu1 %v24235_v57  ;;  %v24319_v57 = vld [vmem:[%s30624_s4 + $0x1bc8] ss:$16 sps:$4 sm:$0xff]  }
 0x8ec   : > { %14541 = vmatprep.subr.bf16.mxu1 %v24240_v6  ;;  %v24324_v6 = vld [vmem:[%s30624_s4 + $0x1bec] ss:$16 sps:$4 sm:$0xff]  }
 0x8ef   : > { %14542 = vmatpush1.bf16.msra.mxu1 %v24238_v17  ;;  %v14807_v17 = vcombine.high %v27042_v9, %v27053_v2  ;;  %v24325_v9 = vld [vmem:[%s30624_s4 + $0x1c00] ss:$16 sps:$4 sm:$0xff]  }
 0x8f0   : > { %14543 = vmatprep.subr.bf16.mxu1 %v24243_v48  ;;  %v14808_v48 = vcombine.high %v27017_v4, %v27017_v4  ;;  %v24330_v4 = vld [vmem:[%s30624_s4 + $0x1c24] ss:$16 sps:$4 sm:$0xff]  }
 0x8f3   : > { %14544 = vmatpush1.bf16.msra.mxu1 %v24241_v46  ;;  %v24322_v46 = vld [vmem:[%s30624_s4 + $0x1be8] ss:$16 sps:$4 sm:$0xff]  }
 0x8f4   : > { %14545 = vmatprep.subr.bf16.mxu1 %v24246_v39  ;;  %v24327_v39 = vld [vmem:[%s30624_s4 + $0x1c04] ss:$16 sps:$4 sm:$0xff]  }
 0x8f7   : > { %14546 = vmatpush1.bf16.msra.mxu1 %v24244_v30  ;;  %v14822_v30 = vrot.slane %v14807_v17, %v26368_v1  ;;  %v24396_v17 = vld [vmem:[%s30624_s4 + $0x1cec] ss:$16 sps:$4 sm:$0xff]  }
 0x8f8   : > { %14547 = vmatprep.subr.bf16.mxu1 %v24249_v3  ;;  %v14836_v3 = vrot.slane %v14808_v48, %v26368_v1  ;;  %v24394_v48 = vld [vmem:[%s30624_s4 + $0x1ce8] ss:$16 sps:$4 sm:$0xff]  }
 0x8fa   : > { %v29442_v2 = vcombine.low %v14822_v30, %v14836_v3  ;;  %v24402_v30 = vld [vmem:[%s30624_s4 + $0x1d2c] ss:$16 sps:$4 sm:$0xff]   ;;  %v24400_v3 = vld [vmem:[%s30624_s4 + $0x1d28] ss:$16 sps:$4 sm:$0xff]  }
 0x8fb   : > { %14548 = vmatpush1.bf16.msra.mxu1 %v24247_v54  ;;  %v24328_v54 = vld [vmem:[%s30624_s4 + $0x1c20] ss:$16 sps:$4 sm:$0xff]  }
 0x8fc   : > { %14549 = vmatprep.subr.bf16.mxu1 %v24252_v0  ;;  %v24333_v0 = vld [vmem:[%s30624_s4 + $0x1c44] ss:$16 sps:$4 sm:$0xff]  }
 0x8ff   : > { %14550 = vmatpush1.bf16.msra.mxu1 %v24250_v27  ;;  %v24331_v27 = vld [vmem:[%s30624_s4 + $0x1c40] ss:$16 sps:$4 sm:$0xff]  }
 0x900   : > { %14551 = vmatprep.subr.bf16.mxu1 %v24255_v51  ;;  %v24334_v51 = vld [vmem:[%s30624_s4 + $0x1c60] ss:$16 sps:$4 sm:$0xff]  }
 0x903   : > { %14552 = vmatpush1.bf16.msra.mxu1 %v24253_v55  ;;  %v24339_v55 = vld [vmem:[%s30624_s4 + $0x1c84] ss:$16 sps:$4 sm:$0xff]  }
 0x904   : > { %14553 = vmatprep.subr.bf16.mxu1 %v24258_v16  ;;  %v24337_v16 = vld [vmem:[%s30624_s4 + $0x1c80] ss:$16 sps:$4 sm:$0xff]  }
 0x907   : > { %14554 = vmatpush1.bf16.msra.mxu1 %v24256_v53  ;;  %v24342_v53 = vld [vmem:[%s30624_s4 + $0x1ca4] ss:$16 sps:$4 sm:$0xff]  }
 0x908   : > { %14555 = vmatprep.subr.bf16.mxu1 %v24261_v45 }
 0x90b   : > { %14556 = vmatpush1.bf16.msra.mxu1 %v24259_v61 }
 0x90c   : > { %14557 = vmatprep.subr.bf16.mxu1 %v24264_v49  ;;  %v24340_v49 = vld [vmem:[%s30624_s4 + $0x1ca0] ss:$16 sps:$4 sm:$0xff]  }
 0x90f   : > { %14558 = vmatpush1.bf16.msra.mxu1 %v24262_v32 }
 0x910   : > { %14559 = vmatprep.subr.bf16.mxu1 %v24267_v29  ;;  %v24345_v29 = vld [vmem:[%s30624_s4 + $0x1cc4] ss:$16 sps:$4 sm:$0xff]  }
 0x913   : > { %14560 = vmatpush1.bf16.msra.mxu1 %v24265_v56 }
 0x914   : > { %14561 = vmatprep.subr.bf16.mxu1 %v24270_v63  ;;  %v24343_v63 = vld [vmem:[%s30624_s4 + $0x1cc0] ss:$16 sps:$4 sm:$0xff]  }
 0x917   : > { %14562 = vmatpush1.bf16.msra.mxu1 %v24268_v23  ;;  %v24348_v23 = vld [vmem:[%s30624_s4 + $0x1ce4] ss:$16 sps:$4 sm:$0xff]  }
 0x918   : > { %14563 = vmatprep.subr.bf16.mxu1 %v24273_v35  ;;  %v24346_v35 = vld [vmem:[%s30624_s4 + $0x1ce0] ss:$16 sps:$4 sm:$0xff]  }
 0x91b   : > { %14564 = vmatpush1.bf16.msra.mxu1 %v24271_v50  ;;  %v24351_v50 = vld [vmem:[%s30624_s4 + $0x1d04] ss:$16 sps:$4 sm:$0xff]  }
 0x91c   : > { %14565 = vmatprep.subr.bf16.mxu1 %v24276_v12  ;;  %v24349_v12 = vld [vmem:[%s30624_s4 + $0x1d00] ss:$16 sps:$4 sm:$0xff]  }
 0x91f   : > { %14566 = vmatpush1.bf16.msra.mxu1 %v24274_v37  ;;  %v24354_v37 = vld [vmem:[%s30624_s4 + $0x1d24] ss:$16 sps:$4 sm:$0xff]  }
 0x920   : > { %14578 = vmatprep.subr.bf16.mxu1 %v24279_v26  ;;  %v24352_v26 = vld [vmem:[%s30624_s4 + $0x1d20] ss:$16 sps:$4 sm:$0xff]  }
 0x922   : > { %14568 = vmatmul.mubr.bf16.vlgmr.msra.gmra.mrb[12].mxu1 %v27050_v22 }
 0x923   : > { %14579 = vmatpush1.bf16.msra.mxu1 %v24277_v24  ;;  %14610 = vmatprep.mubr.bf16.mxu1 %v27039_v59  ;;  %v24286_v59 = vld [vmem:[%s30624_s4 + $0x1a68] ss:$16 sps:$4 sm:$0xff]   ;;  %v24357_v24 = vld [vmem:[%s30624_s4 + $0x1d44] ss:$16 sps:$4 sm:$0xff]  }
 0x924   : > { %14580 = vmatprep.subr.bf16.mxu1 %v24282_v36  ;;  %v24355_v36 = vld [vmem:[%s30624_s4 + $0x1d40] ss:$16 sps:$4 sm:$0xff]  }
 0x927   : > { %14581 = vmatpush1.bf16.msra.mxu1 %v24280_v33  ;;  %v24360_v33 = vld [vmem:[%s30624_s4 + $0x1d64] ss:$16 sps:$4 sm:$0xff]  }
 0x928   : > { %14582 = vmatprep.subr.bf16.mxu1 %v24285_v40  ;;  %v24358_v40 = vld [vmem:[%s30624_s4 + $0x1d60] ss:$16 sps:$4 sm:$0xff]  }
 0x92b   : > { %14583 = vmatpush1.bf16.msra.mxu1 %v24283_v43  ;;  %v24363_v43 = vld [vmem:[%s30624_s4 + $0x1d84] ss:$16 sps:$4 sm:$0xff]  }
 0x92c   : > { %14584 = vmatprep.subr.bf16.mxu1 %v24288_v8  ;;  %v24361_v8 = vld [vmem:[%s30624_s4 + $0x1d80] ss:$16 sps:$4 sm:$0xff]  }
 0x92f   : > { %14585 = vmatpush1.bf16.msra.mxu1 %v24286_v59  ;;  %v24366_v59 = vld [vmem:[%s30624_s4 + $0x1da4] ss:$16 sps:$4 sm:$0xff]  }
 0x930   : > { %14586 = vmatprep.subr.bf16.mxu1 %v24291_v25  ;;  %v24364_v25 = vld [vmem:[%s30624_s4 + $0x1da0] ss:$16 sps:$4 sm:$0xff]  }
 0x933   : > { %14587 = vmatpush1.bf16.msra.mxu1 %v24289_v31  ;;  %v24369_v31 = vld [vmem:[%s30624_s4 + $0x1dc4] ss:$16 sps:$4 sm:$0xff]  }
 0x934   : > { %14588 = vmatprep.subr.bf16.mxu1 %v24294_v14  ;;  %v24367_v14 = vld [vmem:[%s30624_s4 + $0x1dc0] ss:$16 sps:$4 sm:$0xff]  }
 0x937   : > { %14589 = vmatpush1.bf16.msra.mxu1 %v24292_v38  ;;  %v24372_v38 = vld [vmem:[%s30624_s4 + $0x1de4] ss:$16 sps:$4 sm:$0xff]  }
 0x938   : > { %14590 = vmatprep.subr.bf16.mxu1 %v24297_v10  ;;  %v24370_v10 = vld [vmem:[%s30624_s4 + $0x1de0] ss:$16 sps:$4 sm:$0xff]  }
 0x93b   : > { %14591 = vmatpush1.bf16.msra.mxu1 %v24295_v34  ;;  %v24375_v34 = vld [vmem:[%s30624_s4 + $0x1c0c] ss:$16 sps:$4 sm:$0xff]  }
 0x93c   : > { %14592 = vmatprep.subr.bf16.mxu1 %v24300_v19  ;;  %v24373_v19 = vld [vmem:[%s30624_s4 + $0x1c08] ss:$16 sps:$4 sm:$0xff]  }
 0x93f   : > { %14593 = vmatpush1.bf16.msra.mxu1 %v24298_v11  ;;  %v24378_v11 = vld [vmem:[%s30624_s4 + $0x1c2c] ss:$16 sps:$4 sm:$0xff]  }
 0x940   : > { %14594 = vmatprep.subr.bf16.mxu1 %v24303_v58  ;;  %v24376_v58 = vld [vmem:[%s30624_s4 + $0x1c28] ss:$16 sps:$4 sm:$0xff]  }
 0x943   : > { %14595 = vmatpush1.bf16.msra.mxu1 %v24301_v21  ;;  %v24381_v21 = vld [vmem:[%s30624_s4 + $0x1c4c] ss:$16 sps:$4 sm:$0xff]  }
 0x944   : > { %14596 = vmatprep.subr.bf16.mxu1 %v24306_v44  ;;  %v24379_v44 = vld [vmem:[%s30624_s4 + $0x1c48] ss:$16 sps:$4 sm:$0xff]  }
 0x947   : > { %14597 = vmatpush1.bf16.msra.mxu1 %v24304_v52  ;;  %v24384_v52 = vld [vmem:[%s30624_s4 + $0x1c6c] ss:$16 sps:$4 sm:$0xff]  }
 0x948   : > { %14598 = vmatprep.subr.bf16.mxu1 %v24309_v15  ;;  %v24382_v15 = vld [vmem:[%s30624_s4 + $0x1c68] ss:$16 sps:$4 sm:$0xff]  }
 0x94b   : > { %14599 = vmatpush1.bf16.msra.mxu1 %v24307_v18  ;;  %v24387_v18 = vld [vmem:[%s30624_s4 + $0x1c8c] ss:$16 sps:$4 sm:$0xff]  }
 0x94c   : > { %14600 = vmatprep.subr.bf16.mxu1 %v24312_v60  ;;  %v24385_v60 = vld [vmem:[%s30624_s4 + $0x1c88] ss:$16 sps:$4 sm:$0xff]  }
 0x94f   : > { %14601 = vmatpush1.bf16.msra.mxu1 %v24310_v47  ;;  %v24390_v47 = vld [vmem:[%s30624_s4 + $0x1cac] ss:$16 sps:$4 sm:$0xff]  }
 0x950   : > { %14602 = vmatprep.subr.bf16.mxu1 %v24315_v42 }
 0x953   : > { %14603 = vmatpush1.bf16.msra.mxu1 %v24313_v28 }
 0x954   : > { %14604 = vmatprep.subr.bf16.mxu1 %v24318_v7  ;;  %v24388_v7 = vld [vmem:[%s30624_s4 + $0x1ca8] ss:$16 sps:$4 sm:$0xff]  }
 0x957   : > { %14605 = vmatpush1.bf16.msra.mxu1 %v24316_v62 }
 0x958   : > { %14606 = vmatprep.subr.bf16.mxu1 %v24321_v20  ;;  %v24393_v20 = vld [vmem:[%s30624_s4 + $0x1ccc] ss:$16 sps:$4 sm:$0xff]  }
 0x95b   : > { %14607 = vmatpush1.bf16.msra.mxu1 %v24319_v57 }
 0x95c   : > { %14608 = vmatprep.subr.bf16.mxu1 %v24324_v6  ;;  %v24391_v6 = vld [vmem:[%s30624_s4 + $0x1cc8] ss:$16 sps:$4 sm:$0xff]  }
 0x95f   : > { %14609 = vmatpush1.bf16.msra.mxu1 %v24322_v46  ;;  %v24399_v46 = vld [vmem:[%s30624_s4 + $0x1d0c] ss:$16 sps:$4 sm:$0xff]  }
 0x960   : > { %15161 = vmatprep.subr.bf16.mxu1 %v24327_v39  ;;  %v24397_v39 = vld [vmem:[%s30624_s4 + $0x1d08] ss:$16 sps:$4 sm:$0xff]  }
 0x962   : > { %14611 = vmatmul.mubr.bf16.vlgmr.msra.gmra.mrb[8].mxu1 %v27050_v22  ;;  %v24336_v22 = vld [vmem:[%s30624_s4 + $0x1c64] ss:$16 sps:$4 sm:$0xff]  }
 0x963   : > { %15162 = vmatpush1.bf16.msra.mxu1 %v24325_v9  ;;  %15193 = vmatprep.mubr.bf16.mxu1 %v29442_v2  ;;  %v24405_v9 = vld [vmem:[%s30624_s4 + $0x1d4c] ss:$16 sps:$4 sm:$0xff]  }
 0x964   : > { %15163 = vmatprep.subr.bf16.mxu1 %v24330_v4  ;;  %v24403_v4 = vld [vmem:[%s30624_s4 + $0x1d48] ss:$16 sps:$4 sm:$0xff]  }
 0x967   : > { %15164 = vmatpush1.bf16.msra.mxu1 %v24328_v54  ;;  %v24406_v54 = vld [vmem:[%s30624_s4 + $0x1d68] ss:$16 sps:$4 sm:$0xff]  }
 0x968   : > { %15165 = vmatprep.subr.bf16.mxu1 %v24333_v0  ;;  %v24411_v0 = vld [vmem:[%s30624_s4 + $0x1d8c] ss:$16 sps:$4 sm:$0xff]  }
 0x96b   : > { %15166 = vmatpush1.bf16.msra.mxu1 %v24331_v27  ;;  %v24409_v27 = vld [vmem:[%s30624_s4 + $0x1d88] ss:$16 sps:$4 sm:$0xff]  }
 0x96c   : > { %15167 = vmatprep.subr.bf16.mxu1 %v24336_v22  ;;  %v24414_v22 = vld [vmem:[%s30624_s4 + $0x1dac] ss:$16 sps:$4 sm:$0xff]  }
 0x96f   : > { %15168 = vmatpush1.bf16.msra.mxu1 %v24334_v51  ;;  %v24412_v51 = vld [vmem:[%s30624_s4 + $0x1da8] ss:$16 sps:$4 sm:$0xff]  }
 0x970   : > { %15169 = vmatprep.subr.bf16.mxu1 %v24339_v55  ;;  %v24417_v55 = vld [vmem:[%s30624_s4 + $0x1dcc] ss:$16 sps:$4 sm:$0xff]  }
 0x972   : > { %v29470_v45 = vpop.f32.mrb[48].mxu0 }
 0x973   : > { %15170 = vmatpush1.bf16.msra.mxu1 %v24337_v16  ;;  %v29472_v61 = vpop.f32.mrb[49].mxu0  ;;  %v24415_v16 = vld [vmem:[%s30624_s4 + $0x1dc8] ss:$16 sps:$4 sm:$0xff]  }
 0x974   : > { %v29477_v32 = vpop.f32.mrb[50].mxu0  ;;  %15171 = vmatprep.subr.bf16.mxu1 %v24342_v53  ;;  %v24420_v53 = vld [vmem:[%s30624_s4 + $0x1dec] ss:$16 sps:$4 sm:$0xff]  }
 0x975   : > { %v29482_v56 = vpop.f32.mrb[51].mxu0 }
 0x977   : > { %15172 = vmatpush1.bf16.msra.mxu1 %v24340_v49  ;;  %v24418_v49 = vld [vmem:[%s30624_s4 + $0x1de8] ss:$16 sps:$4 sm:$0xff]  }
 0x978   : > { %15173 = vmatprep.subr.bf16.mxu1 %v24345_v29  ;;  %v24423_v29 = vld [vmem:[%s30624_s4 + $0x1e04] ss:$16 sps:$4 sm:$0xff]  }
 0x97b   : > { %15174 = vmatpush1.bf16.msra.mxu1 %v24343_v63  ;;  %v24421_v63 = vld [vmem:[%s30624_s4 + $0x1e00] ss:$16 sps:$4 sm:$0xff]  }
 0x97c   : > { %15175 = vmatprep.subr.bf16.mxu1 %v24348_v23  ;;  %v24426_v23 = vld [vmem:[%s30624_s4 + $0x1e24] ss:$16 sps:$4 sm:$0xff]  }
 0x97f   : > { %15176 = vmatpush1.bf16.msra.mxu1 %v24346_v35  ;;  %v24424_v35 = vld [vmem:[%s30624_s4 + $0x1e20] ss:$16 sps:$4 sm:$0xff]  }
 0x980   : > { %15177 = vmatprep.subr.bf16.mxu1 %v24351_v50  ;;  %v24429_v50 = vld [vmem:[%s30624_s4 + $0x1e44] ss:$16 sps:$4 sm:$0xff]  }
 0x983   : > { %15178 = vmatpush1.bf16.msra.mxu1 %v24349_v12  ;;  %v24427_v12 = vld [vmem:[%s30624_s4 + $0x1e40] ss:$16 sps:$4 sm:$0xff]  }
 0x984   : > { %15179 = vmatprep.subr.bf16.mxu1 %v24354_v37  ;;  %v24430_v37 = vld [vmem:[%s30624_s4 + $0x1e60] ss:$16 sps:$4 sm:$0xff]  }
 0x987   : > { %15180 = vmatpush1.bf16.msra.mxu1 %v24352_v26  ;;  %v24435_v26 = vld [vmem:[%s30624_s4 + $0x1e84] ss:$16 sps:$4 sm:$0xff]  }
 0x988   : > { %15181 = vmatprep.subr.bf16.mxu1 %v24357_v24  ;;  %v24433_v24 = vld [vmem:[%s30624_s4 + $0x1e80] ss:$16 sps:$4 sm:$0xff]  }
 0x98b   : > { %15182 = vmatpush1.bf16.msra.mxu1 %v24355_v36  ;;  %v24438_v36 = vld [vmem:[%s30624_s4 + $0x1ea4] ss:$16 sps:$4 sm:$0xff]  }
 0x98c   : > { %15183 = vmatprep.subr.bf16.mxu1 %v24360_v33  ;;  %v24436_v33 = vld [vmem:[%s30624_s4 + $0x1ea0] ss:$16 sps:$4 sm:$0xff]  }
 0x98f   : > { %15184 = vmatpush1.bf16.msra.mxu1 %v24358_v40  ;;  %v24441_v40 = vld [vmem:[%s30624_s4 + $0x1ec4] ss:$16 sps:$4 sm:$0xff]  }
 0x990   : > { %15185 = vmatprep.subr.bf16.mxu1 %v24363_v43  ;;  %v24439_v43 = vld [vmem:[%s30624_s4 + $0x1ec0] ss:$16 sps:$4 sm:$0xff]  }
 0x993   : > { %15186 = vmatpush1.bf16.msra.mxu1 %v24361_v8  ;;  %v24444_v8 = vld [vmem:[%s30624_s4 + $0x1ee4] ss:$16 sps:$4 sm:$0xff]  }
 0x994   : > { %15187 = vmatprep.subr.bf16.mxu1 %v24366_v59  ;;  %v24442_v59 = vld [vmem:[%s30624_s4 + $0x1ee0] ss:$16 sps:$4 sm:$0xff]  }
 0x997   : > { %15188 = vmatpush1.bf16.msra.mxu1 %v24364_v25  ;;  %v24447_v25 = vld [vmem:[%s30624_s4 + $0x1f04] ss:$16 sps:$4 sm:$0xff]  }
 0x998   : > { %15189 = vmatprep.subr.bf16.mxu1 %v24369_v31  ;;  %v24445_v31 = vld [vmem:[%s30624_s4 + $0x1f00] ss:$16 sps:$4 sm:$0xff]  }
 0x99b   : > { %15190 = vmatpush1.bf16.msra.mxu1 %v24367_v14  ;;  %v24450_v14 = vld [vmem:[%s30624_s4 + $0x1f24] ss:$16 sps:$4 sm:$0xff]  }
 0x99c   : > { %15191 = vmatprep.subr.bf16.mxu1 %v24372_v38  ;;  %v24448_v38 = vld [vmem:[%s30624_s4 + $0x1f20] ss:$16 sps:$4 sm:$0xff]  }
 0x99f   : > { %15192 = vmatpush1.bf16.msra.mxu1 %v24370_v10  ;;  %v24453_v10 = vld [vmem:[%s30624_s4 + $0x1f44] ss:$16 sps:$4 sm:$0xff]  }
 0x9a0   : > { %15204 = vmatprep.subr.bf16.mxu1 %v24375_v34  ;;  %v24451_v34 = vld [vmem:[%s30624_s4 + $0x1f40] ss:$16 sps:$4 sm:$0xff]  }
 0x9a2   : > { %15194 = vmatmul.mubr.bf16.vlgmr.msra.gmra.mrb[12].mxu1 %v27081_v5 }
 0x9a3   : > { %15205 = vmatpush1.bf16.msra.mxu1 %v24373_v19  ;;  %15236 = vmatprep.mubr.bf16.mxu1 %v29442_v2  ;;  %v24408_v2 = vld [vmem:[%s30624_s4 + $0x1d6c] ss:$16 sps:$4 sm:$0xff]   ;;  %v24456_v19 = vld [vmem:[%s30624_s4 + $0x1f64] ss:$16 sps:$4 sm:$0xff]  }
 0x9a4   : > { %15206 = vmatprep.subr.bf16.mxu1 %v24378_v11  ;;  %v24454_v11 = vld [vmem:[%s30624_s4 + $0x1f60] ss:$16 sps:$4 sm:$0xff]  }
 0x9a7   : > { %15207 = vmatpush1.bf16.msra.mxu1 %v24376_v58  ;;  %v24459_v58 = vld [vmem:[%s30624_s4 + $0x1f84] ss:$16 sps:$4 sm:$0xff]  }
 0x9a8   : > { %15208 = vmatprep.subr.bf16.mxu1 %v24381_v21  ;;  %v24457_v21 = vld [vmem:[%s30624_s4 + $0x1f80] ss:$16 sps:$4 sm:$0xff]  }
 0x9ab   : > { %15209 = vmatpush1.bf16.msra.mxu1 %v24379_v44  ;;  %v24462_v44 = vld [vmem:[%s30624_s4 + $0x1fa4] ss:$16 sps:$4 sm:$0xff]  }
 0x9ac   : > { %15210 = vmatprep.subr.bf16.mxu1 %v24384_v52  ;;  %v24460_v52 = vld [vmem:[%s30624_s4 + $0x1fa0] ss:$16 sps:$4 sm:$0xff]  }
 0x9af   : > { %15211 = vmatpush1.bf16.msra.mxu1 %v24382_v15  ;;  %v24465_v15 = vld [vmem:[%s30624_s4 + $0x1fc4] ss:$16 sps:$4 sm:$0xff]  }
 0x9b0   : > { %15212 = vmatprep.subr.bf16.mxu1 %v24387_v18  ;;  %v24463_v18 = vld [vmem:[%s30624_s4 + $0x1fc0] ss:$16 sps:$4 sm:$0xff]  }
 0x9b2   : > { %v29576_v42 = vpop.f32.mrb[44].mxu0 }
 0x9b3   : > { %15213 = vmatpush1.bf16.msra.mxu1 %v24385_v60  ;;  %v29578_v28 = vpop.f32.mrb[45].mxu0  ;;  %v24468_v60 = vld [vmem:[%s30624_s4 + $0x1fe4] ss:$16 sps:$4 sm:$0xff]  }
 0x9b4   : > { %v29583_v62 = vpop.f32.mrb[46].mxu0  ;;  %15214 = vmatprep.subr.bf16.mxu1 %v24390_v47  ;;  %v24466_v47 = vld [vmem:[%s30624_s4 + $0x1fe0] ss:$16 sps:$4 sm:$0xff]  }
 0x9b5   : > { %v29588_v57 = vpop.f32.mrb[47].mxu0 }
 0x9b7   : > { %15215 = vmatpush1.bf16.msra.mxu1 %v24388_v7  ;;  %v24471_v7 = vld [vmem:[%s30624_s4 + $0x1e0c] ss:$16 sps:$4 sm:$0xff]  }
 0x9b8   : > { %15216 = vmatprep.subr.bf16.mxu1 %v24393_v20  ;;  %v24469_v20 = vld [vmem:[%s30624_s4 + $0x1e08] ss:$16 sps:$4 sm:$0xff]  }
 0x9bb   : > { %15217 = vmatpush1.bf16.msra.mxu1 %v24391_v6  ;;  %v24474_v6 = vld [vmem:[%s30624_s4 + $0x1e2c] ss:$16 sps:$4 sm:$0xff]  }
 0x9bc   : > { %15218 = vmatprep.subr.bf16.mxu1 %v24396_v17  ;;  %v24472_v17 = vld [vmem:[%s30624_s4 + $0x1e28] ss:$16 sps:$4 sm:$0xff]  }
 0x9bf   : > { %15219 = vmatpush1.bf16.msra.mxu1 %v24394_v48  ;;  %v24477_v48 = vld [vmem:[%s30624_s4 + $0x1e4c] ss:$16 sps:$4 sm:$0xff]  }
 0x9c0   : > { %15220 = vmatprep.subr.bf16.mxu1 %v24399_v46  ;;  %v24475_v46 = vld [vmem:[%s30624_s4 + $0x1e48] ss:$16 sps:$4 sm:$0xff]  }
 0x9c3   : > { %15221 = vmatpush1.bf16.msra.mxu1 %v24397_v39  ;;  %v24480_v39 = vld [vmem:[%s30624_s4 + $0x1e6c] ss:$16 sps:$4 sm:$0xff]  }
 0x9c4   : > { %15222 = vmatprep.subr.bf16.mxu1 %v24402_v30  ;;  %v24483_v30 = vld [vmem:[%s30624_s4 + $0x1e8c] ss:$16 sps:$4 sm:$0xff]  }
 0x9c7   : > { %15223 = vmatpush1.bf16.msra.mxu1 %v24400_v3  ;;  %v24481_v3 = vld [vmem:[%s30624_s4 + $0x1e88] ss:$16 sps:$4 sm:$0xff]  }
 0x9c8   : > { %15224 = vmatprep.subr.bf16.mxu1 %v24405_v9  ;;  %v24486_v9 = vld [vmem:[%s30624_s4 + $0x1eac] ss:$16 sps:$4 sm:$0xff]  }
 0x9cb   : > { %15225 = vmatpush1.bf16.msra.mxu1 %v24403_v4  ;;  %v24484_v4 = vld [vmem:[%s30624_s4 + $0x1ea8] ss:$16 sps:$4 sm:$0xff]  }
 0x9cc   : > { %15226 = vmatprep.subr.bf16.mxu1 %v24408_v2  ;;  %v24489_v2 = vld [vmem:[%s30624_s4 + $0x1ecc] ss:$16 sps:$4 sm:$0xff]  }
 0x9cf   : > { %15227 = vmatpush1.bf16.msra.mxu1 %v24406_v54  ;;  %v24487_v54 = vld [vmem:[%s30624_s4 + $0x1ec8] ss:$16 sps:$4 sm:$0xff]  }
 0x9d0   : > { %15228 = vmatprep.subr.bf16.mxu1 %v24411_v0  ;;  %v24492_v0 = vld [vmem:[%s30624_s4 + $0x1eec] ss:$16 sps:$4 sm:$0xff]  }
 0x9d3   : > { %15229 = vmatpush1.bf16.msra.mxu1 %v24409_v27  ;;  %v24490_v27 = vld [vmem:[%s30624_s4 + $0x1ee8] ss:$16 sps:$4 sm:$0xff]  }
 0x9d4   : > { %15230 = vmatprep.subr.bf16.mxu1 %v24414_v22  ;;  %v24495_v22 = vld [vmem:[%s30624_s4 + $0x1f0c] ss:$16 sps:$4 sm:$0xff]  }
 0x9d7   : > { %15231 = vmatpush1.bf16.msra.mxu1 %v24412_v51  ;;  %v24493_v51 = vld [vmem:[%s30624_s4 + $0x1f08] ss:$16 sps:$4 sm:$0xff]  }
 0x9d8   : > { %15232 = vmatprep.subr.bf16.mxu1 %v24417_v55  ;;  %v24498_v55 = vld [vmem:[%s30624_s4 + $0x1f2c] ss:$16 sps:$4 sm:$0xff]  }
 0x9db   : > { %15233 = vmatpush1.bf16.msra.mxu1 %v24415_v16  ;;  %v24496_v16 = vld [vmem:[%s30624_s4 + $0x1f28] ss:$16 sps:$4 sm:$0xff]  }
 0x9dc   : > { %15234 = vmatprep.subr.bf16.mxu1 %v24420_v53  ;;  %v24501_v53 = vld [vmem:[%s30624_s4 + $0x1f4c] ss:$16 sps:$4 sm:$0xff]  }
 0x9df   : > { %15235 = vmatpush1.bf16.msra.mxu1 %v24418_v49  ;;  %v24499_v49 = vld [vmem:[%s30624_s4 + $0x1f48] ss:$16 sps:$4 sm:$0xff]  }
 0x9e0   : > { %15787 = vmatprep.subr.bf16.mxu1 %v24423_v29  ;;  %v24504_v29 = vld [vmem:[%s30624_s4 + $0x1f6c] ss:$16 sps:$4 sm:$0xff]  }
 0x9e2   : > { %15237 = vmatmul.mubr.bf16.vlgmr.msra.gmra.mrb[8].mxu1 %v27081_v5  ;;  %v24432_v5 = vld [vmem:[%s30624_s4 + $0x1e64] ss:$16 sps:$4 sm:$0xff]  }
 0x9e3   : > { %15788 = vmatpush1.bf16.msra.mxu1 %v24421_v63  ;;  %15819 = vmatprep.mubr.bf16.mxu1 %v27094_v41  ;;  %v24502_v63 = vld [vmem:[%s30624_s4 + $0x1f68] ss:$16 sps:$4 sm:$0xff]  }
 0x9e4   : > { %15789 = vmatprep.subr.bf16.mxu1 %v24426_v23  ;;  %v24507_v23 = vld [vmem:[%s30624_s4 + $0x1f8c] ss:$16 sps:$4 sm:$0xff]  }
 0x9e7   : > { %15790 = vmatpush1.bf16.msra.mxu1 %v24424_v35  ;;  %v24505_v35 = vld [vmem:[%s30624_s4 + $0x1f88] ss:$16 sps:$4 sm:$0xff]  }
 0x9e8   : > { %15791 = vmatprep.subr.bf16.mxu1 %v24429_v50  ;;  %v24510_v50 = vld [vmem:[%s30624_s4 + $0x1fac] ss:$16 sps:$4 sm:$0xff]  }
 0x9eb   : > { %15792 = vmatpush1.bf16.msra.mxu1 %v24427_v12  ;;  %v24508_v12 = vld [vmem:[%s30624_s4 + $0x1fa8] ss:$16 sps:$4 sm:$0xff]  }
 0x9ec   : > { %15793 = vmatprep.subr.bf16.mxu1 %v24432_v5  ;;  %v24513_v5 = vld [vmem:[%s30624_s4 + $0x1fcc] ss:$16 sps:$4 sm:$0xff]  }
 0x9ef   : > { %15794 = vmatpush1.bf16.msra.mxu1 %v24430_v37  ;;  %v24511_v37 = vld [vmem:[%s30624_s4 + $0x1fc8] ss:$16 sps:$4 sm:$0xff]  }
 0x9f0   : > { %15795 = vmatprep.subr.bf16.mxu1 %v24435_v26  ;;  %v24516_v26 = vld [vmem:[%s30624_s4 + $0x1fec] ss:$16 sps:$4 sm:$0xff]  }
 0x9f3   : > { %15796 = vmatpush1.bf16.msra.mxu1 %v24433_v24  ;;  %v24514_v24 = vld [vmem:[%s30624_s4 + $0x1fe8] ss:$16 sps:$4 sm:$0xff]  }
 0x9f4   : > { %15797 = vmatprep.subr.bf16.mxu1 %v24438_v36  ;;  %v535_v36 = vld [vmem:[#allocation5 + $0x10] sm:$0x77] }
 0x9f7   : > { %15798 = vmatpush1.bf16.msra.mxu1 %v24436_v33  ;;  %v538_v33 = vld [vmem:[#allocation5 + $0x18] sm:$0x77] }
 0x9f8   : > { %15799 = vmatprep.subr.bf16.mxu1 %v24441_v40 }
 0x9fb   : > { %15800 = vmatpush1.bf16.msra.mxu1 %v24439_v43  ;;  %v536_v43 = vsel %vm26220_vm2, 0, %v535_v36 }
 0x9fc   : > { %15801 = vmatprep.subr.bf16.mxu1 %v24444_v8  ;;  %v539_v8 = vsel %vm26220_vm2, 0, %v538_v33  ;;  %537 = vst [vmem:[#allocation5 + $0x10] sm:$0x77] %v536_v43  ;;  %v21603_v33 = vld [vmem:[%s30645_s5 + $0x2] ss:$8 sm:$0xf] }
 0x9fd   : > { %540 = vst [vmem:[#allocation5 + $0x18] sm:$0x77] %v539_v8 }
 0x9ff   : > { %15802 = vmatpush1.bf16.msra.mxu1 %v24442_v59  ;;  %v541_v59 = vld [vmem:[#allocation5 + $0x20] sm:$0x77] }
 0xa00   : > { %15803 = vmatprep.subr.bf16.mxu1 %v24447_v25  ;;  %v544_v25 = vld [vmem:[#allocation5 + $0x28] sm:$0x77] }
 0xa03   : > { %15804 = vmatpush1.bf16.msra.mxu1 %v24445_v31  ;;  %v542_v31 = vsel %vm26220_vm2, 0, %v541_v59 }
 0xa04   : > { %15805 = vmatprep.subr.bf16.mxu1 %v24450_v14  ;;  %v545_v14 = vsel %vm26220_vm2, 0, %v544_v25  ;;  %543 = vst [vmem:[#allocation5 + $0x20] sm:$0x77] %v542_v31 }
 0xa05   : > { %546 = vst [vmem:[#allocation5 + $0x28] sm:$0x77] %v545_v14 }
 0xa07   : > { %15806 = vmatpush1.bf16.msra.mxu1 %v24448_v38  ;;  %v550_v38 = vld [vmem:[#allocation5 + $0x38] sm:$0x77] }
 0xa08   : > { %15807 = vmatprep.subr.bf16.mxu1 %v24453_v10 }
 0xa0b   : > { %15808 = vmatpush1.bf16.msra.mxu1 %v24451_v34  ;;  %v551_v34 = vsel %vm26220_vm2, 0, %v550_v38  ;;  %v21600_v38 = vld.sshfl [vmem:[#allocation5 + $0x8] sm:$0x50 pattern:$0x75316420] }
 0xa0c   : > { %15809 = vmatprep.subr.bf16.mxu1 %v24456_v19  ;;  %552 = vst [vmem:[#allocation5 + $0x38] sm:$0x77] %v551_v34 }
 0xa0f   : > { %15810 = vmatpush1.bf16.msra.mxu1 %v24454_v11 }
 0xa10   : > { %15811 = vmatprep.subr.bf16.mxu1 %v24459_v58 }
 0xa13   : > { %15812 = vmatpush1.bf16.msra.mxu1 %v24457_v21 }
 0xa14   : > { %15813 = vmatprep.subr.bf16.mxu1 %v24462_v44 }
 0xa17   : > { %15814 = vmatpush1.bf16.msra.mxu1 %v24460_v52 }
 0xa18   : > { %15815 = vmatprep.subr.bf16.mxu1 %v24465_v15 }
 0xa1b   : > { %15816 = vmatpush1.bf16.msra.mxu1 %v24463_v18 }
 0xa1c   : > { %15817 = vmatprep.subr.bf16.mxu1 %v24468_v60 }
 0xa1f   : > { %15818 = vmatpush1.bf16.msra.mxu1 %v24466_v47 }
 0xa20   : > { %15830 = vmatprep.subr.bf16.mxu1 %v24471_v7 }
 0xa22   : > { %15820 = vmatmul.mubr.bf16.vlgmr.msra.gmra.mrb[12].mxu1 %v27096_v13 }
 0xa23   : > { %15831 = vmatpush1.bf16.msra.mxu1 %v24469_v20  ;;  %15862 = vmatprep.mubr.bf16.mxu1 %v27094_v41  ;;  %v24478_v41 = vld [vmem:[%s30624_s4 + $0x1e68] ss:$16 sps:$4 sm:$0xff]  }
 0xa24   : > { %15832 = vmatprep.subr.bf16.mxu1 %v24474_v6 }
 0xa27   : > { %15833 = vmatpush1.bf16.msra.mxu1 %v24472_v17 }
 0xa28   : > { %15834 = vmatprep.subr.bf16.mxu1 %v24477_v48 }
 0xa2b   : > { %15835 = vmatpush1.bf16.msra.mxu1 %v24475_v46  ;;  %v16393_v46 = vld [vmem:[%s30645_s5] ss:$8 sm:$0xf] }
 0xa2c   : > { %15836 = vmatprep.subr.bf16.mxu1 %v24480_v39  ;;  %v30646_v39 = vld [vmem:[#allocation15_spill] sm:$0xff] }
 0xa2f   : > { %15837 = vmatpush1.bf16.msra.mxu1 %v24478_v41  ;;  %v29878_v41 = vsub.s32 0, %v30646_v39 }
 0xa30   : > { %15838 = vmatprep.subr.bf16.mxu1 %v24483_v30  ;;  %v29881_v30 = vsub.s32 1, %v30646_v39 }
 0xa32   : > { %v16649_v34 = vrot.slane %v21603_v33, %v29881_v30 }
 0xa33   : > { %15839 = vmatpush1.bf16.msra.mxu1 %v24481_v3  ;;  %v29884_v3 = vsub.s32 2, %v30646_v39 }
 0xa34   : > { %15840 = vmatprep.subr.bf16.mxu1 %v24486_v9  ;;  %v29887_v9 = vsub.s32 3, %v30646_v39 }
 0xa37   : > { %15841 = vmatpush1.bf16.msra.mxu1 %v24484_v4  ;;  %v21592_v4 = vld.sshfl [vmem:[#allocation5] sm:$0x55 pattern:$0x75316420] }
 0xa38   : > { %15842 = vmatprep.subr.bf16.mxu1 %v24489_v2  ;;  %v24648_v2 = vmov 1983009808  }
 0xa3b   : > { %15843 = vmatpush1.bf16.msra.mxu1 %v24487_v54  ;;  %v16414_v54 = vunpack.c.l.s4 %v24648_v2 }
 0xa3c   : > { %15844 = vmatprep.subr.bf16.mxu1 %v24492_v0  ;;  %v21593_v0 = vld.sshfl [vmem:[#allocation5 + $0x8] sm:$0x55 pattern:$0x75316420] }
 0xa3f   : > { %15845 = vmatpush1.bf16.msra.mxu1 %v24490_v27  ;;  %v21598_v27 = vld [vmem:[%s30645_s5 + $0x1] ss:$8 sm:$0xf] }
 0xa40   : > { %15846 = vmatprep.subr.bf16.mxu1 %v24495_v22  ;;  %v21588_v22 = vld.sshfl [vmem:[#allocation5] sm:$0x5 pattern:$0x75316420] }
 0xa43   : > { %15847 = vmatpush1.bf16.msra.mxu1 %v24493_v51  ;;  %v16398_v51 = vrot.slane %v16393_v46, %v29878_v41 }
 0xa44   : > { %15848 = vmatprep.subr.bf16.mxu1 %v24498_v55  ;;  %v16457_v55 = vcombine.low %v21592_v4, %v21593_v0 }
 0xa47   : > { %15849 = vmatpush1.bf16.msra.mxu1 %v24496_v16  ;;  %v16458_v16 = vcombine.high %v21592_v4, %v21593_v0 }
 0xa48   : > { %15850 = vmatprep.subr.bf16.mxu1 %v24501_v53  ;;  %v21604_v53 = vld.sshfl [vmem:[#allocation5] sm:$0x5a pattern:$0x75316420] }
 0xa49   : > { %v16472_v36 = vrot.slane %v16458_v16, %v26368_v1 }
 0xa4b   : > { %15851 = vmatpush1.bf16.msra.mxu1 %v24499_v49  ;;  %v16402_v49 = vrot.slane %v16393_v46, %v29881_v30 }
 0xa4c   : > { %15852 = vmatprep.subr.bf16.mxu1 %v24504_v29  ;;  %v16406_v29 = vrot.slane %v16393_v46, %v29884_v3 }
 0xa4d   : > { %v16411_v8 = vcombine.low %v16398_v51, %v16402_v49  ;;  %v24649_v49 = vmov 1935823168  }
 0xa4f   : > { %15853 = vmatpush1.bf16.msra.mxu1 %v24502_v63  ;;  %v16410_v63 = vrot.slane %v16393_v46, %v29887_v9 }
 0xa50   : > { %15854 = vmatprep.subr.bf16.mxu1 %v24507_v23  ;;  %v16415_v23 = vunpack.c.0.s8 %v16414_v54 }
 0xa51   : > { %v16412_v59 = vcombine.low %v16406_v29, %v16410_v63  ;;  %v16007_v29 = vunpack.c.l.s4 %v24649_v49 }
 0xa52   : > { %v29906_v25 = vsub.s32 %v16415_v23, %v30646_v39 }
 0xa53   : > { %15855 = vmatpush1.bf16.msra.mxu1 %v24505_v35  ;;  %v21605_v35 = vld.sshfl [vmem:[#allocation5 + $0x8] sm:$0x5a pattern:$0x75316420] }
 0xa54   : > { %15856 = vmatprep.subr.bf16.mxu1 %v24510_v50  ;;  %v21589_v50 = vld.sshfl [vmem:[#allocation5 + $0x8] sm:$0x5 pattern:$0x75316420]  ;;  %v16704_v40 = vcombine.low %v21604_v53, %v21605_v35 }
 0xa55   : > { %v16359_v43 = vcombine.low %v21588_v22, %v21589_v50 }
 0xa57   : > { %15857 = vmatpush1.bf16.msra.mxu1 %v24508_v12  ;;  %v16546_v12 = vrot.slane %v21598_v27, %v29878_v41 }
 0xa58   : > { %15858 = vmatprep.subr.bf16.mxu1 %v24513_v5  ;;  %v16550_v5 = vrot.slane %v21598_v27, %v29881_v30 }
 0xa5a   : > { %v16559_v31 = vcombine.low %v16546_v12, %v16550_v5 }
 0xa5b   : > { %15859 = vmatpush1.bf16.msra.mxu1 %v24511_v37  ;;  %v16554_v37 = vrot.slane %v21598_v27, %v29884_v3 }
 0xa5c   : > { %15860 = vmatprep.subr.bf16.mxu1 %v24516_v26  ;;  %v16558_v26 = vrot.slane %v21598_v27, %v29887_v9  ;;  %v29928_v46 = vrot.slane %v16559_v31, %v29906_v25 }
 0xa5e   : > { %v16560_v14 = vcombine.low %v16554_v37, %v16558_v26 }
 0xa5f   : > { %15861 = vmatpush1.bf16.msra.mxu1 %v24514_v24  ;;  %v16465_v24 = vrot.slane %v16457_v55, %v26368_v1 }
 0xa60   : > { %v29931_v4 = vrot.slane %v16560_v14, %v29906_v25 }
 0xa62   : > { %15863 = vmatmul.mubr.bf16.vlgmr.msra.gmra.mrb[8].mxu1 %v27096_v13  ;;  %v547_v13 = vld [vmem:[#allocation5 + $0x30] sm:$0x77]  ;;  %v16575_v12 = vcombine.low %v29928_v46, %v29931_v4 }
 0xa63   : > { %v548_v10 = vsel %vm26220_vm2, 0, %v547_v13  ;;  %vm16505_vm2 = vmor %vm16503_vm15, %vm16504_vm1  ;;  %v21599_v13 = vld.sshfl [vmem:[#allocation5] sm:$0x50 pattern:$0x75316420] }
 0xa64   : > { %549 = vst [vmem:[#allocation5 + $0x30] sm:$0x77] %v548_v10  ;;  %vm16507_vm0 = vmor %vm16505_vm2, %vm16506_vm3  ;;  %v16645_v10 = vrot.slane %v21603_v33, %v29878_v41  ;;  %vm16312_vm3 = vcmask 1041408  }
 0xa65   : > { %vm16509_vm5 = vmor %vm16507_vm0, %vm16508_vm4  ;;  %vm16313_vm0 = vsmask.f32 7938  ;;  %vm16315_vm4 = vcmask 1045508  }
 0xa66   : > { %vm16511_vm7 = vmor %vm16509_vm5, %vm16510_vm6  ;;  %v16658_v2 = vcombine.low %v16645_v10, %v16649_v34  ;;  %v21622_v34 = vld [vmem:[%s30645_s5 + $0x5] ss:$8 sm:$0xf]  ;;  %vm16316_vm5 = vsmask.f32 7954 }
 0xa67   : > { %vm16513_vm9 = vmor %vm16511_vm7, %vm16512_vm8 }
 0xa68   : > { %v29946_v5 = vrot.slane %v16658_v2, %v29906_v25  ;;  %v17012_v2 = vrot.slane %v21622_v34, %v29878_v41  ;;  %vm30181_vm6 = vmand %vm16312_vm3, %vm16313_vm0 }
 0xa69   : > { %vm30187_vm7 = vmand %vm16315_vm4, %vm16316_vm5 }
 0xa6a   : > { %vm30201_vm8 = vmor %vm30187_vm7, %vm30181_vm6 }
 0xaf5   : > { %v15821_v19 = vpop.f32.mrb[12].mxu1 }
 0xaf6   : > { %v22162_v11 = vadd.f32 %v15821_v19, %v29576_v42  ;;  %v15823_v58 = vpop.f32.mrb[13].mxu1  ;;  %v16653_v19 = vrot.slane %v21603_v33, %v29884_v3 }
 0xaf7   : > { %v22163_v21 = vadd.f32 %v15823_v58, %v29578_v28  ;;  %v15825_v44 = vpop.f32.mrb[14].mxu1  ;;  %v16519_v58 = vshrl.u32 %v16465_v24, 16 }
 0xaf8   : > { %vm15881_vm11 = vcmp.ge.f32.partialorder %v22162_v11, 0.0  ;;  %v15889_v52 = vmul.f32 0.2, %v22162_v11  ;;  %v22164_v15 = vadd.f32 %v15825_v44, %v29583_v62  ;;  %v15827_v18 = vpop.f32.mrb[15].mxu1  ;;  %v16705_v44 = vcombine.high %v21604_v53, %v21605_v35 }
 0xaf9   : > { %vm15882_vm12 = vcmp.ge.f32.partialorder %v22163_v21, 0.0  ;;  %v15890_v60 = vmul.f32 0.2, %v22163_v21  ;;  %v22165_v47 = vadd.f32 %v15827_v18, %v29588_v57  ;;  %v16366_v18 = vrot.slane %v16359_v43, %v26368_v1 }
 0xafa   : > { %v29860_v7 = vsel %vm15881_vm11, %v22162_v11, %v15889_v52  ;;  %vm15885_vm13 = vcmp.ge.f32.partialorder %v22164_v15, 0.0  ;;  %v15893_v20 = vmul.f32 0.2, %v22164_v15  ;;  %vm16515_vm11 = vmor %vm16513_vm9, %vm16514_vm10  ;;  %v16657_v11 = vrot.slane %v21603_v33, %v29887_v9 }
 0xafb   : > { %v29862_v6 = vsel %vm15882_vm12, %v22163_v21, %v15890_v60  ;;  %vm15886_vm14 = vcmp.ge.f32.partialorder %v22165_v47, 0.0  ;;  %v15894_v42 = vmul.f32 0.2, %v22165_v47  ;;  %vm16516_vm12 = vsmask.f32 7452 }
 0xafc   : > { %v15913_v28 = vcombine.low %v29860_v7, %v29862_v6  ;;  %v15914_v17 = vcombine.high %v29860_v7, %v29862_v6  ;;  %v29868_v62 = vsel %vm15885_vm13, %v22164_v15, %v15893_v20  ;;  %v16524_v21 = vshll.u32 %v16472_v36, 16  ;;  %vm29913_vm13 = vmor %vm16515_vm11, %vm16516_vm12 }
 0xafd   : > { %v29870_v48 = vsel %vm15886_vm14, %v22165_v47, %v15894_v42  ;;  %v16712_v52 = vrot.slane %v16704_v40, %v26368_v1  ;;  %v29919_v60 = vrot.slane %v16411_v8, %v29906_v25  ;;  %v29922_v47 = vrot.slane %v16412_v59, %v29906_v25  ;;  %v21610_v42 = vld [vmem:[%s30645_s5 + $0x3] ss:$8 sm:$0xf] }
 0xafe   : > { %v15981_v57 = vcombine.low %v29868_v62, %v29870_v48  ;;  %v16605_v20 = vcombine.high %v21599_v13, %v21600_v38  ;;  %v16659_v54 = vcombine.low %v16653_v19, %v16657_v11  ;;  %v16526_v0 = vsel %vm29913_vm13, %v16519_v58, %v16524_v21  ;;  %v21615_v13 = vld [vmem:[%s30645_s5 + $0x4] ss:$8 sm:$0xf] }
 0xaff   : > { %v16719_v27 = vrot.slane %v16705_v44, %v26368_v1  ;;  %v16720_v22 = vcombine.high %v16712_v52, %v16712_v52  ;;  %v16780_v51 = vrot.slane %v21610_v42, %v29878_v41  ;;  %v16784_v55 = vrot.slane %v21610_v42, %v29881_v30  ;;  %v21627_v52 = vld [vmem:[%s30645_s5 + $0x6] ss:$8 sm:$0xf] }
 0xb00   : > { %v16788_v16 = vrot.slane %v21610_v42, %v29884_v3  ;;  %v16792_v53 = vrot.slane %v21610_v42, %v29887_v9  ;;  %v16391_v63 = vunpack.c.l.bf16 %v16366_v18  ;;  %v16427_v23 = vcombine.low %v29919_v60, %v29922_v47 }
 0xb01   : > { %v16612_v35 = vrot.slane %v16605_v20, %v26368_v1  ;;  %v16538_v50 = vunpack.c.l.bf16 %v16526_v0  ;;  %v29949_v37 = vrot.slane %v16659_v54, %v29906_v25  ;;  %v16753_v26 = vshrl.u32 %v16719_v27, 16  ;;  %v21634_v54 = vld [vmem:[%s30645_s5 + $0x7] ss:$8 sm:$0xf] }
 0xb02   : > { %v16758_v24 = vshll.u32 %v16720_v22, 16  ;;  %v16793_v36 = vcombine.low %v16780_v51, %v16784_v55  ;;  %v16794_v33 = vcombine.low %v16788_v16, %v16792_v53  ;;  %v16008_v40 = vunpack.c.0.s8 %v16007_v29 }
 0xb03   : > { %v16431_v43 = vmul.f32 %v16427_v23, %v16391_v63  ;;  %v16579_v8 = vmul.f32 %v16575_v12, %v16538_v50  ;;  %v16637_v59 = vunpack.c.l.bf16 %v16612_v35  ;;  %v16674_v31 = vcombine.low %v29946_v5, %v29949_v37 }
 0xb04   : > { %v16760_v14 = vsel %vm29913_vm13, %v16753_v26, %v16758_v24  ;;  %v29959_v38 = vrot.slane %v16793_v36, %v29906_v25  ;;  %v29962_v10 = vrot.slane %v16794_v33, %v29906_v25  ;;  %v29968_v19 = vsub.s32 %v16008_v40, %v30646_v39  ;;  %v21639_v36 = vld [vmem:[%s30645_s5 + $0x20] ss:$8 sm:$0xf] }
 0xb05   : > { %v16581_v11 = vadd.f32 %v16579_v8, %v16431_v43  ;;  %v16678_v58 = vmul.f32 %v16674_v31, %v16637_v59  ;;  %v16772_v21 = vunpack.c.l.bf16 %v16760_v14  ;;  %v16879_v44 = vrot.slane %v21615_v13, %v29878_v41 }
 0xb06   : > { %v16883_v18 = vrot.slane %v21615_v13, %v29881_v30  ;;  %v16887_v20 = vrot.slane %v21615_v13, %v29884_v3  ;;  %v16891_v42 = vrot.slane %v21615_v13, %v29887_v9  ;;  %v16809_v0 = vcombine.low %v29959_v38, %v29962_v10 }
 0xb07   : > { %v17016_v27 = vrot.slane %v21622_v34, %v29881_v30  ;;  %v17020_v22 = vrot.slane %v21622_v34, %v29884_v3  ;;  %v17024_v51 = vrot.slane %v21622_v34, %v29887_v9  ;;  %v17111_v55 = vrot.slane %v21627_v52, %v29878_v41 }
 0xb08   : > { %v17115_v16 = vrot.slane %v21627_v52, %v29881_v30  ;;  %v17119_v53 = vrot.slane %v21627_v52, %v29884_v3  ;;  %v17123_v49 = vrot.slane %v21627_v52, %v29887_v9  ;;  %v17246_v29 = vrot.slane %v21634_v54, %v29878_v41 }
 0xb09   : > { %v17250_v63 = vrot.slane %v21634_v54, %v29881_v30  ;;  %v17254_v23 = vrot.slane %v21634_v54, %v29884_v3  ;;  %v17258_v35 = vrot.slane %v21634_v54, %v29887_v9  ;;  %v16680_v24 = vadd.f32 %v16678_v58, %v16581_v11 }
 0xb0a   : > { %v16892_v33 = vcombine.low %v16879_v44, %v16883_v18  ;;  %v16893_v40 = vcombine.low %v16887_v20, %v16891_v42  ;;  %v17025_v43 = vcombine.low %v17012_v2, %v17016_v27  ;;  %v17026_v8 = vcombine.low %v17020_v22, %v17024_v51  ;;  %v21646_v20 = vld [vmem:[%s30645_s5 + $0x21] ss:$8 sm:$0xf]  ;;  %v21651_v51 = vld [vmem:[%s30645_s5 + $0x22] ss:$8 sm:$0xf] }
 0xb0b   : > { %v30007_v59 = vrot.slane %v15913_v28, %v26368_v1  ;;  %v16813_v31 = vmul.f32 %v16809_v0, %v16772_v21  ;;  %v17124_v14 = vcombine.low %v17111_v55, %v17115_v16  ;;  %v17125_v13 = vcombine.low %v17119_v53, %v17123_v49 }
 0xb0c   : > { %v17259_v34 = vcombine.low %v17246_v29, %v17250_v63  ;;  %v17260_v52 = vcombine.low %v17254_v23, %v17258_v35  ;;  %v17346_v11 = vrot.slane %v21639_v36, %v29878_v41  ;;  %v17350_v58 = vrot.slane %v21639_v36, %v29881_v30 }
 0xb0d   : > { %v30015_v44 = vrot.slane %v15914_v17, %v26368_v1  ;;  %v30021_v28 = vrot.slane %v15981_v57, %v26368_v1  ;;  %v17354_v21 = vrot.slane %v21639_v36, %v29884_v3  ;;  %v17358_v18 = vrot.slane %v21639_v36, %v29887_v9 }
 0xb0e   : > { %v30029_v42 = vrot.slane %v16892_v33, %v29906_v25  ;;  %v30032_v7 = vrot.slane %v16893_v40, %v29906_v25  ;;  %v30035_v6 = vrot.slane %v17025_v43, %v29906_v25  ;;  %v30038_v17 = vrot.slane %v17026_v8, %v29906_v25 }
 0xb0f   : > { %v30042_v48 = vadd.f32 %v16813_v31, %v16680_v24  ;;  %v30045_v57 = vrot.slane %v17124_v14, %v29906_v25  ;;  %v30048_v2 = vrot.slane %v17125_v13, %v29906_v25  ;;  %v30051_v54 = vrot.slane %v17259_v34, %v29906_v25 }
 0xb10   : > { %v30054_v0 = vrot.slane %v17260_v52, %v29906_v25  ;;  %v17359_v27 = vcombine.low %v17346_v11, %v17350_v58  ;;  %v17479_v22 = vrot.slane %v21646_v20, %v29878_v41  ;;  %v17360_v55 = vcombine.low %v17354_v21, %v17358_v18 }
 0xb11   : > { %v17483_v16 = vrot.slane %v21646_v20, %v29881_v30  ;;  %v17487_v53 = vrot.slane %v21646_v20, %v29884_v3  ;;  %v17491_v49 = vrot.slane %v21646_v20, %v29887_v9  ;;  %v17578_v40 = vrot.slane %v21651_v51, %v29878_v41 }
 0xb12   : > { %v17582_v43 = vrot.slane %v21651_v51, %v29881_v30  ;;  %v30083_v34 = vrot.slane %v17359_v27, %v29906_v25  ;;  %v30087_v58 = vrot.slane %v17360_v55, %v29906_v25  ;;  %v17586_v27 = vrot.slane %v21651_v51, %v29884_v3 }
 0xb13   : > { %v17492_v21 = vcombine.low %v17479_v22, %v17483_v16  ;;  %v17493_v18 = vcombine.low %v17487_v53, %v17491_v49  ;;  %v17590_v55 = vrot.slane %v21651_v51, %v29887_v9  ;;  %vm18241_vm9 = vcmask 1043456  }
 0xb14   : > { %30649 = vst [vmem:[#allocation18_spill] sm:$0xff] %v30083_v34  ;;  %30650 = vst [vmem:[#allocation19_spill] sm:$0xff] %v30087_v58  ;;  %v17591_v51 = vcombine.low %v17578_v40, %v17582_v43  ;;  %v16328_v58 = vld [vmem:[#allocation5 + $0x28] sm:$0x33] }
 0xb15   : > { %v30099_v62 = vrot.slane %v17492_v21, %v29906_v25 }
 0xb35   : > { %v15864_v24 = vpop.f32.mrb[8].mxu1 }
 0xb36   : > { %v22166_v8 = vadd.f32 %v15864_v24, %v29470_v45  ;;  %v15866_v31 = vpop.f32.mrb[9].mxu1  ;;  %v21658_v45 = vld [vmem:[%s30645_s5 + $0x23] ss:$8 sm:$0xf] }
 0xb37   : > { %v22167_v52 = vadd.f32 %v15866_v31, %v29472_v61  ;;  %v15868_v11 = vpop.f32.mrb[10].mxu1  ;;  %v17713_v16 = vrot.slane %v21658_v45, %v29878_v41  ;;  %v17717_v33 = vrot.slane %v21658_v45, %v29881_v30  ;;  %v17721_v21 = vrot.slane %v21658_v45, %v29884_v3 }
 0xb38   : > { %vm15883_vm14 = vcmp.ge.f32.partialorder %v22166_v8, 0.0  ;;  %v15891_v20 = vmul.f32 0.2, %v22166_v8  ;;  %v22168_v24 = vadd.f32 %v15868_v11, %v29477_v32  ;;  %v15870_v13 = vpop.f32.mrb[11].mxu1 }
 0xb39   : > { %vm15884_vm15 = vcmp.ge.f32.partialorder %v22167_v52, 0.0  ;;  %v15892_v35 = vmul.f32 0.2, %v22167_v52  ;;  %v22169_v61 = vadd.f32 %v15870_v13, %v29482_v56 }
 0xb3a   : > { %v15899_v31 = vsel %vm15883_vm14, %v22166_v8, %v15891_v20  ;;  %vm15887_vm1 = vcmp.ge.f32.partialorder %v22168_v24, 0.0  ;;  %v15895_v22 = vmul.f32 0.2, %v22168_v24  ;;  %v17592_v8 = vcombine.low %v17586_v27, %v17590_v55 }
 0xb3b   : > { %v15900_v53 = vsel %vm15884_vm15, %v22167_v52, %v15892_v35  ;;  %vm15888_vm2 = vcmp.ge.f32.partialorder %v22169_v61, 0.0  ;;  %v15896_v49 = vmul.f32 0.2, %v22169_v61 }
 0xb3c   : > { %v15915_v32 = vcombine.low %v15899_v31, %v15900_v53  ;;  %v15916_v11 = vcombine.high %v15899_v31, %v15900_v53  ;;  %v15903_v14 = vsel %vm15887_vm1, %v22168_v24, %v15895_v22  ;;  %v30108_v31 = vrot.slane %v17493_v18, %v29906_v25  ;;  %v30112_v22 = vld.sshfl [vmem:[#allocation5 + $0x40] sm:$0x5 pattern:$0x75316420] }
 0xb3d   : > { %v15904_v63 = vsel %vm15888_vm2, %v22169_v61, %v15896_v49  ;;  %v17725_v24 = vrot.slane %v21658_v45, %v29887_v9  ;;  %v17726_v61 = vcombine.low %v17713_v16, %v17717_v33  ;;  %v30124_v45 = vrot.slane %v17591_v51, %v29906_v25 }
 0xb3e   : > { %v15937_v13 = vrot.slane %v15915_v32, %v26368_v1  ;;  %v15944_v35 = vrot.slane %v15916_v11, %v26368_v1  ;;  %v15982_v52 = vcombine.low %v15903_v14, %v15904_v63  ;;  %v30118_v14 = vld.sshfl [vmem:[#allocation5 + $0x48] sm:$0x5 pattern:$0x75316420]  ;;  %v30127_v33 = vrot.slane %v17592_v8, %v29906_v25 }
 0xb3f   : > { %v30139_v11 = vcombine.low %v17721_v21, %v17725_v24  ;;  %v30142_v51 = vrot.slane %v17726_v61, %v29906_v25 }
 0xb40   : > { %v15945_v40 = vcombine.low %v30007_v59, %v15937_v13  ;;  %v15946_v43 = vcombine.high %v30007_v59, %v15937_v13  ;;  %v15947_v27 = vcombine.low %v30015_v44, %v15944_v35  ;;  %v15948_v63 = vcombine.high %v30015_v44, %v15944_v35  ;;  %v30132_v59 = vld [vmem:[%s30645_s5 + $0x24] ss:$8 sm:$0xf] }
 0xb41   : > { %v15996_v18 = vrot.slane %v15982_v52, %v26368_v1 }
 0xb42   : > { %v15955_v44 = vrot.slane %v15945_v40, %v26368_v1  ;;  %v15962_v16 = vrot.slane %v15947_v27, %v26368_v1  ;;  %v15969_v53 = vrot.slane %v15946_v43, %v26368_v1  ;;  %v15976_v49 = vrot.slane %v15948_v63, %v26368_v1 }
 0xb43   : > { %v15997_v32 = vcombine.low %v30021_v28, %v15996_v18  ;;  %v17817_v40 = vrot.slane %v30132_v59, %v29881_v30 }
 0xb44   : > { %v15977_v13 = vcombine.high %v15955_v44, %v15955_v44  ;;  %v15979_v35 = vcombine.high %v15969_v53, %v15969_v53  ;;  %v15980_v28 = vcombine.high %v15976_v49, %v15976_v49  ;;  %v16019_v21 = vrot.slane %v15969_v53, %v29968_v19 }
 0xb45   : > { %v16110_v24 = vcombine.low %v15955_v44, %v15969_v53  ;;  %v15978_v61 = vcombine.high %v15962_v16, %v15962_v16  ;;  %v16050_v20 = vrot.slane %v15962_v16, %v29968_v19  ;;  %v16004_v56 = vrot.slane %v15997_v32, %v26368_v1 }
 0xb46   : > { %v16005_v43 = vcombine.low %v15955_v44, %v15977_v13  ;;  %v16036_v27 = vcombine.low %v15979_v35, %v15976_v49  ;;  %v16124_v63 = vrot.slane %v15977_v13, %v26368_v1  ;;  %v16143_v18 = vcombine.low %v15979_v35, %v15962_v16 }
 0xb47   : > { %v16117_v55 = vrot.slane %v16110_v24, %v26368_v1  ;;  %v21581_v36 = vcombine.high %v15962_v16, %v15976_v49  ;;  %v16157_v26 = vrot.slane %v15976_v49, %v26368_v1  ;;  %v16067_v16 = vcombine.low %v15978_v61, %v16004_v56 }
 0xb48   : > { %v16012_v23 = vrot.slane %v16005_v43, %v29968_v19  ;;  %v16043_v12 = vrot.slane %v16036_v27, %v29968_v19  ;;  %v16150_v53 = vrot.slane %v16143_v18, %v26368_v1 }
 0xb49   : > { %v16125_v44 = vcombine.low %v16117_v55, %v16124_v63  ;;  %v16126_v32 = vcombine.high %v16117_v55, %v16124_v63  ;;  %v16183_v13 = vrot.slane %v21581_v36, %v26368_v1  ;;  %v16074_v8 = vrot.slane %v16067_v16, %v29968_v19 }
 0xb4a   : > { %v16020_v35 = vcombine.low %v16012_v23, %v16019_v21  ;;  %v16021_v24 = vcombine.high %v16012_v23, %v16019_v21  ;;  %v16051_v43 = vcombine.low %v16043_v12, %v16050_v20  ;;  %v16052_v27 = vcombine.high %v16043_v12, %v16050_v20  ;;  %v21667_v23 = vld.sshfl [vmem:[#allocation5 + $0x48] sm:$0x55 pattern:$0x75316420] }
 0xb4b   : > { %v16133_v49 = vrot.slane %v16125_v44, %v26368_v1  ;;  %v16140_v18 = vrot.slane %v16126_v32, %v26368_v1  ;;  %v16158_v50 = vcombine.low %v16150_v53, %v16157_v26  ;;  %v16159_v29 = vcombine.high %v16150_v53, %v16157_v26 }
 0xb4c   : > { %21575 = vst.sshfl [vmem:[%s30163_s24] sm:$0x5f pattern:$0x75316420] %v16020_v35  ;;  %v16081_v55 = vrot.slane %v15980_v28, %v29968_v19  ;;  %v16190_v36 = vrot.slane %v16004_v56, %v26368_v1 }
 0xb4d   : > { %21576 = vst.sshfl [vmem:[%s30163_s24 + $0x8] sm:$0x5f pattern:$0x75316420] %v16021_v24  ;;  %v16141_v12 = vcombine.high %v16133_v49, %v16133_v49  ;;  %v16142_v20 = vcombine.high %v16140_v18, %v16140_v18  ;;  %v16166_v21 = vrot.slane %v16158_v50, %v26368_v1  ;;  %v16173_v26 = vrot.slane %v16159_v29, %v26368_v1 }
 0xb4e   : > { %21577 = vst.sshfl [vmem:[%s30163_s24 + $0x10] sm:$0x5f pattern:$0x75316420] %v16051_v43  ;;  %v21701_v61 = vpack.c.bf16 %v16140_v18, %v16133_v49  ;;  %v16082_v63 = vcombine.low %v16074_v8, %v16081_v55  ;;  %v16083_v53 = vcombine.high %v16074_v8, %v16081_v55  ;;  %v16191_v44 = vcombine.low %v16183_v13, %v16190_v36 }
 0xb4f   : > { %21578 = vst.sshfl [vmem:[%s30163_s24 + $0x18] sm:$0x5f pattern:$0x75316420] %v16052_v27  ;;  %v16174_v32 = vcombine.high %v16166_v21, %v16166_v21  ;;  %v16175_v16 = vcombine.high %v16173_v26, %v16173_v26  ;;  %v21702_v19 = vpack.c.bf16 %v16142_v20, %v16141_v12  ;;  %v21703_v28 = vpack.c.bf16 %v16173_v26, %v16166_v21 }
 0xb50   : > { %v16264_v35 = vshrl.u32 %v21701_v61, 16  ;;  %21579 = vst.sshfl [vmem:[%s30163_s24 + $0x20] sm:$0x5f pattern:$0x75316420] %v16082_v63  ;;  %v16192_v29 = vcombine.high %v16183_v13, %v16190_v36  ;;  %v16199_v8 = vrot.slane %v16191_v44, %v26368_v1  ;;  %v17825_v24 = vrot.slane %v30132_v59, %v29887_v9 }
 0xb51   : > { %21580 = vst.sshfl [vmem:[%s30163_s24 + $0x28] sm:$0x5f pattern:$0x75316420] %v16083_v53  ;;  %v21704_v43 = vpack.c.bf16 %v16175_v16, %v16174_v32  ;;  %v16267_v27 = vshll.u32 %v21701_v61, 16  ;;  %v16271_v49 = vshrl.u32 %v21702_v19, 16 }
 0xb52   : > { %v16278_v18 = vshrl.u32 %v21703_v28, 16  ;;  %v21666_v55 = vld.sshfl [vmem:[#allocation5 + $0x40] sm:$0x55 pattern:$0x75316420]  ;;  %v16266_v12 = vrot.slane %v16264_v35, 7  ;;  %v16206_v21 = vrot.slane %v16192_v29, %v26368_v1  ;;  %v16207_v26 = vcombine.high %v16199_v8, %v16199_v8 }
 0xb53   : > { %v16274_v20 = vshll.u32 %v21702_v19, 16  ;;  %v16273_v52 = vrot.slane %v16271_v49, 7  ;;  %v16281_v53 = vshll.u32 %v21703_v28, 16  ;;  %v16285_v13 = vshrl.u32 %v21704_v43, 16  ;;  %v16319_v61 = vld [vmem:[#allocation5 + $0x10] sm:$0x33] }
 0xb54   : > { %v16280_v63 = vrot.slane %v16278_v18, 7  ;;  %v16269_v44 = vor.u32 %v16267_v27, %v16266_v12  ;;  %v16322_v32 = vld [vmem:[#allocation5 + $0x18] sm:$0x33]  ;;  %v16325_v16 = vld [vmem:[#allocation5 + $0x20] sm:$0x33]  ;;  %v16208_v19 = vcombine.high %v16206_v21, %v16206_v21  ;;  %v21705_v35 = vpack.c.bf16 %v16206_v21, %v16199_v8  ;;  %s18354_s24 = sshll.u32 %s25394_s22, 4  ;;  %s30455_s24 = int_to_ptr.vmem [resolvable:$true] %s18354_s24 }
 0xb55   : > { %v30657_v28 = vrot.slane %v30132_v59, %v29878_v41  ;;  %v16276_v56 = vor.u32 %v16274_v20, %v16273_v52  ;;  %v16287_v50 = vrot.slane %v16285_v13, 7  ;;  %v16288_v18 = vshll.u32 %v21704_v43, 16  ;;  %v21670_v8 = vld [vmem:[%s30645_s5 + $0x25] ss:$8 sm:$0xf]  ;;  %s24521_s30 = scalar_lea.vmem %s30455_s24, 1024  ;;  %p24528_p0 = scmp.lt.s32.totalorder %s30455_s24, %s24526_s15 }
 0xb56   : > { %v16283_v49 = vor.u32 %v16281_v53, %v16280_v63  ;;  %v16320_v39 = vsel %vm30201_vm8, %v16269_v44, %v16319_v61  ;;  %v21706_v27 = vpack.c.bf16 %v16208_v19, %v16207_v26  ;;  %v16292_v12 = vshrl.u32 %v21705_v35, 16  ;;  %p24522_p11 = scmp.ne.s32.totalorder %s30455_s24, %s24521_s30  ;;  %s24527_s22 = scalar_lea.vmem %s24526_s15, 2048 }
 0xb57   : > { %v17826_v29 = vcombine.low %v30657_v28, %v17817_v40  ;;  %v17902_v34 = vcombine.low %v21666_v55, %v21667_v23  ;;  %v16290_v21 = vor.u32 %v16288_v18, %v16287_v50  ;;  %16321 = vst [vmem:[#allocation5 + $0x10] sm:$0x33] %v16320_v39  ;;  %v16323_v40 = vsel %vm30201_vm8, %v16276_v56, %v16322_v32  ;;  %v16331_v39 = vld [vmem:[#allocation5 + $0x30] sm:$0x33]  ;;  %v16334_v28 = vld [vmem:[#allocation5 + $0x38] sm:$0x33]  ;;  %p24529_p1 = scmp.lt.s32.totalorder %s24527_s22, %s24521_s30 }
 0xb58   : > { %v16326_v52 = vsel %vm30201_vm8, %v16283_v49, %v16325_v16  ;;  %v17903_v43 = vcombine.high %v21666_v55, %v21667_v23  ;;  %16324 = vst [vmem:[#allocation5 + $0x18] sm:$0x33] %v16323_v40  ;;  %v16294_v20 = vrot.slane %v16292_v12, 7  ;;  %v16295_v63 = vshll.u32 %v21705_v35, 16  ;;  %p24523_p12 = pnand %p24522_p11, %p24757_p5 }
 0xb59   : > { %16327 = vst [vmem:[#allocation5 + $0x20] sm:$0x33] %v16326_v52  ;;  %v16299_v26 = vshrl.u32 %v21706_v27, 16  ;;  %v30658_v53 = vrot.slane %v30132_v59, %v29884_v3  ;;  %v16329_v61 = vsel %vm30201_vm8, %v16290_v21, %v16328_v58  ;;  %v30659_v44 = vcombine.low %v30112_v22, %v30118_v14  ;;  %v21675_v50 = vld [vmem:[%s30645_s5 + $0x26] ss:$8 sm:$0xf]  ;;  %p24530_p2 = por %p24529_p1, %p24528_p0 }
 0xb5a   : > { %v17946_v23 = vrot.slane %v21670_v8, %v29878_v41  ;;  %v17950_v55 = vrot.slane %v21670_v8, %v29881_v30  ;;  %v21673_v16 = vld.sshfl [vmem:[#allocation5 + $0x40] sm:$0x50 pattern:$0x75316420]  ;;  %16330 = vst [vmem:[#allocation5 + $0x28] sm:$0x33] %v16329_v61  ;;  %v16297_v19 = vor.u32 %v16295_v63, %v16294_v20  ;;  %v17910_v56 = vrot.slane %v17902_v34, %v26368_v1  ;;  %p24524_p13 = pneg %p24523_p12 }
 0xb5b   : > { %v17827_v13 = vcombine.low %v30658_v53, %v17825_v24  ;;  %v30229_v32 = vrot.slane %v30659_v44, %v26368_v1  ;;  %v16301_v35 = vrot.slane %v16299_v26, 7  ;;  %v16302_v59 = vshll.u32 %v21706_v27, 16  ;;  %v21674_v58 = vld.sshfl [vmem:[#allocation5 + $0x48] sm:$0x50 pattern:$0x75316420] }
 0xb5c   : > { %v30235_v24 = vrot.slane %v30139_v11, %v29906_v25  ;;  %v17917_v22 = vrot.slane %v17903_v43, %v26368_v1  ;;  %v17954_v14 = vrot.slane %v21670_v8, %v29884_v3  ;;  %v17958_v49 = vrot.slane %v21670_v8, %v29887_v9  ;;  %v30258_v52 = vld.sshfl [vmem:[#allocation5 + $0x40] sm:$0x5a pattern:$0x75316420]  ;;  %p24531_p3 = pnand %p24530_p2, %p24524_p13 }
 0xb5d   : > { %v16304_v18 = vor.u32 %v16302_v59, %v16301_v35  ;;  %v16332_v27 = vsel %vm30201_vm8, %v16297_v19, %v16331_v39  ;;  %v30247_v11 = vrot.slane %v17826_v29, %v29906_v25  ;;  %v30250_v12 = vrot.slane %v17827_v13, %v29906_v25  ;;  %v30260_v43 = vld.sshfl [vmem:[#allocation5 + $0x48] sm:$0x5a pattern:$0x75316420] }
 0xb5e   : > { %16333 = vst [vmem:[#allocation5 + $0x30] sm:$0x33] %v16332_v27  ;;  %v17959_v40 = vcombine.low %v17946_v23, %v17950_v55  ;;  %v21590_v20 = vld.sshfl [vmem:[#allocation5 + $0x10] sm:$0x5 pattern:$0x75316420]  ;;  %v18027_v26 = vcombine.high %v21673_v16, %v21674_v58  ;;  %v18045_v53 = vrot.slane %v21675_v50, %v29878_v41  ;;  %v17960_v44 = vcombine.low %v17954_v14, %v17958_v49 }
 0xb5f   : > { %v16335_v29 = vsel %vm30201_vm8, %v16304_v18, %v16334_v28  ;;  %v21591_v13 = vld.sshfl [vmem:[#allocation5 + $0x18] sm:$0x5 pattern:$0x75316420]  ;;  %v17928_v61 = vshrl.u32 %v17910_v56, 16  ;;  %v17933_v39 = vshll.u32 %v17917_v22, 16  ;;  %v18049_v23 = vrot.slane %v21675_v50, %v29881_v30 }
 0xb60   : > { %16336 = vst [vmem:[#allocation5 + $0x38] sm:$0x33] %v16335_v29  ;;  %v16381_v55 = vcombine.low %v21590_v20, %v21591_v13  ;;  %v21594_v19 = vld.sshfl [vmem:[#allocation5 + $0x10] sm:$0x55 pattern:$0x75316420]  ;;  %v30281_v56 = vrot.slane %v17959_v40, %v29906_v25  ;;  %v18053_v22 = vrot.slane %v21675_v50, %v29884_v3  ;;  %v18057_v14 = vrot.slane %v21675_v50, %v29887_v9 }
 0xb61   : > { %v30276_v59 = vld [vmem:[%s30645_s5 + $0x27] ss:$8 sm:$0xf]  ;;  %v18135_v20 = vcombine.low %v30258_v52, %v30260_v43  ;;  %v30290_v36 = vsel %vm29913_vm13, %v17928_v61, %v17933_v39  ;;  %v30293_v40 = vrot.slane %v17960_v44, %v29906_v25  ;;  %v30296_v28 = vrot.slane %v18027_v26, %v26368_v1 }
 0xb62   : > { %v21595_v58 = vld.sshfl [vmem:[#allocation5 + $0x18] sm:$0x55 pattern:$0x75316420]  ;;  %v16388_v49 = vrot.slane %v16381_v55, %v26368_v1  ;;  %v30298_v50 = vcombine.low %v18045_v53, %v18049_v23  ;;  %v30302_v34 = vcombine.low %v18053_v22, %v18057_v14  ;;  %v18136_v61 = vcombine.high %v30258_v52, %v30260_v43 }
 0xb63   : > { %v16487_v18 = vcombine.low %v21594_v19, %v21595_v58  ;;  %v16488_v27 = vcombine.high %v21594_v19, %v21595_v58  ;;  %v21601_v29 = vld.sshfl [vmem:[#allocation5 + $0x10] sm:$0x50 pattern:$0x75316420]  ;;  %v30660_v52 = vcombine.low %v30029_v42, %v30032_v7 }
 0xb64   : > { %v21602_v13 = vld.sshfl [vmem:[#allocation5 + $0x18] sm:$0x50 pattern:$0x75316420]  ;;  %v16392_v55 = vunpack.c.l.bf16 %v16388_v49 }
 0xb65   : > { %v16495_v19 = vrot.slane %v16487_v18, %v26368_v1  ;;  %v16502_v58 = vrot.slane %v16488_v27, %v26368_v1  ;;  %v16627_v63 = vcombine.high %v21601_v29, %v21602_v13  ;;  %v21606_v16 = vld.sshfl [vmem:[#allocation5 + $0x10] sm:$0x5a pattern:$0x75316420]  ;;  %v30312_v18 = vrot.slane %v18135_v20, %v26368_v1 }
 0xb66   : > { %v21607_v21 = vld.sshfl [vmem:[#allocation5 + $0x18] sm:$0x5a pattern:$0x75316420]  ;;  %v16912_v43 = vmul.f32 %v30660_v52, %v16392_v55  ;;  %v30661_v13 = vcombine.high %v29919_v60, %v29922_v47  ;;  %v30662_v29 = vcombine.high %v29946_v5, %v29949_v37 }
 0xb67   : > { %v16528_v53 = vshrl.u32 %v16495_v19, 16  ;;  %v16533_v44 = vshll.u32 %v16502_v58, 16  ;;  %v16634_v23 = vrot.slane %v16627_v63, %v26368_v1  ;;  %v21613_v49 = vld.sshfl [vmem:[#allocation5 + $0x20] sm:$0x5 pattern:$0x75316420]  ;;  %v16735_v27 = vcombine.low %v21606_v16, %v21607_v21 }
 0xb68   : > { %v16736_v22 = vcombine.high %v21606_v16, %v21607_v21  ;;  %v21614_v14 = vld.sshfl [vmem:[#allocation5 + $0x28] sm:$0x5 pattern:$0x75316420]  ;;  %v16432_v19 = vmul.f32 %v30661_v13, %v16392_v55  ;;  %v16914_v52 = vadd.f32 %v16912_v43, %v30042_v48 }
 0xb69   : > { %v16535_v63 = vsel %vm29913_vm13, %v16528_v53, %v16533_v44  ;;  %v16638_v58 = vunpack.c.l.bf16 %v16634_v23  ;;  %v16861_v20 = vcombine.low %v21613_v49, %v21614_v14  ;;  %v21618_v39 = vld.sshfl [vmem:[#allocation5 + $0x20] sm:$0x55 pattern:$0x75316420]  ;;  %v16743_v21 = vrot.slane %v16735_v27, %v26368_v1 }
 0xb6a   : > { %v16539_v26 = vunpack.c.l.bf16 %v16535_v63  ;;  %v16750_v16 = vrot.slane %v16736_v22, %v26368_v1  ;;  %v21619_v35 = vld.sshfl [vmem:[#allocation5 + $0x28] sm:$0x55 pattern:$0x75316420]  ;;  %v30663_v44 = vcombine.high %v29928_v46, %v29931_v4  ;;  %v30664_v22 = vcombine.low %v30035_v6, %v30038_v17 }
 0xb6b   : > { %v16679_v8 = vmul.f32 %v30662_v29, %v16638_v58  ;;  %v16868_v60 = vrot.slane %v16861_v20, %v26368_v1  ;;  %v16968_v47 = vcombine.low %v21618_v39, %v21619_v35  ;;  %v16969_v55 = vcombine.high %v21618_v39, %v21619_v35  ;;  %v21625_v53 = vld.sshfl [vmem:[#allocation5 + $0x20] sm:$0x50 pattern:$0x75316420] }
 0xb6c   : > { %v16580_v23 = vmul.f32 %v30663_v44, %v16539_v26  ;;  %v16751_v49 = vcombine.high %v16743_v21, %v16743_v21  ;;  %v16762_v27 = vshrl.u32 %v16750_v16, 16  ;;  %v17045_v48 = vmul.f32 %v30664_v22, %v16539_v26  ;;  %v21626_v14 = vld.sshfl [vmem:[#allocation5 + $0x28] sm:$0x50 pattern:$0x75316420] }
 0xb6d   : > { %v16872_v43 = vunpack.c.l.bf16 %v16868_v60  ;;  %v16976_v5 = vrot.slane %v16968_v47, %v26368_v1  ;;  %v16983_v37 = vrot.slane %v16969_v55, %v26368_v1  ;;  %v17093_v29 = vcombine.high %v21625_v53, %v21626_v14  ;;  %v21631_v63 = vld.sshfl [vmem:[#allocation5 + $0x28] sm:$0x5a pattern:$0x75316420] }
 0xb6e   : > { %v16582_v13 = vadd.f32 %v16580_v23, %v16432_v19  ;;  %v16767_v35 = vshll.u32 %v16751_v49, 16  ;;  %v17047_v39 = vadd.f32 %v17045_v48, %v16914_v52  ;;  %v30665_v46 = vcombine.low %v30045_v57, %v30048_v2  ;;  %v21630_v26 = vld.sshfl [vmem:[#allocation5 + $0x20] sm:$0x5a pattern:$0x75316420] }
 0xb6f   : > { %v16994_v20 = vshrl.u32 %v16976_v5, 16  ;;  %v16999_v21 = vshll.u32 %v16983_v37, 16  ;;  %v17100_v16 = vrot.slane %v17093_v29, %v26368_v1  ;;  %v30344_v60 = vrot.slane %v18136_v61, %v26368_v1  ;;  %v21638_v52 = vld.sshfl [vmem:[#allocation5 + $0x38] sm:$0x5 pattern:$0x75316420] }
 0xb70   : > { %v17144_v4 = vmul.f32 %v30665_v46, %v16638_v58  ;;  %v16681_v47 = vadd.f32 %v16679_v8, %v16582_v13  ;;  %v16769_v55 = vsel %vm29913_vm13, %v16762_v27, %v16767_v35  ;;  %v17201_v53 = vcombine.low %v21630_v26, %v21631_v63  ;;  %v21637_v22 = vld.sshfl [vmem:[#allocation5 + $0x30] sm:$0x5 pattern:$0x75316420] }
 0xb71   : > { %v16773_v44 = vunpack.c.l.bf16 %v16769_v55  ;;  %v17001_v58 = vsel %vm29913_vm13, %v16994_v20, %v16999_v21  ;;  %v17104_v23 = vunpack.c.l.bf16 %v17100_v16  ;;  %v17202_v49 = vcombine.high %v21630_v26, %v21631_v63  ;;  %v21643_v37 = vld.sshfl [vmem:[#allocation5 + $0x38] sm:$0x55 pattern:$0x75316420]  ;;  %v30669_v46 = vld [vmem:[#allocation18_spill] sm:$0xff] }
 0xb72   : > { %v17146_v19 = vadd.f32 %v17144_v4, %v17047_v39  ;;  %v30666_v48 = vcombine.high %v30029_v42, %v30032_v7  ;;  %v17005_v61 = vunpack.c.l.bf16 %v17001_v58  ;;  %v17209_v8 = vrot.slane %v17201_v53, %v26368_v1  ;;  %v30670_v4 = vld [vmem:[#allocation19_spill] sm:$0xff]  ;;  %v21642_v7 = vld.sshfl [vmem:[#allocation5 + $0x30] sm:$0x55 pattern:$0x75316420] }
 0xb73   : > { %v17328_v5 = vcombine.low %v21637_v22, %v21638_v52  ;;  %v30667_v27 = vcombine.high %v29959_v38, %v29962_v10  ;;  %v17216_v13 = vrot.slane %v17202_v49, %v26368_v1  ;;  %v30668_v35 = vcombine.low %v30051_v54, %v30054_v0  ;;  %v21650_v10 = vld.sshfl [vmem:[#allocation5 + $0x38] sm:$0x50 pattern:$0x75316420] }
 0xb74   : > { %v16913_v14 = vmul.f32 %v30666_v48, %v16872_v43  ;;  %v30671_v63 = vcombine.low %v30669_v46, %v30670_v4  ;;  %v30672_v20 = vcombine.high %v30045_v57, %v30048_v2  ;;  %v17217_v16 = vcombine.high %v17209_v8, %v17209_v8  ;;  %v21649_v48 = vld.sshfl [vmem:[#allocation5 + $0x30] sm:$0x50 pattern:$0x75316420] }
 0xb75   : > { %v16814_v29 = vmul.f32 %v30667_v27, %v16773_v44  ;;  %v17279_v39 = vmul.f32 %v30668_v35, %v16773_v44  ;;  %v17335_v26 = vrot.slane %v17328_v5, %v26368_v1  ;;  %v17435_v38 = vcombine.low %v21642_v7, %v21643_v37 }
 0xb76   : > { %v17379_v42 = vmul.f32 %v30671_v63, %v16872_v43  ;;  %v17145_v21 = vmul.f32 %v30672_v20, %v17104_v23  ;;  %v30673_v53 = vcombine.high %v30035_v6, %v30038_v17  ;;  %v17436_v58 = vcombine.high %v21642_v7, %v21643_v37  ;;  %v21654_v7 = vld.sshfl [vmem:[#allocation5 + $0x30] sm:$0x5a pattern:$0x75316420] }
 0xb77   : > { %v16816_v55 = vadd.f32 %v16814_v29, %v16681_v47  ;;  %v17281_v44 = vadd.f32 %v17279_v39, %v17146_v19  ;;  %v17228_v49 = vshrl.u32 %v17216_v13, 16  ;;  %v17233_v22 = vshll.u32 %v17217_v16, 16  ;;  %v21655_v29 = vld.sshfl [vmem:[#allocation5 + $0x38] sm:$0x5a pattern:$0x75316420] }
 0xb78   : > { %v17046_v52 = vmul.f32 %v30673_v53, %v17005_v61  ;;  %v17443_v43 = vrot.slane %v17435_v38, %v26368_v1  ;;  %v30674_v57 = vcombine.low %v30099_v62, %v30108_v31  ;;  %v17450_v27 = vrot.slane %v17436_v58, %v26368_v1 }
 0xb79   : > { %v16915_v8 = vadd.f32 %v16913_v14, %v16816_v55  ;;  %v17381_v5 = vadd.f32 %v17379_v42, %v17281_v44  ;;  %v17560_v47 = vcombine.high %v21649_v48, %v21650_v10  ;;  %v17235_v6 = vsel %vm29913_vm13, %v17228_v49, %v17233_v22 }
 0xb7a   : > { %v17512_v2 = vmul.f32 %v30674_v57, %v17005_v61  ;;  %v17339_v17 = vunpack.c.l.bf16 %v17335_v26  ;;  %v17461_v19 = vshrl.u32 %v17443_v43, 16  ;;  %v30675_v37 = vcombine.low %v30124_v45, %v30127_v33 }
 0xb7b   : > { %v17048_v35 = vadd.f32 %v17046_v52, %v16915_v8  ;;  %v17239_v39 = vunpack.c.l.bf16 %v17235_v6  ;;  %v17466_v63 = vshll.u32 %v17450_v27, 16  ;;  %v17567_v14 = vrot.slane %v17560_v47, %v26368_v1 }
 0xb7c   : > { %v17611_v13 = vmul.f32 %v30675_v37, %v17104_v23  ;;  %v17514_v61 = vadd.f32 %v17512_v2, %v17381_v5  ;;  %v17668_v42 = vcombine.low %v21654_v7, %v21655_v29  ;;  %v17669_v20 = vcombine.high %v21654_v7, %v21655_v29 }
 0xb7d   : > { %v18192_v16 = vrot.slane %v30276_v59, %v29887_v9  ;;  %v17147_v38 = vadd.f32 %v17145_v21, %v17048_v35  ;;  %v30676_v26 = vcombine.high %v30051_v54, %v30054_v0  ;;  %v17468_v23 = vsel %vm29913_vm13, %v17461_v19, %v17466_v63 }
 0xb7e   : > { %v17613_v55 = vadd.f32 %v17611_v13, %v17514_v61  ;;  %v17472_v53 = vunpack.c.l.bf16 %v17468_v23  ;;  %v17676_v52 = vrot.slane %v17668_v42, %v26368_v1  ;;  %v17683_v44 = vrot.slane %v17669_v20, %v26368_v1 }
 0xb7f   : > { %v17280_v10 = vmul.f32 %v30676_v26, %v17239_v39  ;;  %v18151_v58 = vcombine.high %v30312_v18, %v30312_v18  ;;  %v30677_v9 = vcombine.high %v30669_v46, %v30670_v4  ;;  %v17571_v22 = vunpack.c.l.bf16 %v17567_v14 }
 0xb80   : > { %v30678_v54 = vcombine.low %v30142_v51, %v30235_v24  ;;  %v17684_v43 = vcombine.high %v17676_v52, %v17676_v52  ;;  %v17975_v57 = vcombine.low %v30281_v56, %v30293_v40  ;;  %v18066_v1 = vrot.slane %v30298_v50, %v29906_v25 }
 0xb81   : > { %v17282_v49 = vadd.f32 %v17280_v10, %v17147_v38  ;;  %v17380_v21 = vmul.f32 %v30677_v9, %v17339_v17  ;;  %v18073_v18 = vrot.slane %v30302_v34, %v29906_v25  ;;  %v30679_v46 = vcombine.high %v30099_v62, %v30108_v31 }
 0xb82   : > { %v17746_v0 = vmul.f32 %v30678_v54, %v17239_v39  ;;  %v30680_v8 = vrot.slane %v30276_v59, %v29881_v30  ;;  %v30681_v5 = vrot.slane %v30276_v59, %v29878_v41  ;;  %v17695_v47 = vshrl.u32 %v17683_v44, 16 }
 0xb83   : > { %v17382_v2 = vadd.f32 %v17380_v21, %v17282_v49  ;;  %v17513_v4 = vmul.f32 %v30679_v46, %v17472_v53  ;;  %v17700_v29 = vshll.u32 %v17684_v43, 16  ;;  %v18162_v50 = vshrl.u32 %v30344_v60, 16 }
 0xb84   : > { %v17748_v48 = vadd.f32 %v17746_v0, %v17613_v55  ;;  %v18193_v27 = vcombine.low %v30681_v5, %v30680_v8  ;;  %v18167_v6 = vshll.u32 %v18151_v58, 16  ;;  %v30682_v34 = vcombine.high %v30124_v45, %v30127_v33 }
 0xb85   : > { %v17515_v19 = vadd.f32 %v17513_v4, %v17382_v2  ;;  %v30683_v62 = vcombine.low %v30247_v11, %v30250_v12  ;;  %v30684_v30 = vrot.slane %v30276_v59, %v29884_v3  ;;  %v17702_v41 = vsel %vm29913_vm13, %v17695_v47, %v17700_v29 }
 0xb86   : > { %v17612_v37 = vmul.f32 %v30682_v34, %v17571_v22  ;;  %v17939_v35 = vunpack.c.l.bf16 %v30290_v36  ;;  %v17976_v60 = vcombine.high %v30281_v56, %v30293_v40  ;;  %v17706_v63 = vunpack.c.l.bf16 %v17702_v41 }
 0xb87   : > { %v17846_v31 = vmul.f32 %v30683_v62, %v17339_v17  ;;  %v18194_v13 = vcombine.low %v30684_v30, %v18192_v16  ;;  %v30685_v45 = vunpack.c.l.bf16 %v30229_v32  ;;  %v30686_v33 = vcombine.high %v30247_v11, %v30250_v12 }
 0xb88   : > { %v17614_v39 = vadd.f32 %v17612_v37, %v17515_v19  ;;  %v18038_v3 = vunpack.c.l.bf16 %v30296_v28  ;;  %v18074_v59 = vcombine.low %v18066_v1, %v18073_v18  ;;  %v18075_v7 = vcombine.high %v18066_v1, %v18073_v18 }
 0xb89   : > { %v17847_v17 = vmul.f32 %v30686_v33, %v30685_v45  ;;  %v17848_v61 = vadd.f32 %v17846_v31, %v17748_v48  ;;  %v18169_v14 = vsel %vm29913_vm13, %v18162_v50, %v18167_v6  ;;  %v30687_v36 = vcombine.high %v30142_v51, %v30235_v24 }
 0xb8a   : > { %v17979_v40 = vmul.f32 %v17975_v57, %v17472_v53  ;;  %v18201_v42 = vrot.slane %v18193_v27, %v29906_v25  ;;  %v18208_v32 = vrot.slane %v18194_v13, %v29906_v25  ;;  %v17980_v20 = vmul.f32 %v17976_v60, %v17939_v35 }
 0xb8b   : > { %v17747_v56 = vmul.f32 %v30687_v36, %v17706_v63  ;;  %v18173_v16 = vunpack.c.l.bf16 %v18169_v14  ;;  %v18078_v26 = vmul.f32 %v18074_v59, %v17571_v22  ;;  %v18079_v10 = vmul.f32 %v18075_v7, %v18038_v3 }
 0xb8c   : > { %v17981_v12 = vadd.f32 %v17979_v40, %v17848_v61  ;;  %v18210_v38 = vcombine.high %v18201_v42, %v18208_v32  ;;  %v18209_v23 = vcombine.low %v18201_v42, %v18208_v32 }
 0xb8d   : > { %v17749_v11 = vadd.f32 %v17747_v56, %v17614_v39 }
 0xb8e   : > { %v18080_v55 = vadd.f32 %v18078_v26, %v17981_v12  ;;  %v18214_v52 = vmul.f32 %v18210_v38, %v18173_v16  ;;  %v18213_v51 = vmul.f32 %v18209_v23, %v17706_v63 }
 0xb8f   : > { %v17849_v28 = vadd.f32 %v17847_v17, %v17749_v11 }
 0xb90   : > { %v18215_v24 = vadd.f32 %v18213_v51, %v18080_v55 }
 0xb91   : > { %v17982_v15 = vadd.f32 %v17980_v20, %v17849_v28 }
 0xb93   : > { %v18081_v44 = vadd.f32 %v18079_v10, %v17982_v15 }
 0xb95   : > { %v18216_v53 = vadd.f32 %v18214_v52, %v18081_v44 }
 0xb97   : > { %v18219_v58 = vcombine.low %v18215_v24, %v18216_v53  ;;  %v18220_v49 = vcombine.high %v18215_v24, %v18216_v53 }
 0xb99   : > { %v18227_v9 = vrot.slane %v18219_v58, %v29906_v25  ;;  %v18234_v21 = vrot.slane %v18220_v49, %v29906_v25 }
 0xb9b   : > { %v18235_v22 = vcombine.high %v18227_v9, %v18227_v9  ;;  %v18236_v54 = vcombine.high %v18234_v21, %v18234_v21  ;;  %v18242_v0 = vsel %vm18241_vm9, %v18227_v9, 0.0  ;;  %v18245_v1 = vsel %vm18241_vm9, %v18234_v21, 0.0 }
 0xb9d   : > { %v18243_v43 = vsel %vm18241_vm9, %v18235_v22, 0.0  ;;  %v18247_v2 = vsel %vm18241_vm9, %v18236_v54, 0.0 }
 0xb9e   : > { %v18244_v57 = vadd.f32 %v18243_v43, %v18242_v0 }
 0xba0   : > { %v18246_v18 = vadd.f32 %v18245_v1, %v18244_v57 }
 0xba2   : > { %v18248_v46 = vadd.f32 %v18247_v2, %v18246_v18 }
 0xba4   : > { %18249 = vadd.xlane.f32.xlu0 %v18248_v46 }
 0xba5   : > { %24534 = shalt.err (!%p24531_p3)
}
 0xba6   : > { %s24535_s16 = scalar_lea.hbm %s30453_s0, 1024  ;;  %s24539_s2 = scalar_lea.hbm %s30591_s8, 2048 }
 0xba7   : > { %p24536_p4 = scmp.ne.s32.totalorder %s30453_s0, %s24535_s16  ;;  %p24540_p9 = scmp.lt.u32.totalorder %s30453_s0, %s30591_s8 }
 0xba8   : > { %p24541_p10 = scmp.lt.u32.totalorder %s24539_s2, %s24535_s16  ;;  %p24543_p12 = scmp.lt.u32.totalorder %s24535_s16, %s30453_s0 }
 0xba9   : > { %p24537_p7 = pnand %p24536_p4, %p24757_p5 }
 0xbaa   : > { %p24542_p11 = por %p24541_p10, %p24540_p9 }
 0xbab   : > { %p24538_p8 = pneg %p24537_p7 }
 0xbac   : > { %p24544_p13 = por %p24543_p12, %p24542_p11 }
 0xbae   : > { %p24545_p0 = pnand %p24544_p13, %p24538_p8 }
 0xbb0   : > { %24548 = shalt.err (!%p24545_p0)
}
 0xbb1   : > { %s24651_s30 = smov 128   ;;  %s24652_s22 = smov 8  }
 0xbb2   : > { %22456 = dma.vmem_to_hbm [thread:$0]  (%p24757_p5), %s30455_s24, 1024, %s30453_s0, %s30457_s25, %s24651_s30, %s24651_s30, %s24652_s22  }
 0xbb3   : > { %s21707_s26 = sshll.u32 %s24738_s21, 12  ;;  %s18338_s16 = sshll.u32 %s24997_s12, 4  ;;  %s30491_s16 = int_to_ptr.vmem [resolvable:$true] %s18338_s16 }
 0xbb4   : > { %s30489_s13 = scalar_lea.hbm %s30590_s7, %s21707_s26  ;;  %s18302_s15 = scalar_lea.sflag [#allocation7], %s24994_s29 }
 0xbb5   : > { %s24549_s4 = scalar_lea.vmem %s30491_s16, 4096  ;;  %s24653_s5 = smov [#allocation6]  }
 0xbb6   : > { %p24550_p1 = scmp.ne.s32.totalorder %s30491_s16, %s24549_s4  ;;  %s24553_s24 = sshll.u32 %s24653_s5, 4  ;;  %s24554_s24 = int_to_ptr.vmem [resolvable:$false] %s24553_s24 }
 0xbb7   : > { %s24555_s12 = scalar_lea.vmem %s24554_s24, 8192  ;;  %p24556_p4 = scmp.lt.s32.totalorder %s30491_s16, %s24554_s24 }
 0xbb8   : > { %p24551_p2 = pnand %p24550_p1, %p24757_p5  ;;  %p24557_p7 = scmp.lt.s32.totalorder %s24555_s12, %s24549_s4 }
 0xbba   : > { %p24552_p3 = pneg %p24551_p2  ;;  %p24558_p8 = por %p24557_p7, %p24556_p4 }
 0xbbc   : > { %p24559_p9 = pnand %p24558_p8, %p24552_p3 }
 0xbbe   : > { %24562 = shalt.err (!%p24559_p9)
}
 0xbbf   : > { %s24563_s0 = scalar_lea.hbm %s30489_s13, 4096  ;;  %s24567_s5 = scalar_lea.hbm %s30590_s7, 8192 }
 0xbc0   : > { %p24564_p10 = scmp.ne.s32.totalorder %s30489_s13, %s24563_s0  ;;  %p24568_p13 = scmp.lt.u32.totalorder %s30489_s13, %s30590_s7 }
 0xbc1   : > { %p24569_p0 = scmp.lt.u32.totalorder %s24567_s5, %s24563_s0  ;;  %p24571_p2 = scmp.lt.u32.totalorder %s24563_s0, %s30489_s13 }
 0xbc2   : > { %p24565_p11 = pnand %p24564_p10, %p24757_p5 }
 0xbc3   : > { %p24570_p1 = por %p24569_p0, %p24568_p13 }
 0xbc4   : > { %p24566_p12 = pneg %p24565_p11 }
 0xbc5   : > { %p24572_p3 = por %p24571_p2, %p24570_p1 }
 0xbc7   : > { %p24573_p4 = pnand %p24572_p3, %p24566_p12 }
 0xbc9   : > { %24576 = shalt.err (!%p24573_p4)
}
 0xbca   : > { %22455 = dma.vmem_to_hbm [thread:$0]  (%p24757_p5), %s30491_s16, 4096, %s30489_s13, %s18302_s15, %s24651_s30, %s24651_s30, %s24652_s22  }
 0xbcb   : > { %s21709_s4 = sshll.u32 %s24738_s21, 9  ;;  %s24577_s1 = scalar_lea.vmem %s30445_s3, 512 }
 0xbcc   : > { %s30524_s26 = scalar_lea.hbm %s30592_s9, %s21709_s4  ;;  %p24578_p7 = scmp.ne.s32.totalorder %s30445_s3, %s24577_s1 }
 0xbcd   : > { %s24654_s29 = smov [#allocation10]  }
 0xbce   : > { %p24579_p8 = pnand %p24578_p7, %p24757_p5  ;;  %s24581_s5 = sshll.u32 %s24654_s29, 4  ;;  %s24582_s5 = int_to_ptr.vmem [resolvable:$false] %s24581_s5 }
 0xbcf   : > { %s24583_s2 = scalar_lea.vmem %s24582_s5, 1024  ;;  %p24584_p10 = scmp.lt.s32.totalorder %s30445_s3, %s24582_s5 }
 0xbd0   : > { %p24580_p9 = pneg %p24579_p8  ;;  %p24585_p11 = scmp.lt.s32.totalorder %s24583_s2, %s24577_s1 }
 0xbd2   : > { %p24586_p12 = por %p24585_p11, %p24584_p10 }
 0xbd4   : > { %p24587_p13 = pnand %p24586_p12, %p24580_p9 }
 0xbd6   : > { %24590 = shalt.err (!%p24587_p13)
}
 0xbd7   : > { %s24591_s21 = scalar_lea.hbm %s30524_s26, 512  ;;  %s24595_s15 = scalar_lea.hbm %s30592_s9, 1024 }
 0xbd8   : > { %p24592_p0 = scmp.ne.s32.totalorder %s30524_s26, %s24591_s21  ;;  %p24596_p3 = scmp.lt.u32.totalorder %s30524_s26, %s30592_s9 }
 0xbd9   : > { %p24597_p4 = scmp.lt.u32.totalorder %s24595_s15, %s24591_s21  ;;  %p24599_p8 = scmp.lt.u32.totalorder %s24591_s21, %s30524_s26 }
 0xbda   : > { %p24593_p1 = pnand %p24592_p0, %p24757_p5 }
 0xbdb   : > { %p24598_p7 = por %p24597_p4, %p24596_p3 }
 0xbdc   : > { %p24594_p2 = pneg %p24593_p1 }
 0xbdd   : > { %p24600_p9 = por %p24599_p8, %p24598_p7 }
 0xbdf   : > { %p24601_p10 = pnand %p24600_p9, %p24594_p2 }
 0xbe1   : > { %24604 = shalt.err (!%p24601_p10)
}
 0xbe2   : > { %22457 = dma.vmem_to_hbm [thread:$0]  (%p24757_p5), %s30445_s3, 512, %s30524_s26, %s30457_s25, %s24651_s30, %s24651_s30, %s24652_s22   ;;  %v24655_v25 = vmov 269488144   ;;  %v24656_v48 = vmov 842150450   ;;  %v30688_v47 = vld [vmem:[#allocation15_spill] sm:$0xff] }
 0xbe3   : > { %v18253_v4 = vunpack.c.l.s4 %v24655_v25  ;;  %v18260_v8 = vunpack.c.l.s4 %v24656_v48  ;;  %s21695_s12 = sshll.u32 %s24777_s14, 2  ;;  %vm18268_vm10 = vcmask 1024  }
 0xbe4   : > { %s438_s1 = scalar_lea.vmem %s30594_s11, %s21695_s12  ;;  %s428_s25 = scalar_lea.vmem %s30589_s6, %s21695_s12 }
 0xbe5   : > { %v18254_v5 = vunpack.c.0.s8 %v18253_v4  ;;  %v18261_v27 = vunpack.c.0.s8 %v18260_v8 }
 0xbe7   : > { %v18257_v29 = vsub.s32 %v18254_v5, %v30688_v47  ;;  %v18264_v50 = vsub.s32 %v18261_v27, %v30688_v47 }
 0xc31   : > { %v18250_v6 = vpop.xlane.xlu0 %18249 }
 0xc32   : > { %v18258_v19 = vrot.slane %v18250_v6, %v18257_v29  ;;  %v18265_v34 = vrot.slane %v18250_v6, %v18264_v50  ;;  %v18271_v37 = vsub.f32 0.0, %v18250_v6 }
 0xc34   : > { %18269 = vst.msk [vmem:[%s438_s1] sm:$0x3] %vm18268_vm10, %v18258_v19  ;;  %18270 = vst.msk [vmem:[%s438_s1 + $0x2] sm:$0x3] %vm18268_vm10, %v18265_v34  ;;  %v18272_v62 = vmul.f32 1.442695, %v18271_v37 }
 0xc36   : > { %24517 = vpow2.f32 %v18272_v62 }
 0xc40   : > { %v24518_v31 = vpop.eup %24517 }
 0xc41   : > { %v18274_v30 = vadd.f32 1.0, %v24518_v31 }
 0xc43   : > { %24519 = vrcp.f32 %v18274_v30 }
 0xc4d   : > { %v24520_v13 = vpop.eup %24519 }
 0xc4e   : > { %v18284_v41 = vrot.slane %v24520_v13, %v18257_v29  ;;  %v18291_v35 = vrot.slane %v24520_v13, %v18264_v50 }
 0xc50   : > { %18294 = vst.msk [vmem:[%s428_s25] sm:$0x3] %vm18268_vm10, %v18284_v41  ;;  %18295 = vst.msk [vmem:[%s428_s25 + $0x2] sm:$0x3] %vm18268_vm10, %v18291_v35 }
 0xc51 PF: > { %p22471_p5 = scmp.ge.s32.totalorder %s24643_s20, 2  ;;  %s18399_s30 = sand.u32 1, %s24631_s17  }
 0xc52   : > { %s18400_s22 = scalar_lea.sflag [#allocation7], %s18399_s30 }
 0xc53   : > { %p22462_p11 = pnand %p22471_p5, %p24761_p6 }
 0xc55   : > { %24622 = dma.done.wait (!%p22462_p11), %s18400_s22, 4096  }
 0xc56   : > { %24624 = vsyncadd (!%p22462_p11), %s18400_s22, 4294963200  ;;  %s30689_s26 = sadd.s32 4294967294, %s24643_s20  }
 0xc57   : > { %s18408_s29 = sand.u32 1, %s30689_s26  }
 0xc58   : > { %s18409_s5 = scalar_lea.sflag [#allocation9], %s18408_s29 }
 0xc59   : > { %24626 = dma.done.wait (!%p22462_p11), %s18409_s5, 1536  }
 0xc5a   : > { %24628 = vsyncadd (!%p22462_p11), %s18409_s5, 4294965760  ;;  %s30690_s2 = sld [smem:[#allocation13_spill]]  ;;  %p25_p12 = scmp.ge.s32.totalorder %s24742_s23, 4  }
 0xc5b   : > { %s30691_s17 = smov %s24635_s18  ;;  %s30692_s18 = smov %s24639_s19 }
 0xc5c   : > { %s30694_s20 = smov %s24742_s23  ;;  %27 = sbr.rel (!%p25_p12) target bundleno = 12 (0xc), region = 403 }
 0xc60   : > { %s30693_s19 = smov %s30690_s2 }
 0xc63   :  { %18439 = vsyncpa [#allocation7], 1 }
 0xc64   :  { %18441 = vsyncpa [#allocation7 + $0x1], 1 }
 0xc65   :  { %18442 = vsyncpa [#allocation9], 1 }
 0xc66   :  { %18444 = vsyncpa [#allocation9 + $0x1], 1 }

</bundles_post_ra>
